<compile_context>
chip_gen: v6e
topology: v6e:2x2x1
jax: 0.10.0
libtpu: 0.0.40
codegen_flags: <defaults>
</compile_context>

<pallas_src>
import functools

import numpy as np
import jax
import jax.numpy as jnp
from jax.experimental import pallas as pl
from jax.experimental.pallas import tpu as pltpu


# ----------------------------------------------------------------------------
# Static configuration (kept OUT of the jitted params pytree)
# ----------------------------------------------------------------------------
# TODO(synk): mit_b4 (SegFormer-B4) source is not provided; stand-in is a
# 4-stage patch-merging pyramid producing the same shapes:
# channels (64, 128, 320, 512) at strides (4, 8, 16, 32).
_STAGES = ((4, 3 * 16, 64), (2, 64 * 4, 128), (2, 128 * 4, 320), (2, 320 * 4, 512))


# ----------------------------------------------------------------------------
# Precomputed (static-shape) bilinear interpolation matrices
# ----------------------------------------------------------------------------
@functools.lru_cache(maxsize=None)
def _interp_matrix_np(n_in, n_out):
    """1-D bilinear interpolation matrix, align_corners=True (numpy, cached)."""
    m = np.zeros((n_out, n_in), np.float32)
    if n_in == 1 or n_out == 1:          # degenerate: pick source index 0
        m[:, 0] = 1.0
        return m
    src = np.arange(n_out, dtype=np.float64) * (n_in - 1) / (n_out - 1)
    lo = np.clip(np.floor(src).astype(np.int64), 0, n_in - 2)
    frac = (src - lo).astype(np.float32)
    idx = np.arange(n_out)
    m[idx, lo] += 1.0 - frac
    m[idx, lo + 1] += frac
    return m


@functools.lru_cache(maxsize=None)
def _spatial_kron_np(h, w, scale):
    """Dense (Ho*Wo, H*W) bilinear matrix — only used for the tiny HTLF maps."""
    return np.kron(_interp_matrix_np(h, h * scale), _interp_matrix_np(w, w * scale))


# ----------------------------------------------------------------------------
# Pallas kernels (all matmuls bf16 -> f32 accumulate, f32 bias/epilogue)
# ----------------------------------------------------------------------------
def _backbone_stage_kernel(x_ref, w_ref, b_ref, o_ref):
    # x: (1, M, Cin), w: (1, Cin, Cout), b: (1, 1, Cout)
    acc = jnp.dot(x_ref[0], w_ref[0], preferred_element_type=jnp.float32)
    acc = acc + b_ref[0]
    o_ref[0] = jnp.maximum(acc, 0.0).astype(o_ref.dtype)


def _rdfuse_kernel(x_ref, d_ref, w_ref, b_ref, o_ref):
    # fused: s = x + d ; out = relu(s @ w + b)
    s = x_ref[...] + d_ref[...]
    acc = jnp.dot(s, w_ref[...], preferred_element_type=jnp.float32) + b_ref[...]
    o_ref[...] = jnp.maximum(acc, 0.0).astype(o_ref.dtype)


def _mute_kernel(x_ref, w_ref, b_ref, o_ref):
    # fused: out = x * sigmoid(x @ w + b)
    x = x_ref[...]
    g = jnp.dot(x, w_ref[...], preferred_element_type=jnp.float32) + b_ref[...]
    o_ref[...] = (x.astype(jnp.float32) * jax.nn.sigmoid(g)).astype(o_ref.dtype)


def _htlf_kernel(km_ref, hi_ref, w_ref, b_ref, lo_ref, o_ref):
    # fused: up = bilinear2x(high); p = relu(up @ w + b); out = p*low + low
    up = jnp.dot(km_ref[...], hi_ref[0], preferred_element_type=jnp.float32)
    p = jnp.dot(up.astype(w_ref.dtype), w_ref[...],
                preferred_element_type=jnp.float32)
    p = jnp.maximum(p + b_ref[...], 0.0)
    low = lo_ref[0].astype(jnp.float32)
    o_ref[0] = (p * low + low).astype(o_ref.dtype)


def _final_head_kernel(x_ref, k_ref, mh_ref, b_ref, o_ref):
    # fused conv(64->8) + separable 4x bilinear upsample:
    #   y = x_(H, W*Cin) @ kron(mw^T, Wconv)   -> (H, Wo*Co)
    #   t = mh @ y                             -> (Ho, Wo*Co)
    #   out = t + tiled_bias                   (lane-dense last dim)
    y = jnp.dot(x_ref[0], k_ref[...], preferred_element_type=jnp.float32)
    t = jnp.dot(mh_ref[...], y.astype(mh_ref.dtype),
                preferred_element_type=jnp.float32)
    o_ref[0] = (t + b_ref[...]).astype(o_ref.dtype)


_PAR = pltpu.CompilerParams(dimension_semantics=("parallel",))


# ----------------------------------------------------------------------------
# Wrappers
# ----------------------------------------------------------------------------
def _space_to_depth(x, p):
    *lead, H, W, C = x.shape
    x = x.reshape(*lead, H // p, p, W // p, p, C)
    nd = x.ndim
    perm = tuple(range(nd - 5)) + (nd - 5, nd - 3, nd - 4, nd - 2, nd - 1)
    x = x.transpose(perm)
    return x.reshape(*lead, H // p, W // p, p * p * C)


def backbone_stage(xs, ws, bs):
    """One pyramid stage for BOTH branches (R stacked with D), grid over branch."""
    G, N, H, W, Cin = xs.shape
    Cout = ws.shape[2]
    M = N * H * W
    xm = xs.reshape(G, M, Cin)
    out = pl.pallas_call(
        _backbone_stage_kernel,
        out_shape=jax.ShapeDtypeStruct((G, M, Cout), xs.dtype),
        grid=(G,),
        in_specs=[
            pl.BlockSpec((1, M, Cin), lambda g: (g, 0, 0)),
            pl.BlockSpec((1, Cin, Cout), lambda g: (g, 0, 0)),
            pl.BlockSpec((1, 1, Cout), lambda g: (g, 0, 0)),
        ],
        out_specs=pl.BlockSpec((1, M, Cout), lambda g: (g, 0, 0)),
        compiler_params=_PAR,
    )(xm, ws, bs.reshape(G, 1, Cout))
    return out.reshape(G, N, H, W, Cout)


# TODO(synk): mit_b4 source not provided; structural stand-in (see _STAGES).
def backbone_both(x, d, params_bb):
    h = jnp.stack([x, d])  # (2, N, H, W, 3)
    feats = []
    for (patch, _, _), (ws, bs) in zip(_STAGES, params_bb):
        h = _space_to_depth(h, patch)
        h = backbone_stage(h, ws, bs)
        feats.append(h)
    return [f[0] for f in feats], [f[1] for f in feats]


# TODO(synk): RDF source not provided; stand-in: relu(conv1x1(x + d)).
def rd_fuse(x, d, w, b):
    N, H, W, C = x.shape
    Cout = w.shape[1]
    M = N * H * W
    tm = M if M <= 1024 else 1024
    assert M % tm == 0
    out = pl.pallas_call(
        _rdfuse_kernel,
        out_shape=jax.ShapeDtypeStruct((M, Cout), x.dtype),
        grid=(M // tm,),
        in_specs=[
            pl.BlockSpec((tm, C), lambda i: (i, 0)),
            pl.BlockSpec((tm, C), lambda i: (i, 0)),
            pl.BlockSpec((C, Cout), lambda i: (0, 0)),
            pl.BlockSpec((1, Cout), lambda i: (0, 0)),
        ],
        out_specs=pl.BlockSpec((tm, Cout), lambda i: (i, 0)),
        compiler_params=_PAR,
    )(x.reshape(M, C), d.reshape(M, C), w, b.reshape(1, Cout))
    return out.reshape(N, H, W, Cout)


# TODO(synk): Mute source not provided; stand-in: x * sigmoid(conv1x1(x)).
def mute(x, w, b):
    N, H, W, C = x.shape
    Cout = w.shape[1]
    M = N * H * W
    tm = M if M <= 1024 else 1024
    assert M % tm == 0
    out = pl.pallas_call(
        _mute_kernel,
        out_shape=jax.ShapeDtypeStruct((M, Cout), x.dtype),
        grid=(M // tm,),
        in_specs=[
            pl.BlockSpec((tm, C), lambda i: (i, 0)),
            pl.BlockSpec((C, Cout), lambda i: (0, 0)),
            pl.BlockSpec((1, Cout), lambda i: (0, 0)),
        ],
        out_specs=pl.BlockSpec((tm, Cout), lambda i: (i, 0)),
        compiler_params=_PAR,
    )(x.reshape(M, C), w, b.reshape(1, Cout))
    return out.reshape(N, H, W, Cout)


# TODO(synk): HTLF source not provided; stand-in:
# p = relu(conv1x1_{Ch->Cl}(upsample2(high)));  out = p * low + low.
def htlf(high, low, w, b):
    N, Hh, Wh, Ch = high.shape
    _, Hl, Wl, Cl = low.shape
    km = jnp.asarray(_spatial_kron_np(Hh, Wh, 2), dtype=high.dtype)  # (Hl*Wl, Hh*Wh)
    hi = high.reshape(N, Hh * Wh, Ch)
    lo = low.reshape(N, Hl * Wl, Cl)
    out = pl.pallas_call(
        _htlf_kernel,
        out_shape=jax.ShapeDtypeStruct((N, Hl * Wl, Cl), low.dtype),
        grid=(N,),
        in_specs=[
            pl.BlockSpec((Hl * Wl, Hh * Wh), lambda n: (0, 0)),
            pl.BlockSpec((1, Hh * Wh, Ch), lambda n: (n, 0, 0)),
            pl.BlockSpec((Ch, Cl), lambda n: (0, 0)),
            pl.BlockSpec((1, Cl), lambda n: (0, 0)),
            pl.BlockSpec((1, Hl * Wl, Cl), lambda n: (n, 0, 0)),
        ],
        out_specs=pl.BlockSpec((1, Hl * Wl, Cl), lambda n: (n, 0, 0)),
        compiler_params=_PAR,
    )(km, hi, w, b.reshape(1, Cl), lo)   # <-- fix: `lo` was missing before
    return out.reshape(N, Hl, Wl, Cl)


def final_head(x, w, b, scale=4):
    """conv1x1(64->8, no relu) then bilinear 4x upsample, fused per batch.

    The conv is commuted in front of the upsample; this is exact only because
    relu=False on conv64_1 and align_corners bilinear row weights sum to 1.
    """
    N, H, W, Cin = x.shape
    Co = w.shape[1]
    Ho, Wo = H * scale, W * scale
    mh = jnp.asarray(_interp_matrix_np(H, Ho), dtype=x.dtype)       # (Ho, H)
    mw = jnp.asarray(_interp_matrix_np(W, Wo), dtype=jnp.float32)   # (Wo, W)
    # K[w*Cin+ci, wo*Co+co] = mw[wo, w] * Wconv[ci, co]
    k = jnp.kron(mw.T, w.astype(jnp.float32)).astype(x.dtype)       # (W*Cin, Wo*Co)
    bt = jnp.tile(b.reshape(1, Co), (1, Wo))                        # (1, Wo*Co), f32
    xr = x.reshape(N, H, W * Cin)
    out = pl.pallas_call(
        _final_head_kernel,
        out_shape=jax.ShapeDtypeStruct((N, Ho, Wo * Co), jnp.float32),
        grid=(N,),
        in_specs=[
            pl.BlockSpec((1, H, W * Cin), lambda n: (n, 0, 0)),
            pl.BlockSpec((W * Cin, Wo * Co), lambda n: (0, 0)),
            pl.BlockSpec((Ho, H), lambda n: (0, 0)),
            pl.BlockSpec((1, Wo * Co), lambda n: (0, 0)),
        ],
        out_specs=pl.BlockSpec((1, Ho, Wo * Co), lambda n: (n, 0, 0)),
        compiler_params=_PAR,
    )(xr, k, mh, bt)
    return out.reshape(N, Ho, Wo, Co)


# ----------------------------------------------------------------------------
# Parameter init (deterministic, synthetic; weights bf16, biases f32)
# ----------------------------------------------------------------------------
def _init_linear(key, cin, cout):
    kw, kb = jax.random.split(key)
    w = (jax.random.normal(kw, (cin, cout), jnp.float32) / jnp.sqrt(cin)
         ).astype(jnp.bfloat16)
    b = jax.random.normal(kb, (cout,), jnp.float32) * 0.01
    return w, b


def init_params(key):
    keys = iter(jax.random.split(key, 64))
    p = {}
    bb = []
    for (_, cin, cout) in _STAGES:
        wr, br = _init_linear(next(keys), cin, cout)
        wd, bd = _init_linear(next(keys), cin, cout)
        bb.append((jnp.stack([wr, wd]), jnp.stack([br, bd])))
    p["backbone"] = bb
    for name, c in [("rd_fuse_1", 64), ("rd_fuse_2", 128),
                    ("rd_fuse_3", 320), ("rd_fuse_4", 512)]:
        p[name] = _init_linear(next(keys), c, c)
    for name, c in [("att3", 320), ("att4", 512)]:
        p[name] = _init_linear(next(keys), c, c)
    p["deco3"] = _init_linear(next(keys), 512, 320)
    p["deco2"] = _init_linear(next(keys), 320, 128)
    p["deco1"] = _init_linear(next(keys), 128, 64)
    p["conv64_1"] = _init_linear(next(keys), 64, 8)
    return p


# ----------------------------------------------------------------------------
# FakeNet.forward
# ----------------------------------------------------------------------------
def fakenet_forward(params, x_nchw, d_nchw):
    x = jnp.transpose(x_nchw, (0, 2, 3, 1)).astype(jnp.bfloat16)  # NCHW -> NHWC
    d = jnp.transpose(d_nchw, (0, 2, 3, 1)).astype(jnp.bfloat16)

    (x1, x2, x3, x4), (d1, d2, d3, d4) = backbone_both(x, d, params["backbone"])

    fuse1 = rd_fuse(x1, d1, *params["rd_fuse_1"])
    fuse2 = rd_fuse(x2, d2, *params["rd_fuse_2"])
    fuse3 = rd_fuse(x3, d3, *params["rd_fuse_3"])
    fuse4 = rd_fuse(x4, d4, *params["rd_fuse_4"])

    fuse_att4 = mute(fuse4, *params["att4"])
    fuse_att3 = mute(fuse3, *params["att3"])
    fuse_att2 = fuse2
    fuse_att1 = fuse1

    mult_3 = htlf(fuse_att4, fuse_att3, *params["deco3"])
    mult_2 = htlf(fuse_att3, fuse_att2, *params["deco2"])
    mult_1 = htlf(fuse_att2, fuse_att1, *params["deco1"])

    mul_2 = htlf(mult_3, mult_2, *params["deco2"])   # shared deco2 weights
    mul_1 = htlf(mult_2, mult_1, *params["deco1"])   # shared deco1 weights
    final_l = htlf(mul_2, mul_1, *params["deco1"])   # shared deco1 weights

    final = final_head(final_l, *params["conv64_1"], scale=4)

    outs = (final, fuse_att4, fuse_att3, fuse_att2, fuse_att1,
            mult_3, mult_2, mult_1, mul_2, mul_1)
    # Return in the PyTorch NCHW convention, f32.
    return tuple(jnp.transpose(o.astype(jnp.float32), (0, 3, 1, 2)) for o in outs)


# ----------------------------------------------------------------------------
if __name__ == "__main__":
    key = jax.random.PRNGKey(0)
    kx, kd = jax.random.split(key)
    N, H, W = 2, 64, 64          # must be divisible by 32 (backbone stride)
    x = jax.random.normal(kx, (N, 3, H, W), jnp.float32)
    x_depth = jax.random.normal(kd, (N, 3, H, W), jnp.float32)

    params = init_params(jax.random.PRNGKey(42))

    fwd = jax.jit(fakenet_forward)
    outs = fwd(params, x, x_depth)
    jax.block_until_ready(outs)

    # shape sanity (NCHW, matching the PyTorch module)
    assert outs[0].shape == (N, 8, H, W)                    # final
    assert outs[1].shape == (N, 512, H // 32, W // 32)      # fuse_att4
    assert outs[2].shape == (N, 320, H // 16, W // 16)      # fuse_att3
    assert outs[3].shape == (N, 128, H // 8, W // 8)        # fuse_att2
    assert outs[4].shape == (N, 64, H // 4, W // 4)         # fuse_att1
    assert outs[5].shape == (N, 320, H // 16, W // 16)      # mult_3
    assert outs[9].shape == (N, 64, H // 4, W // 4)         # mul_1

    print("KERNEL_OK")
</pallas_src>

<mosaic_0001>
module attributes {stable_mosaic.version = 11 : i64} {
  func.func @_backbone_stage_kernel(%arg0: i32, %arg1: memref<1x512x48xbf16, #tpu.memory_space<vmem>>, %arg2: memref<1x48x64xbf16, #tpu.memory_space<vmem>>, %arg3: memref<1x1x64xf32, #tpu.memory_space<vmem>>, %arg4: memref<1x512x64xbf16, #tpu.memory_space<vmem>>) attributes {dimension_semantics = [#tpu.dimension_semantics<parallel>], iteration_bounds = array<i64: 2>, scalar_prefetch = 0 : i64, scratch_operands = 0 : i64, tpu.core_type = #tpu.core_type<tc>, window_params = [{transform_indices = @transform_0, window_bounds = array<i64: 1, 512, 48>}, {transform_indices = @transform_1, window_bounds = array<i64: 1, 48, 64>}, {transform_indices = @transform_2, window_bounds = array<i64: 1, 1, 64>}, {transform_indices = @transform_3, window_bounds = array<i64: 1, 512, 64>}]} {
    %c0 = arith.constant 0 : index
    %c0_0 = arith.constant 0 : index
    %c0_1 = arith.constant 0 : index
    %0 = vector.load %arg1[%c0, %c0_0, %c0_1] : memref<1x512x48xbf16, #tpu.memory_space<vmem>>, vector<1x512x48xbf16>
    %1 = vector.shape_cast %0 : vector<1x512x48xbf16> to vector<512x48xbf16>
    %c0_2 = arith.constant 0 : index
    %c0_3 = arith.constant 0 : index
    %c0_4 = arith.constant 0 : index
    %2 = vector.load %arg2[%c0_2, %c0_3, %c0_4] : memref<1x48x64xbf16, #tpu.memory_space<vmem>>, vector<1x48x64xbf16>
    %3 = vector.shape_cast %2 : vector<1x48x64xbf16> to vector<48x64xbf16>
    %cst = arith.constant dense<0.000000e+00> : vector<512x64xf32>
    %4 = tpu.matmul %1, %3, %cst {dimension_numbers = #tpu.dot_dimension_numbers<[1], [0], [0], [1], [0, 0, 1, 1], [], []>} : vector<512x48xbf16>, vector<48x64xbf16>, vector<512x64xf32> -> vector<512x64xf32>
    %c0_5 = arith.constant 0 : index
    %c0_6 = arith.constant 0 : index
    %c0_7 = arith.constant 0 : index
    %5 = vector.load %arg3[%c0_5, %c0_6, %c0_7] : memref<1x1x64xf32, #tpu.memory_space<vmem>>, vector<1x1x64xf32>
    %6 = vector.shape_cast %5 : vector<1x1x64xf32> to vector<1x64xf32>
    %7 = vector.broadcast %6 : vector<1x64xf32> to vector<512x64xf32>
    %8 = arith.addf %4, %7 : vector<512x64xf32>
    %cst_8 = arith.constant 0.000000e+00 : f32
    %9 = vector.broadcast %cst_8 : f32 to vector<512x64xf32>
    %10 = arith.maximumf %8, %9 : vector<512x64xf32>
    %11 = arith.truncf %10 : vector<512x64xf32> to vector<512x64xbf16>
    %c0_9 = arith.constant 0 : index
    %c0_10 = arith.constant 0 : index
    %c0_11 = arith.constant 0 : index
    %12 = vector.load %arg4[%c0_9, %c0_10, %c0_11] : memref<1x512x64xbf16, #tpu.memory_space<vmem>>, vector<1x512x64xbf16>
    %13 = vector.shape_cast %12 : vector<1x512x64xbf16> to vector<512x64xbf16>
    %14 = vector.shape_cast %11 : vector<512x64xbf16> to vector<1x512x64xbf16>
    tpu.vector_store %arg4[%c0_9, %c0_10, %c0_11], %14 {strides = array<i32>} : memref<1x512x64xbf16, #tpu.memory_space<vmem>>, vector<1x512x64xbf16>,
    return
  }
  func.func @transform_0(%arg0: i32) -> (i32, i32, i32) {
    %c0_i32 = arith.constant 0 : i32
    %c0_i32_0 = arith.constant 0 : i32
    %c0_i32_1 = arith.constant 0 : i32
    return %arg0, %c0_i32, %c0_i32_0 : i32, i32, i32
  }
  func.func @transform_1(%arg0: i32) -> (i32, i32, i32) {
    %c0_i32 = arith.constant 0 : i32
    %c0_i32_0 = arith.constant 0 : i32
    %c0_i32_1 = arith.constant 0 : i32
    return %arg0, %c0_i32, %c0_i32_0 : i32, i32, i32
  }
  func.func @transform_2(%arg0: i32) -> (i32, i32, i32) {
    %c0_i32 = arith.constant 0 : i32
    %c0_i32_0 = arith.constant 0 : i32
    %c0_i32_1 = arith.constant 0 : i32
    return %arg0, %c0_i32, %c0_i32_0 : i32, i32, i32
  }
  func.func @transform_3(%arg0: i32) -> (i32, i32, i32) {
    %c0_i32 = arith.constant 0 : i32
    %c0_i32_0 = arith.constant 0 : i32
    %c0_i32_1 = arith.constant 0 : i32
    return %arg0, %c0_i32, %c0_i32_0 : i32, i32, i32
  }
}

module attributes {stable_mosaic.version = 11 : i64} {
  func.func @_backbone_stage_kernel(%arg0: i32, %arg1: memref<1x128x256xbf16, #tpu.memory_space<vmem>>, %arg2: memref<1x256x128xbf16, #tpu.memory_space<vmem>>, %arg3: memref<1x1x128xf32, #tpu.memory_space<vmem>>, %arg4: memref<1x128x128xbf16, #tpu.memory_space<vmem>>) attributes {dimension_semantics = [#tpu.dimension_semantics<parallel>], iteration_bounds = array<i64: 2>, scalar_prefetch = 0 : i64, scratch_operands = 0 : i64, tpu.core_type = #tpu.core_type<tc>, window_params = [{transform_indices = @transform_0, window_bounds = array<i64: 1, 128, 256>}, {transform_indices = @transform_1, window_bounds = array<i64: 1, 256, 128>}, {transform_indices = @transform_2, window_bounds = array<i64: 1, 1, 128>}, {transform_indices = @transform_3, window_bounds = array<i64: 1, 128, 128>}]} {
    %c0 = arith.constant 0 : index
    %c0_0 = arith.constant 0 : index
    %c0_1 = arith.constant 0 : index
    %0 = vector.load %arg1[%c0, %c0_0, %c0_1] : memref<1x128x256xbf16, #tpu.memory_space<vmem>>, vector<1x128x256xbf16>
    %1 = vector.shape_cast %0 : vector<1x128x256xbf16> to vector<128x256xbf16>
    %c0_2 = arith.constant 0 : index
    %c0_3 = arith.constant 0 : index
    %c0_4 = arith.constant 0 : index
    %2 = vector.load %arg2[%c0_2, %c0_3, %c0_4] : memref<1x256x128xbf16, #tpu.memory_space<vmem>>, vector<1x256x128xbf16>
    %3 = vector.shape_cast %2 : vector<1x256x128xbf16> to vector<256x128xbf16>
    %cst = arith.constant dense<0.000000e+00> : vector<128x128xf32>
    %4 = tpu.matmul %1, %3, %cst {dimension_numbers = #tpu.dot_dimension_numbers<[1], [0], [0], [1], [0, 0, 1, 1], [], []>} : vector<128x256xbf16>, vector<256x128xbf16>, vector<128x128xf32> -> vector<128x128xf32>
    %c0_5 = arith.constant 0 : index
    %c0_6 = arith.constant 0 : index
    %c0_7 = arith.constant 0 : index
    %5 = vector.load %arg3[%c0_5, %c0_6, %c0_7] : memref<1x1x128xf32, #tpu.memory_space<vmem>>, vector<1x1x128xf32>
    %6 = vector.shape_cast %5 : vector<1x1x128xf32> to vector<1x128xf32>
    %7 = vector.broadcast %6 : vector<1x128xf32> to vector<128x128xf32>
    %8 = arith.addf %4, %7 : vector<128x128xf32>
    %cst_8 = arith.constant 0.000000e+00 : f32
    %9 = vector.broadcast %cst_8 : f32 to vector<128x128xf32>
    %10 = arith.maximumf %8, %9 : vector<128x128xf32>
    %11 = arith.truncf %10 : vector<128x128xf32> to vector<128x128xbf16>
    %c0_9 = arith.constant 0 : index
    %c0_10 = arith.constant 0 : index
    %c0_11 = arith.constant 0 : index
    %12 = vector.load %arg4[%c0_9, %c0_10, %c0_11] : memref<1x128x128xbf16, #tpu.memory_space<vmem>>, vector<1x128x128xbf16>
    %13 = vector.shape_cast %12 : vector<1x128x128xbf16> to vector<128x128xbf16>
    %14 = vector.shape_cast %11 : vector<128x128xbf16> to vector<1x128x128xbf16>
    tpu.vector_store %arg4[%c0_9, %c0_10, %c0_11], %14 {strides = array<i32>} : memref<1x128x128xbf16, #tpu.memory_space<vmem>>, vector<1x128x128xbf16>,
    return
  }
  func.func @transform_0(%arg0: i32) -> (i32, i32, i32) {
    %c0_i32 = arith.constant 0 : i32
    %c0_i32_0 = arith.constant 0 : i32
    %c0_i32_1 = arith.constant 0 : i32
    return %arg0, %c0_i32, %c0_i32_0 : i32, i32, i32
  }
  func.func @transform_1(%arg0: i32) -> (i32, i32, i32) {
    %c0_i32 = arith.constant 0 : i32
    %c0_i32_0 = arith.constant 0 : i32
    %c0_i32_1 = arith.constant 0 : i32
    return %arg0, %c0_i32, %c0_i32_0 : i32, i32, i32
  }
  func.func @transform_2(%arg0: i32) -> (i32, i32, i32) {
    %c0_i32 = arith.constant 0 : i32
    %c0_i32_0 = arith.constant 0 : i32
    %c0_i32_1 = arith.constant 0 : i32
    return %arg0, %c0_i32, %c0_i32_0 : i32, i32, i32
  }
  func.func @transform_3(%arg0: i32) -> (i32, i32, i32) {
    %c0_i32 = arith.constant 0 : i32
    %c0_i32_0 = arith.constant 0 : i32
    %c0_i32_1 = arith.constant 0 : i32
    return %arg0, %c0_i32, %c0_i32_0 : i32, i32, i32
  }
}

module attributes {stable_mosaic.version = 11 : i64} {
  func.func @_backbone_stage_kernel(%arg0: i32, %arg1: memref<1x32x512xbf16, #tpu.memory_space<vmem>>, %arg2: memref<1x512x320xbf16, #tpu.memory_space<vmem>>, %arg3: memref<1x1x320xf32, #tpu.memory_space<vmem>>, %arg4: memref<1x32x320xbf16, #tpu.memory_space<vmem>>) attributes {dimension_semantics = [#tpu.dimension_semantics<parallel>], iteration_bounds = array<i64: 2>, scalar_prefetch = 0 : i64, scratch_operands = 0 : i64, tpu.core_type = #tpu.core_type<tc>, window_params = [{transform_indices = @transform_0, window_bounds = array<i64: 1, 32, 512>}, {transform_indices = @transform_1, window_bounds = array<i64: 1, 512, 320>}, {transform_indices = @transform_2, window_bounds = array<i64: 1, 1, 320>}, {transform_indices = @transform_3, window_bounds = array<i64: 1, 32, 320>}]} {
    %c0 = arith.constant 0 : index
    %c0_0 = arith.constant 0 : index
    %c0_1 = arith.constant 0 : index
    %0 = vector.load %arg1[%c0, %c0_0, %c0_1] : memref<1x32x512xbf16, #tpu.memory_space<vmem>>, vector<1x32x512xbf16>
    %1 = vector.shape_cast %0 : vector<1x32x512xbf16> to vector<32x512xbf16>
    %c0_2 = arith.constant 0 : index
    %c0_3 = arith.constant 0 : index
    %c0_4 = arith.constant 0 : index
    %2 = vector.load %arg2[%c0_2, %c0_3, %c0_4] : memref<1x512x320xbf16, #tpu.memory_space<vmem>>, vector<1x512x320xbf16>
    %3 = vector.shape_cast %2 : vector<1x512x320xbf16> to vector<512x320xbf16>
    %cst = arith.constant dense<0.000000e+00> : vector<32x320xf32>
    %4 = tpu.matmul %1, %3, %cst {dimension_numbers = #tpu.dot_dimension_numbers<[1], [0], [0], [1], [0, 0, 1, 1], [], []>} : vector<32x512xbf16>, vector<512x320xbf16>, vector<32x320xf32> -> vector<32x320xf32>
    %c0_5 = arith.constant 0 : index
    %c0_6 = arith.constant 0 : index
    %c0_7 = arith.constant 0 : index
    %5 = vector.load %arg3[%c0_5, %c0_6, %c0_7] : memref<1x1x320xf32, #tpu.memory_space<vmem>>, vector<1x1x320xf32>
    %6 = vector.shape_cast %5 : vector<1x1x320xf32> to vector<1x320xf32>
    %7 = vector.broadcast %6 : vector<1x320xf32> to vector<32x320xf32>
    %8 = arith.addf %4, %7 : vector<32x320xf32>
    %cst_8 = arith.constant 0.000000e+00 : f32
    %9 = vector.broadcast %cst_8 : f32 to vector<32x320xf32>
    %10 = arith.maximumf %8, %9 : vector<32x320xf32>
    %11 = arith.truncf %10 : vector<32x320xf32> to vector<32x320xbf16>
    %c0_9 = arith.constant 0 : index
    %c0_10 = arith.constant 0 : index
    %c0_11 = arith.constant 0 : index
    %12 = vector.load %arg4[%c0_9, %c0_10, %c0_11] : memref<1x32x320xbf16, #tpu.memory_space<vmem>>, vector<1x32x320xbf16>
    %13 = vector.shape_cast %12 : vector<1x32x320xbf16> to vector<32x320xbf16>
    %14 = vector.shape_cast %11 : vector<32x320xbf16> to vector<1x32x320xbf16>
    tpu.vector_store %arg4[%c0_9, %c0_10, %c0_11], %14 {strides = array<i32>} : memref<1x32x320xbf16, #tpu.memory_space<vmem>>, vector<1x32x320xbf16>,
    return
  }
  func.func @transform_0(%arg0: i32) -> (i32, i32, i32) {
    %c0_i32 = arith.constant 0 : i32
    %c0_i32_0 = arith.constant 0 : i32
    %c0_i32_1 = arith.constant 0 : i32
    return %arg0, %c0_i32, %c0_i32_0 : i32, i32, i32
  }
  func.func @transform_1(%arg0: i32) -> (i32, i32, i32) {
    %c0_i32 = arith.constant 0 : i32
    %c0_i32_0 = arith.constant 0 : i32
    %c0_i32_1 = arith.constant 0 : i32
    return %arg0, %c0_i32, %c0_i32_0 : i32, i32, i32
  }
  func.func @transform_2(%arg0: i32) -> (i32, i32, i32) {
    %c0_i32 = arith.constant 0 : i32
    %c0_i32_0 = arith.constant 0 : i32
    %c0_i32_1 = arith.constant 0 : i32
    return %arg0, %c0_i32, %c0_i32_0 : i32, i32, i32
  }
  func.func @transform_3(%arg0: i32) -> (i32, i32, i32) {
    %c0_i32 = arith.constant 0 : i32
    %c0_i32_0 = arith.constant 0 : i32
    %c0_i32_1 = arith.constant 0 : i32
    return %arg0, %c0_i32, %c0_i32_0 : i32, i32, i32
  }
}

module attributes {stable_mosaic.version = 11 : i64} {
  func.func @_backbone_stage_kernel(%arg0: i32, %arg1: memref<1x8x1280xbf16, #tpu.memory_space<vmem>>, %arg2: memref<1x1280x512xbf16, #tpu.memory_space<vmem>>, %arg3: memref<1x1x512xf32, #tpu.memory_space<vmem>>, %arg4: memref<1x8x512xbf16, #tpu.memory_space<vmem>>) attributes {dimension_semantics = [#tpu.dimension_semantics<parallel>], iteration_bounds = array<i64: 2>, scalar_prefetch = 0 : i64, scratch_operands = 0 : i64, tpu.core_type = #tpu.core_type<tc>, window_params = [{transform_indices = @transform_0, window_bounds = array<i64: 1, 8, 1280>}, {transform_indices = @transform_1, window_bounds = array<i64: 1, 1280, 512>}, {transform_indices = @transform_2, window_bounds = array<i64: 1, 1, 512>}, {transform_indices = @transform_3, window_bounds = array<i64: 1, 8, 512>}]} {
    %c0 = arith.constant 0 : index
    %c0_0 = arith.constant 0 : index
    %c0_1 = arith.constant 0 : index
    %0 = vector.load %arg1[%c0, %c0_0, %c0_1] : memref<1x8x1280xbf16, #tpu.memory_space<vmem>>, vector<1x8x1280xbf16>
    %1 = vector.shape_cast %0 : vector<1x8x1280xbf16> to vector<8x1280xbf16>
    %c0_2 = arith.constant 0 : index
    %c0_3 = arith.constant 0 : index
    %c0_4 = arith.constant 0 : index
    %2 = vector.load %arg2[%c0_2, %c0_3, %c0_4] : memref<1x1280x512xbf16, #tpu.memory_space<vmem>>, vector<1x1280x512xbf16>
    %3 = vector.shape_cast %2 : vector<1x1280x512xbf16> to vector<1280x512xbf16>
    %cst = arith.constant dense<0.000000e+00> : vector<8x512xf32>
    %4 = tpu.matmul %1, %3, %cst {dimension_numbers = #tpu.dot_dimension_numbers<[1], [0], [0], [1], [0, 0, 1, 1], [], []>} : vector<8x1280xbf16>, vector<1280x512xbf16>, vector<8x512xf32> -> vector<8x512xf32>
    %c0_5 = arith.constant 0 : index
    %c0_6 = arith.constant 0 : index
    %c0_7 = arith.constant 0 : index
    %5 = vector.load %arg3[%c0_5, %c0_6, %c0_7] : memref<1x1x512xf32, #tpu.memory_space<vmem>>, vector<1x1x512xf32>
    %6 = vector.shape_cast %5 : vector<1x1x512xf32> to vector<1x512xf32>
    %7 = vector.broadcast %6 : vector<1x512xf32> to vector<8x512xf32>
    %8 = arith.addf %4, %7 : vector<8x512xf32>
    %cst_8 = arith.constant 0.000000e+00 : f32
    %9 = vector.broadcast %cst_8 : f32 to vector<8x512xf32>
    %10 = arith.maximumf %8, %9 : vector<8x512xf32>
    %11 = arith.truncf %10 : vector<8x512xf32> to vector<8x512xbf16>
    %c0_9 = arith.constant 0 : index
    %c0_10 = arith.constant 0 : index
    %c0_11 = arith.constant 0 : index
    %12 = vector.load %arg4[%c0_9, %c0_10, %c0_11] : memref<1x8x512xbf16, #tpu.memory_space<vmem>>, vector<1x8x512xbf16>
    %13 = vector.shape_cast %12 : vector<1x8x512xbf16> to vector<8x512xbf16>
    %14 = vector.shape_cast %11 : vector<8x512xbf16> to vector<1x8x512xbf16>
    tpu.vector_store %arg4[%c0_9, %c0_10, %c0_11], %14 {strides = array<i32>} : memref<1x8x512xbf16, #tpu.memory_space<vmem>>, vector<1x8x512xbf16>,
    return
  }
  func.func @transform_0(%arg0: i32) -> (i32, i32, i32) {
    %c0_i32 = arith.constant 0 : i32
    %c0_i32_0 = arith.constant 0 : i32
    %c0_i32_1 = arith.constant 0 : i32
    return %arg0, %c0_i32, %c0_i32_0 : i32, i32, i32
  }
  func.func @transform_1(%arg0: i32) -> (i32, i32, i32) {
    %c0_i32 = arith.constant 0 : i32
    %c0_i32_0 = arith.constant 0 : i32
    %c0_i32_1 = arith.constant 0 : i32
    return %arg0, %c0_i32, %c0_i32_0 : i32, i32, i32
  }
  func.func @transform_2(%arg0: i32) -> (i32, i32, i32) {
    %c0_i32 = arith.constant 0 : i32
    %c0_i32_0 = arith.constant 0 : i32
    %c0_i32_1 = arith.constant 0 : i32
    return %arg0, %c0_i32, %c0_i32_0 : i32, i32, i32
  }
  func.func @transform_3(%arg0: i32) -> (i32, i32, i32) {
    %c0_i32 = arith.constant 0 : i32
    %c0_i32_0 = arith.constant 0 : i32
    %c0_i32_1 = arith.constant 0 : i32
    return %arg0, %c0_i32, %c0_i32_0 : i32, i32, i32
  }
}

module attributes {stable_mosaic.version = 11 : i64} {
  func.func @_rdfuse_kernel(%arg0: i32, %arg1: memref<8x512xbf16, #tpu.memory_space<vmem>>, %arg2: memref<8x512xbf16, #tpu.memory_space<vmem>>, %arg3: memref<512x512xbf16, #tpu.memory_space<vmem>>, %arg4: memref<1x512xf32, #tpu.memory_space<vmem>>, %arg5: memref<8x512xbf16, #tpu.memory_space<vmem>>) attributes {dimension_semantics = [#tpu.dimension_semantics<parallel>], iteration_bounds = array<i64: 1>, scalar_prefetch = 0 : i64, scratch_operands = 0 : i64, tpu.core_type = #tpu.core_type<tc>, window_params = [{transform_indices = @transform_0, window_bounds = array<i64: 8, 512>}, {transform_indices = @transform_1, window_bounds = array<i64: 8, 512>}, {pipeline_mode = #tpu.pipeline_mode<synchronous>, transform_indices = @transform_2, window_bounds = array<i64: 512, 512>}, {pipeline_mode = #tpu.pipeline_mode<synchronous>, transform_indices = @transform_3, window_bounds = array<i64: 1, 512>}, {transform_indices = @transform_4, window_bounds = array<i64: 8, 512>}]} {
    %c0 = arith.constant 0 : index
    %c0_0 = arith.constant 0 : index
    %0 = vector.load %arg1[%c0, %c0_0] : memref<8x512xbf16, #tpu.memory_space<vmem>>, vector<8x512xbf16>
    %c0_1 = arith.constant 0 : index
    %c0_2 = arith.constant 0 : index
    %1 = vector.load %arg2[%c0_1, %c0_2] : memref<8x512xbf16, #tpu.memory_space<vmem>>, vector<8x512xbf16>
    %2 = arith.addf %0, %1 : vector<8x512xbf16>
    %c0_3 = arith.constant 0 : index
    %c0_4 = arith.constant 0 : index
    %3 = vector.load %arg3[%c0_3, %c0_4] : memref<512x512xbf16, #tpu.memory_space<vmem>>, vector<512x512xbf16>
    %cst = arith.constant dense<0.000000e+00> : vector<8x512xf32>
    %4 = tpu.matmul %2, %3, %cst {dimension_numbers = #tpu.dot_dimension_numbers<[1], [0], [0], [1], [0, 0, 1, 1], [], []>} : vector<8x512xbf16>, vector<512x512xbf16>, vector<8x512xf32> -> vector<8x512xf32>
    %c0_5 = arith.constant 0 : index
    %c0_6 = arith.constant 0 : index
    %5 = vector.load %arg4[%c0_5, %c0_6] : memref<1x512xf32, #tpu.memory_space<vmem>>, vector<1x512xf32>
    %6 = vector.broadcast %5 : vector<1x512xf32> to vector<8x512xf32>
    %7 = arith.addf %4, %6 : vector<8x512xf32>
    %cst_7 = arith.constant 0.000000e+00 : f32
    %8 = vector.broadcast %cst_7 : f32 to vector<8x512xf32>
    %9 = arith.maximumf %7, %8 : vector<8x512xf32>
    %10 = arith.truncf %9 : vector<8x512xf32> to vector<8x512xbf16>
    %c0_8 = arith.constant 0 : index
    %c0_9 = arith.constant 0 : index
    %11 = vector.load %arg5[%c0_8, %c0_9] : memref<8x512xbf16, #tpu.memory_space<vmem>>, vector<8x512xbf16>
    tpu.vector_store %arg5[%c0_8, %c0_9], %10 {strides = array<i32>} : memref<8x512xbf16, #tpu.memory_space<vmem>>, vector<8x512xbf16>,
    return
  }
  func.func @transform_0(%arg0: i32) -> (i32, i32) {
    %c0_i32 = arith.constant 0 : i32
    %c0_i32_0 = arith.constant 0 : i32
    return %arg0, %c0_i32 : i32, i32
  }
  func.func @transform_1(%arg0: i32) -> (i32, i32) {
    %c0_i32 = arith.constant 0 : i32
    %c0_i32_0 = arith.constant 0 : i32
    return %arg0, %c0_i32 : i32, i32
  }
  func.func @transform_2(%arg0: i32) -> (i32, i32) {
    %c0_i32 = arith.constant 0 : i32
    %c0_i32_0 = arith.constant 0 : i32
    %c0_i32_1 = arith.constant 0 : i32
    return %c0_i32, %c0_i32_0 : i32, i32
  }
  func.func @transform_3(%arg0: i32) -> (i32, i32) {
    %c0_i32 = arith.constant 0 : i32
    %c0_i32_0 = arith.constant 0 : i32
    %c0_i32_1 = arith.constant 0 : i32
    return %c0_i32, %c0_i32_0 : i32, i32
  }
  func.func @transform_4(%arg0: i32) -> (i32, i32) {
    %c0_i32 = arith.constant 0 : i32
    %c0_i32_0 = arith.constant 0 : i32
    return %arg0, %c0_i32 : i32, i32
  }
}

module attributes {stable_mosaic.version = 11 : i64} {
  func.func @_mute_kernel(%arg0: i32, %arg1: memref<8x512xbf16, #tpu.memory_space<vmem>>, %arg2: memref<512x512xbf16, #tpu.memory_space<vmem>>, %arg3: memref<1x512xf32, #tpu.memory_space<vmem>>, %arg4: memref<8x512xbf16, #tpu.memory_space<vmem>>) attributes {dimension_semantics = [#tpu.dimension_semantics<parallel>], iteration_bounds = array<i64: 1>, scalar_prefetch = 0 : i64, scratch_operands = 0 : i64, tpu.core_type = #tpu.core_type<tc>, window_params = [{transform_indices = @transform_0, window_bounds = array<i64: 8, 512>}, {pipeline_mode = #tpu.pipeline_mode<synchronous>, transform_indices = @transform_1, window_bounds = array<i64: 512, 512>}, {pipeline_mode = #tpu.pipeline_mode<synchronous>, transform_indices = @transform_2, window_bounds = array<i64: 1, 512>}, {transform_indices = @transform_3, window_bounds = array<i64: 8, 512>}]} {
    %c0 = arith.constant 0 : index
    %c0_0 = arith.constant 0 : index
    %0 = vector.load %arg1[%c0, %c0_0] : memref<8x512xbf16, #tpu.memory_space<vmem>>, vector<8x512xbf16>
    %c0_1 = arith.constant 0 : index
    %c0_2 = arith.constant 0 : index
    %1 = vector.load %arg2[%c0_1, %c0_2] : memref<512x512xbf16, #tpu.memory_space<vmem>>, vector<512x512xbf16>
    %cst = arith.constant dense<0.000000e+00> : vector<8x512xf32>
    %2 = tpu.matmul %0, %1, %cst {dimension_numbers = #tpu.dot_dimension_numbers<[1], [0], [0], [1], [0, 0, 1, 1], [], []>} : vector<8x512xbf16>, vector<512x512xbf16>, vector<8x512xf32> -> vector<8x512xf32>
    %c0_3 = arith.constant 0 : index
    %c0_4 = arith.constant 0 : index
    %3 = vector.load %arg3[%c0_3, %c0_4] : memref<1x512xf32, #tpu.memory_space<vmem>>, vector<1x512xf32>
    %4 = vector.broadcast %3 : vector<1x512xf32> to vector<8x512xf32>
    %5 = arith.addf %2, %4 : vector<8x512xf32>
    %6 = arith.extf %0 : vector<8x512xbf16> to vector<8x512xf32>
    %7 = arith.negf %5 : vector<8x512xf32>
    %8 = math.exp %7 : vector<8x512xf32>
    %cst_5 = arith.constant 1.000000e+00 : f32
    %9 = vector.broadcast %cst_5 : f32 to vector<8x512xf32>
    %10 = arith.addf %9, %8 : vector<8x512xf32>
    %11 = arith.divf %9, %10 : vector<8x512xf32>
    %12 = arith.mulf %6, %11 : vector<8x512xf32>
    %13 = arith.truncf %12 : vector<8x512xf32> to vector<8x512xbf16>
    %c0_6 = arith.constant 0 : index
    %c0_7 = arith.constant 0 : index
    %14 = vector.load %arg4[%c0_6, %c0_7] : memref<8x512xbf16, #tpu.memory_space<vmem>>, vector<8x512xbf16>
    tpu.vector_store %arg4[%c0_6, %c0_7], %13 {strides = array<i32>} : memref<8x512xbf16, #tpu.memory_space<vmem>>, vector<8x512xbf16>,
    return
  }
  func.func @transform_0(%arg0: i32) -> (i32, i32) {
    %c0_i32 = arith.constant 0 : i32
    %c0_i32_0 = arith.constant 0 : i32
    return %arg0, %c0_i32 : i32, i32
  }
  func.func @transform_1(%arg0: i32) -> (i32, i32) {
    %c0_i32 = arith.constant 0 : i32
    %c0_i32_0 = arith.constant 0 : i32
    %c0_i32_1 = arith.constant 0 : i32
    return %c0_i32, %c0_i32_0 : i32, i32
  }
  func.func @transform_2(%arg0: i32) -> (i32, i32) {
    %c0_i32 = arith.constant 0 : i32
    %c0_i32_0 = arith.constant 0 : i32
    %c0_i32_1 = arith.constant 0 : i32
    return %c0_i32, %c0_i32_0 : i32, i32
  }
  func.func @transform_3(%arg0: i32) -> (i32, i32) {
    %c0_i32 = arith.constant 0 : i32
    %c0_i32_0 = arith.constant 0 : i32
    return %arg0, %c0_i32 : i32, i32
  }
}

module attributes {stable_mosaic.version = 11 : i64} {
  func.func @_mute_kernel(%arg0: i32, %arg1: memref<32x320xbf16, #tpu.memory_space<vmem>>, %arg2: memref<320x320xbf16, #tpu.memory_space<vmem>>, %arg3: memref<1x320xf32, #tpu.memory_space<vmem>>, %arg4: memref<32x320xbf16, #tpu.memory_space<vmem>>) attributes {dimension_semantics = [#tpu.dimension_semantics<parallel>], iteration_bounds = array<i64: 1>, scalar_prefetch = 0 : i64, scratch_operands = 0 : i64, tpu.core_type = #tpu.core_type<tc>, window_params = [{transform_indices = @transform_0, window_bounds = array<i64: 32, 320>}, {pipeline_mode = #tpu.pipeline_mode<synchronous>, transform_indices = @transform_1, window_bounds = array<i64: 320, 320>}, {pipeline_mode = #tpu.pipeline_mode<synchronous>, transform_indices = @transform_2, window_bounds = array<i64: 1, 320>}, {transform_indices = @transform_3, window_bounds = array<i64: 32, 320>}]} {
    %c0 = arith.constant 0 : index
    %c0_0 = arith.constant 0 : index
    %0 = vector.load %arg1[%c0, %c0_0] : memref<32x320xbf16, #tpu.memory_space<vmem>>, vector<32x320xbf16>
    %c0_1 = arith.constant 0 : index
    %c0_2 = arith.constant 0 : index
    %1 = vector.load %arg2[%c0_1, %c0_2] : memref<320x320xbf16, #tpu.memory_space<vmem>>, vector<320x320xbf16>
    %cst = arith.constant dense<0.000000e+00> : vector<32x320xf32>
    %2 = tpu.matmul %0, %1, %cst {dimension_numbers = #tpu.dot_dimension_numbers<[1], [0], [0], [1], [0, 0, 1, 1], [], []>} : vector<32x320xbf16>, vector<320x320xbf16>, vector<32x320xf32> -> vector<32x320xf32>
    %c0_3 = arith.constant 0 : index
    %c0_4 = arith.constant 0 : index
    %3 = vector.load %arg3[%c0_3, %c0_4] : memref<1x320xf32, #tpu.memory_space<vmem>>, vector<1x320xf32>
    %4 = vector.broadcast %3 : vector<1x320xf32> to vector<32x320xf32>
    %5 = arith.addf %2, %4 : vector<32x320xf32>
    %6 = arith.extf %0 : vector<32x320xbf16> to vector<32x320xf32>
    %7 = arith.negf %5 : vector<32x320xf32>
    %8 = math.exp %7 : vector<32x320xf32>
    %cst_5 = arith.constant 1.000000e+00 : f32
    %9 = vector.broadcast %cst_5 : f32 to vector<32x320xf32>
    %10 = arith.addf %9, %8 : vector<32x320xf32>
    %11 = arith.divf %9, %10 : vector<32x320xf32>
    %12 = arith.mulf %6, %11 : vector<32x320xf32>
    %13 = arith.truncf %12 : vector<32x320xf32> to vector<32x320xbf16>
    %c0_6 = arith.constant 0 : index
    %c0_7 = arith.constant 0 : index
    %14 = vector.load %arg4[%c0_6, %c0_7] : memref<32x320xbf16, #tpu.memory_space<vmem>>, vector<32x320xbf16>
    tpu.vector_store %arg4[%c0_6, %c0_7], %13 {strides = array<i32>} : memref<32x320xbf16, #tpu.memory_space<vmem>>, vector<32x320xbf16>,
    return
  }
  func.func @transform_0(%arg0: i32) -> (i32, i32) {
    %c0_i32 = arith.constant 0 : i32
    %c0_i32_0 = arith.constant 0 : i32
    return %arg0, %c0_i32 : i32, i32
  }
  func.func @transform_1(%arg0: i32) -> (i32, i32) {
    %c0_i32 = arith.constant 0 : i32
    %c0_i32_0 = arith.constant 0 : i32
    %c0_i32_1 = arith.constant 0 : i32
    return %c0_i32, %c0_i32_0 : i32, i32
  }
  func.func @transform_2(%arg0: i32) -> (i32, i32) {
    %c0_i32 = arith.constant 0 : i32
    %c0_i32_0 = arith.constant 0 : i32
    %c0_i32_1 = arith.constant 0 : i32
    return %c0_i32, %c0_i32_0 : i32, i32
  }
  func.func @transform_3(%arg0: i32) -> (i32, i32) {
    %c0_i32 = arith.constant 0 : i32
    %c0_i32_0 = arith.constant 0 : i32
    return %arg0, %c0_i32 : i32, i32
  }
}

module attributes {stable_mosaic.version = 11 : i64} {
  func.func @_rdfuse_kernel(%arg0: i32, %arg1: memref<32x320xbf16, #tpu.memory_space<vmem>>, %arg2: memref<32x320xbf16, #tpu.memory_space<vmem>>, %arg3: memref<320x320xbf16, #tpu.memory_space<vmem>>, %arg4: memref<1x320xf32, #tpu.memory_space<vmem>>, %arg5: memref<32x320xbf16, #tpu.memory_space<vmem>>) attributes {dimension_semantics = [#tpu.dimension_semantics<parallel>], iteration_bounds = array<i64: 1>, scalar_prefetch = 0 : i64, scratch_operands = 0 : i64, tpu.core_type = #tpu.core_type<tc>, window_params = [{transform_indices = @transform_0, window_bounds = array<i64: 32, 320>}, {transform_indices = @transform_1, window_bounds = array<i64: 32, 320>}, {pipeline_mode = #tpu.pipeline_mode<synchronous>, transform_indices = @transform_2, window_bounds = array<i64: 320, 320>}, {pipeline_mode = #tpu.pipeline_mode<synchronous>, transform_indices = @transform_3, window_bounds = array<i64: 1, 320>}, {transform_indices = @transform_4, window_bounds = array<i64: 32, 320>}]} {
    %c0 = arith.constant 0 : index
    %c0_0 = arith.constant 0 : index
    %0 = vector.load %arg1[%c0, %c0_0] : memref<32x320xbf16, #tpu.memory_space<vmem>>, vector<32x320xbf16>
    %c0_1 = arith.constant 0 : index
    %c0_2 = arith.constant 0 : index
    %1 = vector.load %arg2[%c0_1, %c0_2] : memref<32x320xbf16, #tpu.memory_space<vmem>>, vector<32x320xbf16>
    %2 = arith.addf %0, %1 : vector<32x320xbf16>
    %c0_3 = arith.constant 0 : index
    %c0_4 = arith.constant 0 : index
    %3 = vector.load %arg3[%c0_3, %c0_4] : memref<320x320xbf16, #tpu.memory_space<vmem>>, vector<320x320xbf16>
    %cst = arith.constant dense<0.000000e+00> : vector<32x320xf32>
    %4 = tpu.matmul %2, %3, %cst {dimension_numbers = #tpu.dot_dimension_numbers<[1], [0], [0], [1], [0, 0, 1, 1], [], []>} : vector<32x320xbf16>, vector<320x320xbf16>, vector<32x320xf32> -> vector<32x320xf32>
    %c0_5 = arith.constant 0 : index
    %c0_6 = arith.constant 0 : index
    %5 = vector.load %arg4[%c0_5, %c0_6] : memref<1x320xf32, #tpu.memory_space<vmem>>, vector<1x320xf32>
    %6 = vector.broadcast %5 : vector<1x320xf32> to vector<32x320xf32>
    %7 = arith.addf %4, %6 : vector<32x320xf32>
    %cst_7 = arith.constant 0.000000e+00 : f32
    %8 = vector.broadcast %cst_7 : f32 to vector<32x320xf32>
    %9 = arith.maximumf %7, %8 : vector<32x320xf32>
    %10 = arith.truncf %9 : vector<32x320xf32> to vector<32x320xbf16>
    %c0_8 = arith.constant 0 : index
    %c0_9 = arith.constant 0 : index
    %11 = vector.load %arg5[%c0_8, %c0_9] : memref<32x320xbf16, #tpu.memory_space<vmem>>, vector<32x320xbf16>
    tpu.vector_store %arg5[%c0_8, %c0_9], %10 {strides = array<i32>} : memref<32x320xbf16, #tpu.memory_space<vmem>>, vector<32x320xbf16>,
    return
  }
  func.func @transform_0(%arg0: i32) -> (i32, i32) {
    %c0_i32 = arith.constant 0 : i32
    %c0_i32_0 = arith.constant 0 : i32
    return %arg0, %c0_i32 : i32, i32
  }
  func.func @transform_1(%arg0: i32) -> (i32, i32) {
    %c0_i32 = arith.constant 0 : i32
    %c0_i32_0 = arith.constant 0 : i32
    return %arg0, %c0_i32 : i32, i32
  }
  func.func @transform_2(%arg0: i32) -> (i32, i32) {
    %c0_i32 = arith.constant 0 : i32
    %c0_i32_0 = arith.constant 0 : i32
    %c0_i32_1 = arith.constant 0 : i32
    return %c0_i32, %c0_i32_0 : i32, i32
  }
  func.func @transform_3(%arg0: i32) -> (i32, i32) {
    %c0_i32 = arith.constant 0 : i32
    %c0_i32_0 = arith.constant 0 : i32
    %c0_i32_1 = arith.constant 0 : i32
    return %c0_i32, %c0_i32_0 : i32, i32
  }
  func.func @transform_4(%arg0: i32) -> (i32, i32) {
    %c0_i32 = arith.constant 0 : i32
    %c0_i32_0 = arith.constant 0 : i32
    return %arg0, %c0_i32 : i32, i32
  }
}

module attributes {stable_mosaic.version = 11 : i64} {
  func.func @_htlf_kernel(%arg0: i32, %arg1: memref<16x4xbf16, #tpu.memory_space<vmem>>, %arg2: memref<1x4x512xbf16, #tpu.memory_space<vmem>>, %arg3: memref<512x320xbf16, #tpu.memory_space<vmem>>, %arg4: memref<1x320xf32, #tpu.memory_space<vmem>>, %arg5: memref<1x16x320xbf16, #tpu.memory_space<vmem>>, %arg6: memref<1x16x320xbf16, #tpu.memory_space<vmem>>) attributes {dimension_semantics = [#tpu.dimension_semantics<parallel>], iteration_bounds = array<i64: 2>, scalar_prefetch = 0 : i64, scratch_operands = 0 : i64, tpu.core_type = #tpu.core_type<tc>, window_params = [{pipeline_mode = #tpu.pipeline_mode<synchronous>, transform_indices = @transform_0, window_bounds = array<i64: 16, 4>}, {transform_indices = @transform_1, window_bounds = array<i64: 1, 4, 512>}, {pipeline_mode = #tpu.pipeline_mode<synchronous>, transform_indices = @transform_2, window_bounds = array<i64: 512, 320>}, {pipeline_mode = #tpu.pipeline_mode<synchronous>, transform_indices = @transform_3, window_bounds = array<i64: 1, 320>}, {transform_indices = @transform_4, window_bounds = array<i64: 1, 16, 320>}, {transform_indices = @transform_5, window_bounds = array<i64: 1, 16, 320>}]} {
    %c0 = arith.constant 0 : index
    %c0_0 = arith.constant 0 : index
    %0 = vector.load %arg1[%c0, %c0_0] : memref<16x4xbf16, #tpu.memory_space<vmem>>, vector<16x4xbf16>
    %c0_1 = arith.constant 0 : index
    %c0_2 = arith.constant 0 : index
    %c0_3 = arith.constant 0 : index
    %1 = vector.load %arg2[%c0_1, %c0_2, %c0_3] : memref<1x4x512xbf16, #tpu.memory_space<vmem>>, vector<1x4x512xbf16>
    %2 = vector.shape_cast %1 : vector<1x4x512xbf16> to vector<4x512xbf16>
    %cst = arith.constant dense<0.000000e+00> : vector<16x512xf32>
    %3 = tpu.matmul %0, %2, %cst {dimension_numbers = #tpu.dot_dimension_numbers<[1], [0], [0], [1], [0, 0, 1, 1], [], []>} : vector<16x4xbf16>, vector<4x512xbf16>, vector<16x512xf32> -> vector<16x512xf32>
    %4 = arith.truncf %3 : vector<16x512xf32> to vector<16x512xbf16>
    %c0_4 = arith.constant 0 : index
    %c0_5 = arith.constant 0 : index
    %5 = vector.load %arg3[%c0_4, %c0_5] : memref<512x320xbf16, #tpu.memory_space<vmem>>, vector<512x320xbf16>
    %cst_6 = arith.constant dense<0.000000e+00> : vector<16x320xf32>
    %6 = tpu.matmul %4, %5, %cst_6 {dimension_numbers = #tpu.dot_dimension_numbers<[1], [0], [0], [1], [0, 0, 1, 1], [], []>} : vector<16x512xbf16>, vector<512x320xbf16>, vector<16x320xf32> -> vector<16x320xf32>
    %c0_7 = arith.constant 0 : index
    %c0_8 = arith.constant 0 : index
    %7 = vector.load %arg4[%c0_7, %c0_8] : memref<1x320xf32, #tpu.memory_space<vmem>>, vector<1x320xf32>
    %8 = vector.broadcast %7 : vector<1x320xf32> to vector<16x320xf32>
    %9 = arith.addf %6, %8 : vector<16x320xf32>
    %cst_9 = arith.constant 0.000000e+00 : f32
    %10 = vector.broadcast %cst_9 : f32 to vector<16x320xf32>
    %11 = arith.maximumf %9, %10 : vector<16x320xf32>
    %c0_10 = arith.constant 0 : index
    %c0_11 = arith.constant 0 : index
    %c0_12 = arith.constant 0 : index
    %12 = vector.load %arg5[%c0_10, %c0_11, %c0_12] : memref<1x16x320xbf16, #tpu.memory_space<vmem>>, vector<1x16x320xbf16>
    %13 = vector.shape_cast %12 : vector<1x16x320xbf16> to vector<16x320xbf16>
    %14 = arith.extf %13 : vector<16x320xbf16> to vector<16x320xf32>
    %15 = arith.mulf %11, %14 : vector<16x320xf32>
    %16 = arith.addf %15, %14 : vector<16x320xf32>
    %17 = arith.truncf %16 : vector<16x320xf32> to vector<16x320xbf16>
    %c0_13 = arith.constant 0 : index
    %c0_14 = arith.constant 0 : index
    %c0_15 = arith.constant 0 : index
    %18 = vector.load %arg6[%c0_13, %c0_14, %c0_15] : memref<1x16x320xbf16, #tpu.memory_space<vmem>>, vector<1x16x320xbf16>
    %19 = vector.shape_cast %18 : vector<1x16x320xbf16> to vector<16x320xbf16>
    %20 = vector.shape_cast %17 : vector<16x320xbf16> to vector<1x16x320xbf16>
    tpu.vector_store %arg6[%c0_13, %c0_14, %c0_15], %20 {strides = array<i32>} : memref<1x16x320xbf16, #tpu.memory_space<vmem>>, vector<1x16x320xbf16>,
    return
  }
  func.func @transform_0(%arg0: i32) -> (i32, i32) {
    %c0_i32 = arith.constant 0 : i32
    %c0_i32_0 = arith.constant 0 : i32
    %c0_i32_1 = arith.constant 0 : i32
    return %c0_i32, %c0_i32_0 : i32, i32
  }
  func.func @transform_1(%arg0: i32) -> (i32, i32, i32) {
    %c0_i32 = arith.constant 0 : i32
    %c0_i32_0 = arith.constant 0 : i32
    %c0_i32_1 = arith.constant 0 : i32
    return %arg0, %c0_i32, %c0_i32_0 : i32, i32, i32
  }
  func.func @transform_2(%arg0: i32) -> (i32, i32) {
    %c0_i32 = arith.constant 0 : i32
    %c0_i32_0 = arith.constant 0 : i32
    %c0_i32_1 = arith.constant 0 : i32
    return %c0_i32, %c0_i32_0 : i32, i32
  }
  func.func @transform_3(%arg0: i32) -> (i32, i32) {
    %c0_i32 = arith.constant 0 : i32
    %c0_i32_0 = arith.constant 0 : i32
    %c0_i32_1 = arith.constant 0 : i32
    return %c0_i32, %c0_i32_0 : i32, i32
  }
  func.func @transform_4(%arg0: i32) -> (i32, i32, i32) {
    %c0_i32 = arith.constant 0 : i32
    %c0_i32_0 = arith.constant 0 : i32
    %c0_i32_1 = arith.constant 0 : i32
    return %arg0, %c0_i32, %c0_i32_0 : i32, i32, i32
  }
  func.func @transform_5(%arg0: i32) -> (i32, i32, i32) {
    %c0_i32 = arith.constant 0 : i32
    %c0_i32_0 = arith.constant 0 : i32
    %c0_i32_1 = arith.constant 0 : i32
    return %arg0, %c0_i32, %c0_i32_0 : i32, i32, i32
  }
}

module attributes {stable_mosaic.version = 11 : i64} {
  func.func @_rdfuse_kernel(%arg0: i32, %arg1: memref<128x128xbf16, #tpu.memory_space<vmem>>, %arg2: memref<128x128xbf16, #tpu.memory_space<vmem>>, %arg3: memref<128x128xbf16, #tpu.memory_space<vmem>>, %arg4: memref<1x128xf32, #tpu.memory_space<vmem>>, %arg5: memref<128x128xbf16, #tpu.memory_space<vmem>>) attributes {dimension_semantics = [#tpu.dimension_semantics<parallel>], iteration_bounds = array<i64: 1>, scalar_prefetch = 0 : i64, scratch_operands = 0 : i64, tpu.core_type = #tpu.core_type<tc>, window_params = [{transform_indices = @transform_0, window_bounds = array<i64: 128, 128>}, {transform_indices = @transform_1, window_bounds = array<i64: 128, 128>}, {pipeline_mode = #tpu.pipeline_mode<synchronous>, transform_indices = @transform_2, window_bounds = array<i64: 128, 128>}, {pipeline_mode = #tpu.pipeline_mode<synchronous>, transform_indices = @transform_3, window_bounds = array<i64: 1, 128>}, {transform_indices = @transform_4, window_bounds = array<i64: 128, 128>}]} {
    %c0 = arith.constant 0 : index
    %c0_0 = arith.constant 0 : index
    %0 = vector.load %arg1[%c0, %c0_0] : memref<128x128xbf16, #tpu.memory_space<vmem>>, vector<128x128xbf16>
    %c0_1 = arith.constant 0 : index
    %c0_2 = arith.constant 0 : index
    %1 = vector.load %arg2[%c0_1, %c0_2] : memref<128x128xbf16, #tpu.memory_space<vmem>>, vector<128x128xbf16>
    %2 = arith.addf %0, %1 : vector<128x128xbf16>
    %c0_3 = arith.constant 0 : index
    %c0_4 = arith.constant 0 : index
    %3 = vector.load %arg3[%c0_3, %c0_4] : memref<128x128xbf16, #tpu.memory_space<vmem>>, vector<128x128xbf16>
    %cst = arith.constant dense<0.000000e+00> : vector<128x128xf32>
    %4 = tpu.matmul %2, %3, %cst {dimension_numbers = #tpu.dot_dimension_numbers<[1], [0], [0], [1], [0, 0, 1, 1], [], []>} : vector<128x128xbf16>, vector<128x128xbf16>, vector<128x128xf32> -> vector<128x128xf32>
    %c0_5 = arith.constant 0 : index
    %c0_6 = arith.constant 0 : index
    %5 = vector.load %arg4[%c0_5, %c0_6] : memref<1x128xf32, #tpu.memory_space<vmem>>, vector<1x128xf32>
    %6 = vector.broadcast %5 : vector<1x128xf32> to vector<128x128xf32>
    %7 = arith.addf %4, %6 : vector<128x128xf32>
    %cst_7 = arith.constant 0.000000e+00 : f32
    %8 = vector.broadcast %cst_7 : f32 to vector<128x128xf32>
    %9 = arith.maximumf %7, %8 : vector<128x128xf32>
    %10 = arith.truncf %9 : vector<128x128xf32> to vector<128x128xbf16>
    %c0_8 = arith.constant 0 : index
    %c0_9 = arith.constant 0 : index
    %11 = vector.load %arg5[%c0_8, %c0_9] : memref<128x128xbf16, #tpu.memory_space<vmem>>, vector<128x128xbf16>
    tpu.vector_store %arg5[%c0_8, %c0_9], %10 {strides = array<i32>} : memref<128x128xbf16, #tpu.memory_space<vmem>>, vector<128x128xbf16>,
    return
  }
  func.func @transform_0(%arg0: i32) -> (i32, i32) {
    %c0_i32 = arith.constant 0 : i32
    %c0_i32_0 = arith.constant 0 : i32
    return %arg0, %c0_i32 : i32, i32
  }
  func.func @transform_1(%arg0: i32) -> (i32, i32) {
    %c0_i32 = arith.constant 0 : i32
    %c0_i32_0 = arith.constant 0 : i32
    return %arg0, %c0_i32 : i32, i32
  }
  func.func @transform_2(%arg0: i32) -> (i32, i32) {
    %c0_i32 = arith.constant 0 : i32
    %c0_i32_0 = arith.constant 0 : i32
    %c0_i32_1 = arith.constant 0 : i32
    return %c0_i32, %c0_i32_0 : i32, i32
  }
  func.func @transform_3(%arg0: i32) -> (i32, i32) {
    %c0_i32 = arith.constant 0 : i32
    %c0_i32_0 = arith.constant 0 : i32
    %c0_i32_1 = arith.constant 0 : i32
    return %c0_i32, %c0_i32_0 : i32, i32
  }
  func.func @transform_4(%arg0: i32) -> (i32, i32) {
    %c0_i32 = arith.constant 0 : i32
    %c0_i32_0 = arith.constant 0 : i32
    return %arg0, %c0_i32 : i32, i32
  }
}

module attributes {stable_mosaic.version = 11 : i64} {
  func.func @_htlf_kernel(%arg0: i32, %arg1: memref<64x16xbf16, #tpu.memory_space<vmem>>, %arg2: memref<1x16x320xbf16, #tpu.memory_space<vmem>>, %arg3: memref<320x128xbf16, #tpu.memory_space<vmem>>, %arg4: memref<1x128xf32, #tpu.memory_space<vmem>>, %arg5: memref<1x64x128xbf16, #tpu.memory_space<vmem>>, %arg6: memref<1x64x128xbf16, #tpu.memory_space<vmem>>) attributes {dimension_semantics = [#tpu.dimension_semantics<parallel>], iteration_bounds = array<i64: 2>, scalar_prefetch = 0 : i64, scratch_operands = 0 : i64, tpu.core_type = #tpu.core_type<tc>, window_params = [{pipeline_mode = #tpu.pipeline_mode<synchronous>, transform_indices = @transform_0, window_bounds = array<i64: 64, 16>}, {transform_indices = @transform_1, window_bounds = array<i64: 1, 16, 320>}, {pipeline_mode = #tpu.pipeline_mode<synchronous>, transform_indices = @transform_2, window_bounds = array<i64: 320, 128>}, {pipeline_mode = #tpu.pipeline_mode<synchronous>, transform_indices = @transform_3, window_bounds = array<i64: 1, 128>}, {transform_indices = @transform_4, window_bounds = array<i64: 1, 64, 128>}, {transform_indices = @transform_5, window_bounds = array<i64: 1, 64, 128>}]} {
    %c0 = arith.constant 0 : index
    %c0_0 = arith.constant 0 : index
    %0 = vector.load %arg1[%c0, %c0_0] : memref<64x16xbf16, #tpu.memory_space<vmem>>, vector<64x16xbf16>
    %c0_1 = arith.constant 0 : index
    %c0_2 = arith.constant 0 : index
    %c0_3 = arith.constant 0 : index
    %1 = vector.load %arg2[%c0_1, %c0_2, %c0_3] : memref<1x16x320xbf16, #tpu.memory_space<vmem>>, vector<1x16x320xbf16>
    %2 = vector.shape_cast %1 : vector<1x16x320xbf16> to vector<16x320xbf16>
    %cst = arith.constant dense<0.000000e+00> : vector<64x320xf32>
    %3 = tpu.matmul %0, %2, %cst {dimension_numbers = #tpu.dot_dimension_numbers<[1], [0], [0], [1], [0, 0, 1, 1], [], []>} : vector<64x16xbf16>, vector<16x320xbf16>, vector<64x320xf32> -> vector<64x320xf32>
    %4 = arith.truncf %3 : vector<64x320xf32> to vector<64x320xbf16>
    %c0_4 = arith.constant 0 : index
    %c0_5 = arith.constant 0 : index
    %5 = vector.load %arg3[%c0_4, %c0_5] : memref<320x128xbf16, #tpu.memory_space<vmem>>, vector<320x128xbf16>
    %cst_6 = arith.constant dense<0.000000e+00> : vector<64x128xf32>
    %6 = tpu.matmul %4, %5, %cst_6 {dimension_numbers = #tpu.dot_dimension_numbers<[1], [0], [0], [1], [0, 0, 1, 1], [], []>} : vector<64x320xbf16>, vector<320x128xbf16>, vector<64x128xf32> -> vector<64x128xf32>
    %c0_7 = arith.constant 0 : index
    %c0_8 = arith.constant 0 : index
    %7 = vector.load %arg4[%c0_7, %c0_8] : memref<1x128xf32, #tpu.memory_space<vmem>>, vector<1x128xf32>
    %8 = vector.broadcast %7 : vector<1x128xf32> to vector<64x128xf32>
    %9 = arith.addf %6, %8 : vector<64x128xf32>
    %cst_9 = arith.constant 0.000000e+00 : f32
    %10 = vector.broadcast %cst_9 : f32 to vector<64x128xf32>
    %11 = arith.maximumf %9, %10 : vector<64x128xf32>
    %c0_10 = arith.constant 0 : index
    %c0_11 = arith.constant 0 : index
    %c0_12 = arith.constant 0 : index
    %12 = vector.load %arg5[%c0_10, %c0_11, %c0_12] : memref<1x64x128xbf16, #tpu.memory_space<vmem>>, vector<1x64x128xbf16>
    %13 = vector.shape_cast %12 : vector<1x64x128xbf16> to vector<64x128xbf16>
    %14 = arith.extf %13 : vector<64x128xbf16> to vector<64x128xf32>
    %15 = arith.mulf %11, %14 : vector<64x128xf32>
    %16 = arith.addf %15, %14 : vector<64x128xf32>
    %17 = arith.truncf %16 : vector<64x128xf32> to vector<64x128xbf16>
    %c0_13 = arith.constant 0 : index
    %c0_14 = arith.constant 0 : index
    %c0_15 = arith.constant 0 : index
    %18 = vector.load %arg6[%c0_13, %c0_14, %c0_15] : memref<1x64x128xbf16, #tpu.memory_space<vmem>>, vector<1x64x128xbf16>
    %19 = vector.shape_cast %18 : vector<1x64x128xbf16> to vector<64x128xbf16>
    %20 = vector.shape_cast %17 : vector<64x128xbf16> to vector<1x64x128xbf16>
    tpu.vector_store %arg6[%c0_13, %c0_14, %c0_15], %20 {strides = array<i32>} : memref<1x64x128xbf16, #tpu.memory_space<vmem>>, vector<1x64x128xbf16>,
    return
  }
  func.func @transform_0(%arg0: i32) -> (i32, i32) {
    %c0_i32 = arith.constant 0 : i32
    %c0_i32_0 = arith.constant 0 : i32
    %c0_i32_1 = arith.constant 0 : i32
    return %c0_i32, %c0_i32_0 : i32, i32
  }
  func.func @transform_1(%arg0: i32) -> (i32, i32, i32) {
    %c0_i32 = arith.constant 0 : i32
    %c0_i32_0 = arith.constant 0 : i32
    %c0_i32_1 = arith.constant 0 : i32
    return %arg0, %c0_i32, %c0_i32_0 : i32, i32, i32
  }
  func.func @transform_2(%arg0: i32) -> (i32, i32) {
    %c0_i32 = arith.constant 0 : i32
    %c0_i32_0 = arith.constant 0 : i32
    %c0_i32_1 = arith.constant 0 : i32
    return %c0_i32, %c0_i32_0 : i32, i32
  }
  func.func @transform_3(%arg0: i32) -> (i32, i32) {
    %c0_i32 = arith.constant 0 : i32
    %c0_i32_0 = arith.constant 0 : i32
    %c0_i32_1 = arith.constant 0 : i32
    return %c0_i32, %c0_i32_0 : i32, i32
  }
  func.func @transform_4(%arg0: i32) -> (i32, i32, i32) {
    %c0_i32 = arith.constant 0 : i32
    %c0_i32_0 = arith.constant 0 : i32
    %c0_i32_1 = arith.constant 0 : i32
    return %arg0, %c0_i32, %c0_i32_0 : i32, i32, i32
  }
  func.func @transform_5(%arg0: i32) -> (i32, i32, i32) {
    %c0_i32 = arith.constant 0 : i32
    %c0_i32_0 = arith.constant 0 : i32
    %c0_i32_1 = arith.constant 0 : i32
    return %arg0, %c0_i32, %c0_i32_0 : i32, i32, i32
  }
}

module attributes {stable_mosaic.version = 11 : i64} {
  func.func @_rdfuse_kernel(%arg0: i32, %arg1: memref<512x64xbf16, #tpu.memory_space<vmem>>, %arg2: memref<512x64xbf16, #tpu.memory_space<vmem>>, %arg3: memref<64x64xbf16, #tpu.memory_space<vmem>>, %arg4: memref<1x64xf32, #tpu.memory_space<vmem>>, %arg5: memref<512x64xbf16, #tpu.memory_space<vmem>>) attributes {dimension_semantics = [#tpu.dimension_semantics<parallel>], iteration_bounds = array<i64: 1>, scalar_prefetch = 0 : i64, scratch_operands = 0 : i64, tpu.core_type = #tpu.core_type<tc>, window_params = [{transform_indices = @transform_0, window_bounds = array<i64: 512, 64>}, {transform_indices = @transform_1, window_bounds = array<i64: 512, 64>}, {pipeline_mode = #tpu.pipeline_mode<synchronous>, transform_indices = @transform_2, window_bounds = array<i64: 64, 64>}, {pipeline_mode = #tpu.pipeline_mode<synchronous>, transform_indices = @transform_3, window_bounds = array<i64: 1, 64>}, {transform_indices = @transform_4, window_bounds = array<i64: 512, 64>}]} {
    %c0 = arith.constant 0 : index
    %c0_0 = arith.constant 0 : index
    %0 = vector.load %arg1[%c0, %c0_0] : memref<512x64xbf16, #tpu.memory_space<vmem>>, vector<512x64xbf16>
    %c0_1 = arith.constant 0 : index
    %c0_2 = arith.constant 0 : index
    %1 = vector.load %arg2[%c0_1, %c0_2] : memref<512x64xbf16, #tpu.memory_space<vmem>>, vector<512x64xbf16>
    %2 = arith.addf %0, %1 : vector<512x64xbf16>
    %c0_3 = arith.constant 0 : index
    %c0_4 = arith.constant 0 : index
    %3 = vector.load %arg3[%c0_3, %c0_4] : memref<64x64xbf16, #tpu.memory_space<vmem>>, vector<64x64xbf16>
    %cst = arith.constant dense<0.000000e+00> : vector<512x64xf32>
    %4 = tpu.matmul %2, %3, %cst {dimension_numbers = #tpu.dot_dimension_numbers<[1], [0], [0], [1], [0, 0, 1, 1], [], []>} : vector<512x64xbf16>, vector<64x64xbf16>, vector<512x64xf32> -> vector<512x64xf32>
    %c0_5 = arith.constant 0 : index
    %c0_6 = arith.constant 0 : index
    %5 = vector.load %arg4[%c0_5, %c0_6] : memref<1x64xf32, #tpu.memory_space<vmem>>, vector<1x64xf32>
    %6 = vector.broadcast %5 : vector<1x64xf32> to vector<512x64xf32>
    %7 = arith.addf %4, %6 : vector<512x64xf32>
    %cst_7 = arith.constant 0.000000e+00 : f32
    %8 = vector.broadcast %cst_7 : f32 to vector<512x64xf32>
    %9 = arith.maximumf %7, %8 : vector<512x64xf32>
    %10 = arith.truncf %9 : vector<512x64xf32> to vector<512x64xbf16>
    %c0_8 = arith.constant 0 : index
    %c0_9 = arith.constant 0 : index
    %11 = vector.load %arg5[%c0_8, %c0_9] : memref<512x64xbf16, #tpu.memory_space<vmem>>, vector<512x64xbf16>
    tpu.vector_store %arg5[%c0_8, %c0_9], %10 {strides = array<i32>} : memref<512x64xbf16, #tpu.memory_space<vmem>>, vector<512x64xbf16>,
    return
  }
  func.func @transform_0(%arg0: i32) -> (i32, i32) {
    %c0_i32 = arith.constant 0 : i32
    %c0_i32_0 = arith.constant 0 : i32
    return %arg0, %c0_i32 : i32, i32
  }
  func.func @transform_1(%arg0: i32) -> (i32, i32) {
    %c0_i32 = arith.constant 0 : i32
    %c0_i32_0 = arith.constant 0 : i32
    return %arg0, %c0_i32 : i32, i32
  }
  func.func @transform_2(%arg0: i32) -> (i32, i32) {
    %c0_i32 = arith.constant 0 : i32
    %c0_i32_0 = arith.constant 0 : i32
    %c0_i32_1 = arith.constant 0 : i32
    return %c0_i32, %c0_i32_0 : i32, i32
  }
  func.func @transform_3(%arg0: i32) -> (i32, i32) {
    %c0_i32 = arith.constant 0 : i32
    %c0_i32_0 = arith.constant 0 : i32
    %c0_i32_1 = arith.constant 0 : i32
    return %c0_i32, %c0_i32_0 : i32, i32
  }
  func.func @transform_4(%arg0: i32) -> (i32, i32) {
    %c0_i32 = arith.constant 0 : i32
    %c0_i32_0 = arith.constant 0 : i32
    return %arg0, %c0_i32 : i32, i32
  }
}

module attributes {stable_mosaic.version = 11 : i64} {
  func.func @_htlf_kernel(%arg0: i32, %arg1: memref<256x64xbf16, #tpu.memory_space<vmem>>, %arg2: memref<1x64x128xbf16, #tpu.memory_space<vmem>>, %arg3: memref<128x64xbf16, #tpu.memory_space<vmem>>, %arg4: memref<1x64xf32, #tpu.memory_space<vmem>>, %arg5: memref<1x256x64xbf16, #tpu.memory_space<vmem>>, %arg6: memref<1x256x64xbf16, #tpu.memory_space<vmem>>) attributes {dimension_semantics = [#tpu.dimension_semantics<parallel>], iteration_bounds = array<i64: 2>, scalar_prefetch = 0 : i64, scratch_operands = 0 : i64, tpu.core_type = #tpu.core_type<tc>, window_params = [{pipeline_mode = #tpu.pipeline_mode<synchronous>, transform_indices = @transform_0, window_bounds = array<i64: 256, 64>}, {transform_indices = @transform_1, window_bounds = array<i64: 1, 64, 128>}, {pipeline_mode = #tpu.pipeline_mode<synchronous>, transform_indices = @transform_2, window_bounds = array<i64: 128, 64>}, {pipeline_mode = #tpu.pipeline_mode<synchronous>, transform_indices = @transform_3, window_bounds = array<i64: 1, 64>}, {transform_indices = @transform_4, window_bounds = array<i64: 1, 256, 64>}, {transform_indices = @transform_5, window_bounds = array<i64: 1, 256, 64>}]} {
    %c0 = arith.constant 0 : index
    %c0_0 = arith.constant 0 : index
    %0 = vector.load %arg1[%c0, %c0_0] : memref<256x64xbf16, #tpu.memory_space<vmem>>, vector<256x64xbf16>
    %c0_1 = arith.constant 0 : index
    %c0_2 = arith.constant 0 : index
    %c0_3 = arith.constant 0 : index
    %1 = vector.load %arg2[%c0_1, %c0_2, %c0_3] : memref<1x64x128xbf16, #tpu.memory_space<vmem>>, vector<1x64x128xbf16>
    %2 = vector.shape_cast %1 : vector<1x64x128xbf16> to vector<64x128xbf16>
    %cst = arith.constant dense<0.000000e+00> : vector<256x128xf32>
    %3 = tpu.matmul %0, %2, %cst {dimension_numbers = #tpu.dot_dimension_numbers<[1], [0], [0], [1], [0, 0, 1, 1], [], []>} : vector<256x64xbf16>, vector<64x128xbf16>, vector<256x128xf32> -> vector<256x128xf32>
    %4 = arith.truncf %3 : vector<256x128xf32> to vector<256x128xbf16>
    %c0_4 = arith.constant 0 : index
    %c0_5 = arith.constant 0 : index
    %5 = vector.load %arg3[%c0_4, %c0_5] : memref<128x64xbf16, #tpu.memory_space<vmem>>, vector<128x64xbf16>
    %cst_6 = arith.constant dense<0.000000e+00> : vector<256x64xf32>
    %6 = tpu.matmul %4, %5, %cst_6 {dimension_numbers = #tpu.dot_dimension_numbers<[1], [0], [0], [1], [0, 0, 1, 1], [], []>} : vector<256x128xbf16>, vector<128x64xbf16>, vector<256x64xf32> -> vector<256x64xf32>
    %c0_7 = arith.constant 0 : index
    %c0_8 = arith.constant 0 : index
    %7 = vector.load %arg4[%c0_7, %c0_8] : memref<1x64xf32, #tpu.memory_space<vmem>>, vector<1x64xf32>
    %8 = vector.broadcast %7 : vector<1x64xf32> to vector<256x64xf32>
    %9 = arith.addf %6, %8 : vector<256x64xf32>
    %cst_9 = arith.constant 0.000000e+00 : f32
    %10 = vector.broadcast %cst_9 : f32 to vector<256x64xf32>
    %11 = arith.maximumf %9, %10 : vector<256x64xf32>
    %c0_10 = arith.constant 0 : index
    %c0_11 = arith.constant 0 : index
    %c0_12 = arith.constant 0 : index
    %12 = vector.load %arg5[%c0_10, %c0_11, %c0_12] : memref<1x256x64xbf16, #tpu.memory_space<vmem>>, vector<1x256x64xbf16>
    %13 = vector.shape_cast %12 : vector<1x256x64xbf16> to vector<256x64xbf16>
    %14 = arith.extf %13 : vector<256x64xbf16> to vector<256x64xf32>
    %15 = arith.mulf %11, %14 : vector<256x64xf32>
    %16 = arith.addf %15, %14 : vector<256x64xf32>
    %17 = arith.truncf %16 : vector<256x64xf32> to vector<256x64xbf16>
    %c0_13 = arith.constant 0 : index
    %c0_14 = arith.constant 0 : index
    %c0_15 = arith.constant 0 : index
    %18 = vector.load %arg6[%c0_13, %c0_14, %c0_15] : memref<1x256x64xbf16, #tpu.memory_space<vmem>>, vector<1x256x64xbf16>
    %19 = vector.shape_cast %18 : vector<1x256x64xbf16> to vector<256x64xbf16>
    %20 = vector.shape_cast %17 : vector<256x64xbf16> to vector<1x256x64xbf16>
    tpu.vector_store %arg6[%c0_13, %c0_14, %c0_15], %20 {strides = array<i32>} : memref<1x256x64xbf16, #tpu.memory_space<vmem>>, vector<1x256x64xbf16>,
    return
  }
  func.func @transform_0(%arg0: i32) -> (i32, i32) {
    %c0_i32 = arith.constant 0 : i32
    %c0_i32_0 = arith.constant 0 : i32
    %c0_i32_1 = arith.constant 0 : i32
    return %c0_i32, %c0_i32_0 : i32, i32
  }
  func.func @transform_1(%arg0: i32) -> (i32, i32, i32) {
    %c0_i32 = arith.constant 0 : i32
    %c0_i32_0 = arith.constant 0 : i32
    %c0_i32_1 = arith.constant 0 : i32
    return %arg0, %c0_i32, %c0_i32_0 : i32, i32, i32
  }
  func.func @transform_2(%arg0: i32) -> (i32, i32) {
    %c0_i32 = arith.constant 0 : i32
    %c0_i32_0 = arith.constant 0 : i32
    %c0_i32_1 = arith.constant 0 : i32
    return %c0_i32, %c0_i32_0 : i32, i32
  }
  func.func @transform_3(%arg0: i32) -> (i32, i32) {
    %c0_i32 = arith.constant 0 : i32
    %c0_i32_0 = arith.constant 0 : i32
    %c0_i32_1 = arith.constant 0 : i32
    return %c0_i32, %c0_i32_0 : i32, i32
  }
  func.func @transform_4(%arg0: i32) -> (i32, i32, i32) {
    %c0_i32 = arith.constant 0 : i32
    %c0_i32_0 = arith.constant 0 : i32
    %c0_i32_1 = arith.constant 0 : i32
    return %arg0, %c0_i32, %c0_i32_0 : i32, i32, i32
  }
  func.func @transform_5(%arg0: i32) -> (i32, i32, i32) {
    %c0_i32 = arith.constant 0 : i32
    %c0_i32_0 = arith.constant 0 : i32
    %c0_i32_1 = arith.constant 0 : i32
    return %arg0, %c0_i32, %c0_i32_0 : i32, i32, i32
  }
}

module attributes {stable_mosaic.version = 11 : i64} {
  func.func @_final_head_kernel(%arg0: i32, %arg1: memref<1x16x1024xbf16, #tpu.memory_space<vmem>>, %arg2: memref<1024x512xbf16, #tpu.memory_space<vmem>>, %arg3: memref<64x16xbf16, #tpu.memory_space<vmem>>, %arg4: memref<1x512xf32, #tpu.memory_space<vmem>>, %arg5: memref<1x64x512xf32, #tpu.memory_space<vmem>>) attributes {dimension_semantics = [#tpu.dimension_semantics<parallel>], iteration_bounds = array<i64: 2>, scalar_prefetch = 0 : i64, scratch_operands = 0 : i64, tpu.core_type = #tpu.core_type<tc>, window_params = [{transform_indices = @transform_0, window_bounds = array<i64: 1, 16, 1024>}, {pipeline_mode = #tpu.pipeline_mode<synchronous>, transform_indices = @transform_1, window_bounds = array<i64: 1024, 512>}, {pipeline_mode = #tpu.pipeline_mode<synchronous>, transform_indices = @transform_2, window_bounds = array<i64: 64, 16>}, {pipeline_mode = #tpu.pipeline_mode<synchronous>, transform_indices = @transform_3, window_bounds = array<i64: 1, 512>}, {transform_indices = @transform_4, window_bounds = array<i64: 1, 64, 512>}]} {
    %c0 = arith.constant 0 : index
    %c0_0 = arith.constant 0 : index
    %c0_1 = arith.constant 0 : index
    %0 = vector.load %arg1[%c0, %c0_0, %c0_1] : memref<1x16x1024xbf16, #tpu.memory_space<vmem>>, vector<1x16x1024xbf16>
    %1 = vector.shape_cast %0 : vector<1x16x1024xbf16> to vector<16x1024xbf16>
    %c0_2 = arith.constant 0 : index
    %c0_3 = arith.constant 0 : index
    %2 = vector.load %arg2[%c0_2, %c0_3] : memref<1024x512xbf16, #tpu.memory_space<vmem>>, vector<1024x512xbf16>
    %cst = arith.constant dense<0.000000e+00> : vector<16x512xf32>
    %3 = tpu.matmul %1, %2, %cst {dimension_numbers = #tpu.dot_dimension_numbers<[1], [0], [0], [1], [0, 0, 1, 1], [], []>} : vector<16x1024xbf16>, vector<1024x512xbf16>, vector<16x512xf32> -> vector<16x512xf32>
    %c0_4 = arith.constant 0 : index
    %c0_5 = arith.constant 0 : index
    %4 = vector.load %arg3[%c0_4, %c0_5] : memref<64x16xbf16, #tpu.memory_space<vmem>>, vector<64x16xbf16>
    %5 = arith.truncf %3 : vector<16x512xf32> to vector<16x512xbf16>
    %cst_6 = arith.constant dense<0.000000e+00> : vector<64x512xf32>
    %6 = tpu.matmul %4, %5, %cst_6 {dimension_numbers = #tpu.dot_dimension_numbers<[1], [0], [0], [1], [0, 0, 1, 1], [], []>} : vector<64x16xbf16>, vector<16x512xbf16>, vector<64x512xf32> -> vector<64x512xf32>
    %c0_7 = arith.constant 0 : index
    %c0_8 = arith.constant 0 : index
    %7 = vector.load %arg4[%c0_7, %c0_8] : memref<1x512xf32, #tpu.memory_space<vmem>>, vector<1x512xf32>
    %8 = vector.broadcast %7 : vector<1x512xf32> to vector<64x512xf32>
    %9 = arith.addf %6, %8 : vector<64x512xf32>
    %c0_9 = arith.constant 0 : index
    %c0_10 = arith.constant 0 : index
    %c0_11 = arith.constant 0 : index
    %10 = vector.load %arg5[%c0_9, %c0_10, %c0_11] : memref<1x64x512xf32, #tpu.memory_space<vmem>>, vector<1x64x512xf32>
    %11 = vector.shape_cast %10 : vector<1x64x512xf32> to vector<64x512xf32>
    %12 = vector.shape_cast %9 : vector<64x512xf32> to vector<1x64x512xf32>
    tpu.vector_store %arg5[%c0_9, %c0_10, %c0_11], %12 {strides = array<i32>} : memref<1x64x512xf32, #tpu.memory_space<vmem>>, vector<1x64x512xf32>,
    return
  }
  func.func @transform_0(%arg0: i32) -> (i32, i32, i32) {
    %c0_i32 = arith.constant 0 : i32
    %c0_i32_0 = arith.constant 0 : i32
    %c0_i32_1 = arith.constant 0 : i32
    return %arg0, %c0_i32, %c0_i32_0 : i32, i32, i32
  }
  func.func @transform_1(%arg0: i32) -> (i32, i32) {
    %c0_i32 = arith.constant 0 : i32
    %c0_i32_0 = arith.constant 0 : i32
    %c0_i32_1 = arith.constant 0 : i32
    return %c0_i32, %c0_i32_0 : i32, i32
  }
  func.func @transform_2(%arg0: i32) -> (i32, i32) {
    %c0_i32 = arith.constant 0 : i32
    %c0_i32_0 = arith.constant 0 : i32
    %c0_i32_1 = arith.constant 0 : i32
    return %c0_i32, %c0_i32_0 : i32, i32
  }
  func.func @transform_3(%arg0: i32) -> (i32, i32) {
    %c0_i32 = arith.constant 0 : i32
    %c0_i32_0 = arith.constant 0 : i32
    %c0_i32_1 = arith.constant 0 : i32
    return %c0_i32, %c0_i32_0 : i32, i32
  }
  func.func @transform_4(%arg0: i32) -> (i32, i32, i32) {
    %c0_i32 = arith.constant 0 : i32
    %c0_i32_0 = arith.constant 0 : i32
    %c0_i32_1 = arith.constant 0 : i32
    return %arg0, %c0_i32, %c0_i32_0 : i32, i32, i32
  }
}

</mosaic_0001>

<bundles_post_ra>
// kernel: fakenet_forward.17
= control target key start
LH: loop header
LB: loop body
LE: loop exit
PB: predicated region body
PF: predicated region fallthrough
CT: control target
= control target key end

     0   :  { %s1701_s12 = smov 0   ;;  %s1995_s0 = inlined_call_operand.vmem [shape: bf16[2,512,48], index: 0, kind: input, shape index: {}]   ;;  %s1996_s1 = inlined_call_operand.vmem [shape: bf16[2,48,64], index: 1, kind: input, shape index: {}]   ;;  %s1997_s2 = inlined_call_operand.vmem [shape: f32[2,1,64], index: 2, kind: input, shape index: {}]   ;;  %s1998_s3 = inlined_call_operand.vmem [shape: bf16[2,512,64], index: 3, kind: output, shape index: {}]  }
   0x1 LB: > { %s1308_s13 = sadd.s32 4294967295, %s1679_s12   ;;  %p1312_p0 = scmp.ge.s32.totalorder %s1679_s12, 1  ;;  %s1679_s12 = sphi %s1701_s12, %s13_s12  }
   0x2   : > { %p155_p1 = scmp.lt.s32.totalorder %s1679_s12, 3 }
   0x4   : > { %p156_p2 = pnand %p1312_p0, %p155_p1 }
   0x5   : > { %p187_p3 = scmp.lt.s32.totalorder (!%p156_p2), %s1308_s13, 1 }
   0x6   : > { %159 = sbr.rel (%p156_p2) target bundleno = 290 (0x122), region = 32 }
   0xb   : > { %s2000_s13 = smov (!%p187_p3, %s1308_s13), 1  ;;  %vm461_vm0 = vcmask 392192   ;;  %vm1167_vm1 = vcmask 519168  }
   0xc   : > { %s1452_s14 = sshll.u32 %s2000_s13, 8  ;;  %s1629_s15 = smul.u32 24, %s2000_s13 }
   0xd   : > { %s1718_s18 = scalar_lea.vmem %s1995_s0, %s1452_s14  ;;  %s199_s24 = scalar_lea.vmem %s1997_s2, %s2000_s13 }
   0xe   : > { %s196_s21 = scalar_lea.vmem %s1996_s1, %s1629_s15  ;;  %v1641_v3 = vld [vmem:[%s1718_s18] sm:$0xff]   ;;  %v1643_v5 = vld [vmem:[%s1718_s18 + $0x8] sm:$0xff]   ;;  %v1645_v7 = vld [vmem:[%s1718_s18 + $0x10] sm:$0xff]   ;;  %s1802_s27 = scalar_lea.vmem %s1998_s3, %s1452_s14 }
   0xf   : > { %v1638_v0 = vld [vmem:[%s196_s21 + $0x10] sm:$0xff]   ;;  %v1639_v1 = vld [vmem:[%s196_s21 + $0x8] sm:$0xff]   ;;  %v1640_v2 = vld [vmem:[%s196_s21] sm:$0xff]   ;;  %1559 = vmatprep.mubr.msk.bf16.mxu0 %vm461_vm0, %v1641_v3 }
  0x10   : > { %1553 = vmatprep.subr.bf16.mxu0 %v1638_v0  ;;  %1623 = vmatprep.subr.bf16.mxu1 %v1638_v0  ;;  %v1642_v4 = vld [vmem:[%s1718_s18 + $0x80] sm:$0xff]   ;;  %v1644_v6 = vld [vmem:[%s1718_s18 + $0x88] sm:$0xff]   ;;  %v1646_v8 = vld [vmem:[%s1718_s18 + $0x90] sm:$0xff]  }
  0x11   : > { %1554 = vmatpush3.bf16.msra.mxu0 %v1638_v0  ;;  %1626 = vmatpush3.bf16.msra.mxu1 %v1638_v0  ;;  %v1647_v9 = vld [vmem:[%s1718_s18 + $0x18] sm:$0xff]   ;;  %v1649_v11 = vld [vmem:[%s1718_s18 + $0x20] sm:$0xff]   ;;  %v1651_v13 = vld [vmem:[%s1718_s18 + $0x28] sm:$0xff]  }
  0x12   : > { %1555 = vmatprep.subr.bf16.mxu0 %v1639_v1  ;;  %1624 = vmatprep.subr.bf16.mxu1 %v1639_v1  ;;  %v1648_v10 = vld [vmem:[%s1718_s18 + $0x98] sm:$0xff]   ;;  %v1650_v12 = vld [vmem:[%s1718_s18 + $0xa0] sm:$0xff]   ;;  %v1652_v14 = vld [vmem:[%s1718_s18 + $0xa8] sm:$0xff]  }
  0x13   : > { %1591 = vmatprep.mubr.msk.bf16.mxu1 %vm461_vm0, %v1642_v4  ;;  %v1653_v15 = vld [vmem:[%s1718_s18 + $0x30] sm:$0xff]   ;;  %v1655_v17 = vld [vmem:[%s1718_s18 + $0x38] sm:$0xff]   ;;  %v1657_v19 = vld [vmem:[%s1718_s18 + $0x40] sm:$0xff]  }
  0x14   : > { %v1654_v16 = vld [vmem:[%s1718_s18 + $0xb0] sm:$0xff]   ;;  %v1656_v18 = vld [vmem:[%s1718_s18 + $0xb8] sm:$0xff]   ;;  %v1658_v20 = vld [vmem:[%s1718_s18 + $0xc0] sm:$0xff]  }
  0x15   : > { %1556 = vmatpush3.bf16.msra.mxu0 %v1639_v1  ;;  %1627 = vmatpush3.bf16.msra.mxu1 %v1639_v1  ;;  %v1659_v21 = vld [vmem:[%s1718_s18 + $0x48] sm:$0xff]   ;;  %v1661_v23 = vld [vmem:[%s1718_s18 + $0x50] sm:$0xff]   ;;  %v1663_v25 = vld [vmem:[%s1718_s18 + $0x58] sm:$0xff]  }
  0x16   : > { %1557 = vmatprep.subr.bf16.mxu0 %v1640_v2  ;;  %1625 = vmatprep.subr.bf16.mxu1 %v1640_v2  ;;  %v1660_v22 = vld [vmem:[%s1718_s18 + $0xc8] sm:$0xff]   ;;  %v1662_v24 = vld [vmem:[%s1718_s18 + $0xd0] sm:$0xff]   ;;  %v1664_v26 = vld [vmem:[%s1718_s18 + $0xd8] sm:$0xff]  }
  0x17   : > { %v1665_v27 = vld [vmem:[%s1718_s18 + $0x60] sm:$0xff]   ;;  %v1667_v29 = vld [vmem:[%s1718_s18 + $0x68] sm:$0xff]   ;;  %v1669_v31 = vld [vmem:[%s1718_s18 + $0x70] sm:$0xff]  }
  0x18   : > { %v1666_v28 = vld [vmem:[%s1718_s18 + $0xe0] sm:$0xff]   ;;  %v1668_v30 = vld [vmem:[%s1718_s18 + $0xe8] sm:$0xff]   ;;  %v1670_v32 = vld [vmem:[%s1718_s18 + $0xf0] sm:$0xff]  }
  0x19   : > { %1558 = vmatpush3.bf16.msra.mxu0 %v1640_v2  ;;  %1628 = vmatpush3.bf16.msra.mxu1 %v1640_v2  ;;  %v1671_v33 = vld [vmem:[%s1718_s18 + $0x78] sm:$0xff]   ;;  %v1791_v35 = vld [vmem:[%s199_s24] ss:$0 sm:$0xff] }
  0x1a   : > { %v1672_v34 = vld [vmem:[%s1718_s18 + $0xf8] sm:$0xff]  }
  0x1c   : > { %1560 = vmatmul.mubr.msk.bf16.vlgmr.msra.gmra.mxu0 %vm461_vm0, %v1643_v5  ;;  %1592 = vmatmul.mubr.msk.bf16.vlgmr.msra.gmra.mxu1 %vm461_vm0, %v1644_v6 }
  0x1d   : > { %1563 = vmatprep.mubr.msk.bf16.mxu0 %vm461_vm0, %v1645_v7  ;;  %1595 = vmatprep.mubr.msk.bf16.mxu1 %vm461_vm0, %v1646_v8 }
  0x24   : > { %1564 = vmatmul.mubr.msk.bf16.gmra.mxu0 %vm461_vm0, %v1647_v9  ;;  %1596 = vmatmul.mubr.msk.bf16.gmra.mxu1 %vm461_vm0, %v1648_v10 }
  0x25   : > { %1567 = vmatprep.mubr.msk.bf16.mxu0 %vm461_vm0, %v1649_v11  ;;  %1599 = vmatprep.mubr.msk.bf16.mxu1 %vm461_vm0, %v1650_v12 }
  0x2c   : > { %1568 = vmatmul.mubr.msk.bf16.gmra.mxu0 %vm461_vm0, %v1651_v13  ;;  %1600 = vmatmul.mubr.msk.bf16.gmra.mxu1 %vm461_vm0, %v1652_v14 }
  0x2d   : > { %1571 = vmatprep.mubr.msk.bf16.mxu0 %vm461_vm0, %v1653_v15  ;;  %1603 = vmatprep.mubr.msk.bf16.mxu1 %vm461_vm0, %v1654_v16 }
  0x34   : > { %1572 = vmatmul.mubr.msk.bf16.gmra.mxu0 %vm461_vm0, %v1655_v17  ;;  %1604 = vmatmul.mubr.msk.bf16.gmra.mxu1 %vm461_vm0, %v1656_v18 }
  0x35   : > { %1575 = vmatprep.mubr.msk.bf16.mxu0 %vm461_vm0, %v1657_v19  ;;  %1607 = vmatprep.mubr.msk.bf16.mxu1 %vm461_vm0, %v1658_v20 }
  0x3c   : > { %1576 = vmatmul.mubr.msk.bf16.gmra.mxu0 %vm461_vm0, %v1659_v21  ;;  %1608 = vmatmul.mubr.msk.bf16.gmra.mxu1 %vm461_vm0, %v1660_v22 }
  0x3d   : > { %1579 = vmatprep.mubr.msk.bf16.mxu0 %vm461_vm0, %v1661_v23  ;;  %1611 = vmatprep.mubr.msk.bf16.mxu1 %vm461_vm0, %v1662_v24 }
  0x44   : > { %1580 = vmatmul.mubr.msk.bf16.gmra.mxu0 %vm461_vm0, %v1663_v25  ;;  %1612 = vmatmul.mubr.msk.bf16.gmra.mxu1 %vm461_vm0, %v1664_v26 }
  0x45   : > { %1583 = vmatprep.mubr.msk.bf16.mxu0 %vm461_vm0, %v1665_v27  ;;  %1615 = vmatprep.mubr.msk.bf16.mxu1 %vm461_vm0, %v1666_v28 }
  0x4c   : > { %1584 = vmatmul.mubr.msk.bf16.gmra.mxu0 %vm461_vm0, %v1667_v29  ;;  %1616 = vmatmul.mubr.msk.bf16.gmra.mxu1 %vm461_vm0, %v1668_v30 }
  0x4d   : > { %1587 = vmatprep.mubr.msk.bf16.mxu0 %vm461_vm0, %v1669_v31  ;;  %1619 = vmatprep.mubr.msk.bf16.mxu1 %vm461_vm0, %v1670_v32 }
  0x54   : > { %1588 = vmatmul.mubr.msk.bf16.gmra.mxu0 %vm461_vm0, %v1671_v33  ;;  %1620 = vmatmul.mubr.msk.bf16.gmra.mxu1 %vm461_vm0, %v1672_v34 }
  0xdc   : > { %v1561_v36 = vpop.f32.mrf.mxu0  ;;  %v1593_v37 = vpop.f32.mrf.mxu1 }
  0xdd   : > { %v601_v38 = vadd.f32 %v1561_v36, %v1791_v35  ;;  %v729_v39 = vadd.f32 %v1593_v37, %v1791_v35 }
  0xde   : > { %v592_v40 = vpop.f32.mrf.mxu0  ;;  %v720_v41 = vpop.f32.mrf.mxu1 }
  0xdf   : > { %v849_v42 = vmax.f32 %v601_v38, 0.0  ;;  %v881_v43 = vmax.f32 %v729_v39, 0.0  ;;  %v593_v44 = vadd.f32 %v1791_v35, %v592_v40  ;;  %v721_v45 = vadd.f32 %v1791_v35, %v720_v41 }
  0xe0   : > { %v1562_v46 = vpop.f32.mrf.mxu0  ;;  %v1594_v47 = vpop.f32.mrf.mxu1 }
  0xe1   : > { %v1456_v48 = vpack.c.bf16 %v849_v42, %v849_v42  ;;  %v1488_v49 = vpack.c.bf16 %v881_v43, %v881_v43  ;;  %v847_v50 = vmax.f32 %v593_v44, 0.0  ;;  %v879_v51 = vmax.f32 %v721_v45, 0.0 }
  0xe2   : > { %v604_v52 = vadd.f32 %v1562_v46, %v1791_v35  ;;  %v732_v53 = vadd.f32 %v1594_v47, %v1791_v35  ;;  %v595_v54 = vpop.f32.mrf.mxu0  ;;  %v723_v55 = vpop.f32.mrf.mxu1 }
  0xe3   : > { %1170 = vst.msk [vmem:[%s1802_s27 + $0x8] sm:$0xf] %vm1167_vm1, %v1456_v48  ;;  %1202 = vst.msk [vmem:[%s1802_s27 + $0x88] sm:$0xf] %vm1167_vm1, %v1488_v49  ;;  %v1454_v56 = vpack.c.bf16 %v847_v50, %v847_v50  ;;  %v1486_v57 = vpack.c.bf16 %v879_v51, %v879_v51  ;;  %v596_v58 = vadd.f32 %v1791_v35, %v595_v54 }
  0xe4   : > { %v724_v59 = vadd.f32 %v1791_v35, %v723_v55  ;;  %v850_v60 = vmax.f32 %v604_v52, 0.0  ;;  %v882_v61 = vmax.f32 %v732_v53, 0.0  ;;  %v1565_v62 = vpop.f32.mrf.mxu0  ;;  %v1597_v63 = vpop.f32.mrf.mxu1 }
  0xe5   : > { %1168 = vst.msk [vmem:[%s1802_s27] sm:$0xf] %vm1167_vm1, %v1454_v56  ;;  %1200 = vst.msk [vmem:[%s1802_s27 + $0x80] sm:$0xf] %vm1167_vm1, %v1486_v57  ;;  %v848_v0 = vmax.f32 %v596_v58, 0.0  ;;  %v617_v2 = vadd.f32 %v1565_v62, %v1791_v35  ;;  %v745_v3 = vadd.f32 %v1597_v63, %v1791_v35 }
  0xe6   : > { %v880_v1 = vmax.f32 %v724_v59, 0.0  ;;  %v1457_v4 = vpack.c.bf16 %v850_v60, %v850_v60  ;;  %v1489_v5 = vpack.c.bf16 %v882_v61, %v882_v61  ;;  %v608_v6 = vpop.f32.mrf.mxu0  ;;  %v736_v7 = vpop.f32.mrf.mxu1 }
  0xe7   : > { %v1455_v8 = vpack.c.bf16 %v848_v0, %v848_v0  ;;  %v853_v10 = vmax.f32 %v617_v2, 0.0  ;;  %v885_v11 = vmax.f32 %v745_v3, 0.0  ;;  %v609_v12 = vadd.f32 %v1791_v35, %v608_v6 }
  0xe8   : > { %v1487_v9 = vpack.c.bf16 %v880_v1, %v880_v1  ;;  %1171 = vst.msk [vmem:[%s1802_s27 + $0xc] sm:$0xf] %vm1167_vm1, %v1457_v4  ;;  %1203 = vst.msk [vmem:[%s1802_s27 + $0x8c] sm:$0xf] %vm1167_vm1, %v1489_v5  ;;  %v737_v13 = vadd.f32 %v1791_v35, %v736_v7  ;;  %v1566_v14 = vpop.f32.mrf.mxu0  ;;  %v1598_v15 = vpop.f32.mrf.mxu1 }
  0xe9   : > { %1169 = vst.msk [vmem:[%s1802_s27 + $0x4] sm:$0xf] %vm1167_vm1, %v1455_v8  ;;  %v1460_v16 = vpack.c.bf16 %v853_v10, %v853_v10  ;;  %v1492_v17 = vpack.c.bf16 %v885_v11, %v885_v11  ;;  %v620_v18 = vadd.f32 %v1566_v14, %v1791_v35  ;;  %v748_v19 = vadd.f32 %v1598_v15, %v1791_v35 }
  0xea   : > { %1201 = vst.msk [vmem:[%s1802_s27 + $0x84] sm:$0xf] %vm1167_vm1, %v1487_v9  ;;  %v851_v20 = vmax.f32 %v609_v12, 0.0  ;;  %v883_v21 = vmax.f32 %v737_v13, 0.0  ;;  %v611_v22 = vpop.f32.mrf.mxu0  ;;  %v739_v23 = vpop.f32.mrf.mxu1 }
  0xeb   : > { %1174 = vst.msk [vmem:[%s1802_s27 + $0x18] sm:$0xf] %vm1167_vm1, %v1460_v16  ;;  %1206 = vst.msk [vmem:[%s1802_s27 + $0x98] sm:$0xf] %vm1167_vm1, %v1492_v17  ;;  %v854_v24 = vmax.f32 %v620_v18, 0.0  ;;  %v886_v25 = vmax.f32 %v748_v19, 0.0  ;;  %v612_v26 = vadd.f32 %v1791_v35, %v611_v22  ;;  %v740_v27 = vadd.f32 %v1791_v35, %v739_v23 }
  0xec   : > { %v1458_v28 = vpack.c.bf16 %v851_v20, %v851_v20  ;;  %v1490_v29 = vpack.c.bf16 %v883_v21, %v883_v21  ;;  %v1569_v30 = vpop.f32.mrf.mxu0  ;;  %v1601_v31 = vpop.f32.mrf.mxu1 }
  0xed   : > { %v1461_v32 = vpack.c.bf16 %v854_v24, %v854_v24  ;;  %v1493_v33 = vpack.c.bf16 %v886_v25, %v886_v25  ;;  %v852_v34 = vmax.f32 %v612_v26, 0.0  ;;  %v884_v36 = vmax.f32 %v740_v27, 0.0 }
  0xee   : > { %1172 = vst.msk [vmem:[%s1802_s27 + $0x10] sm:$0xf] %vm1167_vm1, %v1458_v28  ;;  %1204 = vst.msk [vmem:[%s1802_s27 + $0x90] sm:$0xf] %vm1167_vm1, %v1490_v29  ;;  %v633_v37 = vadd.f32 %v1569_v30, %v1791_v35  ;;  %v761_v38 = vadd.f32 %v1601_v31, %v1791_v35  ;;  %v624_v39 = vpop.f32.mrf.mxu0  ;;  %v752_v40 = vpop.f32.mrf.mxu1 }
  0xef   : > { %1175 = vst.msk [vmem:[%s1802_s27 + $0x1c] sm:$0xf] %vm1167_vm1, %v1461_v32  ;;  %1207 = vst.msk [vmem:[%s1802_s27 + $0x9c] sm:$0xf] %vm1167_vm1, %v1493_v33  ;;  %v1459_v41 = vpack.c.bf16 %v852_v34, %v852_v34  ;;  %v1491_v42 = vpack.c.bf16 %v884_v36, %v884_v36  ;;  %v625_v43 = vadd.f32 %v1791_v35, %v624_v39 }
  0xf0   : > { %v753_v44 = vadd.f32 %v1791_v35, %v752_v40  ;;  %v857_v45 = vmax.f32 %v633_v37, 0.0  ;;  %v889_v46 = vmax.f32 %v761_v38, 0.0  ;;  %v1570_v47 = vpop.f32.mrf.mxu0  ;;  %v1602_v48 = vpop.f32.mrf.mxu1 }
  0xf1   : > { %1173 = vst.msk [vmem:[%s1802_s27 + $0x14] sm:$0xf] %vm1167_vm1, %v1459_v41  ;;  %1205 = vst.msk [vmem:[%s1802_s27 + $0x94] sm:$0xf] %vm1167_vm1, %v1491_v42  ;;  %v855_v49 = vmax.f32 %v625_v43, 0.0  ;;  %v636_v51 = vadd.f32 %v1570_v47, %v1791_v35  ;;  %v764_v52 = vadd.f32 %v1602_v48, %v1791_v35 }
  0xf2   : > { %v887_v50 = vmax.f32 %v753_v44, 0.0  ;;  %v1464_v53 = vpack.c.bf16 %v857_v45, %v857_v45  ;;  %v1496_v54 = vpack.c.bf16 %v889_v46, %v889_v46  ;;  %v627_v55 = vpop.f32.mrf.mxu0  ;;  %v755_v56 = vpop.f32.mrf.mxu1 }
  0xf3   : > { %v1462_v57 = vpack.c.bf16 %v855_v49, %v855_v49  ;;  %v858_v59 = vmax.f32 %v636_v51, 0.0  ;;  %v890_v60 = vmax.f32 %v764_v52, 0.0  ;;  %v628_v61 = vadd.f32 %v1791_v35, %v627_v55 }
  0xf4   : > { %v1494_v58 = vpack.c.bf16 %v887_v50, %v887_v50  ;;  %1178 = vst.msk [vmem:[%s1802_s27 + $0x28] sm:$0xf] %vm1167_vm1, %v1464_v53  ;;  %1210 = vst.msk [vmem:[%s1802_s27 + $0xa8] sm:$0xf] %vm1167_vm1, %v1496_v54  ;;  %v756_v62 = vadd.f32 %v1791_v35, %v755_v56  ;;  %v1573_v63 = vpop.f32.mrf.mxu0  ;;  %v1605_v0 = vpop.f32.mrf.mxu1 }
  0xf5   : > { %1176 = vst.msk [vmem:[%s1802_s27 + $0x20] sm:$0xf] %vm1167_vm1, %v1462_v57  ;;  %v1465_v1 = vpack.c.bf16 %v858_v59, %v858_v59  ;;  %v1497_v2 = vpack.c.bf16 %v890_v60, %v890_v60  ;;  %v649_v3 = vadd.f32 %v1573_v63, %v1791_v35  ;;  %v777_v4 = vadd.f32 %v1605_v0, %v1791_v35 }
  0xf6   : > { %1208 = vst.msk [vmem:[%s1802_s27 + $0xa0] sm:$0xf] %vm1167_vm1, %v1494_v58  ;;  %v856_v5 = vmax.f32 %v628_v61, 0.0  ;;  %v888_v6 = vmax.f32 %v756_v62, 0.0  ;;  %v640_v7 = vpop.f32.mrf.mxu0  ;;  %v768_v8 = vpop.f32.mrf.mxu1 }
  0xf7   : > { %1179 = vst.msk [vmem:[%s1802_s27 + $0x2c] sm:$0xf] %vm1167_vm1, %v1465_v1  ;;  %1211 = vst.msk [vmem:[%s1802_s27 + $0xac] sm:$0xf] %vm1167_vm1, %v1497_v2  ;;  %v861_v9 = vmax.f32 %v649_v3, 0.0  ;;  %v893_v10 = vmax.f32 %v777_v4, 0.0  ;;  %v641_v11 = vadd.f32 %v1791_v35, %v640_v7  ;;  %v769_v12 = vadd.f32 %v1791_v35, %v768_v8 }
  0xf8   : > { %v1463_v13 = vpack.c.bf16 %v856_v5, %v856_v5  ;;  %v1495_v14 = vpack.c.bf16 %v888_v6, %v888_v6  ;;  %v1574_v15 = vpop.f32.mrf.mxu0  ;;  %v1606_v16 = vpop.f32.mrf.mxu1 }
  0xf9   : > { %v1468_v17 = vpack.c.bf16 %v861_v9, %v861_v9  ;;  %v1500_v18 = vpack.c.bf16 %v893_v10, %v893_v10  ;;  %v859_v19 = vmax.f32 %v641_v11, 0.0  ;;  %v891_v20 = vmax.f32 %v769_v12, 0.0 }
  0xfa   : > { %1177 = vst.msk [vmem:[%s1802_s27 + $0x24] sm:$0xf] %vm1167_vm1, %v1463_v13  ;;  %1209 = vst.msk [vmem:[%s1802_s27 + $0xa4] sm:$0xf] %vm1167_vm1, %v1495_v14  ;;  %v652_v21 = vadd.f32 %v1574_v15, %v1791_v35  ;;  %v780_v22 = vadd.f32 %v1606_v16, %v1791_v35  ;;  %v643_v23 = vpop.f32.mrf.mxu0  ;;  %v771_v24 = vpop.f32.mrf.mxu1 }
  0xfb   : > { %1182 = vst.msk [vmem:[%s1802_s27 + $0x38] sm:$0xf] %vm1167_vm1, %v1468_v17  ;;  %1214 = vst.msk [vmem:[%s1802_s27 + $0xb8] sm:$0xf] %vm1167_vm1, %v1500_v18  ;;  %v1466_v25 = vpack.c.bf16 %v859_v19, %v859_v19  ;;  %v1498_v26 = vpack.c.bf16 %v891_v20, %v891_v20  ;;  %v644_v27 = vadd.f32 %v1791_v35, %v643_v23 }
  0xfc   : > { %v772_v28 = vadd.f32 %v1791_v35, %v771_v24  ;;  %v862_v29 = vmax.f32 %v652_v21, 0.0  ;;  %v894_v30 = vmax.f32 %v780_v22, 0.0  ;;  %v1577_v31 = vpop.f32.mrf.mxu0  ;;  %v1609_v32 = vpop.f32.mrf.mxu1 }
  0xfd   : > { %1180 = vst.msk [vmem:[%s1802_s27 + $0x30] sm:$0xf] %vm1167_vm1, %v1466_v25  ;;  %1212 = vst.msk [vmem:[%s1802_s27 + $0xb0] sm:$0xf] %vm1167_vm1, %v1498_v26  ;;  %v860_v33 = vmax.f32 %v644_v27, 0.0  ;;  %v665_v36 = vadd.f32 %v1577_v31, %v1791_v35  ;;  %v793_v37 = vadd.f32 %v1609_v32, %v1791_v35 }
  0xfe   : > { %v892_v34 = vmax.f32 %v772_v28, 0.0  ;;  %v1469_v38 = vpack.c.bf16 %v862_v29, %v862_v29  ;;  %v1501_v39 = vpack.c.bf16 %v894_v30, %v894_v30  ;;  %v656_v40 = vpop.f32.mrf.mxu0  ;;  %v784_v41 = vpop.f32.mrf.mxu1 }
  0xff   : > { %v1467_v42 = vpack.c.bf16 %v860_v33, %v860_v33  ;;  %v865_v44 = vmax.f32 %v665_v36, 0.0  ;;  %v897_v45 = vmax.f32 %v793_v37, 0.0  ;;  %v657_v46 = vadd.f32 %v1791_v35, %v656_v40 }
 0x100   : > { %v1499_v43 = vpack.c.bf16 %v892_v34, %v892_v34  ;;  %1183 = vst.msk [vmem:[%s1802_s27 + $0x3c] sm:$0xf] %vm1167_vm1, %v1469_v38  ;;  %1215 = vst.msk [vmem:[%s1802_s27 + $0xbc] sm:$0xf] %vm1167_vm1, %v1501_v39  ;;  %v785_v47 = vadd.f32 %v1791_v35, %v784_v41  ;;  %v1578_v48 = vpop.f32.mrf.mxu0  ;;  %v1610_v49 = vpop.f32.mrf.mxu1 }
 0x101   : > { %1181 = vst.msk [vmem:[%s1802_s27 + $0x34] sm:$0xf] %vm1167_vm1, %v1467_v42  ;;  %v1472_v50 = vpack.c.bf16 %v865_v44, %v865_v44  ;;  %v1504_v51 = vpack.c.bf16 %v897_v45, %v897_v45  ;;  %v668_v52 = vadd.f32 %v1578_v48, %v1791_v35  ;;  %v796_v53 = vadd.f32 %v1610_v49, %v1791_v35 }
 0x102   : > { %1213 = vst.msk [vmem:[%s1802_s27 + $0xb4] sm:$0xf] %vm1167_vm1, %v1499_v43  ;;  %v863_v54 = vmax.f32 %v657_v46, 0.0  ;;  %v895_v55 = vmax.f32 %v785_v47, 0.0  ;;  %v659_v56 = vpop.f32.mrf.mxu0  ;;  %v787_v57 = vpop.f32.mrf.mxu1 }
 0x103   : > { %1186 = vst.msk [vmem:[%s1802_s27 + $0x48] sm:$0xf] %vm1167_vm1, %v1472_v50  ;;  %1218 = vst.msk [vmem:[%s1802_s27 + $0xc8] sm:$0xf] %vm1167_vm1, %v1504_v51  ;;  %v866_v58 = vmax.f32 %v668_v52, 0.0  ;;  %v898_v59 = vmax.f32 %v796_v53, 0.0  ;;  %v660_v60 = vadd.f32 %v1791_v35, %v659_v56  ;;  %v788_v61 = vadd.f32 %v1791_v35, %v787_v57 }
 0x104   : > { %v1470_v62 = vpack.c.bf16 %v863_v54, %v863_v54  ;;  %v1502_v63 = vpack.c.bf16 %v895_v55, %v895_v55  ;;  %v1581_v0 = vpop.f32.mrf.mxu0  ;;  %v1613_v1 = vpop.f32.mrf.mxu1 }
 0x105   : > { %v1473_v2 = vpack.c.bf16 %v866_v58, %v866_v58  ;;  %v1505_v3 = vpack.c.bf16 %v898_v59, %v898_v59  ;;  %v864_v4 = vmax.f32 %v660_v60, 0.0  ;;  %v896_v5 = vmax.f32 %v788_v61, 0.0 }
 0x106   : > { %1184 = vst.msk [vmem:[%s1802_s27 + $0x40] sm:$0xf] %vm1167_vm1, %v1470_v62  ;;  %1216 = vst.msk [vmem:[%s1802_s27 + $0xc0] sm:$0xf] %vm1167_vm1, %v1502_v63  ;;  %v681_v6 = vadd.f32 %v1581_v0, %v1791_v35  ;;  %v809_v7 = vadd.f32 %v1613_v1, %v1791_v35  ;;  %v672_v8 = vpop.f32.mrf.mxu0  ;;  %v800_v9 = vpop.f32.mrf.mxu1 }
 0x107   : > { %1187 = vst.msk [vmem:[%s1802_s27 + $0x4c] sm:$0xf] %vm1167_vm1, %v1473_v2  ;;  %1219 = vst.msk [vmem:[%s1802_s27 + $0xcc] sm:$0xf] %vm1167_vm1, %v1505_v3  ;;  %v1471_v10 = vpack.c.bf16 %v864_v4, %v864_v4  ;;  %v1503_v11 = vpack.c.bf16 %v896_v5, %v896_v5  ;;  %v673_v12 = vadd.f32 %v1791_v35, %v672_v8 }
 0x108   : > { %v801_v13 = vadd.f32 %v1791_v35, %v800_v9  ;;  %v869_v14 = vmax.f32 %v681_v6, 0.0  ;;  %v901_v15 = vmax.f32 %v809_v7, 0.0  ;;  %v1582_v16 = vpop.f32.mrf.mxu0  ;;  %v1614_v17 = vpop.f32.mrf.mxu1 }
 0x109   : > { %1185 = vst.msk [vmem:[%s1802_s27 + $0x44] sm:$0xf] %vm1167_vm1, %v1471_v10  ;;  %1217 = vst.msk [vmem:[%s1802_s27 + $0xc4] sm:$0xf] %vm1167_vm1, %v1503_v11  ;;  %v867_v18 = vmax.f32 %v673_v12, 0.0  ;;  %v684_v20 = vadd.f32 %v1582_v16, %v1791_v35  ;;  %v812_v21 = vadd.f32 %v1614_v17, %v1791_v35 }
 0x10a   : > { %v899_v19 = vmax.f32 %v801_v13, 0.0  ;;  %v1476_v22 = vpack.c.bf16 %v869_v14, %v869_v14  ;;  %v1508_v23 = vpack.c.bf16 %v901_v15, %v901_v15  ;;  %v675_v24 = vpop.f32.mrf.mxu0  ;;  %v803_v25 = vpop.f32.mrf.mxu1 }
 0x10b   : > { %v1474_v26 = vpack.c.bf16 %v867_v18, %v867_v18  ;;  %v870_v28 = vmax.f32 %v684_v20, 0.0  ;;  %v902_v29 = vmax.f32 %v812_v21, 0.0  ;;  %v676_v30 = vadd.f32 %v1791_v35, %v675_v24 }
 0x10c   : > { %v1506_v27 = vpack.c.bf16 %v899_v19, %v899_v19  ;;  %1190 = vst.msk [vmem:[%s1802_s27 + $0x58] sm:$0xf] %vm1167_vm1, %v1476_v22  ;;  %1222 = vst.msk [vmem:[%s1802_s27 + $0xd8] sm:$0xf] %vm1167_vm1, %v1508_v23  ;;  %v804_v31 = vadd.f32 %v1791_v35, %v803_v25  ;;  %v1585_v32 = vpop.f32.mrf.mxu0  ;;  %v1617_v33 = vpop.f32.mrf.mxu1 }
 0x10d   : > { %1188 = vst.msk [vmem:[%s1802_s27 + $0x50] sm:$0xf] %vm1167_vm1, %v1474_v26  ;;  %v1477_v34 = vpack.c.bf16 %v870_v28, %v870_v28  ;;  %v1509_v36 = vpack.c.bf16 %v902_v29, %v902_v29  ;;  %v697_v37 = vadd.f32 %v1585_v32, %v1791_v35  ;;  %v825_v38 = vadd.f32 %v1617_v33, %v1791_v35 }
 0x10e   : > { %1220 = vst.msk [vmem:[%s1802_s27 + $0xd0] sm:$0xf] %vm1167_vm1, %v1506_v27  ;;  %v868_v39 = vmax.f32 %v676_v30, 0.0  ;;  %v900_v40 = vmax.f32 %v804_v31, 0.0  ;;  %v688_v41 = vpop.f32.mrf.mxu0  ;;  %v816_v42 = vpop.f32.mrf.mxu1 }
 0x10f   : > { %1191 = vst.msk [vmem:[%s1802_s27 + $0x5c] sm:$0xf] %vm1167_vm1, %v1477_v34  ;;  %1223 = vst.msk [vmem:[%s1802_s27 + $0xdc] sm:$0xf] %vm1167_vm1, %v1509_v36  ;;  %v873_v43 = vmax.f32 %v697_v37, 0.0  ;;  %v905_v44 = vmax.f32 %v825_v38, 0.0  ;;  %v689_v45 = vadd.f32 %v1791_v35, %v688_v41  ;;  %v817_v46 = vadd.f32 %v1791_v35, %v816_v42 }
 0x110   : > { %v1475_v47 = vpack.c.bf16 %v868_v39, %v868_v39  ;;  %v1507_v48 = vpack.c.bf16 %v900_v40, %v900_v40  ;;  %v1586_v49 = vpop.f32.mrf.mxu0  ;;  %v1618_v50 = vpop.f32.mrf.mxu1 }
 0x111   : > { %v1480_v51 = vpack.c.bf16 %v873_v43, %v873_v43  ;;  %v1512_v52 = vpack.c.bf16 %v905_v44, %v905_v44  ;;  %v871_v53 = vmax.f32 %v689_v45, 0.0  ;;  %v903_v54 = vmax.f32 %v817_v46, 0.0 }
 0x112   : > { %1189 = vst.msk [vmem:[%s1802_s27 + $0x54] sm:$0xf] %vm1167_vm1, %v1475_v47  ;;  %1221 = vst.msk [vmem:[%s1802_s27 + $0xd4] sm:$0xf] %vm1167_vm1, %v1507_v48  ;;  %v700_v55 = vadd.f32 %v1586_v49, %v1791_v35  ;;  %v828_v56 = vadd.f32 %v1618_v50, %v1791_v35  ;;  %v691_v57 = vpop.f32.mrf.mxu0  ;;  %v819_v58 = vpop.f32.mrf.mxu1 }
 0x113   : > { %1194 = vst.msk [vmem:[%s1802_s27 + $0x68] sm:$0xf] %vm1167_vm1, %v1480_v51  ;;  %1226 = vst.msk [vmem:[%s1802_s27 + $0xe8] sm:$0xf] %vm1167_vm1, %v1512_v52  ;;  %v1478_v59 = vpack.c.bf16 %v871_v53, %v871_v53  ;;  %v1510_v60 = vpack.c.bf16 %v903_v54, %v903_v54  ;;  %v692_v61 = vadd.f32 %v1791_v35, %v691_v57 }
 0x114   : > { %v820_v62 = vadd.f32 %v1791_v35, %v819_v58  ;;  %v874_v63 = vmax.f32 %v700_v55, 0.0  ;;  %v906_v0 = vmax.f32 %v828_v56, 0.0  ;;  %v1589_v1 = vpop.f32.mrf.mxu0  ;;  %v1621_v2 = vpop.f32.mrf.mxu1 }
 0x115   : > { %1192 = vst.msk [vmem:[%s1802_s27 + $0x60] sm:$0xf] %vm1167_vm1, %v1478_v59  ;;  %1224 = vst.msk [vmem:[%s1802_s27 + $0xe0] sm:$0xf] %vm1167_vm1, %v1510_v60  ;;  %v872_v3 = vmax.f32 %v692_v61, 0.0  ;;  %v713_v5 = vadd.f32 %v1589_v1, %v1791_v35  ;;  %v841_v6 = vadd.f32 %v1621_v2, %v1791_v35 }
 0x116   : > { %v904_v4 = vmax.f32 %v820_v62, 0.0  ;;  %v1481_v7 = vpack.c.bf16 %v874_v63, %v874_v63  ;;  %v1513_v8 = vpack.c.bf16 %v906_v0, %v906_v0  ;;  %v704_v9 = vpop.f32.mrf.mxu0  ;;  %v832_v10 = vpop.f32.mrf.mxu1 }
 0x117   : > { %v1479_v11 = vpack.c.bf16 %v872_v3, %v872_v3  ;;  %v877_v13 = vmax.f32 %v713_v5, 0.0  ;;  %v909_v14 = vmax.f32 %v841_v6, 0.0  ;;  %v705_v15 = vadd.f32 %v1791_v35, %v704_v9 }
 0x118   : > { %v1511_v12 = vpack.c.bf16 %v904_v4, %v904_v4  ;;  %1195 = vst.msk [vmem:[%s1802_s27 + $0x6c] sm:$0xf] %vm1167_vm1, %v1481_v7  ;;  %1227 = vst.msk [vmem:[%s1802_s27 + $0xec] sm:$0xf] %vm1167_vm1, %v1513_v8  ;;  %v833_v16 = vadd.f32 %v1791_v35, %v832_v10  ;;  %v1590_v17 = vpop.f32.mrf.mxu0  ;;  %v1622_v18 = vpop.f32.mrf.mxu1 }
 0x119   : > { %1193 = vst.msk [vmem:[%s1802_s27 + $0x64] sm:$0xf] %vm1167_vm1, %v1479_v11  ;;  %v1484_v19 = vpack.c.bf16 %v877_v13, %v877_v13  ;;  %v1516_v20 = vpack.c.bf16 %v909_v14, %v909_v14  ;;  %v716_v21 = vadd.f32 %v1590_v17, %v1791_v35  ;;  %v844_v22 = vadd.f32 %v1622_v18, %v1791_v35 }
 0x11a   : > { %1225 = vst.msk [vmem:[%s1802_s27 + $0xe4] sm:$0xf] %vm1167_vm1, %v1511_v12  ;;  %v875_v23 = vmax.f32 %v705_v15, 0.0  ;;  %v907_v24 = vmax.f32 %v833_v16, 0.0  ;;  %v707_v25 = vpop.f32.mrf.mxu0  ;;  %v835_v26 = vpop.f32.mrf.mxu1 }
 0x11b   : > { %1198 = vst.msk [vmem:[%s1802_s27 + $0x78] sm:$0xf] %vm1167_vm1, %v1484_v19  ;;  %1230 = vst.msk [vmem:[%s1802_s27 + $0xf8] sm:$0xf] %vm1167_vm1, %v1516_v20  ;;  %v878_v27 = vmax.f32 %v716_v21, 0.0  ;;  %v910_v28 = vmax.f32 %v844_v22, 0.0  ;;  %v708_v29 = vadd.f32 %v1791_v35, %v707_v25  ;;  %v836_v30 = vadd.f32 %v1791_v35, %v835_v26 }
 0x11c   : > { %v1482_v31 = vpack.c.bf16 %v875_v23, %v875_v23  ;;  %v1514_v32 = vpack.c.bf16 %v907_v24, %v907_v24 }
 0x11d   : > { %v1485_v33 = vpack.c.bf16 %v878_v27, %v878_v27  ;;  %v1517_v34 = vpack.c.bf16 %v910_v28, %v910_v28  ;;  %v876_v36 = vmax.f32 %v708_v29, 0.0  ;;  %v908_v37 = vmax.f32 %v836_v30, 0.0 }
 0x11e   : > { %1196 = vst.msk [vmem:[%s1802_s27 + $0x70] sm:$0xf] %vm1167_vm1, %v1482_v31  ;;  %1228 = vst.msk [vmem:[%s1802_s27 + $0xf0] sm:$0xf] %vm1167_vm1, %v1514_v32 }
 0x11f   : > { %1199 = vst.msk [vmem:[%s1802_s27 + $0x7c] sm:$0xf] %vm1167_vm1, %v1485_v33  ;;  %1231 = vst.msk [vmem:[%s1802_s27 + $0xfc] sm:$0xf] %vm1167_vm1, %v1517_v34  ;;  %v1483_v38 = vpack.c.bf16 %v876_v36, %v876_v36  ;;  %v1515_v39 = vpack.c.bf16 %v908_v37, %v908_v37 }
 0x121   : > { %1197 = vst.msk [vmem:[%s1802_s27 + $0x74] sm:$0xf] %vm1167_vm1, %v1483_v38  ;;  %1229 = vst.msk [vmem:[%s1802_s27 + $0xf4] sm:$0xf] %vm1167_vm1, %v1515_v39 }
 0x122 PF: > { %s13_s12 = sadd.s32 1, %s1679_s12  }
 0x123   : > { %p10_p4 = scmp.ge.s32.totalorder %s13_s12, 4  }
 0x125   :  { %12 = sbr.rel (!%p10_p4) target bundleno = 1 (0x1), region = 68 }

// kernel: fakenet_forward.18
= control target key start
LH: loop header
LB: loop body
LE: loop exit
PB: predicated region body
PF: predicated region fallthrough
CT: control target
= control target key end

     0   :  { %s990_s12 = smov 0   ;;  %s1082_s0 = inlined_call_operand.vmem [shape: bf16[2,128,256], index: 0, kind: input, shape index: {}]   ;;  %s1083_s1 = inlined_call_operand.vmem [shape: bf16[2,256,128], index: 1, kind: input, shape index: {}]   ;;  %s1084_s2 = inlined_call_operand.vmem [shape: f32[2,1,128], index: 2, kind: input, shape index: {}]   ;;  %s1085_s3 = inlined_call_operand.vmem [shape: bf16[2,128,128], index: 3, kind: output, shape index: {}]  }
   0x1 LB: > { %s706_s13 = sadd.s32 4294967295, %s968_s12   ;;  %p710_p0 = scmp.ge.s32.totalorder %s968_s12, 1  ;;  %s968_s12 = sphi %s990_s12, %s13_s12  }
   0x2   : > { %p155_p1 = scmp.lt.s32.totalorder %s968_s12, 3 }
   0x4   : > { %p156_p2 = pnand %p710_p0, %p155_p1 }
   0x5   : > { %p187_p3 = scmp.lt.s32.totalorder (!%p156_p2), %s706_s13, 1 }
   0x6   : > { %159 = sbr.rel (%p156_p2) target bundleno = 279 (0x117), region = 32 }
   0xb   : > { %s1087_s13 = smov (!%p187_p3, %s706_s13), 1 }
   0xc   : > { %s768_s14 = sshll.u32 %s1087_s13, 7  ;;  %s199_s23 = scalar_lea.vmem %s1084_s2, %s1087_s13 }
   0xd   : > { %s1004_s17 = scalar_lea.vmem %s1083_s1, %s768_s14  ;;  %s1018_s20 = scalar_lea.vmem %s1082_s0, %s768_s14  ;;  %v1047_v36 = vld [vmem:[%s199_s23] ss:$0 sm:$0xff] }
   0xe   : > { %v922_v0 = vld [vmem:[%s1004_s17 + $0x78] sm:$0xff]   ;;  %v924_v2 = vld [vmem:[%s1004_s17 + $0x70] sm:$0xff]   ;;  %v926_v4 = vld [vmem:[%s1004_s17 + $0x68] sm:$0xff]   ;;  %s770_s24 = sshll.u32 %s1087_s13, 6 }
   0xf   : > { %v923_v1 = vld [vmem:[%s1004_s17 + $0x38] sm:$0xff]   ;;  %834 = vmatprep.subr.bf16.mxu0 %v922_v0  ;;  %898 = vmatprep.subr.bf16.mxu1 %v922_v0  ;;  %v925_v3 = vld [vmem:[%s1004_s17 + $0x30] sm:$0xff]   ;;  %v927_v5 = vld [vmem:[%s1004_s17 + $0x28] sm:$0xff]   ;;  %s1057_s27 = scalar_lea.vmem %s1085_s3, %s770_s24 }
  0x10   : > { %835 = vmatpush3.bf16.msra.mxu0 %v923_v1  ;;  %906 = vmatpush3.bf16.msra.mxu1 %v923_v1  ;;  %v928_v6 = vld [vmem:[%s1004_s17 + $0x60] sm:$0xff]   ;;  %v930_v8 = vld [vmem:[%s1004_s17 + $0x58] sm:$0xff]   ;;  %v932_v10 = vld [vmem:[%s1004_s17 + $0x50] sm:$0xff]  }
  0x11   : > { %836 = vmatprep.subr.bf16.mxu0 %v924_v2  ;;  %899 = vmatprep.subr.bf16.mxu1 %v924_v2  ;;  %v929_v7 = vld [vmem:[%s1004_s17 + $0x20] sm:$0xff]   ;;  %v931_v9 = vld [vmem:[%s1004_s17 + $0x18] sm:$0xff]   ;;  %v933_v13 = vld [vmem:[%s1004_s17 + $0x10] sm:$0xff]  }
  0x12   : > { %v940_v11 = vld [vmem:[%s1018_s20 + $0x4] ss:$8 sps:$4 sm:$0xff]   ;;  %v938_v18 = vld [vmem:[%s1018_s20] ss:$8 sps:$4 sm:$0xff]   ;;  %v944_v20 = vld [vmem:[%s1018_s20 + $0x14] ss:$8 sps:$4 sm:$0xff]  }
  0x13   : > { %v943_v12 = vld [vmem:[%s1018_s20 + $0x44] ss:$8 sps:$4 sm:$0xff]   ;;  %469 = vmatprep.mubr.bf16.mxu0 %v940_v11  ;;  %v941_v19 = vld [vmem:[%s1018_s20 + $0x40] ss:$8 sps:$4 sm:$0xff]   ;;  %v946_v21 = vld [vmem:[%s1018_s20 + $0x54] ss:$8 sps:$4 sm:$0xff]  }
  0x14   : > { %837 = vmatpush3.bf16.msra.mxu0 %v925_v3  ;;  %907 = vmatpush3.bf16.msra.mxu1 %v925_v3  ;;  %v934_v14 = vld [vmem:[%s1004_s17 + $0x48] sm:$0xff]   ;;  %v936_v16 = vld [vmem:[%s1004_s17 + $0x40] sm:$0xff]   ;;  %v948_v22 = vld [vmem:[%s1018_s20 + $0x10] ss:$8 sps:$4 sm:$0xff]  }
  0x15   : > { %838 = vmatprep.subr.bf16.mxu0 %v926_v4  ;;  %900 = vmatprep.subr.bf16.mxu1 %v926_v4  ;;  %v935_v15 = vld [vmem:[%s1004_s17 + $0x8] sm:$0xff]   ;;  %v937_v17 = vld [vmem:[%s1004_s17] sm:$0xff]   ;;  %v949_v23 = vld [vmem:[%s1018_s20 + $0x50] ss:$8 sps:$4 sm:$0xff]  }
  0x16   : > { %501 = vmatprep.mubr.bf16.mxu1 %v943_v12  ;;  %v950_v24 = vld [vmem:[%s1018_s20 + $0x24] ss:$8 sps:$4 sm:$0xff]   ;;  %v954_v26 = vld [vmem:[%s1018_s20 + $0x20] ss:$8 sps:$4 sm:$0xff]   ;;  %v956_v28 = vld [vmem:[%s1018_s20 + $0x34] ss:$8 sps:$4 sm:$0xff]  }
  0x17   : > { %v952_v25 = vld [vmem:[%s1018_s20 + $0x64] ss:$8 sps:$4 sm:$0xff]   ;;  %v955_v27 = vld [vmem:[%s1018_s20 + $0x60] ss:$8 sps:$4 sm:$0xff]   ;;  %v958_v29 = vld [vmem:[%s1018_s20 + $0x74] ss:$8 sps:$4 sm:$0xff]  }
  0x18   : > { %839 = vmatpush3.bf16.msra.mxu0 %v927_v5  ;;  %908 = vmatpush3.bf16.msra.mxu1 %v927_v5  ;;  %v960_v30 = vld [vmem:[%s1018_s20 + $0x30] ss:$8 sps:$4 sm:$0xff]  }
  0x19   : > { %840 = vmatprep.subr.bf16.mxu0 %v928_v6  ;;  %901 = vmatprep.subr.bf16.mxu1 %v928_v6  ;;  %v961_v31 = vld [vmem:[%s1018_s20 + $0x70] ss:$8 sps:$4 sm:$0xff]  }
  0x1c   : > { %841 = vmatpush3.bf16.msra.mxu0 %v929_v7  ;;  %909 = vmatpush3.bf16.msra.mxu1 %v929_v7 }
  0x1d   : > { %842 = vmatprep.subr.bf16.mxu0 %v930_v8  ;;  %902 = vmatprep.subr.bf16.mxu1 %v930_v8 }
  0x20   : > { %843 = vmatpush3.bf16.msra.mxu0 %v931_v9  ;;  %910 = vmatpush3.bf16.msra.mxu1 %v931_v9 }
  0x21   : > { %844 = vmatprep.subr.bf16.mxu0 %v932_v10  ;;  %903 = vmatprep.subr.bf16.mxu1 %v932_v10 }
  0x24   : > { %845 = vmatpush3.bf16.msra.mxu0 %v933_v13  ;;  %911 = vmatpush3.bf16.msra.mxu1 %v933_v13 }
  0x25   : > { %846 = vmatprep.subr.bf16.mxu0 %v934_v14  ;;  %904 = vmatprep.subr.bf16.mxu1 %v934_v14 }
  0x28   : > { %847 = vmatpush3.bf16.msra.mxu0 %v935_v15  ;;  %912 = vmatpush3.bf16.msra.mxu1 %v935_v15 }
  0x29   : > { %848 = vmatprep.subr.bf16.mxu0 %v936_v16  ;;  %905 = vmatprep.subr.bf16.mxu1 %v936_v16 }
  0x2c   : > { %849 = vmatpush3.bf16.msra.mxu0 %v937_v17  ;;  %913 = vmatpush3.bf16.msra.mxu1 %v937_v17 }
  0x2f   : > { %470 = vmatmul.mubr.bf16.vlgmr.msra.gmra.mxu0 %v938_v18  ;;  %502 = vmatmul.mubr.bf16.vlgmr.msra.gmra.mxu1 %v941_v19 }
  0x30   : > { %477 = vmatprep.mubr.bf16.mxu0 %v944_v20  ;;  %509 = vmatprep.mubr.bf16.mxu1 %v946_v21 }
  0x37   : > { %478 = vmatmul.mubr.bf16.gmra.mxu0 %v948_v22  ;;  %510 = vmatmul.mubr.bf16.gmra.mxu1 %v949_v23 }
  0x38   : > { %485 = vmatprep.mubr.bf16.mxu0 %v950_v24  ;;  %517 = vmatprep.mubr.bf16.mxu1 %v952_v25 }
  0x3f   : > { %486 = vmatmul.mubr.bf16.gmra.mxu0 %v954_v26  ;;  %518 = vmatmul.mubr.bf16.gmra.mxu1 %v955_v27 }
  0x40   : > { %493 = vmatprep.mubr.bf16.mxu0 %v956_v28  ;;  %525 = vmatprep.mubr.bf16.mxu1 %v958_v29 }
  0x47   : > { %494 = vmatmul.mubr.bf16.gmra.mxu0 %v960_v30  ;;  %526 = vmatmul.mubr.bf16.gmra.mxu1 %v961_v31 }
  0xef   : > { %v850_v32 = vpop.f32.mrf.mxu0  ;;  %v874_v33 = vpop.f32.mrf.mxu1 }
  0xf1   : > { %v851_v34 = vpop.f32.mrf.mxu0  ;;  %v875_v35 = vpop.f32.mrf.mxu1 }
  0xf2   : > { %v852_v37 = vadd.f32 %v851_v34, %v850_v32  ;;  %v876_v38 = vadd.f32 %v875_v35, %v874_v33 }
  0xf3   : > { %v853_v39 = vpop.f32.mrf.mxu0  ;;  %v877_v40 = vpop.f32.mrf.mxu1 }
  0xf4   : > { %v472_v41 = vadd.f32 %v852_v37, %v1047_v36  ;;  %v504_v42 = vadd.f32 %v876_v38, %v1047_v36 }
  0xf5   : > { %v854_v43 = vpop.f32.mrf.mxu0  ;;  %v878_v44 = vpop.f32.mrf.mxu1 }
  0xf6   : > { %v855_v45 = vadd.f32 %v854_v43, %v853_v39  ;;  %v879_v46 = vadd.f32 %v878_v44, %v877_v40  ;;  %v534_v51 = vmax.f32 %v472_v41, 0.0  ;;  %v542_v52 = vmax.f32 %v504_v42, 0.0 }
  0xf7   : > { %v856_v47 = vpop.f32.mrf.mxu0  ;;  %v880_v48 = vpop.f32.mrf.mxu1 }
  0xf8   : > { %v475_v49 = vadd.f32 %v855_v45, %v1047_v36  ;;  %v507_v50 = vadd.f32 %v879_v46, %v1047_v36 }
  0xf9   : > { %v857_v53 = vpop.f32.mrf.mxu0  ;;  %v881_v54 = vpop.f32.mrf.mxu1 }
  0xfa   : > { %v535_v55 = vmax.f32 %v475_v49, 0.0  ;;  %v543_v56 = vmax.f32 %v507_v50, 0.0  ;;  %v858_v57 = vadd.f32 %v857_v53, %v856_v47  ;;  %v882_v58 = vadd.f32 %v881_v54, %v880_v48 }
  0xfb   : > { %v859_v59 = vpop.f32.mrf.mxu0  ;;  %v883_v60 = vpop.f32.mrf.mxu1 }
  0xfc   : > { %v790_v61 = vpack.c.bf16 %v535_v55, %v534_v51  ;;  %v810_v62 = vpack.c.bf16 %v543_v56, %v542_v52  ;;  %v480_v63 = vadd.f32 %v858_v57, %v1047_v36  ;;  %v512_v0 = vadd.f32 %v882_v58, %v1047_v36 }
  0xfd   : > { %v860_v1 = vpop.f32.mrf.mxu0  ;;  %v884_v2 = vpop.f32.mrf.mxu1 }
  0xfe   : > { %791 = vst [vmem:[%s1057_s27] sm:$0xff] %v790_v61   ;;  %830 = vst [vmem:[%s1057_s27 + $0x20] sm:$0xff] %v810_v62   ;;  %v861_v3 = vadd.f32 %v860_v1, %v859_v59  ;;  %v885_v4 = vadd.f32 %v884_v2, %v883_v60  ;;  %v536_v9 = vmax.f32 %v480_v63, 0.0  ;;  %v544_v10 = vmax.f32 %v512_v0, 0.0 }
  0xff   : > { %v862_v5 = vpop.f32.mrf.mxu0  ;;  %v886_v6 = vpop.f32.mrf.mxu1 }
 0x100   : > { %v483_v7 = vadd.f32 %v861_v3, %v1047_v36  ;;  %v515_v8 = vadd.f32 %v885_v4, %v1047_v36 }
 0x101   : > { %v863_v11 = vpop.f32.mrf.mxu0  ;;  %v887_v12 = vpop.f32.mrf.mxu1 }
 0x102   : > { %v537_v13 = vmax.f32 %v483_v7, 0.0  ;;  %v545_v14 = vmax.f32 %v515_v8, 0.0  ;;  %v864_v15 = vadd.f32 %v863_v11, %v862_v5  ;;  %v888_v16 = vadd.f32 %v887_v12, %v886_v6 }
 0x103   : > { %v865_v17 = vpop.f32.mrf.mxu0  ;;  %v889_v18 = vpop.f32.mrf.mxu1 }
 0x104   : > { %v795_v19 = vpack.c.bf16 %v537_v13, %v536_v9  ;;  %v815_v20 = vpack.c.bf16 %v545_v14, %v544_v10  ;;  %v488_v21 = vadd.f32 %v864_v15, %v1047_v36  ;;  %v520_v22 = vadd.f32 %v888_v16, %v1047_v36 }
 0x105   : > { %v866_v23 = vpop.f32.mrf.mxu0  ;;  %v890_v24 = vpop.f32.mrf.mxu1 }
 0x106   : > { %827 = vst [vmem:[%s1057_s27 + $0x8] sm:$0xff] %v795_v19   ;;  %831 = vst [vmem:[%s1057_s27 + $0x28] sm:$0xff] %v815_v20   ;;  %v867_v25 = vadd.f32 %v866_v23, %v865_v17  ;;  %v891_v26 = vadd.f32 %v890_v24, %v889_v18  ;;  %v538_v31 = vmax.f32 %v488_v21, 0.0  ;;  %v546_v32 = vmax.f32 %v520_v22, 0.0 }
 0x107   : > { %v868_v27 = vpop.f32.mrf.mxu0  ;;  %v892_v28 = vpop.f32.mrf.mxu1 }
 0x108   : > { %v491_v29 = vadd.f32 %v867_v25, %v1047_v36  ;;  %v523_v30 = vadd.f32 %v891_v26, %v1047_v36 }
 0x109   : > { %v869_v33 = vpop.f32.mrf.mxu0  ;;  %v893_v34 = vpop.f32.mrf.mxu1 }
 0x10a   : > { %v539_v35 = vmax.f32 %v491_v29, 0.0  ;;  %v547_v37 = vmax.f32 %v523_v30, 0.0  ;;  %v870_v38 = vadd.f32 %v869_v33, %v868_v27  ;;  %v894_v39 = vadd.f32 %v893_v34, %v892_v28 }
 0x10b   : > { %v871_v40 = vpop.f32.mrf.mxu0  ;;  %v895_v41 = vpop.f32.mrf.mxu1 }
 0x10c   : > { %v800_v42 = vpack.c.bf16 %v539_v35, %v538_v31  ;;  %v820_v43 = vpack.c.bf16 %v547_v37, %v546_v32  ;;  %v496_v46 = vadd.f32 %v870_v38, %v1047_v36  ;;  %v528_v47 = vadd.f32 %v894_v39, %v1047_v36 }
 0x10d   : > { %v872_v44 = vpop.f32.mrf.mxu0  ;;  %v896_v45 = vpop.f32.mrf.mxu1 }
 0x10e   : > { %828 = vst [vmem:[%s1057_s27 + $0x10] sm:$0xff] %v800_v42   ;;  %832 = vst [vmem:[%s1057_s27 + $0x30] sm:$0xff] %v820_v43   ;;  %v873_v48 = vadd.f32 %v872_v44, %v871_v40  ;;  %v897_v49 = vadd.f32 %v896_v45, %v895_v41  ;;  %v540_v52 = vmax.f32 %v496_v46, 0.0  ;;  %v548_v53 = vmax.f32 %v528_v47, 0.0 }
 0x110   : > { %v499_v50 = vadd.f32 %v873_v48, %v1047_v36  ;;  %v531_v51 = vadd.f32 %v897_v49, %v1047_v36 }
 0x112   : > { %v541_v54 = vmax.f32 %v499_v50, 0.0  ;;  %v549_v55 = vmax.f32 %v531_v51, 0.0 }
 0x114   : > { %v805_v56 = vpack.c.bf16 %v541_v54, %v540_v52  ;;  %v825_v57 = vpack.c.bf16 %v549_v55, %v548_v53 }
 0x116   : > { %829 = vst [vmem:[%s1057_s27 + $0x18] sm:$0xff] %v805_v56   ;;  %833 = vst [vmem:[%s1057_s27 + $0x38] sm:$0xff] %v825_v57  }
 0x117 PF: > { %s13_s12 = sadd.s32 1, %s968_s12  }
 0x118   : > { %p10_p4 = scmp.ge.s32.totalorder %s13_s12, 4  }
 0x11a   :  { %12 = sbr.rel (!%p10_p4) target bundleno = 1 (0x1), region = 68 }

// kernel: fakenet_forward.19
= control target key start
LH: loop header
LB: loop body
LE: loop exit
PB: predicated region body
PF: predicated region fallthrough
CT: control target
= control target key end

     0   :  { %s1625_s12 = smov 0   ;;  %s1800_s0 = inlined_call_operand.vmem [shape: bf16[2,32,512], index: 0, kind: input, shape index: {}]   ;;  %s1801_s1 = inlined_call_operand.vmem [shape: bf16[2,512,320], index: 1, kind: input, shape index: {}]   ;;  %s1802_s2 = inlined_call_operand.vmem [shape: f32[2,1,320], index: 2, kind: input, shape index: {}]   ;;  %s1803_s3 = inlined_call_operand.vmem [shape: bf16[2,32,320], index: 3, kind: output, shape index: {}]  }
   0x1 LB: > { %s1258_s13 = sadd.s32 4294967295, %s1603_s12   ;;  %p1262_p0 = scmp.ge.s32.totalorder %s1603_s12, 1  ;;  %s1603_s12 = sphi %s1625_s12, %s13_s12  }
   0x2   : > { %p156_p1 = scmp.lt.s32.totalorder %s1603_s12, 3 }
   0x4   : > { %p157_p2 = pnand %p1262_p0, %p156_p1 }
   0x5   : > { %p189_p3 = scmp.lt.s32.totalorder (!%p157_p2), %s1258_s13, 1 }
   0x6   : > { %160 = sbr.rel (%p157_p2) target bundleno = 330 (0x14a), region = 32 }
   0xb   : > { %s1805_s13 = smov (!%p189_p3, %s1258_s13), 1  ;;  %vm1171_vm0 = vcmask 519168  }
   0xc   : > { %s1446_s14 = smul.u32 768, %s1805_s13  ;;  %s1381_s15 = sshll.u32 %s1805_s13, 6 }
   0xd   : > { %s1640_s18 = scalar_lea.vmem %s1800_s0, %s1381_s15  ;;  %s1447_s22 = smul.u32 3, %s1805_s13 }
   0xe   : > { %s1645_s21 = scalar_lea.vmem %s1801_s1, %s1446_s14  ;;  %v1696_v48 = vld [vmem:[%s1640_s18 + $0x4] ss:$16 sps:$4 sm:$0xff]   ;;  %v1700_v50 = vld [vmem:[%s1640_s18 + $0xc] ss:$16 sps:$4 sm:$0xff]   ;;  %s1448_s26 = smul.u32 48, %s1805_s13 }
   0xf   : > { %v1457_v0 = vld [vmem:[%s1645_s21 + $0xac] ss:$12 sps:$4 sm:$0xff]   ;;  %v1461_v2 = vld [vmem:[%s1645_s21 + $0xa8] ss:$12 sps:$4 sm:$0xff]   ;;  %v1467_v6 = vld [vmem:[%s1645_s21 + $0x90] ss:$12 sps:$4 sm:$0xff]   ;;  %946 = vmatprep.mubr.bf16.mxu0 %v1696_v48  ;;  %999 = vmatprep.mubr.bf16.mxu1 %v1700_v50  ;;  %s202_s25 = scalar_lea.vmem %s1802_s2, %s1447_s22 }
  0x10   : > { %v1459_v1 = vld [vmem:[%s1645_s21 + $0x22c] ss:$12 sps:$4 sm:$0xff]   ;;  %914 = vmatprep.subr.bf16.mxu0 %v1457_v0  ;;  %v1462_v3 = vld [vmem:[%s1645_s21 + $0x228] ss:$12 sps:$4 sm:$0xff]   ;;  %v1468_v7 = vld [vmem:[%s1645_s21 + $0x210] ss:$12 sps:$4 sm:$0xff]   ;;  %s1783_s29 = scalar_lea.vmem %s1803_s3, %s1448_s26 }
  0x11   : > { %967 = vmatprep.subr.bf16.mxu1 %v1459_v1  ;;  %v1463_v4 = vld [vmem:[%s1645_s21 + $0x94] ss:$12 sps:$4 sm:$0xff]   ;;  %915 = vmatpush1.bf16.msra.mxu0 %v1461_v2  ;;  %v1469_v8 = vld [vmem:[%s1645_s21 + $0x7c] ss:$12 sps:$4 sm:$0xff]   ;;  %v1473_v10 = vld [vmem:[%s1645_s21 + $0x78] ss:$12 sps:$4 sm:$0xff]  }
  0x12   : > { %968 = vmatpush1.bf16.msra.mxu1 %v1462_v3  ;;  %v1465_v5 = vld [vmem:[%s1645_s21 + $0x214] ss:$12 sps:$4 sm:$0xff]   ;;  %916 = vmatprep.subr.bf16.mxu0 %v1463_v4  ;;  %v1471_v9 = vld [vmem:[%s1645_s21 + $0x1fc] ss:$12 sps:$4 sm:$0xff]   ;;  %v1474_v11 = vld [vmem:[%s1645_s21 + $0x1f8] ss:$12 sps:$4 sm:$0xff]  }
  0x13   : > { %969 = vmatprep.subr.bf16.mxu1 %v1465_v5  ;;  %v1475_v12 = vld [vmem:[%s1645_s21 + $0x64] ss:$12 sps:$4 sm:$0xff]   ;;  %v1479_v14 = vld [vmem:[%s1645_s21 + $0x60] ss:$12 sps:$4 sm:$0xff]   ;;  %v1485_v18 = vld [vmem:[%s1645_s21 + $0x48] ss:$12 sps:$4 sm:$0xff]  }
  0x14   : > { %v1477_v13 = vld [vmem:[%s1645_s21 + $0x1e4] ss:$12 sps:$4 sm:$0xff]   ;;  %v1480_v15 = vld [vmem:[%s1645_s21 + $0x1e0] ss:$12 sps:$4 sm:$0xff]   ;;  %v1486_v19 = vld [vmem:[%s1645_s21 + $0x1c8] ss:$12 sps:$4 sm:$0xff]  }
  0x15   : > { %917 = vmatpush1.bf16.msra.mxu0 %v1467_v6  ;;  %v1481_v16 = vld [vmem:[%s1645_s21 + $0x4c] ss:$12 sps:$4 sm:$0xff]   ;;  %v1487_v20 = vld [vmem:[%s1645_s21 + $0x34] ss:$12 sps:$4 sm:$0xff]   ;;  %v1491_v22 = vld [vmem:[%s1645_s21 + $0x30] ss:$12 sps:$4 sm:$0xff]  }
  0x16   : > { %970 = vmatpush1.bf16.msra.mxu1 %v1468_v7  ;;  %918 = vmatprep.subr.bf16.mxu0 %v1469_v8  ;;  %v1483_v17 = vld [vmem:[%s1645_s21 + $0x1cc] ss:$12 sps:$4 sm:$0xff]   ;;  %v1489_v21 = vld [vmem:[%s1645_s21 + $0x1b4] ss:$12 sps:$4 sm:$0xff]   ;;  %v1492_v23 = vld [vmem:[%s1645_s21 + $0x1b0] ss:$12 sps:$4 sm:$0xff]  }
  0x17   : > { %971 = vmatprep.subr.bf16.mxu1 %v1471_v9  ;;  %v1493_v24 = vld [vmem:[%s1645_s21 + $0x1c] ss:$12 sps:$4 sm:$0xff]   ;;  %v1497_v26 = vld [vmem:[%s1645_s21 + $0x18] ss:$12 sps:$4 sm:$0xff]   ;;  %v1503_v30 = vld [vmem:[%s1645_s21] ss:$12 sps:$4 sm:$0xff]  }
  0x18   : > { %v1495_v25 = vld [vmem:[%s1645_s21 + $0x19c] ss:$12 sps:$4 sm:$0xff]   ;;  %v1498_v27 = vld [vmem:[%s1645_s21 + $0x198] ss:$12 sps:$4 sm:$0xff]   ;;  %v1504_v31 = vld [vmem:[%s1645_s21 + $0x180] ss:$12 sps:$4 sm:$0xff]  }
  0x19   : > { %919 = vmatpush1.bf16.msra.mxu0 %v1473_v10  ;;  %v1499_v28 = vld [vmem:[%s1645_s21 + $0x4] ss:$12 sps:$4 sm:$0xff]   ;;  %v1505_v32 = vld [vmem:[%s1645_s21 + $0x16c] ss:$12 sps:$4 sm:$0xff]   ;;  %v1509_v34 = vld [vmem:[%s1645_s21 + $0x168] ss:$12 sps:$4 sm:$0xff]  }
  0x1a   : > { %972 = vmatpush1.bf16.msra.mxu1 %v1474_v11  ;;  %920 = vmatprep.subr.bf16.mxu0 %v1475_v12  ;;  %v1501_v29 = vld [vmem:[%s1645_s21 + $0x184] ss:$12 sps:$4 sm:$0xff]   ;;  %v1507_v33 = vld [vmem:[%s1645_s21 + $0x2ec] ss:$12 sps:$4 sm:$0xff]   ;;  %v1510_v35 = vld [vmem:[%s1645_s21 + $0x2e8] ss:$12 sps:$4 sm:$0xff]  }
  0x1b   : > { %973 = vmatprep.subr.bf16.mxu1 %v1477_v13  ;;  %v1511_v36 = vld [vmem:[%s1645_s21 + $0x154] ss:$12 sps:$4 sm:$0xff]   ;;  %v1515_v38 = vld [vmem:[%s1645_s21 + $0x150] ss:$12 sps:$4 sm:$0xff]   ;;  %v1521_v42 = vld [vmem:[%s1645_s21 + $0x138] ss:$12 sps:$4 sm:$0xff]  }
  0x1c   : > { %v1513_v37 = vld [vmem:[%s1645_s21 + $0x2d4] ss:$12 sps:$4 sm:$0xff]   ;;  %v1516_v39 = vld [vmem:[%s1645_s21 + $0x2d0] ss:$12 sps:$4 sm:$0xff]   ;;  %v1522_v43 = vld [vmem:[%s1645_s21 + $0x2b8] ss:$12 sps:$4 sm:$0xff]  }
  0x1d   : > { %921 = vmatpush1.bf16.msra.mxu0 %v1479_v14  ;;  %v1517_v40 = vld [vmem:[%s1645_s21 + $0x13c] ss:$12 sps:$4 sm:$0xff]   ;;  %v1523_v44 = vld [vmem:[%s1645_s21 + $0x124] ss:$12 sps:$4 sm:$0xff]   ;;  %v1527_v46 = vld [vmem:[%s1645_s21 + $0x120] ss:$12 sps:$4 sm:$0xff]  }
  0x1e   : > { %974 = vmatpush1.bf16.msra.mxu1 %v1480_v15  ;;  %922 = vmatprep.subr.bf16.mxu0 %v1481_v16  ;;  %v1519_v41 = vld [vmem:[%s1645_s21 + $0x2bc] ss:$12 sps:$4 sm:$0xff]   ;;  %v1525_v45 = vld [vmem:[%s1645_s21 + $0x2a4] ss:$12 sps:$4 sm:$0xff]   ;;  %v1528_v47 = vld [vmem:[%s1645_s21 + $0x2a0] ss:$12 sps:$4 sm:$0xff]  }
  0x1f   : > { %975 = vmatprep.subr.bf16.mxu1 %v1483_v17  ;;  %v1529_v49 = vld [vmem:[%s1645_s21 + $0x10c] ss:$12 sps:$4 sm:$0xff]   ;;  %v1533_v52 = vld [vmem:[%s1645_s21 + $0x108] ss:$12 sps:$4 sm:$0xff]   ;;  %v1539_v56 = vld [vmem:[%s1645_s21 + $0xf0] ss:$12 sps:$4 sm:$0xff]  }
  0x20   : > { %v1531_v51 = vld [vmem:[%s1645_s21 + $0x28c] ss:$12 sps:$4 sm:$0xff]   ;;  %v1534_v53 = vld [vmem:[%s1645_s21 + $0x288] ss:$12 sps:$4 sm:$0xff]   ;;  %v1540_v57 = vld [vmem:[%s1645_s21 + $0x270] ss:$12 sps:$4 sm:$0xff]  }
  0x21   : > { %923 = vmatpush1.bf16.msra.mxu0 %v1485_v18  ;;  %v1535_v54 = vld [vmem:[%s1645_s21 + $0xf4] ss:$12 sps:$4 sm:$0xff]   ;;  %v1541_v58 = vld [vmem:[%s1645_s21 + $0xdc] ss:$12 sps:$4 sm:$0xff]   ;;  %v1545_v60 = vld [vmem:[%s1645_s21 + $0xd8] ss:$12 sps:$4 sm:$0xff]  }
  0x22   : > { %976 = vmatpush1.bf16.msra.mxu1 %v1486_v19  ;;  %924 = vmatprep.subr.bf16.mxu0 %v1487_v20  ;;  %v1537_v55 = vld [vmem:[%s1645_s21 + $0x274] ss:$12 sps:$4 sm:$0xff]   ;;  %v1543_v59 = vld [vmem:[%s1645_s21 + $0x25c] ss:$12 sps:$4 sm:$0xff]   ;;  %v1546_v61 = vld [vmem:[%s1645_s21 + $0x258] ss:$12 sps:$4 sm:$0xff]  }
  0x23   : > { %977 = vmatprep.subr.bf16.mxu1 %v1489_v21  ;;  %v1547_v62 = vld [vmem:[%s1645_s21 + $0xc4] ss:$12 sps:$4 sm:$0xff]   ;;  %v1551_v0 = vld [vmem:[%s1645_s21 + $0xc0] ss:$12 sps:$4 sm:$0xff]   ;;  %v1725_v5 = vld [vmem:[%s1640_s18 + $0x8] ss:$16 sps:$4 sm:$0xff]  }
  0x24   : > { %v1549_v63 = vld [vmem:[%s1645_s21 + $0x244] ss:$12 sps:$4 sm:$0xff]   ;;  %v1552_v1 = vld [vmem:[%s1645_s21 + $0x240] ss:$12 sps:$4 sm:$0xff]   ;;  %v1584_v19 = vld [vmem:[%s1640_s18 + $0x28] ss:$16 sps:$4 sm:$0xff]  }
  0x25   : > { %925 = vmatpush1.bf16.msra.mxu0 %v1491_v22  ;;  %v1559_v2 = vld [vmem:[%s1645_s21 + $0x170] ss:$12 sps:$4 sm:$0xff]   ;;  %v1563_v8 = vld [vmem:[%s1645_s21 + $0x158] ss:$12 sps:$4 sm:$0xff]   ;;  %v1567_v14 = vld [vmem:[%s1645_s21 + $0x140] ss:$12 sps:$4 sm:$0xff]  }
  0x26   : > { %978 = vmatpush1.bf16.msra.mxu1 %v1492_v23  ;;  %926 = vmatprep.subr.bf16.mxu0 %v1493_v24  ;;  %v1721_v3 = vld [vmem:[%s1640_s18] ss:$16 sps:$4 sm:$0xff]   ;;  %v1564_v9 = vld [vmem:[%s1645_s21 + $0x2d8] ss:$12 sps:$4 sm:$0xff]   ;;  %v1736_v12 = vld [vmem:[%s1640_s18 + $0x2c] ss:$16 sps:$4 sm:$0xff]  }
  0x27   : > { %979 = vmatprep.subr.bf16.mxu1 %v1495_v25  ;;  %v1560_v4 = vld [vmem:[%s1645_s21 + $0x2f0] ss:$12 sps:$4 sm:$0xff]   ;;  %v1565_v10 = vld [vmem:[%s1645_s21 + $0x98] ss:$12 sps:$4 sm:$0xff]   ;;  %v1568_v15 = vld [vmem:[%s1645_s21 + $0x2c0] ss:$12 sps:$4 sm:$0xff]  }
  0x28   : > { %v1561_v6 = vld [vmem:[%s1645_s21 + $0xb0] ss:$12 sps:$4 sm:$0xff]   ;;  %v1733_v11 = vld [vmem:[%s1640_s18 + $0x24] ss:$16 sps:$4 sm:$0xff]   ;;  %v1569_v16 = vld [vmem:[%s1645_s21 + $0x80] ss:$12 sps:$4 sm:$0xff]  }
  0x29   : > { %927 = vmatpush1.bf16.msra.mxu0 %v1497_v26  ;;  %v1562_v7 = vld [vmem:[%s1645_s21 + $0x230] ss:$12 sps:$4 sm:$0xff]   ;;  %v1566_v13 = vld [vmem:[%s1645_s21 + $0x218] ss:$12 sps:$4 sm:$0xff]   ;;  %v1570_v17 = vld [vmem:[%s1645_s21 + $0x200] ss:$12 sps:$4 sm:$0xff]  }
  0x2a   : > { %980 = vmatpush1.bf16.msra.mxu1 %v1498_v27  ;;  %928 = vmatprep.subr.bf16.mxu0 %v1499_v28  ;;  %v1581_v18 = vld [vmem:[%s1640_s18 + $0x20] ss:$16 sps:$4 sm:$0xff]   ;;  %v1571_v20 = vld [vmem:[%s1645_s21 + $0x128] ss:$12 sps:$4 sm:$0xff]   ;;  %v1585_v28 = vld [vmem:[%s1645_s21 + $0xf8] ss:$12 sps:$4 sm:$0xff]  }
  0x2b   : > { %981 = vmatprep.subr.bf16.mxu1 %v1501_v29  ;;  %v1572_v21 = vld [vmem:[%s1645_s21 + $0x2a8] ss:$12 sps:$4 sm:$0xff]   ;;  %v1575_v24 = vld [vmem:[%s1645_s21 + $0x110] ss:$12 sps:$4 sm:$0xff]   ;;  %v1586_v29 = vld [vmem:[%s1645_s21 + $0x278] ss:$12 sps:$4 sm:$0xff]  }
  0x2c   : > { %v1573_v22 = vld [vmem:[%s1645_s21 + $0x68] ss:$12 sps:$4 sm:$0xff]   ;;  %v1576_v25 = vld [vmem:[%s1645_s21 + $0x290] ss:$12 sps:$4 sm:$0xff]  }
  0x2d   : > { %929 = vmatpush1.bf16.msra.mxu0 %v1503_v30  ;;  %v1574_v23 = vld [vmem:[%s1645_s21 + $0x1e8] ss:$12 sps:$4 sm:$0xff]   ;;  %v1579_v26 = vld [vmem:[%s1645_s21 + $0x50] ss:$12 sps:$4 sm:$0xff]   ;;  %v1587_v30 = vld [vmem:[%s1645_s21 + $0x38] ss:$12 sps:$4 sm:$0xff]  }
  0x2e   : > { %982 = vmatpush1.bf16.msra.mxu1 %v1504_v31  ;;  %930 = vmatprep.subr.bf16.mxu0 %v1505_v32  ;;  %v1580_v27 = vld [vmem:[%s1645_s21 + $0x1d0] ss:$12 sps:$4 sm:$0xff]   ;;  %v1588_v31 = vld [vmem:[%s1645_s21 + $0x1b8] ss:$12 sps:$4 sm:$0xff]   ;;  %v1589_v32 = vld [vmem:[%s1645_s21 + $0xe0] ss:$12 sps:$4 sm:$0xff]  }
  0x2f   : > { %983 = vmatprep.subr.bf16.mxu1 %v1507_v33  ;;  %v1590_v33 = vld [vmem:[%s1645_s21 + $0x260] ss:$12 sps:$4 sm:$0xff]  }
  0x31   : > { %931 = vmatpush2.bf16.msra.mxu0 %v1509_v34  ;;  %v1591_v34 = vld [vmem:[%s1645_s21 + $0x20] ss:$12 sps:$4 sm:$0xff]  }
  0x32   : > { %984 = vmatpush2.bf16.msra.mxu1 %v1510_v35  ;;  %932 = vmatprep.subr.bf16.mxu0 %v1511_v36  ;;  %v1592_v35 = vld [vmem:[%s1645_s21 + $0x1a0] ss:$12 sps:$4 sm:$0xff]   ;;  %v1593_v36 = vld [vmem:[%s1645_s21 + $0xc8] ss:$12 sps:$4 sm:$0xff]  }
  0x33   : > { %985 = vmatprep.subr.bf16.mxu1 %v1513_v37  ;;  %v1594_v37 = vld [vmem:[%s1645_s21 + $0x248] ss:$12 sps:$4 sm:$0xff]  }
  0x35   : > { %933 = vmatpush2.bf16.msra.mxu0 %v1515_v38  ;;  %v1595_v38 = vld [vmem:[%s1645_s21 + $0x8] ss:$12 sps:$4 sm:$0xff]  }
  0x36   : > { %986 = vmatpush2.bf16.msra.mxu1 %v1516_v39  ;;  %934 = vmatprep.subr.bf16.mxu0 %v1517_v40  ;;  %v1596_v39 = vld [vmem:[%s1645_s21 + $0x188] ss:$12 sps:$4 sm:$0xff]   ;;  %v347_v40 = vlaneseq }
  0x37   : > { %987 = vmatprep.subr.bf16.mxu1 %v1519_v41 }
  0x38   : > { %v348_v41 = vshrl.u32 %v347_v40, 7 }
  0x39   : > { %935 = vmatpush2.bf16.msra.mxu0 %v1521_v42 }
  0x3a   : > { %988 = vmatpush2.bf16.msra.mxu1 %v1522_v43  ;;  %936 = vmatprep.subr.bf16.mxu0 %v1523_v44  ;;  %v349_v42 = vsub.s32 0, %v348_v41  ;;  %v345_v43 = vld [vmem:[%s202_s25] sm:$0x7]  ;;  %v353_v44 = vsub.s32 1, %v348_v41 }
  0x3b   : > { %989 = vmatprep.subr.bf16.mxu1 %v1525_v45 }
  0x3c   : > { %v350_v45 = vrot.slane %v345_v43, %v349_v42 }
  0x3d   : > { %937 = vmatpush2.bf16.msra.mxu0 %v1527_v46  ;;  %v354_v46 = vrot.slane %v345_v43, %v353_v44 }
  0x3e   : > { %990 = vmatpush2.bf16.msra.mxu1 %v1528_v47  ;;  %938 = vmatprep.subr.bf16.mxu0 %v1529_v49 }
  0x3f   : > { %991 = vmatprep.subr.bf16.mxu1 %v1531_v51 }
  0x41   : > { %939 = vmatpush2.bf16.msra.mxu0 %v1533_v52 }
  0x42   : > { %992 = vmatpush2.bf16.msra.mxu1 %v1534_v53  ;;  %940 = vmatprep.subr.bf16.mxu0 %v1535_v54 }
  0x43   : > { %993 = vmatprep.subr.bf16.mxu1 %v1537_v55 }
  0x45   : > { %941 = vmatpush2.bf16.msra.mxu0 %v1539_v56 }
  0x46   : > { %994 = vmatpush2.bf16.msra.mxu1 %v1540_v57  ;;  %942 = vmatprep.subr.bf16.mxu0 %v1541_v58 }
  0x47   : > { %995 = vmatprep.subr.bf16.mxu1 %v1543_v59 }
  0x49   : > { %943 = vmatpush2.bf16.msra.mxu0 %v1545_v60 }
  0x4a   : > { %996 = vmatpush2.bf16.msra.mxu1 %v1546_v61  ;;  %944 = vmatprep.subr.bf16.mxu0 %v1547_v62 }
  0x4b   : > { %997 = vmatprep.subr.bf16.mxu1 %v1549_v63 }
  0x4d   : > { %945 = vmatpush2.bf16.msra.mxu0 %v1551_v0 }
  0x4e   : > { %998 = vmatpush2.bf16.msra.mxu1 %v1552_v1  ;;  %1390 = vmatprep.subr.bf16.mxu0 %v1559_v2 }
  0x4f   : > { %1418 = vmatprep.subr.bf16.mxu1 %v1560_v4 }
  0x50   : > { %947 = vmatmul.mubr.bf16.vlgmr.msra.gmra.mxu0 %v1721_v3 }
  0x51   : > { %1000 = vmatmul.mubr.bf16.vlgmr.msra.gmra.mxu1 %v1725_v5  ;;  %1391 = vmatpush3.bf16.msra.mxu0 %v1561_v6 }
  0x52   : > { %1419 = vmatpush3.bf16.msra.mxu1 %v1562_v7  ;;  %1392 = vmatprep.subr.bf16.mxu0 %v1563_v8 }
  0x53   : > { %1420 = vmatprep.subr.bf16.mxu1 %v1564_v9  ;;  %956 = vmatprep.mubr.bf16.mxu0 %v1733_v11 }
  0x54   : > { %1009 = vmatprep.mubr.bf16.mxu1 %v1736_v12 }
  0x55   : > { %1393 = vmatpush3.bf16.msra.mxu0 %v1565_v10 }
  0x56   : > { %1421 = vmatpush3.bf16.msra.mxu1 %v1566_v13  ;;  %1394 = vmatprep.subr.bf16.mxu0 %v1567_v14 }
  0x57   : > { %1422 = vmatprep.subr.bf16.mxu1 %v1568_v15 }
  0x58   : > { %957 = vmatmul.mubr.bf16.gmra.mxu0 %v1581_v18 }
  0x59   : > { %1010 = vmatmul.mubr.bf16.gmra.mxu1 %v1584_v19  ;;  %1395 = vmatpush3.bf16.msra.mxu0 %v1569_v16 }
  0x5a   : > { %1423 = vmatpush3.bf16.msra.mxu1 %v1570_v17  ;;  %1396 = vmatprep.subr.bf16.mxu0 %v1571_v20 }
  0x5b   : > { %1424 = vmatprep.subr.bf16.mxu1 %v1572_v21  ;;  %1052 = vmatprep.mubr.bf16.mxu0 %v1696_v48 }
  0x5c   : > { %1101 = vmatprep.mubr.bf16.mxu1 %v1700_v50 }
  0x5d   : > { %1397 = vmatpush3.bf16.msra.mxu0 %v1573_v22 }
  0x5e   : > { %1425 = vmatpush3.bf16.msra.mxu1 %v1574_v23  ;;  %1398 = vmatprep.subr.bf16.mxu0 %v1575_v24 }
  0x5f   : > { %1426 = vmatprep.subr.bf16.mxu1 %v1576_v25 }
  0x61   : > { %1399 = vmatpush3.bf16.msra.mxu0 %v1579_v26 }
  0x62   : > { %1427 = vmatpush3.bf16.msra.mxu1 %v1580_v27  ;;  %1400 = vmatprep.subr.bf16.mxu0 %v1585_v28  ;;  %v357_v27 = vsub.s32 2, %v348_v41 }
  0x63   : > { %1428 = vmatprep.subr.bf16.mxu1 %v1586_v29 }
  0x65   : > { %1401 = vmatpush3.bf16.msra.mxu0 %v1587_v30  ;;  %v358_v30 = vrot.slane %v345_v43, %v357_v27 }
  0x66   : > { %1429 = vmatpush3.bf16.msra.mxu1 %v1588_v31  ;;  %1402 = vmatprep.subr.bf16.mxu0 %v1589_v32 }
  0x67   : > { %1430 = vmatprep.subr.bf16.mxu1 %v1590_v33 }
  0x69   : > { %1403 = vmatpush3.bf16.msra.mxu0 %v1591_v34 }
  0x6a   : > { %1431 = vmatpush3.bf16.msra.mxu1 %v1592_v35  ;;  %1404 = vmatprep.subr.bf16.mxu0 %v1593_v36 }
  0x6b   : > { %1432 = vmatprep.subr.bf16.mxu1 %v1594_v37 }
  0x6d   : > { %1405 = vmatpush3.bf16.msra.mxu0 %v1595_v38 }
  0x6e   : > { %1433 = vmatpush3.bf16.msra.mxu1 %v1596_v39 }
  0x70   : > { %1053 = vmatmul.mubr.bf16.vlgmr.msra.gmra.mxu0 %v1721_v3 }
  0x71   : > { %1102 = vmatmul.mubr.bf16.vlgmr.msra.gmra.mxu1 %v1725_v5  ;;  %1060 = vmatprep.mubr.bf16.mxu0 %v1733_v11 }
  0x72   : > { %1109 = vmatprep.mubr.bf16.mxu1 %v1736_v12 }
  0x78   : > { %1061 = vmatmul.mubr.bf16.gmra.mxu0 %v1581_v18 }
  0x79   : > { %1110 = vmatmul.mubr.bf16.gmra.mxu1 %v1584_v19 }
 0x110   : > { %v948_v47 = vpop.f32.mrf.mxu0 }
 0x111   : > { %v1001_v48 = vpop.f32.mrf.mxu1  ;;  %v949_v49 = vadd.f32 %v948_v47, %v350_v45 }
 0x112   : > { %v950_v50 = vpop.f32.mrf.mxu0 }
 0x113   : > { %v1003_v51 = vpop.f32.mrf.mxu1  ;;  %v1002_v52 = vadd.f32 %v1001_v48, %v949_v49  ;;  %v951_v53 = vadd.f32 %v950_v50, %v354_v46 }
 0x114   : > { %v952_v54 = vpop.f32.mrf.mxu0 }
 0x115   : > { %v1005_v55 = vpop.f32.mrf.mxu1  ;;  %v1118_v56 = vmax.f32 %v1002_v52, 0.0  ;;  %v1004_v57 = vadd.f32 %v1003_v51, %v951_v53  ;;  %v953_v58 = vadd.f32 %v952_v54, %v350_v45 }
 0x116   : > { %v954_v59 = vpop.f32.mrf.mxu0 }
 0x117   : > { %v1007_v60 = vpop.f32.mrf.mxu1  ;;  %v1119_v61 = vmax.f32 %v1004_v57, 0.0  ;;  %v1006_v62 = vadd.f32 %v1005_v55, %v953_v58  ;;  %v955_v63 = vadd.f32 %v954_v59, %v354_v46 }
 0x118   : > { %v958_v0 = vpop.f32.mrf.mxu0 }
 0x119   : > { %v1011_v1 = vpop.f32.mrf.mxu1  ;;  %v1382_v2 = vpack.c.bf16 %v1119_v61, %v1118_v56  ;;  %v1008_v3 = vadd.f32 %v1007_v60, %v955_v63  ;;  %v959_v4 = vadd.f32 %v958_v0, %v350_v45  ;;  %v1121_v7 = vmax.f32 %v1006_v62, 0.0 }
 0x11a   : > { %v960_v5 = vpop.f32.mrf.mxu0 }
 0x11b   : > { %v1013_v6 = vpop.f32.mrf.mxu1  ;;  %1170 = vst [vmem:[%s1783_s29] sm:$0xff] %v1382_v2  ;;  %v1122_v8 = vmax.f32 %v1008_v3, 0.0  ;;  %v961_v9 = vadd.f32 %v960_v5, %v354_v46  ;;  %v1012_v10 = vadd.f32 %v1011_v1, %v959_v4 }
 0x11c   : > { %v962_v11 = vpop.f32.mrf.mxu0 }
 0x11d   : > { %v1015_v12 = vpop.f32.mrf.mxu1  ;;  %v1384_v13 = vpack.c.bf16 %v1122_v8, %v1121_v7  ;;  %v1124_v14 = vmax.f32 %v1012_v10, 0.0  ;;  %v963_v15 = vadd.f32 %v962_v11, %v350_v45  ;;  %v1014_v16 = vadd.f32 %v1013_v6, %v961_v9 }
 0x11e   : > { %v964_v17 = vpop.f32.mrf.mxu0 }
 0x11f   : > { %v1017_v18 = vpop.f32.mrf.mxu1  ;;  %1173 = vst [vmem:[%s1783_s29 + $0xc] sm:$0xff] %v1384_v13  ;;  %v1125_v19 = vmax.f32 %v1014_v16, 0.0  ;;  %v965_v20 = vadd.f32 %v964_v17, %v354_v46  ;;  %v1016_v21 = vadd.f32 %v1015_v12, %v963_v15 }
 0x121   : > { %v1386_v22 = vpack.c.bf16 %v1125_v19, %v1124_v14  ;;  %v1127_v23 = vmax.f32 %v1016_v21, 0.0  ;;  %v1018_v24 = vadd.f32 %v1017_v18, %v965_v20 }
 0x123   : > { %1175 = vst [vmem:[%s1783_s29 + $0x18] sm:$0xff] %v1386_v22  ;;  %v1128_v25 = vmax.f32 %v1018_v24, 0.0 }
 0x125   : > { %v1388_v26 = vpack.c.bf16 %v1128_v25, %v1127_v23 }
 0x127   : > { %1177 = vst [vmem:[%s1783_s29 + $0x24] sm:$0xff] %v1388_v26 }
 0x130   : > { %v1406_v28 = vpop.f32.mrf.mxu0 }
 0x131   : > { %v1434_v29 = vpop.f32.mrf.mxu1 }
 0x132   : > { %v1407_v31 = vpop.f32.mrf.mxu0 }
 0x133   : > { %v1435_v32 = vpop.f32.mrf.mxu1  ;;  %v1408_v33 = vadd.f32 %v1407_v31, %v1406_v28 }
 0x134   : > { %v1409_v34 = vpop.f32.mrf.mxu0  ;;  %v1436_v37 = vadd.f32 %v1435_v32, %v1434_v29 }
 0x135   : > { %v1437_v35 = vpop.f32.mrf.mxu1  ;;  %v1055_v36 = vadd.f32 %v1408_v33, %v358_v30 }
 0x136   : > { %v1410_v38 = vpop.f32.mrf.mxu0 }
 0x137   : > { %v1438_v39 = vpop.f32.mrf.mxu1  ;;  %v1104_v40 = vadd.f32 %v1436_v37, %v1055_v36  ;;  %v1411_v42 = vadd.f32 %v1410_v38, %v1409_v34 }
 0x138   : > { %v1412_v44 = vpop.f32.mrf.mxu0  ;;  %v1439_v41 = vadd.f32 %v1438_v39, %v1437_v35 }
 0x139   : > { %v1440_v45 = vpop.f32.mrf.mxu1  ;;  %v1120_v46 = vmax.f32 %v1104_v40, 0.0  ;;  %v1058_v47 = vadd.f32 %v1411_v42, %v358_v30 }
 0x13a   : > { %v1413_v48 = vpop.f32.mrf.mxu0 }
 0x13b   : > { %v1441_v43 = vpop.f32.mrf.mxu1  ;;  %v1383_v49 = vpack.c.bf16 %v1120_v46, %v1120_v46  ;;  %v1107_v50 = vadd.f32 %v1439_v41, %v1058_v47  ;;  %v1414_v51 = vadd.f32 %v1413_v48, %v1412_v44 }
 0x13c   : > { %v1415_v52 = vpop.f32.mrf.mxu0  ;;  %v1442_v56 = vadd.f32 %v1441_v43, %v1440_v45 }
 0x13d   : > { %v1443_v53 = vpop.f32.mrf.mxu1  ;;  %1172 = vst.msk [vmem:[%s1783_s29 + $0x8] sm:$0xf] %vm1171_vm0, %v1383_v49  ;;  %v1123_v54 = vmax.f32 %v1107_v50, 0.0  ;;  %v1063_v55 = vadd.f32 %v1414_v51, %v358_v30 }
 0x13e   : > { %v1416_v57 = vpop.f32.mrf.mxu0 }
 0x13f   : > { %v1444_v58 = vpop.f32.mrf.mxu1  ;;  %v1385_v59 = vpack.c.bf16 %v1123_v54, %v1123_v54  ;;  %v1112_v60 = vadd.f32 %v1442_v56, %v1063_v55  ;;  %v1417_v61 = vadd.f32 %v1416_v57, %v1415_v52 }
 0x140   : > { %v1445_v0 = vadd.f32 %v1444_v58, %v1443_v53 }
 0x141   : > { %1174 = vst.msk [vmem:[%s1783_s29 + $0x14] sm:$0xf] %vm1171_vm0, %v1385_v59  ;;  %v1126_v62 = vmax.f32 %v1112_v60, 0.0  ;;  %v1066_v63 = vadd.f32 %v1417_v61, %v358_v30 }
 0x143   : > { %v1387_v1 = vpack.c.bf16 %v1126_v62, %v1126_v62  ;;  %v1115_v2 = vadd.f32 %v1445_v0, %v1066_v63 }
 0x145   : > { %1176 = vst.msk [vmem:[%s1783_s29 + $0x20] sm:$0xf] %vm1171_vm0, %v1387_v1  ;;  %v1129_v3 = vmax.f32 %v1115_v2, 0.0 }
 0x147   : > { %v1389_v4 = vpack.c.bf16 %v1129_v3, %v1129_v3 }
 0x149   : > { %1178 = vst.msk [vmem:[%s1783_s29 + $0x2c] sm:$0xf] %vm1171_vm0, %v1389_v4 }
 0x14a PF: > { %s13_s12 = sadd.s32 1, %s1603_s12  }
 0x14b   : > { %p10_p4 = scmp.ge.s32.totalorder %s13_s12, 4  }
 0x14d   :  { %12 = sbr.rel (!%p10_p4) target bundleno = 1 (0x1), region = 68 }

// kernel: squeeze.15
= control target key start
LH: loop header
LB: loop body
LE: loop exit
PB: predicated region body
PF: predicated region fallthrough
CT: control target
= control target key end

     0   :  { %s462_s0 = inlined_call_operand.vmem [shape: bf16[1,2,2,2,512], index: 0, kind: input, shape index: {}]   ;;  %s463_s1 = inlined_call_operand.vmem [shape: bf16[8,512], index: 1, kind: output, shape index: {}]  }
   0x1   :  { %v369_v0 = vld [vmem:[%s462_s0 + $0xf] sm:$0x1]  ;;  %v370_v1 = vld [vmem:[%s462_s0 + $0xe] sm:$0x1]  ;;  %v371_v2 = vld [vmem:[%s462_s0 + $0xd] sm:$0x1] }
   0x2   :  { %v18_v3 = vunpack.c.l.bf16 %v369_v0  ;;  %v34_v4 = vunpack.c.l.bf16 %v370_v1  ;;  %v50_v5 = vunpack.c.l.bf16 %v371_v2  ;;  %v372_v6 = vld [vmem:[%s462_s0 + $0xc] sm:$0x1]  ;;  %v373_v7 = vld [vmem:[%s462_s0 + $0xb] sm:$0x1]  ;;  %v374_v8 = vld [vmem:[%s462_s0 + $0xa] sm:$0x1] }
   0x3   :  { %v66_v9 = vunpack.c.l.bf16 %v372_v6  ;;  %v82_v10 = vunpack.c.l.bf16 %v373_v7  ;;  %v98_v11 = vunpack.c.l.bf16 %v374_v8  ;;  %v375_v12 = vld [vmem:[%s462_s0 + $0x9] sm:$0x1]  ;;  %v376_v13 = vld [vmem:[%s462_s0 + $0x8] sm:$0x1]  ;;  %v377_v14 = vld [vmem:[%s462_s0 + $0x7] sm:$0x1] }
   0x4   :  { %21 = vst [vmem:[#allocation1 + $0x48] sm:$0x3] %v18_v3  ;;  %37 = vst [vmem:[#allocation1 + $0x78] sm:$0x3] %v34_v4  ;;  %v114_v15 = vunpack.c.l.bf16 %v375_v12  ;;  %v130_v16 = vunpack.c.l.bf16 %v376_v13  ;;  %v146_v17 = vunpack.c.l.bf16 %v377_v14  ;;  %v378_v18 = vld [vmem:[%s462_s0 + $0x6] sm:$0x1] }
   0x5   :  { %53 = vst [vmem:[#allocation1 + $0x20] sm:$0x3] %v50_v5  ;;  %v379_v19 = vld [vmem:[%s462_s0 + $0x5] sm:$0x1]  ;;  %v380_v20 = vld [vmem:[%s462_s0 + $0x4] sm:$0x1]  ;;  %v162_v21 = vunpack.c.l.bf16 %v378_v18 }
   0x6   :  { %69 = vst [vmem:[#allocation1 + $0x60] sm:$0x3] %v66_v9  ;;  %85 = vst [vmem:[#allocation1 + $0x28] sm:$0x3] %v82_v10  ;;  %v178_v22 = vunpack.c.l.bf16 %v379_v19  ;;  %v194_v23 = vunpack.c.l.bf16 %v380_v20  ;;  %v381_v24 = vld [vmem:[%s462_s0 + $0x3] sm:$0x1] }
   0x7   :  { %101 = vst [vmem:[#allocation1 + $0x10] sm:$0x3] %v98_v11  ;;  %v382_v25 = vld [vmem:[%s462_s0 + $0x2] sm:$0x1]  ;;  %v383_v26 = vld [vmem:[%s462_s0 + $0x1] sm:$0x1]  ;;  %v210_v27 = vunpack.c.l.bf16 %v381_v24 }
   0x8   :  { %117 = vst [vmem:[#allocation1 + $0x70] sm:$0x3] %v114_v15  ;;  %133 = vst [vmem:[#allocation1 + $0x30] sm:$0x3] %v130_v16  ;;  %v226_v28 = vunpack.c.l.bf16 %v382_v25  ;;  %v241_v29 = vunpack.c.l.bf16 %v383_v26  ;;  %v254_v30 = vld [vmem:[%s462_s0] sm:$0x1] }
   0x9   :  { %149 = vst [vmem:[#allocation1 + $0x38] sm:$0x3] %v146_v17  ;;  %165 = vst [vmem:[#allocation1 + $0x58] sm:$0x3] %v162_v21  ;;  %v255_v31 = vunpack.c.l.bf16 %v254_v30 }
   0xa   :  { %181 = vst [vmem:[#allocation1 + $0x68] sm:$0x3] %v178_v22  ;;  %197 = vst [vmem:[#allocation1 + $0x40] sm:$0x3] %v194_v23 }
   0xb   :  { %213 = vst [vmem:[#allocation1 + $0x18] sm:$0x3] %v210_v27  ;;  %229 = vst [vmem:[#allocation1 + $0x8] sm:$0x3] %v226_v28  ;;  %v313_v33 = vld [vmem:[#allocation1 + $0x78] sm:$0x3]  }
   0xc   :  { %244 = vst [vmem:[#allocation1] sm:$0x3] %v241_v29  ;;  %257 = vst [vmem:[#allocation1 + $0x50] sm:$0x3] %v255_v31  ;;  %v309_v32 = vld [vmem:[#allocation1 + $0x20] sm:$0x3]  }
   0xd   :  { %v317_v34 = vld [vmem:[#allocation1 + $0x48] sm:$0x3]   ;;  %v305_v37 = vld [vmem:[#allocation1 + $0x60] sm:$0x3]   ;;  %311 = vst [vmem:[#allocation0 + $0xe] sm:$0x3] %v309_v32  }
   0xe   :  { %v297_v35 = vld [vmem:[#allocation1 + $0x10] sm:$0x3]   ;;  %v301_v36 = vld [vmem:[#allocation1 + $0x28] sm:$0x3]   ;;  %315 = vst [vmem:[#allocation0 + $0x16] sm:$0x3] %v313_v33  }
   0xf   :  { %319 = vst [vmem:[#allocation0 + $0x1e] sm:$0x3] %v317_v34   ;;  %v289_v39 = vld [vmem:[#allocation1 + $0x30] sm:$0x3]   ;;  %299 = vst [vmem:[#allocation0 + $0x14] sm:$0x3] %v297_v35  }
  0x10   :  { %v285_v38 = vld [vmem:[#allocation1 + $0x38] sm:$0x3]   ;;  %v293_v40 = vld [vmem:[#allocation1 + $0x70] sm:$0x3]   ;;  %303 = vst [vmem:[#allocation0 + $0x1c] sm:$0x3] %v301_v36  }
  0x11   :  { %307 = vst [vmem:[#allocation0 + $0x6] sm:$0x3] %v305_v37   ;;  %v273_v41 = vld [vmem:[#allocation1 + $0x40] sm:$0x3]   ;;  %v277_v42 = vld [vmem:[#allocation1 + $0x68] sm:$0x3]  }
  0x12   :  { %v281_v43 = vld [vmem:[#allocation1 + $0x58] sm:$0x3]   ;;  %287 = vst [vmem:[#allocation0 + $0x1a] sm:$0x3] %v285_v38   ;;  %291 = vst [vmem:[#allocation0 + $0x4] sm:$0x3] %v289_v39  }
  0x13   :  { %295 = vst [vmem:[#allocation0 + $0xc] sm:$0x3] %v293_v40   ;;  %v261_v44 = vld [vmem:[#allocation1] sm:$0x3]   ;;  %v265_v45 = vld [vmem:[#allocation1 + $0x8] sm:$0x3]  }
  0x14   :  { %v269_v46 = vld [vmem:[#allocation1 + $0x18] sm:$0x3]   ;;  %275 = vst [vmem:[#allocation0 + $0x2] sm:$0x3] %v273_v41   ;;  %279 = vst [vmem:[#allocation0 + $0xa] sm:$0x3] %v277_v42  }
  0x15   :  { %283 = vst [vmem:[#allocation0 + $0x12] sm:$0x3] %v281_v43   ;;  %v258_v47 = vld [vmem:[#allocation1 + $0x50] sm:$0x3]   ;;  %263 = vst [vmem:[#allocation0 + $0x8] sm:$0x3] %v261_v44  }
  0x16   :  { %267 = vst [vmem:[#allocation0 + $0x10] sm:$0x3] %v265_v45   ;;  %271 = vst [vmem:[#allocation0 + $0x18] sm:$0x3] %v269_v46  }
  0x17   :  { %259 = vst [vmem:[#allocation0] sm:$0x3] %v258_v47  }
  0x1c   :  { %v331_v48 = vld [vmem:[#allocation0 + $0x8] sm:$0xff] }
  0x1d   :  { %v338_v49 = vld [vmem:[#allocation0 + $0x10] sm:$0xff]  ;;  %v346_v50 = vld [vmem:[#allocation0 + $0x18] sm:$0xff] }
  0x1e   :  { %v325_v51 = vld [vmem:[#allocation0] sm:$0xff]  ;;  %v395_v52 = vpack.c.bf16 %v346_v50, %v338_v49 }
  0x1f   :  { %v390_v53 = vpack.c.bf16 %v331_v48, %v325_v51 }
  0x20   :  { %397 = vst [vmem:[%s463_s1 + $0x8] sm:$0xff] %v395_v52  }
  0x21   :  { %391 = vst [vmem:[%s463_s1] sm:$0xff] %v390_v53  }

// kernel: fakenet_forward.24
= control target key start
LH: loop header
LB: loop body
LE: loop exit
PB: predicated region body
PF: predicated region fallthrough
CT: control target
= control target key end

     0   :  { %s1783_s2 = inlined_call_operand.vmem [shape: bf16[512,512], index: 2, kind: input, shape index: {}]   ;;  %s1784_s0 = inlined_call_operand.vmem [shape: bf16[8,512], index: 0, kind: input, shape index: {}]   ;;  %s1785_s1 = inlined_call_operand.vmem [shape: bf16[8,512], index: 1, kind: input, shape index: {}]   ;;  %s1786_s3 = inlined_call_operand.vmem [shape: f32[1,512], index: 3, kind: input, shape index: {}]   ;;  %s1787_s4 = inlined_call_operand.vmem [shape: bf16[8,512], index: 4, kind: output, shape index: {}]  }
   0x1   :  { %v1153_v0 = vld [vmem:[%s1783_s2 + $0xe4] ss:$16 sps:$4 sm:$0xff]   ;;  %v1157_v2 = vld [vmem:[%s1783_s2 + $0xe0] ss:$16 sps:$4 sm:$0xff]   ;;  %v18_v50 = vld [vmem:[%s1784_s0 + $0x8] sm:$0xff] }
   0x2   :  { %v1155_v1 = vld [vmem:[%s1783_s2 + $0x2e4] ss:$16 sps:$4 sm:$0xff]   ;;  %827 = vmatprep.subr.bf16.mxu0 %v1153_v0  ;;  %v1158_v3 = vld [vmem:[%s1783_s2 + $0x2e0] ss:$16 sps:$4 sm:$0xff]   ;;  %v20_v51 = vld [vmem:[%s1785_s1 + $0x8] sm:$0xff] }
   0x3   :  { %868 = vmatprep.subr.bf16.mxu1 %v1155_v1  ;;  %v1159_v4 = vld [vmem:[%s1783_s2 + $0xc4] ss:$16 sps:$4 sm:$0xff]   ;;  %828 = vmatpush1.bf16.msra.mxu0 %v1157_v2  ;;  %v1163_v6 = vld [vmem:[%s1783_s2 + $0xc0] ss:$16 sps:$4 sm:$0xff]   ;;  %v22_v54 = vadd.bf16 %v20_v51, %v18_v50  ;;  %v1311_v50 = vld [vmem:[%s1783_s2 + $0x1ac] ss:$16 sps:$4 sm:$0xff]  }
   0x4   :  { %869 = vmatpush1.bf16.msra.mxu1 %v1158_v3  ;;  %v1161_v5 = vld [vmem:[%s1783_s2 + $0x2c4] ss:$16 sps:$4 sm:$0xff]   ;;  %829 = vmatprep.subr.bf16.mxu0 %v1159_v4  ;;  %v1164_v7 = vld [vmem:[%s1783_s2 + $0x2c0] ss:$16 sps:$4 sm:$0xff]   ;;  %v1314_v51 = vld [vmem:[%s1783_s2 + $0x3ac] ss:$16 sps:$4 sm:$0xff]  }
   0x5   :  { %870 = vmatprep.subr.bf16.mxu1 %v1161_v5  ;;  %v1165_v8 = vld [vmem:[%s1783_s2 + $0xa4] ss:$16 sps:$4 sm:$0xff]   ;;  %v1169_v10 = vld [vmem:[%s1783_s2 + $0xa0] ss:$16 sps:$4 sm:$0xff]   ;;  %v1020_v57 = vcombine.high %v22_v54, %v22_v54 }
   0x6   :  { %v1167_v9 = vld [vmem:[%s1783_s2 + $0x2a4] ss:$16 sps:$4 sm:$0xff]   ;;  %v1170_v11 = vld [vmem:[%s1783_s2 + $0x2a0] ss:$16 sps:$4 sm:$0xff]  }
   0x7   :  { %830 = vmatpush1.bf16.msra.mxu0 %v1163_v6  ;;  %v1171_v12 = vld [vmem:[%s1783_s2 + $0x84] ss:$16 sps:$4 sm:$0xff]   ;;  %v1175_v14 = vld [vmem:[%s1783_s2 + $0x80] ss:$16 sps:$4 sm:$0xff]   ;;  %900 = vmatprep.mubr.bf16.mxu1 %v1020_v57 }
   0x8   :  { %871 = vmatpush1.bf16.msra.mxu1 %v1164_v7  ;;  %831 = vmatprep.subr.bf16.mxu0 %v1165_v8  ;;  %v1173_v13 = vld [vmem:[%s1783_s2 + $0x284] ss:$16 sps:$4 sm:$0xff]   ;;  %v1176_v15 = vld [vmem:[%s1783_s2 + $0x280] ss:$16 sps:$4 sm:$0xff]   ;;  %v1251_v8 = vld [vmem:[%s1783_s2 + $0xec] ss:$16 sps:$4 sm:$0xff]  }
   0x9   :  { %872 = vmatprep.subr.bf16.mxu1 %v1167_v9  ;;  %v1177_v16 = vld [vmem:[%s1783_s2 + $0x64] ss:$16 sps:$4 sm:$0xff]   ;;  %v1181_v18 = vld [vmem:[%s1783_s2 + $0x60] ss:$16 sps:$4 sm:$0xff]   ;;  %v1254_v9 = vld [vmem:[%s1783_s2 + $0x2ec] ss:$16 sps:$4 sm:$0xff]  }
   0xa   :  { %v1179_v17 = vld [vmem:[%s1783_s2 + $0x264] ss:$16 sps:$4 sm:$0xff]   ;;  %v1182_v19 = vld [vmem:[%s1783_s2 + $0x260] ss:$16 sps:$4 sm:$0xff]  }
   0xb   :  { %832 = vmatpush1.bf16.msra.mxu0 %v1169_v10  ;;  %v1183_v20 = vld [vmem:[%s1783_s2 + $0x44] ss:$16 sps:$4 sm:$0xff]   ;;  %v1187_v22 = vld [vmem:[%s1783_s2 + $0x40] ss:$16 sps:$4 sm:$0xff]  }
   0xc   :  { %873 = vmatpush1.bf16.msra.mxu1 %v1170_v11  ;;  %833 = vmatprep.subr.bf16.mxu0 %v1171_v12  ;;  %v1185_v21 = vld [vmem:[%s1783_s2 + $0x244] ss:$16 sps:$4 sm:$0xff]   ;;  %v1188_v23 = vld [vmem:[%s1783_s2 + $0x240] ss:$16 sps:$4 sm:$0xff]   ;;  %v1582_v11 = vcombine.low %v22_v54, %v22_v54  ;;  %v1249_v12 = vld [vmem:[%s1783_s2 + $0xe8] ss:$16 sps:$4 sm:$0xff]  }
   0xd   :  { %874 = vmatprep.subr.bf16.mxu1 %v1173_v13  ;;  %v1189_v24 = vld [vmem:[%s1783_s2 + $0x24] ss:$16 sps:$4 sm:$0xff]   ;;  %v1193_v26 = vld [vmem:[%s1783_s2 + $0x20] ss:$16 sps:$4 sm:$0xff]   ;;  %v1252_v13 = vld [vmem:[%s1783_s2 + $0x2e8] ss:$16 sps:$4 sm:$0xff]  }
   0xe   :  { %v1191_v25 = vld [vmem:[%s1783_s2 + $0x224] ss:$16 sps:$4 sm:$0xff]   ;;  %v1194_v27 = vld [vmem:[%s1783_s2 + $0x220] ss:$16 sps:$4 sm:$0xff]   ;;  %v1317_v54 = vld [vmem:[%s1783_s2 + $0x18c] ss:$16 sps:$4 sm:$0xff]  }
   0xf   :  { %834 = vmatpush1.bf16.msra.mxu0 %v1175_v14  ;;  %v1195_v28 = vld [vmem:[%s1783_s2 + $0x4] ss:$16 sps:$4 sm:$0xff]   ;;  %v1199_v30 = vld [vmem:[%s1783_s2] ss:$16 sps:$4 sm:$0xff]   ;;  %v1257_v14 = vld [vmem:[%s1783_s2 + $0xcc] ss:$16 sps:$4 sm:$0xff]  }
  0x10   :  { %875 = vmatpush1.bf16.msra.mxu1 %v1176_v15  ;;  %835 = vmatprep.subr.bf16.mxu0 %v1177_v16  ;;  %v1197_v29 = vld [vmem:[%s1783_s2 + $0x204] ss:$16 sps:$4 sm:$0xff]   ;;  %v1200_v31 = vld [vmem:[%s1783_s2 + $0x200] ss:$16 sps:$4 sm:$0xff]   ;;  %v1260_v15 = vld [vmem:[%s1783_s2 + $0x2cc] ss:$16 sps:$4 sm:$0xff]  }
  0x11   :  { %876 = vmatprep.subr.bf16.mxu1 %v1179_v17  ;;  %v1201_v32 = vld [vmem:[%s1783_s2 + $0x1e4] ss:$16 sps:$4 sm:$0xff]   ;;  %v1205_v34 = vld [vmem:[%s1783_s2 + $0x1e0] ss:$16 sps:$4 sm:$0xff]   ;;  %v1255_v16 = vld [vmem:[%s1783_s2 + $0xc8] ss:$16 sps:$4 sm:$0xff]  }
  0x12   :  { %v1203_v33 = vld [vmem:[%s1783_s2 + $0x3e4] ss:$16 sps:$4 sm:$0xff]   ;;  %v1206_v35 = vld [vmem:[%s1783_s2 + $0x3e0] ss:$16 sps:$4 sm:$0xff]   ;;  %v1258_v17 = vld [vmem:[%s1783_s2 + $0x2c8] ss:$16 sps:$4 sm:$0xff]  }
  0x13   :  { %836 = vmatpush1.bf16.msra.mxu0 %v1181_v18  ;;  %v1207_v36 = vld [vmem:[%s1783_s2 + $0x1c4] ss:$16 sps:$4 sm:$0xff]   ;;  %v1211_v38 = vld [vmem:[%s1783_s2 + $0x1c0] ss:$16 sps:$4 sm:$0xff]   ;;  %v1263_v18 = vld [vmem:[%s1783_s2 + $0xac] ss:$16 sps:$4 sm:$0xff]  }
  0x14   :  { %877 = vmatpush1.bf16.msra.mxu1 %v1182_v19  ;;  %837 = vmatprep.subr.bf16.mxu0 %v1183_v20  ;;  %v1209_v37 = vld [vmem:[%s1783_s2 + $0x3c4] ss:$16 sps:$4 sm:$0xff]   ;;  %v1212_v39 = vld [vmem:[%s1783_s2 + $0x3c0] ss:$16 sps:$4 sm:$0xff]   ;;  %v1266_v19 = vld [vmem:[%s1783_s2 + $0x2ac] ss:$16 sps:$4 sm:$0xff]  }
  0x15   :  { %878 = vmatprep.subr.bf16.mxu1 %v1185_v21  ;;  %v1213_v40 = vld [vmem:[%s1783_s2 + $0x1a4] ss:$16 sps:$4 sm:$0xff]   ;;  %v1217_v42 = vld [vmem:[%s1783_s2 + $0x1a0] ss:$16 sps:$4 sm:$0xff]   ;;  %v1261_v20 = vld [vmem:[%s1783_s2 + $0xa8] ss:$16 sps:$4 sm:$0xff]  }
  0x16   :  { %v1215_v41 = vld [vmem:[%s1783_s2 + $0x3a4] ss:$16 sps:$4 sm:$0xff]   ;;  %v1218_v43 = vld [vmem:[%s1783_s2 + $0x3a0] ss:$16 sps:$4 sm:$0xff]   ;;  %v1264_v21 = vld [vmem:[%s1783_s2 + $0x2a8] ss:$16 sps:$4 sm:$0xff]  }
  0x17   :  { %838 = vmatpush1.bf16.msra.mxu0 %v1187_v22  ;;  %v1219_v44 = vld [vmem:[%s1783_s2 + $0x184] ss:$16 sps:$4 sm:$0xff]   ;;  %v1223_v46 = vld [vmem:[%s1783_s2 + $0x180] ss:$16 sps:$4 sm:$0xff]   ;;  %v1269_v22 = vld [vmem:[%s1783_s2 + $0x8c] ss:$16 sps:$4 sm:$0xff]  }
  0x18   :  { %879 = vmatpush1.bf16.msra.mxu1 %v1188_v23  ;;  %839 = vmatprep.subr.bf16.mxu0 %v1189_v24  ;;  %v1221_v45 = vld [vmem:[%s1783_s2 + $0x384] ss:$16 sps:$4 sm:$0xff]   ;;  %v1224_v47 = vld [vmem:[%s1783_s2 + $0x380] ss:$16 sps:$4 sm:$0xff]   ;;  %v1272_v23 = vld [vmem:[%s1783_s2 + $0x28c] ss:$16 sps:$4 sm:$0xff]  }
  0x19   :  { %880 = vmatprep.subr.bf16.mxu1 %v1191_v25  ;;  %v17_v48 = vld [vmem:[%s1784_s0] sm:$0xff]  ;;  %v1267_v24 = vld [vmem:[%s1783_s2 + $0x88] ss:$16 sps:$4 sm:$0xff]  }
  0x1a   :  { %v19_v49 = vld [vmem:[%s1785_s1] sm:$0xff]  ;;  %v1270_v25 = vld [vmem:[%s1783_s2 + $0x288] ss:$16 sps:$4 sm:$0xff]  }
  0x1b   :  { %840 = vmatpush1.bf16.msra.mxu0 %v1193_v26  ;;  %v1225_v52 = vld [vmem:[%s1783_s2 + $0x164] ss:$16 sps:$4 sm:$0xff]   ;;  %v21_v53 = vadd.bf16 %v19_v49, %v17_v48  ;;  %v1229_v58 = vld [vmem:[%s1783_s2 + $0x160] ss:$16 sps:$4 sm:$0xff]   ;;  %v1275_v26 = vld [vmem:[%s1783_s2 + $0x6c] ss:$16 sps:$4 sm:$0xff]  }
  0x1c   :  { %881 = vmatpush1.bf16.msra.mxu1 %v1194_v27  ;;  %841 = vmatprep.subr.bf16.mxu0 %v1195_v28  ;;  %v1227_v55 = vld [vmem:[%s1783_s2 + $0x364] ss:$16 sps:$4 sm:$0xff]   ;;  %v1230_v59 = vld [vmem:[%s1783_s2 + $0x360] ss:$16 sps:$4 sm:$0xff]   ;;  %v1278_v27 = vld [vmem:[%s1783_s2 + $0x26c] ss:$16 sps:$4 sm:$0xff]  }
  0x1d   :  { %882 = vmatprep.subr.bf16.mxu1 %v1197_v29  ;;  %v1018_v56 = vcombine.high %v21_v53, %v21_v53  ;;  %v1231_v60 = vld [vmem:[%s1783_s2 + $0x144] ss:$16 sps:$4 sm:$0xff]   ;;  %v1235_v62 = vld [vmem:[%s1783_s2 + $0x140] ss:$16 sps:$4 sm:$0xff]   ;;  %v1580_v10 = vcombine.low %v21_v53, %v21_v53  ;;  %v1273_v28 = vld [vmem:[%s1783_s2 + $0x68] ss:$16 sps:$4 sm:$0xff]  }
  0x1e   :  { %v1233_v61 = vld [vmem:[%s1783_s2 + $0x344] ss:$16 sps:$4 sm:$0xff]   ;;  %v1236_v63 = vld [vmem:[%s1783_s2 + $0x340] ss:$16 sps:$4 sm:$0xff]   ;;  %v1276_v29 = vld [vmem:[%s1783_s2 + $0x268] ss:$16 sps:$4 sm:$0xff]  }
  0x1f   :  { %842 = vmatpush1.bf16.msra.mxu0 %v1199_v30  ;;  %859 = vmatprep.mubr.bf16.mxu0 %v1018_v56  ;;  %v1237_v0 = vld [vmem:[%s1783_s2 + $0x124] ss:$16 sps:$4 sm:$0xff]   ;;  %v1241_v2 = vld [vmem:[%s1783_s2 + $0x120] ss:$16 sps:$4 sm:$0xff]   ;;  %v1281_v30 = vld [vmem:[%s1783_s2 + $0x4c] ss:$16 sps:$4 sm:$0xff]  }
  0x20   :  { %883 = vmatpush1.bf16.msra.mxu1 %v1200_v31  ;;  %843 = vmatprep.subr.bf16.mxu0 %v1201_v32  ;;  %v1239_v1 = vld [vmem:[%s1783_s2 + $0x324] ss:$16 sps:$4 sm:$0xff]   ;;  %v1242_v3 = vld [vmem:[%s1783_s2 + $0x320] ss:$16 sps:$4 sm:$0xff]   ;;  %v1284_v31 = vld [vmem:[%s1783_s2 + $0x24c] ss:$16 sps:$4 sm:$0xff]  }
  0x21   :  { %884 = vmatprep.subr.bf16.mxu1 %v1203_v33  ;;  %v1243_v4 = vld [vmem:[%s1783_s2 + $0x104] ss:$16 sps:$4 sm:$0xff]   ;;  %v1247_v6 = vld [vmem:[%s1783_s2 + $0x100] ss:$16 sps:$4 sm:$0xff]   ;;  %v1279_v32 = vld [vmem:[%s1783_s2 + $0x48] ss:$16 sps:$4 sm:$0xff]  }
  0x22   :  { %v1245_v5 = vld [vmem:[%s1783_s2 + $0x304] ss:$16 sps:$4 sm:$0xff]   ;;  %v1248_v7 = vld [vmem:[%s1783_s2 + $0x300] ss:$16 sps:$4 sm:$0xff]   ;;  %v1282_v33 = vld [vmem:[%s1783_s2 + $0x248] ss:$16 sps:$4 sm:$0xff]  }
  0x23   :  { %844 = vmatpush2.bf16.msra.mxu0 %v1205_v34  ;;  %v1287_v34 = vld [vmem:[%s1783_s2 + $0x2c] ss:$16 sps:$4 sm:$0xff]   ;;  %v1303_v48 = vld [vmem:[%s1783_s2 + $0x1c8] ss:$16 sps:$4 sm:$0xff]  }
  0x24   :  { %885 = vmatpush2.bf16.msra.mxu1 %v1206_v35  ;;  %845 = vmatprep.subr.bf16.mxu0 %v1207_v36  ;;  %v1290_v35 = vld [vmem:[%s1783_s2 + $0x22c] ss:$16 sps:$4 sm:$0xff]   ;;  %v1285_v36 = vld [vmem:[%s1783_s2 + $0x28] ss:$16 sps:$4 sm:$0xff]  }
  0x25   :  { %886 = vmatprep.subr.bf16.mxu1 %v1209_v37  ;;  %v1288_v37 = vld [vmem:[%s1783_s2 + $0x228] ss:$16 sps:$4 sm:$0xff]  }
  0x26   :  { %v1306_v49 = vld [vmem:[%s1783_s2 + $0x3c8] ss:$16 sps:$4 sm:$0xff]  }
  0x27   :  { %846 = vmatpush2.bf16.msra.mxu0 %v1211_v38  ;;  %v1293_v38 = vld [vmem:[%s1783_s2 + $0xc] ss:$16 sps:$4 sm:$0xff]   ;;  %v1312_v53 = vld [vmem:[%s1783_s2 + $0x3a8] ss:$16 sps:$4 sm:$0xff]  }
  0x28   :  { %887 = vmatpush2.bf16.msra.mxu1 %v1212_v39  ;;  %847 = vmatprep.subr.bf16.mxu0 %v1213_v40  ;;  %v1296_v39 = vld [vmem:[%s1783_s2 + $0x20c] ss:$16 sps:$4 sm:$0xff]   ;;  %v1291_v40 = vld [vmem:[%s1783_s2 + $0x8] ss:$16 sps:$4 sm:$0xff]  }
  0x29   :  { %888 = vmatprep.subr.bf16.mxu1 %v1215_v41  ;;  %v1294_v41 = vld [vmem:[%s1783_s2 + $0x208] ss:$16 sps:$4 sm:$0xff]  }
  0x2b   :  { %848 = vmatpush2.bf16.msra.mxu0 %v1217_v42  ;;  %v1299_v42 = vld [vmem:[%s1783_s2 + $0x1ec] ss:$16 sps:$4 sm:$0xff]  }
  0x2c   :  { %889 = vmatpush2.bf16.msra.mxu1 %v1218_v43  ;;  %849 = vmatprep.subr.bf16.mxu0 %v1219_v44  ;;  %v1302_v43 = vld [vmem:[%s1783_s2 + $0x3ec] ss:$16 sps:$4 sm:$0xff]   ;;  %v1297_v44 = vld [vmem:[%s1783_s2 + $0x1e8] ss:$16 sps:$4 sm:$0xff]  }
  0x2d   :  { %890 = vmatprep.subr.bf16.mxu1 %v1221_v45  ;;  %v1300_v45 = vld [vmem:[%s1783_s2 + $0x3e8] ss:$16 sps:$4 sm:$0xff]  }
  0x2f   :  { %850 = vmatpush2.bf16.msra.mxu0 %v1223_v46  ;;  %v1305_v46 = vld [vmem:[%s1783_s2 + $0x1cc] ss:$16 sps:$4 sm:$0xff]  }
  0x30   :  { %891 = vmatpush2.bf16.msra.mxu1 %v1224_v47  ;;  %851 = vmatprep.subr.bf16.mxu0 %v1225_v52  ;;  %v1308_v47 = vld [vmem:[%s1783_s2 + $0x3cc] ss:$16 sps:$4 sm:$0xff]   ;;  %v1309_v52 = vld [vmem:[%s1783_s2 + $0x1a8] ss:$16 sps:$4 sm:$0xff]  }
  0x31   :  { %892 = vmatprep.subr.bf16.mxu1 %v1227_v55  ;;  %v1320_v55 = vld [vmem:[%s1783_s2 + $0x38c] ss:$16 sps:$4 sm:$0xff]  }
  0x33   :  { %852 = vmatpush2.bf16.msra.mxu0 %v1229_v58  ;;  %v1323_v58 = vld [vmem:[%s1783_s2 + $0x16c] ss:$16 sps:$4 sm:$0xff]  }
  0x34   :  { %893 = vmatpush2.bf16.msra.mxu1 %v1230_v59  ;;  %853 = vmatprep.subr.bf16.mxu0 %v1231_v60  ;;  %v1326_v59 = vld [vmem:[%s1783_s2 + $0x36c] ss:$16 sps:$4 sm:$0xff]   ;;  %v1321_v60 = vld [vmem:[%s1783_s2 + $0x168] ss:$16 sps:$4 sm:$0xff]  }
  0x35   :  { %894 = vmatprep.subr.bf16.mxu1 %v1233_v61  ;;  %v1324_v61 = vld [vmem:[%s1783_s2 + $0x368] ss:$16 sps:$4 sm:$0xff]  }
  0x37   :  { %854 = vmatpush2.bf16.msra.mxu0 %v1235_v62  ;;  %v1329_v62 = vld [vmem:[%s1783_s2 + $0x14c] ss:$16 sps:$4 sm:$0xff]  }
  0x38   :  { %895 = vmatpush2.bf16.msra.mxu1 %v1236_v63  ;;  %855 = vmatprep.subr.bf16.mxu0 %v1237_v0  ;;  %v1332_v63 = vld [vmem:[%s1783_s2 + $0x34c] ss:$16 sps:$4 sm:$0xff]   ;;  %v1327_v0 = vld [vmem:[%s1783_s2 + $0x148] ss:$16 sps:$4 sm:$0xff]  }
  0x39   :  { %896 = vmatprep.subr.bf16.mxu1 %v1239_v1  ;;  %v1330_v1 = vld [vmem:[%s1783_s2 + $0x348] ss:$16 sps:$4 sm:$0xff]  }
  0x3b   :  { %856 = vmatpush2.bf16.msra.mxu0 %v1241_v2  ;;  %v1335_v2 = vld [vmem:[%s1783_s2 + $0x12c] ss:$16 sps:$4 sm:$0xff]  }
  0x3c   :  { %897 = vmatpush2.bf16.msra.mxu1 %v1242_v3  ;;  %857 = vmatprep.subr.bf16.mxu0 %v1243_v4  ;;  %v1338_v3 = vld [vmem:[%s1783_s2 + $0x32c] ss:$16 sps:$4 sm:$0xff]   ;;  %v1333_v4 = vld [vmem:[%s1783_s2 + $0x128] ss:$16 sps:$4 sm:$0xff]  }
  0x3d   :  { %898 = vmatprep.subr.bf16.mxu1 %v1245_v5  ;;  %v1336_v5 = vld [vmem:[%s1783_s2 + $0x328] ss:$16 sps:$4 sm:$0xff]  }
  0x3f   :  { %858 = vmatpush2.bf16.msra.mxu0 %v1247_v6  ;;  %v1341_v6 = vld [vmem:[%s1783_s2 + $0x10c] ss:$16 sps:$4 sm:$0xff]  }
  0x40   :  { %899 = vmatpush2.bf16.msra.mxu1 %v1248_v7  ;;  %909 = vmatprep.subr.bf16.mxu0 %v1251_v8  ;;  %v1344_v7 = vld [vmem:[%s1783_s2 + $0x30c] ss:$16 sps:$4 sm:$0xff]   ;;  %v1339_v8 = vld [vmem:[%s1783_s2 + $0x108] ss:$16 sps:$4 sm:$0xff]  }
  0x41   :  { %950 = vmatprep.subr.bf16.mxu1 %v1254_v9  ;;  %v1342_v9 = vld [vmem:[%s1783_s2 + $0x308] ss:$16 sps:$4 sm:$0xff]  }
  0x42   :  { %860 = vmatmul.mubr.bf16.vlgmr.msra.gmra.mxu0 %v1580_v10 }
  0x43   :  { %901 = vmatmul.mubr.bf16.vlgmr.msra.gmra.mxu1 %v1582_v11  ;;  %910 = vmatpush1.bf16.msra.mxu0 %v1249_v12  ;;  %v153_v12 = vlaneseq }
  0x44   :  { %951 = vmatpush1.bf16.msra.mxu1 %v1252_v13  ;;  %911 = vmatprep.subr.bf16.mxu0 %v1257_v14 }
  0x45   :  { %952 = vmatprep.subr.bf16.mxu1 %v1260_v15  ;;  %941 = vmatprep.mubr.bf16.mxu0 %v1018_v56  ;;  %v1315_v56 = vld [vmem:[%s1783_s2 + $0x188] ss:$16 sps:$4 sm:$0xff]   ;;  %v154_v13 = vshrl.u32 %v153_v12, 7  ;;  %v151_v15 = vld [vmem:[%s1786_s3] sm:$0xf] }
  0x46   :  { %982 = vmatprep.mubr.bf16.mxu1 %v1020_v57  ;;  %v1318_v57 = vld [vmem:[%s1783_s2 + $0x388] ss:$16 sps:$4 sm:$0xff]  }
  0x47   :  { %912 = vmatpush1.bf16.msra.mxu0 %v1255_v16  ;;  %v163_v14 = vsub.s32 2, %v154_v13 }
  0x48   :  { %953 = vmatpush1.bf16.msra.mxu1 %v1258_v17  ;;  %913 = vmatprep.subr.bf16.mxu0 %v1263_v18  ;;  %v167_v17 = vsub.s32 3, %v154_v13 }
  0x49   :  { %954 = vmatprep.subr.bf16.mxu1 %v1266_v19  ;;  %v164_v16 = vrot.slane %v151_v15, %v163_v14  ;;  %v155_v19 = vsub.s32 0, %v154_v13 }
  0x4a   :  { %v168_v18 = vrot.slane %v151_v15, %v167_v17 }
  0x4b   :  { %914 = vmatpush1.bf16.msra.mxu0 %v1261_v20  ;;  %v159_v20 = vsub.s32 1, %v154_v13 }
  0x4c   :  { %955 = vmatpush1.bf16.msra.mxu1 %v1264_v21  ;;  %915 = vmatprep.subr.bf16.mxu0 %v1269_v22  ;;  %v156_v21 = vrot.slane %v151_v15, %v155_v19 }
  0x4d   :  { %956 = vmatprep.subr.bf16.mxu1 %v1272_v23  ;;  %v160_v22 = vrot.slane %v151_v15, %v159_v20 }
  0x4f   :  { %916 = vmatpush1.bf16.msra.mxu0 %v1267_v24 }
  0x50   :  { %957 = vmatpush1.bf16.msra.mxu1 %v1270_v25  ;;  %917 = vmatprep.subr.bf16.mxu0 %v1275_v26 }
  0x51   :  { %958 = vmatprep.subr.bf16.mxu1 %v1278_v27 }
  0x53   :  { %918 = vmatpush1.bf16.msra.mxu0 %v1273_v28 }
  0x54   :  { %959 = vmatpush1.bf16.msra.mxu1 %v1276_v29  ;;  %919 = vmatprep.subr.bf16.mxu0 %v1281_v30 }
  0x55   :  { %960 = vmatprep.subr.bf16.mxu1 %v1284_v31 }
  0x57   :  { %920 = vmatpush1.bf16.msra.mxu0 %v1279_v32 }
  0x58   :  { %961 = vmatpush1.bf16.msra.mxu1 %v1282_v33  ;;  %921 = vmatprep.subr.bf16.mxu0 %v1287_v34 }
  0x59   :  { %962 = vmatprep.subr.bf16.mxu1 %v1290_v35 }
  0x5b   :  { %922 = vmatpush1.bf16.msra.mxu0 %v1285_v36 }
  0x5c   :  { %963 = vmatpush1.bf16.msra.mxu1 %v1288_v37  ;;  %923 = vmatprep.subr.bf16.mxu0 %v1293_v38 }
  0x5d   :  { %964 = vmatprep.subr.bf16.mxu1 %v1296_v39 }
  0x5f   :  { %924 = vmatpush1.bf16.msra.mxu0 %v1291_v40 }
  0x60   :  { %965 = vmatpush1.bf16.msra.mxu1 %v1294_v41  ;;  %925 = vmatprep.subr.bf16.mxu0 %v1299_v42 }
  0x61   :  { %966 = vmatprep.subr.bf16.mxu1 %v1302_v43 }
  0x63   :  { %926 = vmatpush2.bf16.msra.mxu0 %v1297_v44 }
  0x64   :  { %967 = vmatpush2.bf16.msra.mxu1 %v1300_v45  ;;  %927 = vmatprep.subr.bf16.mxu0 %v1305_v46 }
  0x65   :  { %968 = vmatprep.subr.bf16.mxu1 %v1308_v47 }
  0x67   :  { %928 = vmatpush2.bf16.msra.mxu0 %v1303_v48 }
  0x68   :  { %969 = vmatpush2.bf16.msra.mxu1 %v1306_v49  ;;  %929 = vmatprep.subr.bf16.mxu0 %v1311_v50 }
  0x69   :  { %970 = vmatprep.subr.bf16.mxu1 %v1314_v51 }
  0x6b   :  { %930 = vmatpush2.bf16.msra.mxu0 %v1309_v52 }
  0x6c   :  { %971 = vmatpush2.bf16.msra.mxu1 %v1312_v53  ;;  %931 = vmatprep.subr.bf16.mxu0 %v1317_v54 }
  0x6d   :  { %972 = vmatprep.subr.bf16.mxu1 %v1320_v55 }
  0x6f   :  { %932 = vmatpush2.bf16.msra.mxu0 %v1315_v56 }
  0x70   :  { %973 = vmatpush2.bf16.msra.mxu1 %v1318_v57  ;;  %933 = vmatprep.subr.bf16.mxu0 %v1323_v58 }
  0x71   :  { %974 = vmatprep.subr.bf16.mxu1 %v1326_v59 }
  0x73   :  { %934 = vmatpush2.bf16.msra.mxu0 %v1321_v60 }
  0x74   :  { %975 = vmatpush2.bf16.msra.mxu1 %v1324_v61  ;;  %935 = vmatprep.subr.bf16.mxu0 %v1329_v62 }
  0x75   :  { %976 = vmatprep.subr.bf16.mxu1 %v1332_v63 }
  0x77   :  { %936 = vmatpush2.bf16.msra.mxu0 %v1327_v0 }
  0x78   :  { %977 = vmatpush2.bf16.msra.mxu1 %v1330_v1  ;;  %937 = vmatprep.subr.bf16.mxu0 %v1335_v2 }
  0x79   :  { %978 = vmatprep.subr.bf16.mxu1 %v1338_v3 }
  0x7b   :  { %938 = vmatpush2.bf16.msra.mxu0 %v1333_v4 }
  0x7c   :  { %979 = vmatpush2.bf16.msra.mxu1 %v1336_v5  ;;  %939 = vmatprep.subr.bf16.mxu0 %v1341_v6 }
  0x7d   :  { %980 = vmatprep.subr.bf16.mxu1 %v1344_v7 }
  0x7f   :  { %940 = vmatpush2.bf16.msra.mxu0 %v1339_v8 }
  0x80   :  { %981 = vmatpush2.bf16.msra.mxu1 %v1342_v9 }
  0x82   :  { %942 = vmatmul.mubr.bf16.vlgmr.msra.gmra.mxu0 %v1580_v10 }
  0x83   :  { %983 = vmatmul.mubr.bf16.vlgmr.msra.gmra.mxu1 %v1582_v11 }
 0x102   :  { %v861_v23 = vpop.f32.mrf.mxu0 }
 0x103   :  { %v902_v24 = vpop.f32.mrf.mxu1  ;;  %v862_v25 = vadd.f32 %v861_v23, %v156_v21 }
 0x104   :  { %v863_v10 = vpop.f32.mrf.mxu0 }
 0x105   :  { %v904_v26 = vpop.f32.mrf.mxu1  ;;  %v903_v11 = vadd.f32 %v902_v24, %v862_v25  ;;  %v864_v27 = vadd.f32 %v863_v10, %v160_v22 }
 0x106   :  { %v865_v28 = vpop.f32.mrf.mxu0 }
 0x107   :  { %v906_v29 = vpop.f32.mrf.mxu1  ;;  %v991_v30 = vmax.f32 %v903_v11, 0.0  ;;  %v905_v31 = vadd.f32 %v904_v26, %v864_v27 }
 0x108   :  { %v866_v32 = vpop.f32.mrf.mxu0 }
 0x109   :  { %v907_v33 = vpop.f32.mrf.mxu1  ;;  %v992_v34 = vmax.f32 %v905_v31, 0.0 }
 0x10b   :  { %v1151_v35 = vpack.c.bf16 %v992_v34, %v991_v30 }
 0x10d   :  { %1011 = vst [vmem:[%s1787_s4] sm:$0xff] %v1151_v35 }
 0x142   :  { %v943_v36 = vpop.f32.mrf.mxu0 }
 0x143   :  { %v984_v37 = vpop.f32.mrf.mxu1  ;;  %v944_v38 = vadd.f32 %v943_v36, %v164_v16 }
 0x144   :  { %v945_v39 = vpop.f32.mrf.mxu0 }
 0x145   :  { %v986_v40 = vpop.f32.mrf.mxu1  ;;  %v985_v41 = vadd.f32 %v984_v37, %v944_v38  ;;  %v946_v42 = vadd.f32 %v945_v39, %v168_v18 }
 0x146   :  { %v947_v43 = vpop.f32.mrf.mxu0 }
 0x147   :  { %v988_v44 = vpop.f32.mrf.mxu1  ;;  %v987_v45 = vadd.f32 %v986_v40, %v946_v42  ;;  %v993_v48 = vmax.f32 %v985_v41, 0.0 }
 0x148   :  { %v948_v46 = vpop.f32.mrf.mxu0 }
 0x149   :  { %v989_v47 = vpop.f32.mrf.mxu1  ;;  %v994_v49 = vmax.f32 %v987_v45, 0.0 }
 0x14b   :  { %v1152_v50 = vpack.c.bf16 %v994_v49, %v993_v48 }
 0x14d   :  { %1012 = vst [vmem:[%s1787_s4 + $0x8] sm:$0xff] %v1152_v50 }

// kernel: fakenet_forward.25
= control target key start
LH: loop header
LB: loop body
LE: loop exit
PB: predicated region body
PF: predicated region fallthrough
CT: control target
= control target key end

     0   :  { %s1837_s1 = inlined_call_operand.vmem [shape: bf16[512,512], index: 1, kind: input, shape index: {}]   ;;  %s1838_s0 = inlined_call_operand.vmem [shape: bf16[8,512], index: 0, kind: input, shape index: {}]   ;;  %s1839_s2 = inlined_call_operand.vmem [shape: f32[1,512], index: 2, kind: input, shape index: {}]   ;;  %s1840_s3 = inlined_call_operand.vmem [shape: bf16[8,512], index: 3, kind: output, shape index: {}]  }
   0x1   :  { %v1178_v0 = vld [vmem:[%s1837_s1 + $0xe4] ss:$16 sps:$4 sm:$0xff]   ;;  %v1182_v2 = vld [vmem:[%s1837_s1 + $0xe0] ss:$16 sps:$4 sm:$0xff]   ;;  %v1560_v48 = vld [vmem:[%s1838_s0 + $0x8] sm:$0xff] }
   0x2   :  { %v1180_v1 = vld [vmem:[%s1837_s1 + $0x2e4] ss:$16 sps:$4 sm:$0xff]   ;;  %820 = vmatprep.subr.bf16.mxu0 %v1178_v0  ;;  %v1183_v3 = vld [vmem:[%s1837_s1 + $0x2e0] ss:$16 sps:$4 sm:$0xff]   ;;  %v1041_v51 = vcombine.high %v1560_v48, %v1560_v48 }
   0x3   :  { %861 = vmatprep.subr.bf16.mxu1 %v1180_v1  ;;  %v1184_v4 = vld [vmem:[%s1837_s1 + $0xc4] ss:$16 sps:$4 sm:$0xff]   ;;  %821 = vmatpush1.bf16.msra.mxu0 %v1182_v2  ;;  %v1188_v6 = vld [vmem:[%s1837_s1 + $0xc0] ss:$16 sps:$4 sm:$0xff]  }
   0x4   :  { %862 = vmatpush1.bf16.msra.mxu1 %v1183_v3  ;;  %v1186_v5 = vld [vmem:[%s1837_s1 + $0x2c4] ss:$16 sps:$4 sm:$0xff]   ;;  %822 = vmatprep.subr.bf16.mxu0 %v1184_v4  ;;  %v1189_v7 = vld [vmem:[%s1837_s1 + $0x2c0] ss:$16 sps:$4 sm:$0xff]   ;;  %v1280_v4 = vld [vmem:[%s1837_s1 + $0xec] ss:$16 sps:$4 sm:$0xff]  }
   0x5   :  { %863 = vmatprep.subr.bf16.mxu1 %v1186_v5  ;;  %v1190_v8 = vld [vmem:[%s1837_s1 + $0xa4] ss:$16 sps:$4 sm:$0xff]   ;;  %v1194_v10 = vld [vmem:[%s1837_s1 + $0xa0] ss:$16 sps:$4 sm:$0xff]   ;;  %893 = vmatprep.mubr.bf16.mxu1 %v1041_v51  ;;  %v1283_v5 = vld [vmem:[%s1837_s1 + $0x2ec] ss:$16 sps:$4 sm:$0xff]  }
   0x6   :  { %v1192_v9 = vld [vmem:[%s1837_s1 + $0x2a4] ss:$16 sps:$4 sm:$0xff]   ;;  %v1195_v11 = vld [vmem:[%s1837_s1 + $0x2a0] ss:$16 sps:$4 sm:$0xff]  }
   0x7   :  { %823 = vmatpush1.bf16.msra.mxu0 %v1188_v6  ;;  %v1196_v12 = vld [vmem:[%s1837_s1 + $0x84] ss:$16 sps:$4 sm:$0xff]   ;;  %v1200_v14 = vld [vmem:[%s1837_s1 + $0x80] ss:$16 sps:$4 sm:$0xff]  }
   0x8   :  { %864 = vmatpush1.bf16.msra.mxu1 %v1189_v7  ;;  %824 = vmatprep.subr.bf16.mxu0 %v1190_v8  ;;  %v1198_v13 = vld [vmem:[%s1837_s1 + $0x284] ss:$16 sps:$4 sm:$0xff]   ;;  %v1201_v15 = vld [vmem:[%s1837_s1 + $0x280] ss:$16 sps:$4 sm:$0xff]   ;;  %v1631_v7 = vcombine.low %v1560_v48, %v1560_v48  ;;  %v1278_v8 = vld [vmem:[%s1837_s1 + $0xe8] ss:$16 sps:$4 sm:$0xff]  }
   0x9   :  { %865 = vmatprep.subr.bf16.mxu1 %v1192_v9  ;;  %v1202_v16 = vld [vmem:[%s1837_s1 + $0x64] ss:$16 sps:$4 sm:$0xff]   ;;  %v1206_v18 = vld [vmem:[%s1837_s1 + $0x60] ss:$16 sps:$4 sm:$0xff]   ;;  %v1281_v9 = vld [vmem:[%s1837_s1 + $0x2e8] ss:$16 sps:$4 sm:$0xff]  }
   0xa   :  { %v1204_v17 = vld [vmem:[%s1837_s1 + $0x264] ss:$16 sps:$4 sm:$0xff]   ;;  %v1207_v19 = vld [vmem:[%s1837_s1 + $0x260] ss:$16 sps:$4 sm:$0xff]  }
   0xb   :  { %825 = vmatpush1.bf16.msra.mxu0 %v1194_v10  ;;  %v1208_v20 = vld [vmem:[%s1837_s1 + $0x44] ss:$16 sps:$4 sm:$0xff]   ;;  %v1212_v22 = vld [vmem:[%s1837_s1 + $0x40] ss:$16 sps:$4 sm:$0xff]   ;;  %v1286_v10 = vld [vmem:[%s1837_s1 + $0xcc] ss:$16 sps:$4 sm:$0xff]  }
   0xc   :  { %866 = vmatpush1.bf16.msra.mxu1 %v1195_v11  ;;  %826 = vmatprep.subr.bf16.mxu0 %v1196_v12  ;;  %v1210_v21 = vld [vmem:[%s1837_s1 + $0x244] ss:$16 sps:$4 sm:$0xff]   ;;  %v1213_v23 = vld [vmem:[%s1837_s1 + $0x240] ss:$16 sps:$4 sm:$0xff]   ;;  %v1289_v11 = vld [vmem:[%s1837_s1 + $0x2cc] ss:$16 sps:$4 sm:$0xff]  }
   0xd   :  { %867 = vmatprep.subr.bf16.mxu1 %v1198_v13  ;;  %v1214_v24 = vld [vmem:[%s1837_s1 + $0x24] ss:$16 sps:$4 sm:$0xff]   ;;  %v1218_v26 = vld [vmem:[%s1837_s1 + $0x20] ss:$16 sps:$4 sm:$0xff]   ;;  %v1284_v12 = vld [vmem:[%s1837_s1 + $0xc8] ss:$16 sps:$4 sm:$0xff]  }
   0xe   :  { %v1216_v25 = vld [vmem:[%s1837_s1 + $0x224] ss:$16 sps:$4 sm:$0xff]   ;;  %v1219_v27 = vld [vmem:[%s1837_s1 + $0x220] ss:$16 sps:$4 sm:$0xff]   ;;  %v1287_v13 = vld [vmem:[%s1837_s1 + $0x2c8] ss:$16 sps:$4 sm:$0xff]  }
   0xf   :  { %827 = vmatpush1.bf16.msra.mxu0 %v1200_v14  ;;  %v1220_v28 = vld [vmem:[%s1837_s1 + $0x4] ss:$16 sps:$4 sm:$0xff]   ;;  %v1224_v30 = vld [vmem:[%s1837_s1] ss:$16 sps:$4 sm:$0xff]   ;;  %v1292_v14 = vld [vmem:[%s1837_s1 + $0xac] ss:$16 sps:$4 sm:$0xff]  }
  0x10   :  { %868 = vmatpush1.bf16.msra.mxu1 %v1201_v15  ;;  %828 = vmatprep.subr.bf16.mxu0 %v1202_v16  ;;  %v1222_v29 = vld [vmem:[%s1837_s1 + $0x204] ss:$16 sps:$4 sm:$0xff]   ;;  %v1225_v31 = vld [vmem:[%s1837_s1 + $0x200] ss:$16 sps:$4 sm:$0xff]   ;;  %v1295_v15 = vld [vmem:[%s1837_s1 + $0x2ac] ss:$16 sps:$4 sm:$0xff]  }
  0x11   :  { %869 = vmatprep.subr.bf16.mxu1 %v1204_v17  ;;  %v1226_v32 = vld [vmem:[%s1837_s1 + $0x1e4] ss:$16 sps:$4 sm:$0xff]   ;;  %v1230_v34 = vld [vmem:[%s1837_s1 + $0x1e0] ss:$16 sps:$4 sm:$0xff]   ;;  %v1290_v16 = vld [vmem:[%s1837_s1 + $0xa8] ss:$16 sps:$4 sm:$0xff]  }
  0x12   :  { %v1228_v33 = vld [vmem:[%s1837_s1 + $0x3e4] ss:$16 sps:$4 sm:$0xff]   ;;  %v1231_v35 = vld [vmem:[%s1837_s1 + $0x3e0] ss:$16 sps:$4 sm:$0xff]   ;;  %v1293_v17 = vld [vmem:[%s1837_s1 + $0x2a8] ss:$16 sps:$4 sm:$0xff]  }
  0x13   :  { %829 = vmatpush1.bf16.msra.mxu0 %v1206_v18  ;;  %v1232_v36 = vld [vmem:[%s1837_s1 + $0x1c4] ss:$16 sps:$4 sm:$0xff]   ;;  %v1236_v38 = vld [vmem:[%s1837_s1 + $0x1c0] ss:$16 sps:$4 sm:$0xff]   ;;  %v1298_v18 = vld [vmem:[%s1837_s1 + $0x8c] ss:$16 sps:$4 sm:$0xff]  }
  0x14   :  { %870 = vmatpush1.bf16.msra.mxu1 %v1207_v19  ;;  %830 = vmatprep.subr.bf16.mxu0 %v1208_v20  ;;  %v1234_v37 = vld [vmem:[%s1837_s1 + $0x3c4] ss:$16 sps:$4 sm:$0xff]   ;;  %v1237_v39 = vld [vmem:[%s1837_s1 + $0x3c0] ss:$16 sps:$4 sm:$0xff]   ;;  %v1301_v19 = vld [vmem:[%s1837_s1 + $0x28c] ss:$16 sps:$4 sm:$0xff]  }
  0x15   :  { %871 = vmatprep.subr.bf16.mxu1 %v1210_v21  ;;  %v1238_v40 = vld [vmem:[%s1837_s1 + $0x1a4] ss:$16 sps:$4 sm:$0xff]   ;;  %v1242_v42 = vld [vmem:[%s1837_s1 + $0x1a0] ss:$16 sps:$4 sm:$0xff]   ;;  %v1296_v20 = vld [vmem:[%s1837_s1 + $0x88] ss:$16 sps:$4 sm:$0xff]  }
  0x16   :  { %v1240_v41 = vld [vmem:[%s1837_s1 + $0x3a4] ss:$16 sps:$4 sm:$0xff]   ;;  %v1243_v43 = vld [vmem:[%s1837_s1 + $0x3a0] ss:$16 sps:$4 sm:$0xff]   ;;  %v1299_v21 = vld [vmem:[%s1837_s1 + $0x288] ss:$16 sps:$4 sm:$0xff]  }
  0x17   :  { %831 = vmatpush1.bf16.msra.mxu0 %v1212_v22  ;;  %v1244_v44 = vld [vmem:[%s1837_s1 + $0x184] ss:$16 sps:$4 sm:$0xff]   ;;  %v1248_v49 = vld [vmem:[%s1837_s1 + $0x180] ss:$16 sps:$4 sm:$0xff]   ;;  %v1304_v22 = vld [vmem:[%s1837_s1 + $0x6c] ss:$16 sps:$4 sm:$0xff]  }
  0x18   :  { %872 = vmatpush1.bf16.msra.mxu1 %v1213_v23  ;;  %832 = vmatprep.subr.bf16.mxu0 %v1214_v24  ;;  %v1246_v45 = vld [vmem:[%s1837_s1 + $0x384] ss:$16 sps:$4 sm:$0xff]   ;;  %v1249_v50 = vld [vmem:[%s1837_s1 + $0x380] ss:$16 sps:$4 sm:$0xff]   ;;  %v1307_v23 = vld [vmem:[%s1837_s1 + $0x26c] ss:$16 sps:$4 sm:$0xff]  }
  0x19   :  { %873 = vmatprep.subr.bf16.mxu1 %v1216_v25  ;;  %v1551_v46 = vld [vmem:[%s1838_s0] sm:$0xff]  ;;  %v1302_v24 = vld [vmem:[%s1837_s1 + $0x68] ss:$16 sps:$4 sm:$0xff]  }
  0x1a   :  { %v1555_v47 = vcombine.high %v1551_v46, %v1551_v46  ;;  %v1250_v52 = vld [vmem:[%s1837_s1 + $0x164] ss:$16 sps:$4 sm:$0xff]   ;;  %v1254_v54 = vld [vmem:[%s1837_s1 + $0x160] ss:$16 sps:$4 sm:$0xff]   ;;  %v1627_v6 = vcombine.low %v1551_v46, %v1551_v46  ;;  %v1305_v25 = vld [vmem:[%s1837_s1 + $0x268] ss:$16 sps:$4 sm:$0xff]  }
  0x1b   :  { %833 = vmatpush1.bf16.msra.mxu0 %v1218_v26  ;;  %v1252_v53 = vld [vmem:[%s1837_s1 + $0x364] ss:$16 sps:$4 sm:$0xff]   ;;  %v1255_v55 = vld [vmem:[%s1837_s1 + $0x360] ss:$16 sps:$4 sm:$0xff]   ;;  %v1310_v26 = vld [vmem:[%s1837_s1 + $0x4c] ss:$16 sps:$4 sm:$0xff]  }
  0x1c   :  { %874 = vmatpush1.bf16.msra.mxu1 %v1219_v27  ;;  %834 = vmatprep.subr.bf16.mxu0 %v1220_v28  ;;  %v1256_v56 = vld [vmem:[%s1837_s1 + $0x144] ss:$16 sps:$4 sm:$0xff]   ;;  %v1260_v58 = vld [vmem:[%s1837_s1 + $0x140] ss:$16 sps:$4 sm:$0xff]   ;;  %v1313_v27 = vld [vmem:[%s1837_s1 + $0x24c] ss:$16 sps:$4 sm:$0xff]  }
  0x1d   :  { %875 = vmatprep.subr.bf16.mxu1 %v1222_v29  ;;  %852 = vmatprep.mubr.bf16.mxu0 %v1555_v47  ;;  %v1258_v57 = vld [vmem:[%s1837_s1 + $0x344] ss:$16 sps:$4 sm:$0xff]   ;;  %v1261_v59 = vld [vmem:[%s1837_s1 + $0x340] ss:$16 sps:$4 sm:$0xff]   ;;  %v1308_v28 = vld [vmem:[%s1837_s1 + $0x48] ss:$16 sps:$4 sm:$0xff]  }
  0x1e   :  { %v1262_v60 = vld [vmem:[%s1837_s1 + $0x124] ss:$16 sps:$4 sm:$0xff]   ;;  %v1266_v62 = vld [vmem:[%s1837_s1 + $0x120] ss:$16 sps:$4 sm:$0xff]   ;;  %v1311_v29 = vld [vmem:[%s1837_s1 + $0x248] ss:$16 sps:$4 sm:$0xff]  }
  0x1f   :  { %835 = vmatpush1.bf16.msra.mxu0 %v1224_v30  ;;  %v1264_v61 = vld [vmem:[%s1837_s1 + $0x324] ss:$16 sps:$4 sm:$0xff]   ;;  %v1267_v63 = vld [vmem:[%s1837_s1 + $0x320] ss:$16 sps:$4 sm:$0xff]   ;;  %v1316_v30 = vld [vmem:[%s1837_s1 + $0x2c] ss:$16 sps:$4 sm:$0xff]  }
  0x20   :  { %876 = vmatpush1.bf16.msra.mxu1 %v1225_v31  ;;  %836 = vmatprep.subr.bf16.mxu0 %v1226_v32  ;;  %v1268_v0 = vld [vmem:[%s1837_s1 + $0x104] ss:$16 sps:$4 sm:$0xff]   ;;  %v1272_v2 = vld [vmem:[%s1837_s1 + $0x100] ss:$16 sps:$4 sm:$0xff]   ;;  %v1319_v31 = vld [vmem:[%s1837_s1 + $0x22c] ss:$16 sps:$4 sm:$0xff]  }
  0x21   :  { %877 = vmatprep.subr.bf16.mxu1 %v1228_v33  ;;  %v1270_v1 = vld [vmem:[%s1837_s1 + $0x304] ss:$16 sps:$4 sm:$0xff]   ;;  %v1273_v3 = vld [vmem:[%s1837_s1 + $0x300] ss:$16 sps:$4 sm:$0xff]   ;;  %v1314_v32 = vld [vmem:[%s1837_s1 + $0x28] ss:$16 sps:$4 sm:$0xff]  }
  0x22   :  { %v1317_v33 = vld [vmem:[%s1837_s1 + $0x228] ss:$16 sps:$4 sm:$0xff]  }
  0x23   :  { %837 = vmatpush2.bf16.msra.mxu0 %v1230_v34  ;;  %v1322_v34 = vld [vmem:[%s1837_s1 + $0xc] ss:$16 sps:$4 sm:$0xff]  }
  0x24   :  { %878 = vmatpush2.bf16.msra.mxu1 %v1231_v35  ;;  %838 = vmatprep.subr.bf16.mxu0 %v1232_v36  ;;  %v1325_v35 = vld [vmem:[%s1837_s1 + $0x20c] ss:$16 sps:$4 sm:$0xff]   ;;  %v1320_v36 = vld [vmem:[%s1837_s1 + $0x8] ss:$16 sps:$4 sm:$0xff]  }
  0x25   :  { %879 = vmatprep.subr.bf16.mxu1 %v1234_v37  ;;  %v1323_v37 = vld [vmem:[%s1837_s1 + $0x208] ss:$16 sps:$4 sm:$0xff]  }
  0x27   :  { %839 = vmatpush2.bf16.msra.mxu0 %v1236_v38  ;;  %v1328_v38 = vld [vmem:[%s1837_s1 + $0x1ec] ss:$16 sps:$4 sm:$0xff]  }
  0x28   :  { %880 = vmatpush2.bf16.msra.mxu1 %v1237_v39  ;;  %840 = vmatprep.subr.bf16.mxu0 %v1238_v40  ;;  %v1331_v39 = vld [vmem:[%s1837_s1 + $0x3ec] ss:$16 sps:$4 sm:$0xff]   ;;  %v1326_v40 = vld [vmem:[%s1837_s1 + $0x1e8] ss:$16 sps:$4 sm:$0xff]  }
  0x29   :  { %881 = vmatprep.subr.bf16.mxu1 %v1240_v41  ;;  %v1329_v41 = vld [vmem:[%s1837_s1 + $0x3e8] ss:$16 sps:$4 sm:$0xff]  }
  0x2b   :  { %841 = vmatpush2.bf16.msra.mxu0 %v1242_v42  ;;  %v1334_v42 = vld [vmem:[%s1837_s1 + $0x1cc] ss:$16 sps:$4 sm:$0xff]  }
  0x2c   :  { %882 = vmatpush2.bf16.msra.mxu1 %v1243_v43  ;;  %842 = vmatprep.subr.bf16.mxu0 %v1244_v44  ;;  %v1337_v43 = vld [vmem:[%s1837_s1 + $0x3cc] ss:$16 sps:$4 sm:$0xff]   ;;  %v1332_v44 = vld [vmem:[%s1837_s1 + $0x1c8] ss:$16 sps:$4 sm:$0xff]  }
  0x2d   :  { %883 = vmatprep.subr.bf16.mxu1 %v1246_v45  ;;  %v1335_v45 = vld [vmem:[%s1837_s1 + $0x3c8] ss:$16 sps:$4 sm:$0xff]  }
  0x2f   :  { %843 = vmatpush2.bf16.msra.mxu0 %v1248_v49  ;;  %v1343_v49 = vld [vmem:[%s1837_s1 + $0x3ac] ss:$16 sps:$4 sm:$0xff]  }
  0x30   :  { %884 = vmatpush2.bf16.msra.mxu1 %v1249_v50  ;;  %844 = vmatprep.subr.bf16.mxu0 %v1250_v52  ;;  %v1338_v50 = vld [vmem:[%s1837_s1 + $0x1a8] ss:$16 sps:$4 sm:$0xff]   ;;  %v1346_v52 = vld [vmem:[%s1837_s1 + $0x18c] ss:$16 sps:$4 sm:$0xff]  }
  0x31   :  { %885 = vmatprep.subr.bf16.mxu1 %v1252_v53  ;;  %v1349_v53 = vld [vmem:[%s1837_s1 + $0x38c] ss:$16 sps:$4 sm:$0xff]  }
  0x33   :  { %845 = vmatpush2.bf16.msra.mxu0 %v1254_v54  ;;  %v1344_v54 = vld [vmem:[%s1837_s1 + $0x188] ss:$16 sps:$4 sm:$0xff]  }
  0x34   :  { %886 = vmatpush2.bf16.msra.mxu1 %v1255_v55  ;;  %846 = vmatprep.subr.bf16.mxu0 %v1256_v56  ;;  %v1347_v55 = vld [vmem:[%s1837_s1 + $0x388] ss:$16 sps:$4 sm:$0xff]   ;;  %v1352_v56 = vld [vmem:[%s1837_s1 + $0x16c] ss:$16 sps:$4 sm:$0xff]  }
  0x35   :  { %887 = vmatprep.subr.bf16.mxu1 %v1258_v57  ;;  %v1355_v57 = vld [vmem:[%s1837_s1 + $0x36c] ss:$16 sps:$4 sm:$0xff]  }
  0x37   :  { %847 = vmatpush2.bf16.msra.mxu0 %v1260_v58  ;;  %v1350_v58 = vld [vmem:[%s1837_s1 + $0x168] ss:$16 sps:$4 sm:$0xff]  }
  0x38   :  { %888 = vmatpush2.bf16.msra.mxu1 %v1261_v59  ;;  %848 = vmatprep.subr.bf16.mxu0 %v1262_v60  ;;  %v1353_v59 = vld [vmem:[%s1837_s1 + $0x368] ss:$16 sps:$4 sm:$0xff]   ;;  %v1358_v60 = vld [vmem:[%s1837_s1 + $0x14c] ss:$16 sps:$4 sm:$0xff]  }
  0x39   :  { %889 = vmatprep.subr.bf16.mxu1 %v1264_v61  ;;  %v1361_v61 = vld [vmem:[%s1837_s1 + $0x34c] ss:$16 sps:$4 sm:$0xff]  }
  0x3b   :  { %849 = vmatpush2.bf16.msra.mxu0 %v1266_v62  ;;  %v1356_v62 = vld [vmem:[%s1837_s1 + $0x148] ss:$16 sps:$4 sm:$0xff]  }
  0x3c   :  { %890 = vmatpush2.bf16.msra.mxu1 %v1267_v63  ;;  %850 = vmatprep.subr.bf16.mxu0 %v1268_v0  ;;  %v1359_v63 = vld [vmem:[%s1837_s1 + $0x348] ss:$16 sps:$4 sm:$0xff]   ;;  %v1364_v0 = vld [vmem:[%s1837_s1 + $0x12c] ss:$16 sps:$4 sm:$0xff]  }
  0x3d   :  { %891 = vmatprep.subr.bf16.mxu1 %v1270_v1  ;;  %v1367_v1 = vld [vmem:[%s1837_s1 + $0x32c] ss:$16 sps:$4 sm:$0xff]  }
  0x3f   :  { %851 = vmatpush2.bf16.msra.mxu0 %v1272_v2  ;;  %v1362_v2 = vld [vmem:[%s1837_s1 + $0x128] ss:$16 sps:$4 sm:$0xff]  }
  0x40   :  { %892 = vmatpush2.bf16.msra.mxu1 %v1273_v3  ;;  %902 = vmatprep.subr.bf16.mxu0 %v1280_v4  ;;  %v1365_v3 = vld [vmem:[%s1837_s1 + $0x328] ss:$16 sps:$4 sm:$0xff]   ;;  %v1370_v4 = vld [vmem:[%s1837_s1 + $0x10c] ss:$16 sps:$4 sm:$0xff]  }
  0x41   :  { %943 = vmatprep.subr.bf16.mxu1 %v1283_v5  ;;  %v1373_v5 = vld [vmem:[%s1837_s1 + $0x30c] ss:$16 sps:$4 sm:$0xff]  }
  0x42   :  { %853 = vmatmul.mubr.bf16.vlgmr.msra.gmra.mxu0 %v1627_v6 }
  0x43   :  { %894 = vmatmul.mubr.bf16.vlgmr.msra.gmra.mxu1 %v1631_v7  ;;  %903 = vmatpush1.bf16.msra.mxu0 %v1278_v8  ;;  %v1368_v8 = vld [vmem:[%s1837_s1 + $0x108] ss:$16 sps:$4 sm:$0xff]  }
  0x44   :  { %944 = vmatpush1.bf16.msra.mxu1 %v1281_v9  ;;  %904 = vmatprep.subr.bf16.mxu0 %v1286_v10  ;;  %v1371_v9 = vld [vmem:[%s1837_s1 + $0x308] ss:$16 sps:$4 sm:$0xff]   ;;  %v146_v10 = vlaneseq }
  0x45   :  { %945 = vmatprep.subr.bf16.mxu1 %v1289_v11  ;;  %934 = vmatprep.mubr.bf16.mxu0 %v1555_v47  ;;  %v1340_v47 = vld [vmem:[%s1837_s1 + $0x1ac] ss:$16 sps:$4 sm:$0xff]  }
  0x46   :  { %975 = vmatprep.mubr.bf16.mxu1 %v1041_v51  ;;  %v1341_v51 = vld [vmem:[%s1837_s1 + $0x3a8] ss:$16 sps:$4 sm:$0xff]   ;;  %v147_v11 = vshrl.u32 %v146_v10, 7 }
  0x47   :  { %905 = vmatpush1.bf16.msra.mxu0 %v1284_v12 }
  0x48   :  { %946 = vmatpush1.bf16.msra.mxu1 %v1287_v13  ;;  %906 = vmatprep.subr.bf16.mxu0 %v1292_v14  ;;  %v156_v12 = vsub.s32 2, %v147_v11  ;;  %v144_v13 = vld [vmem:[%s1839_s2] sm:$0xf] }
  0x49   :  { %947 = vmatprep.subr.bf16.mxu1 %v1295_v15  ;;  %v160_v15 = vsub.s32 3, %v147_v11 }
  0x4a   :  { %v157_v14 = vrot.slane %v144_v13, %v156_v12 }
  0x4b   :  { %907 = vmatpush1.bf16.msra.mxu0 %v1290_v16  ;;  %v161_v16 = vrot.slane %v144_v13, %v160_v15 }
  0x4c   :  { %948 = vmatpush1.bf16.msra.mxu1 %v1293_v17  ;;  %908 = vmatprep.subr.bf16.mxu0 %v1298_v18  ;;  %v148_v17 = vsub.s32 0, %v147_v11  ;;  %v152_v18 = vsub.s32 1, %v147_v11 }
  0x4d   :  { %949 = vmatprep.subr.bf16.mxu1 %v1301_v19 }
  0x4e   :  { %v149_v19 = vrot.slane %v144_v13, %v148_v17 }
  0x4f   :  { %909 = vmatpush1.bf16.msra.mxu0 %v1296_v20  ;;  %v153_v20 = vrot.slane %v144_v13, %v152_v18 }
  0x50   :  { %950 = vmatpush1.bf16.msra.mxu1 %v1299_v21  ;;  %910 = vmatprep.subr.bf16.mxu0 %v1304_v22 }
  0x51   :  { %951 = vmatprep.subr.bf16.mxu1 %v1307_v23 }
  0x53   :  { %911 = vmatpush1.bf16.msra.mxu0 %v1302_v24 }
  0x54   :  { %952 = vmatpush1.bf16.msra.mxu1 %v1305_v25  ;;  %912 = vmatprep.subr.bf16.mxu0 %v1310_v26 }
  0x55   :  { %953 = vmatprep.subr.bf16.mxu1 %v1313_v27 }
  0x57   :  { %913 = vmatpush1.bf16.msra.mxu0 %v1308_v28 }
  0x58   :  { %954 = vmatpush1.bf16.msra.mxu1 %v1311_v29  ;;  %914 = vmatprep.subr.bf16.mxu0 %v1316_v30 }
  0x59   :  { %955 = vmatprep.subr.bf16.mxu1 %v1319_v31 }
  0x5b   :  { %915 = vmatpush1.bf16.msra.mxu0 %v1314_v32 }
  0x5c   :  { %956 = vmatpush1.bf16.msra.mxu1 %v1317_v33  ;;  %916 = vmatprep.subr.bf16.mxu0 %v1322_v34 }
  0x5d   :  { %957 = vmatprep.subr.bf16.mxu1 %v1325_v35 }
  0x5f   :  { %917 = vmatpush1.bf16.msra.mxu0 %v1320_v36 }
  0x60   :  { %958 = vmatpush1.bf16.msra.mxu1 %v1323_v37  ;;  %918 = vmatprep.subr.bf16.mxu0 %v1328_v38  ;;  %v984_v37 = vunpack.c.l.bf16 %v1551_v46  ;;  %v985_v38 = vunpack.c.h.bf16 %v1551_v46 }
  0x61   :  { %959 = vmatprep.subr.bf16.mxu1 %v1331_v39 }
  0x63   :  { %919 = vmatpush2.bf16.msra.mxu0 %v1326_v40 }
  0x64   :  { %960 = vmatpush2.bf16.msra.mxu1 %v1329_v41  ;;  %920 = vmatprep.subr.bf16.mxu0 %v1334_v42 }
  0x65   :  { %961 = vmatprep.subr.bf16.mxu1 %v1337_v43 }
  0x67   :  { %921 = vmatpush2.bf16.msra.mxu0 %v1332_v44 }
  0x68   :  { %962 = vmatpush2.bf16.msra.mxu1 %v1335_v45  ;;  %922 = vmatprep.subr.bf16.mxu0 %v1340_v47 }
  0x69   :  { %963 = vmatprep.subr.bf16.mxu1 %v1343_v49 }
  0x6b   :  { %923 = vmatpush2.bf16.msra.mxu0 %v1338_v50 }
  0x6c   :  { %964 = vmatpush2.bf16.msra.mxu1 %v1341_v51  ;;  %924 = vmatprep.subr.bf16.mxu0 %v1346_v52 }
  0x6d   :  { %965 = vmatprep.subr.bf16.mxu1 %v1349_v53 }
  0x6f   :  { %925 = vmatpush2.bf16.msra.mxu0 %v1344_v54 }
  0x70   :  { %966 = vmatpush2.bf16.msra.mxu1 %v1347_v55  ;;  %926 = vmatprep.subr.bf16.mxu0 %v1352_v56 }
  0x71   :  { %967 = vmatprep.subr.bf16.mxu1 %v1355_v57 }
  0x73   :  { %927 = vmatpush2.bf16.msra.mxu0 %v1350_v58 }
  0x74   :  { %968 = vmatpush2.bf16.msra.mxu1 %v1353_v59  ;;  %928 = vmatprep.subr.bf16.mxu0 %v1358_v60 }
  0x75   :  { %969 = vmatprep.subr.bf16.mxu1 %v1361_v61 }
  0x77   :  { %929 = vmatpush2.bf16.msra.mxu0 %v1356_v62 }
  0x78   :  { %970 = vmatpush2.bf16.msra.mxu1 %v1359_v63  ;;  %930 = vmatprep.subr.bf16.mxu0 %v1364_v0  ;;  %v986_v63 = vunpack.c.l.bf16 %v1560_v48  ;;  %v987_v0 = vunpack.c.h.bf16 %v1560_v48 }
  0x79   :  { %971 = vmatprep.subr.bf16.mxu1 %v1367_v1 }
  0x7b   :  { %931 = vmatpush2.bf16.msra.mxu0 %v1362_v2 }
  0x7c   :  { %972 = vmatpush2.bf16.msra.mxu1 %v1365_v3  ;;  %932 = vmatprep.subr.bf16.mxu0 %v1370_v4 }
  0x7d   :  { %973 = vmatprep.subr.bf16.mxu1 %v1373_v5 }
  0x7f   :  { %933 = vmatpush2.bf16.msra.mxu0 %v1368_v8 }
  0x80   :  { %974 = vmatpush2.bf16.msra.mxu1 %v1371_v9 }
  0x82   :  { %935 = vmatmul.mubr.bf16.vlgmr.msra.gmra.mxu0 %v1627_v6 }
  0x83   :  { %976 = vmatmul.mubr.bf16.vlgmr.msra.gmra.mxu1 %v1631_v7 }
 0x102   :  { %v854_v21 = vpop.f32.mrf.mxu0 }
 0x103   :  { %v895_v22 = vpop.f32.mrf.mxu1  ;;  %v855_v23 = vadd.f32 %v854_v21, %v149_v19 }
 0x104   :  { %v856_v6 = vpop.f32.mrf.mxu0 }
 0x105   :  { %v897_v24 = vpop.f32.mrf.mxu1  ;;  %v896_v7 = vadd.f32 %v895_v22, %v855_v23  ;;  %v857_v25 = vadd.f32 %v856_v6, %v153_v20 }
 0x106   :  { %v858_v26 = vpop.f32.mrf.mxu0 }
 0x107   :  { %v899_v27 = vpop.f32.mrf.mxu1  ;;  %v1170_v28 = vmul.f32 -1.442695, %v896_v7  ;;  %v898_v29 = vadd.f32 %v897_v24, %v857_v25 }
 0x108   :  { %v859_v30 = vpop.f32.mrf.mxu0 }
 0x109   :  { %v900_v31 = vpop.f32.mrf.mxu1  ;;  %1374 = vpow2.f32 %v1170_v28  ;;  %v1171_v32 = vmul.f32 -1.442695, %v898_v29 }
 0x10b   :  { %1376 = vpow2.f32 %v1171_v32 }
 0x116   :  { %v1375_v33 = vpop.eup %1374 }
 0x117   :  { %v1000_v34 = vadd.f32 1.0, %v1375_v33 }
 0x118   :  { %v1377_v35 = vpop.eup %1376 }
 0x119   :  { %1378 = vrcp.f32 %v1000_v34  ;;  %v1001_v36 = vadd.f32 1.0, %v1377_v35 }
 0x11b   :  { %1380 = vrcp.f32 %v1001_v36 }
 0x126   :  { %v1379_v39 = vpop.eup %1378 }
 0x127   :  { %v1012_v40 = vmul.f32 %v1379_v39, %v984_v37 }
 0x128   :  { %v1381_v41 = vpop.eup %1380 }
 0x129   :  { %v1013_v42 = vmul.f32 %v1381_v41, %v985_v38 }
 0x12b   :  { %v1176_v43 = vpack.c.bf16 %v1013_v42, %v1012_v40 }
 0x12d   :  { %1032 = vst [vmem:[%s1840_s3] sm:$0xff] %v1176_v43 }
 0x142   :  { %v936_v44 = vpop.f32.mrf.mxu0 }
 0x143   :  { %v977_v45 = vpop.f32.mrf.mxu1  ;;  %v937_v47 = vadd.f32 %v936_v44, %v157_v14 }
 0x144   :  { %v938_v49 = vpop.f32.mrf.mxu0 }
 0x145   :  { %v979_v50 = vpop.f32.mrf.mxu1  ;;  %v978_v51 = vadd.f32 %v977_v45, %v937_v47  ;;  %v939_v52 = vadd.f32 %v938_v49, %v161_v16 }
 0x146   :  { %v940_v53 = vpop.f32.mrf.mxu0 }
 0x147   :  { %v981_v54 = vpop.f32.mrf.mxu1  ;;  %v1172_v55 = vmul.f32 -1.442695, %v978_v51  ;;  %v980_v46 = vadd.f32 %v979_v50, %v939_v52 }
 0x148   :  { %v941_v56 = vpop.f32.mrf.mxu0 }
 0x149   :  { %v982_v57 = vpop.f32.mrf.mxu1  ;;  %1382 = vpow2.f32 %v1172_v55  ;;  %v1173_v58 = vmul.f32 -1.442695, %v980_v46 }
 0x14b   :  { %1384 = vpow2.f32 %v1173_v58 }
 0x156   :  { %v1383_v59 = vpop.eup %1382 }
 0x157   :  { %v1002_v60 = vadd.f32 1.0, %v1383_v59 }
 0x158   :  { %v1385_v61 = vpop.eup %1384 }
 0x159   :  { %1386 = vrcp.f32 %v1002_v60  ;;  %v1003_v62 = vadd.f32 1.0, %v1385_v61 }
 0x15b   :  { %1388 = vrcp.f32 %v1003_v62 }
 0x166   :  { %v1387_v1 = vpop.eup %1386 }
 0x167   :  { %v1014_v2 = vmul.f32 %v1387_v1, %v986_v63 }
 0x168   :  { %v1389_v3 = vpop.eup %1388 }
 0x169   :  { %v1015_v4 = vmul.f32 %v1389_v3, %v987_v0 }
 0x16b   :  { %v1177_v5 = vpack.c.bf16 %v1015_v4, %v1014_v2 }
 0x16d   :  { %1033 = vst [vmem:[%s1840_s3 + $0x8] sm:$0xff] %v1177_v5 }

// kernel: fakenet_forward.20
= control target key start
LH: loop header
LB: loop body
LE: loop exit
PB: predicated region body
PF: predicated region fallthrough
CT: control target
= control target key end

     0   :  { %s3576_s12 = smov 0   ;;  %s4014_s0 = inlined_call_operand.vmem [shape: bf16[2,8,1280], index: 0, kind: input, shape index: {}]   ;;  %s4015_s1 = inlined_call_operand.vmem [shape: bf16[2,1280,512], index: 1, kind: input, shape index: {}]   ;;  %s4016_s2 = inlined_call_operand.vmem [shape: f32[2,1,512], index: 2, kind: input, shape index: {}]   ;;  %s4017_s3 = inlined_call_operand.vmem [shape: bf16[2,8,512], index: 3, kind: output, shape index: {}]  }
   0x1 LB: > { %s2701_s13 = sadd.s32 4294967295, %s3554_s12   ;;  %p2705_p0 = scmp.ge.s32.totalorder %s3554_s12, 1  ;;  %s3554_s12 = sphi %s3576_s12, %s13_s12  }
   0x2   : > { %p156_p1 = scmp.lt.s32.totalorder %s3554_s12, 3 }
   0x4   : > { %p157_p2 = pnand %p2705_p0, %p156_p1 }
   0x5   : > { %p189_p3 = scmp.lt.s32.totalorder (!%p157_p2), %s2701_s13, 1 }
   0x6   : > { %160 = sbr.rel (%p157_p2) target bundleno = 540 (0x21c), region = 32 }
   0xb   : > { %s4019_s13 = smov (!%p189_p3, %s2701_s13), 1 }
   0xc   : > { %s3049_s14 = smul.u32 2560, %s4019_s13  ;;  %s2708_s22 = sshll.u32 %s4019_s13, 2 }
   0xd   : > { %s3048_s18 = smul.u32 40, %s4019_s13  ;;  %s202_s25 = scalar_lea.vmem %s4016_s2, %s2708_s22 }
   0xe   : > { %s3590_s17 = scalar_lea.vmem %s4015_s1, %s3049_s14  ;;  %s3045_s26 = sshll.u32 %s4019_s13, 4 }
   0xf   : > { %v3058_v0 = vld [vmem:[%s3590_s17 + $0xe4] ss:$16 sps:$4 sm:$0xff]   ;;  %v3062_v2 = vld [vmem:[%s3590_s17 + $0xe0] ss:$16 sps:$4 sm:$0xff]   ;;  %s3640_s21 = scalar_lea.vmem %s4014_s0, %s3048_s18  ;;  %s4003_s29 = scalar_lea.vmem %s4017_s3, %s3045_s26 }
  0x10   : > { %v3060_v1 = vld [vmem:[%s3590_s17 + $0x2e4] ss:$16 sps:$4 sm:$0xff]   ;;  %2190 = vmatprep.subr.bf16.mxu0 %v3058_v0  ;;  %v3063_v3 = vld [vmem:[%s3590_s17 + $0x2e0] ss:$16 sps:$4 sm:$0xff]   ;;  %v209_v48 = vld [vmem:[%s3640_s21 + $0x8] sm:$0xff] }
  0x11   : > { %2231 = vmatprep.subr.bf16.mxu1 %v3060_v1  ;;  %v3064_v4 = vld [vmem:[%s3590_s17 + $0xc4] ss:$16 sps:$4 sm:$0xff]   ;;  %2191 = vmatpush1.bf16.msra.mxu0 %v3062_v2  ;;  %v3068_v6 = vld [vmem:[%s3590_s17 + $0xc0] ss:$16 sps:$4 sm:$0xff]   ;;  %v3650_v51 = vcombine.high %v209_v48, %v209_v48 }
  0x12   : > { %2232 = vmatpush1.bf16.msra.mxu1 %v3063_v3  ;;  %v3066_v5 = vld [vmem:[%s3590_s17 + $0x2c4] ss:$16 sps:$4 sm:$0xff]   ;;  %2192 = vmatprep.subr.bf16.mxu0 %v3064_v4  ;;  %v3069_v7 = vld [vmem:[%s3590_s17 + $0x2c0] ss:$16 sps:$4 sm:$0xff]  }
  0x13   : > { %2233 = vmatprep.subr.bf16.mxu1 %v3066_v5  ;;  %v3070_v8 = vld [vmem:[%s3590_s17 + $0xa4] ss:$16 sps:$4 sm:$0xff]   ;;  %v3074_v10 = vld [vmem:[%s3590_s17 + $0xa0] ss:$16 sps:$4 sm:$0xff]   ;;  %2263 = vmatprep.mubr.bf16.mxu1 %v3650_v51 }
  0x14   : > { %v3072_v9 = vld [vmem:[%s3590_s17 + $0x2a4] ss:$16 sps:$4 sm:$0xff]   ;;  %v3075_v11 = vld [vmem:[%s3590_s17 + $0x2a0] ss:$16 sps:$4 sm:$0xff]  }
  0x15   : > { %2193 = vmatpush1.bf16.msra.mxu0 %v3068_v6  ;;  %v3076_v12 = vld [vmem:[%s3590_s17 + $0x84] ss:$16 sps:$4 sm:$0xff]   ;;  %v3080_v14 = vld [vmem:[%s3590_s17 + $0x80] ss:$16 sps:$4 sm:$0xff]  }
  0x16   : > { %2234 = vmatpush1.bf16.msra.mxu1 %v3069_v7  ;;  %2194 = vmatprep.subr.bf16.mxu0 %v3070_v8  ;;  %v3078_v13 = vld [vmem:[%s3590_s17 + $0x284] ss:$16 sps:$4 sm:$0xff]   ;;  %v3081_v15 = vld [vmem:[%s3590_s17 + $0x280] ss:$16 sps:$4 sm:$0xff]   ;;  %v3674_v7 = vcombine.low %v209_v48, %v209_v48 }
  0x17   : > { %2235 = vmatprep.subr.bf16.mxu1 %v3072_v9  ;;  %v3082_v16 = vld [vmem:[%s3590_s17 + $0x64] ss:$16 sps:$4 sm:$0xff]   ;;  %v3086_v18 = vld [vmem:[%s3590_s17 + $0x60] ss:$16 sps:$4 sm:$0xff]  }
  0x18   : > { %v3084_v17 = vld [vmem:[%s3590_s17 + $0x264] ss:$16 sps:$4 sm:$0xff]   ;;  %v3087_v19 = vld [vmem:[%s3590_s17 + $0x260] ss:$16 sps:$4 sm:$0xff]  }
  0x19   : > { %2195 = vmatpush1.bf16.msra.mxu0 %v3074_v10  ;;  %v3088_v20 = vld [vmem:[%s3590_s17 + $0x44] ss:$16 sps:$4 sm:$0xff]   ;;  %v3092_v22 = vld [vmem:[%s3590_s17 + $0x40] ss:$16 sps:$4 sm:$0xff]  }
  0x1a   : > { %2236 = vmatpush1.bf16.msra.mxu1 %v3075_v11  ;;  %2196 = vmatprep.subr.bf16.mxu0 %v3076_v12  ;;  %v3090_v21 = vld [vmem:[%s3590_s17 + $0x244] ss:$16 sps:$4 sm:$0xff]   ;;  %v3093_v23 = vld [vmem:[%s3590_s17 + $0x240] ss:$16 sps:$4 sm:$0xff]  }
  0x1b   : > { %2237 = vmatprep.subr.bf16.mxu1 %v3078_v13  ;;  %v3094_v24 = vld [vmem:[%s3590_s17 + $0x24] ss:$16 sps:$4 sm:$0xff]   ;;  %v3098_v26 = vld [vmem:[%s3590_s17 + $0x20] ss:$16 sps:$4 sm:$0xff]  }
  0x1c   : > { %v3096_v25 = vld [vmem:[%s3590_s17 + $0x224] ss:$16 sps:$4 sm:$0xff]   ;;  %v3099_v27 = vld [vmem:[%s3590_s17 + $0x220] ss:$16 sps:$4 sm:$0xff]  }
  0x1d   : > { %2197 = vmatpush1.bf16.msra.mxu0 %v3080_v14  ;;  %v3100_v28 = vld [vmem:[%s3590_s17 + $0x4] ss:$16 sps:$4 sm:$0xff]   ;;  %v3104_v30 = vld [vmem:[%s3590_s17] ss:$16 sps:$4 sm:$0xff]  }
  0x1e   : > { %2238 = vmatpush1.bf16.msra.mxu1 %v3081_v15  ;;  %2198 = vmatprep.subr.bf16.mxu0 %v3082_v16  ;;  %v3102_v29 = vld [vmem:[%s3590_s17 + $0x204] ss:$16 sps:$4 sm:$0xff]   ;;  %v3105_v31 = vld [vmem:[%s3590_s17 + $0x200] ss:$16 sps:$4 sm:$0xff]  }
  0x1f   : > { %2239 = vmatprep.subr.bf16.mxu1 %v3084_v17  ;;  %v3106_v32 = vld [vmem:[%s3590_s17 + $0x1e4] ss:$16 sps:$4 sm:$0xff]   ;;  %v3110_v34 = vld [vmem:[%s3590_s17 + $0x1e0] ss:$16 sps:$4 sm:$0xff]  }
  0x20   : > { %v3108_v33 = vld [vmem:[%s3590_s17 + $0x3e4] ss:$16 sps:$4 sm:$0xff]   ;;  %v3111_v35 = vld [vmem:[%s3590_s17 + $0x3e0] ss:$16 sps:$4 sm:$0xff]  }
  0x21   : > { %2199 = vmatpush1.bf16.msra.mxu0 %v3086_v18  ;;  %v3112_v36 = vld [vmem:[%s3590_s17 + $0x1c4] ss:$16 sps:$4 sm:$0xff]   ;;  %v3116_v38 = vld [vmem:[%s3590_s17 + $0x1c0] ss:$16 sps:$4 sm:$0xff]  }
  0x22   : > { %2240 = vmatpush1.bf16.msra.mxu1 %v3087_v19  ;;  %2200 = vmatprep.subr.bf16.mxu0 %v3088_v20  ;;  %v3114_v37 = vld [vmem:[%s3590_s17 + $0x3c4] ss:$16 sps:$4 sm:$0xff]   ;;  %v3117_v39 = vld [vmem:[%s3590_s17 + $0x3c0] ss:$16 sps:$4 sm:$0xff]  }
  0x23   : > { %2241 = vmatprep.subr.bf16.mxu1 %v3090_v21  ;;  %v3118_v40 = vld [vmem:[%s3590_s17 + $0x1a4] ss:$16 sps:$4 sm:$0xff]   ;;  %v3122_v42 = vld [vmem:[%s3590_s17 + $0x1a0] ss:$16 sps:$4 sm:$0xff]  }
  0x24   : > { %v3120_v41 = vld [vmem:[%s3590_s17 + $0x3a4] ss:$16 sps:$4 sm:$0xff]   ;;  %v3123_v43 = vld [vmem:[%s3590_s17 + $0x3a0] ss:$16 sps:$4 sm:$0xff]  }
  0x25   : > { %2201 = vmatpush1.bf16.msra.mxu0 %v3092_v22  ;;  %v3124_v44 = vld [vmem:[%s3590_s17 + $0x184] ss:$16 sps:$4 sm:$0xff]   ;;  %v3128_v49 = vld [vmem:[%s3590_s17 + $0x180] ss:$16 sps:$4 sm:$0xff]  }
  0x26   : > { %2242 = vmatpush1.bf16.msra.mxu1 %v3093_v23  ;;  %2202 = vmatprep.subr.bf16.mxu0 %v3094_v24  ;;  %v3126_v45 = vld [vmem:[%s3590_s17 + $0x384] ss:$16 sps:$4 sm:$0xff]   ;;  %v3129_v50 = vld [vmem:[%s3590_s17 + $0x380] ss:$16 sps:$4 sm:$0xff]  }
  0x27   : > { %2243 = vmatprep.subr.bf16.mxu1 %v3096_v25  ;;  %v208_v46 = vld [vmem:[%s3640_s21] sm:$0xff] }
  0x28   : > { %v3645_v47 = vcombine.high %v208_v46, %v208_v46  ;;  %v3130_v52 = vld [vmem:[%s3590_s17 + $0x164] ss:$16 sps:$4 sm:$0xff]   ;;  %v3134_v54 = vld [vmem:[%s3590_s17 + $0x160] ss:$16 sps:$4 sm:$0xff]   ;;  %v3672_v6 = vcombine.low %v208_v46, %v208_v46 }
  0x29   : > { %2203 = vmatpush1.bf16.msra.mxu0 %v3098_v26  ;;  %v3132_v53 = vld [vmem:[%s3590_s17 + $0x364] ss:$16 sps:$4 sm:$0xff]   ;;  %v3135_v55 = vld [vmem:[%s3590_s17 + $0x360] ss:$16 sps:$4 sm:$0xff]  }
  0x2a   : > { %2244 = vmatpush1.bf16.msra.mxu1 %v3099_v27  ;;  %2204 = vmatprep.subr.bf16.mxu0 %v3100_v28  ;;  %v3136_v56 = vld [vmem:[%s3590_s17 + $0x144] ss:$16 sps:$4 sm:$0xff]   ;;  %v3140_v58 = vld [vmem:[%s3590_s17 + $0x140] ss:$16 sps:$4 sm:$0xff]  }
  0x2b   : > { %2245 = vmatprep.subr.bf16.mxu1 %v3102_v29  ;;  %2222 = vmatprep.mubr.bf16.mxu0 %v3645_v47  ;;  %v3138_v57 = vld [vmem:[%s3590_s17 + $0x344] ss:$16 sps:$4 sm:$0xff]   ;;  %v3141_v59 = vld [vmem:[%s3590_s17 + $0x340] ss:$16 sps:$4 sm:$0xff]  }
  0x2c   : > { %v3142_v60 = vld [vmem:[%s3590_s17 + $0x124] ss:$16 sps:$4 sm:$0xff]   ;;  %v3146_v62 = vld [vmem:[%s3590_s17 + $0x120] ss:$16 sps:$4 sm:$0xff]  }
  0x2d   : > { %2205 = vmatpush1.bf16.msra.mxu0 %v3104_v30  ;;  %v3144_v61 = vld [vmem:[%s3590_s17 + $0x324] ss:$16 sps:$4 sm:$0xff]   ;;  %v3147_v63 = vld [vmem:[%s3590_s17 + $0x320] ss:$16 sps:$4 sm:$0xff]  }
  0x2e   : > { %2246 = vmatpush1.bf16.msra.mxu1 %v3105_v31  ;;  %2206 = vmatprep.subr.bf16.mxu0 %v3106_v32  ;;  %v3148_v0 = vld [vmem:[%s3590_s17 + $0x104] ss:$16 sps:$4 sm:$0xff]   ;;  %v3152_v2 = vld [vmem:[%s3590_s17 + $0x100] ss:$16 sps:$4 sm:$0xff]  }
  0x2f   : > { %2247 = vmatprep.subr.bf16.mxu1 %v3108_v33  ;;  %v3150_v1 = vld [vmem:[%s3590_s17 + $0x304] ss:$16 sps:$4 sm:$0xff]   ;;  %v3153_v3 = vld [vmem:[%s3590_s17 + $0x300] ss:$16 sps:$4 sm:$0xff]   ;;  %v3706_v33 = vld [vmem:[%s3640_s21 + $0x18] sm:$0xff] }
  0x30   : > { %v3160_v4 = vld [vmem:[%s3590_s17 + $0x4e4] ss:$16 sps:$4 sm:$0xff]   ;;  %v3158_v8 = vld [vmem:[%s3590_s17 + $0x4e0] ss:$16 sps:$4 sm:$0xff]  }
  0x31   : > { %2207 = vmatpush2.bf16.msra.mxu0 %v3110_v34  ;;  %v3163_v5 = vld [vmem:[%s3590_s17 + $0x6e4] ss:$16 sps:$4 sm:$0xff]   ;;  %v3161_v9 = vld [vmem:[%s3590_s17 + $0x6e0] ss:$16 sps:$4 sm:$0xff]  }
  0x32   : > { %2248 = vmatpush2.bf16.msra.mxu1 %v3111_v35  ;;  %2208 = vmatprep.subr.bf16.mxu0 %v3112_v36  ;;  %v3166_v10 = vld [vmem:[%s3590_s17 + $0x4c4] ss:$16 sps:$4 sm:$0xff]   ;;  %v3164_v12 = vld [vmem:[%s3590_s17 + $0x4c0] ss:$16 sps:$4 sm:$0xff]  }
  0x33   : > { %2249 = vmatprep.subr.bf16.mxu1 %v3114_v37  ;;  %v3169_v11 = vld [vmem:[%s3590_s17 + $0x6c4] ss:$16 sps:$4 sm:$0xff]   ;;  %v3167_v13 = vld [vmem:[%s3590_s17 + $0x6c0] ss:$16 sps:$4 sm:$0xff]   ;;  %v3716_v37 = vcombine.high %v3706_v33, %v3706_v33 }
  0x34   : > { %v3172_v14 = vld [vmem:[%s3590_s17 + $0x4a4] ss:$16 sps:$4 sm:$0xff]   ;;  %v3170_v16 = vld [vmem:[%s3590_s17 + $0x4a0] ss:$16 sps:$4 sm:$0xff]  }
  0x35   : > { %2209 = vmatpush2.bf16.msra.mxu0 %v3116_v38  ;;  %v3175_v15 = vld [vmem:[%s3590_s17 + $0x6a4] ss:$16 sps:$4 sm:$0xff]   ;;  %v3173_v17 = vld [vmem:[%s3590_s17 + $0x6a0] ss:$16 sps:$4 sm:$0xff]  }
  0x36   : > { %2250 = vmatpush2.bf16.msra.mxu1 %v3117_v39  ;;  %2210 = vmatprep.subr.bf16.mxu0 %v3118_v40  ;;  %v3178_v18 = vld [vmem:[%s3590_s17 + $0x484] ss:$16 sps:$4 sm:$0xff]   ;;  %v3176_v20 = vld [vmem:[%s3590_s17 + $0x480] ss:$16 sps:$4 sm:$0xff]  }
  0x37   : > { %2251 = vmatprep.subr.bf16.mxu1 %v3120_v41  ;;  %v3181_v19 = vld [vmem:[%s3590_s17 + $0x684] ss:$16 sps:$4 sm:$0xff]   ;;  %v3179_v21 = vld [vmem:[%s3590_s17 + $0x680] ss:$16 sps:$4 sm:$0xff]  }
  0x38   : > { %v3184_v22 = vld [vmem:[%s3590_s17 + $0x464] ss:$16 sps:$4 sm:$0xff]   ;;  %v3182_v24 = vld [vmem:[%s3590_s17 + $0x460] ss:$16 sps:$4 sm:$0xff]  }
  0x39   : > { %2211 = vmatpush2.bf16.msra.mxu0 %v3122_v42  ;;  %v3187_v23 = vld [vmem:[%s3590_s17 + $0x664] ss:$16 sps:$4 sm:$0xff]   ;;  %v3185_v25 = vld [vmem:[%s3590_s17 + $0x660] ss:$16 sps:$4 sm:$0xff]  }
  0x3a   : > { %2252 = vmatpush2.bf16.msra.mxu1 %v3123_v43  ;;  %2212 = vmatprep.subr.bf16.mxu0 %v3124_v44  ;;  %v3190_v26 = vld [vmem:[%s3590_s17 + $0x444] ss:$16 sps:$4 sm:$0xff]   ;;  %v3188_v28 = vld [vmem:[%s3590_s17 + $0x440] ss:$16 sps:$4 sm:$0xff]  }
  0x3b   : > { %2253 = vmatprep.subr.bf16.mxu1 %v3126_v45  ;;  %v3193_v27 = vld [vmem:[%s3590_s17 + $0x644] ss:$16 sps:$4 sm:$0xff]   ;;  %v3191_v29 = vld [vmem:[%s3590_s17 + $0x640] ss:$16 sps:$4 sm:$0xff]  }
  0x3c   : > { %v3196_v30 = vld [vmem:[%s3590_s17 + $0x424] ss:$16 sps:$4 sm:$0xff]   ;;  %v3194_v34 = vld [vmem:[%s3590_s17 + $0x420] ss:$16 sps:$4 sm:$0xff]  }
  0x3d   : > { %2213 = vmatpush2.bf16.msra.mxu0 %v3128_v49  ;;  %v3199_v31 = vld [vmem:[%s3590_s17 + $0x624] ss:$16 sps:$4 sm:$0xff]   ;;  %v3197_v35 = vld [vmem:[%s3590_s17 + $0x620] ss:$16 sps:$4 sm:$0xff]  }
  0x3e   : > { %2254 = vmatpush2.bf16.msra.mxu1 %v3129_v50  ;;  %2214 = vmatprep.subr.bf16.mxu0 %v3130_v52  ;;  %v3703_v32 = vld [vmem:[%s3640_s21 + $0x10] sm:$0xff] }
  0x3f   : > { %2255 = vmatprep.subr.bf16.mxu1 %v3132_v53  ;;  %v3712_v36 = vcombine.high %v3703_v32, %v3703_v32  ;;  %v3202_v38 = vld [vmem:[%s3590_s17 + $0x404] ss:$16 sps:$4 sm:$0xff]   ;;  %v3200_v40 = vld [vmem:[%s3590_s17 + $0x400] ss:$16 sps:$4 sm:$0xff]  }
  0x40   : > { %v3205_v39 = vld [vmem:[%s3590_s17 + $0x604] ss:$16 sps:$4 sm:$0xff]   ;;  %v3203_v41 = vld [vmem:[%s3590_s17 + $0x600] ss:$16 sps:$4 sm:$0xff]  }
  0x41   : > { %2215 = vmatpush2.bf16.msra.mxu0 %v3134_v54  ;;  %v3208_v42 = vld [vmem:[%s3590_s17 + $0x5e4] ss:$16 sps:$4 sm:$0xff]   ;;  %v3206_v44 = vld [vmem:[%s3590_s17 + $0x5e0] ss:$16 sps:$4 sm:$0xff]  }
  0x42   : > { %2256 = vmatpush2.bf16.msra.mxu1 %v3135_v55  ;;  %2216 = vmatprep.subr.bf16.mxu0 %v3136_v56  ;;  %v3211_v43 = vld [vmem:[%s3590_s17 + $0x7e4] ss:$16 sps:$4 sm:$0xff]   ;;  %v3209_v45 = vld [vmem:[%s3590_s17 + $0x7e0] ss:$16 sps:$4 sm:$0xff]  }
  0x43   : > { %2257 = vmatprep.subr.bf16.mxu1 %v3138_v57  ;;  %v3214_v46 = vld [vmem:[%s3590_s17 + $0x5c4] ss:$16 sps:$4 sm:$0xff]   ;;  %v3212_v49 = vld [vmem:[%s3590_s17 + $0x5c0] ss:$16 sps:$4 sm:$0xff]  }
  0x44   : > { %v3217_v48 = vld [vmem:[%s3590_s17 + $0x7c4] ss:$16 sps:$4 sm:$0xff]   ;;  %v3215_v50 = vld [vmem:[%s3590_s17 + $0x7c0] ss:$16 sps:$4 sm:$0xff]  }
  0x45   : > { %2217 = vmatpush2.bf16.msra.mxu0 %v3140_v58  ;;  %v3220_v52 = vld [vmem:[%s3590_s17 + $0x5a4] ss:$16 sps:$4 sm:$0xff]   ;;  %v3218_v54 = vld [vmem:[%s3590_s17 + $0x5a0] ss:$16 sps:$4 sm:$0xff]  }
  0x46   : > { %2258 = vmatpush2.bf16.msra.mxu1 %v3141_v59  ;;  %2218 = vmatprep.subr.bf16.mxu0 %v3142_v60  ;;  %v3223_v53 = vld [vmem:[%s3590_s17 + $0x7a4] ss:$16 sps:$4 sm:$0xff]   ;;  %v3221_v55 = vld [vmem:[%s3590_s17 + $0x7a0] ss:$16 sps:$4 sm:$0xff]  }
  0x47   : > { %2259 = vmatprep.subr.bf16.mxu1 %v3144_v61  ;;  %v3226_v56 = vld [vmem:[%s3590_s17 + $0x584] ss:$16 sps:$4 sm:$0xff]   ;;  %v3224_v58 = vld [vmem:[%s3590_s17 + $0x580] ss:$16 sps:$4 sm:$0xff]  }
  0x48   : > { %v3229_v57 = vld [vmem:[%s3590_s17 + $0x784] ss:$16 sps:$4 sm:$0xff]   ;;  %v3227_v59 = vld [vmem:[%s3590_s17 + $0x780] ss:$16 sps:$4 sm:$0xff]  }
  0x49   : > { %2219 = vmatpush2.bf16.msra.mxu0 %v3146_v62  ;;  %v3232_v60 = vld [vmem:[%s3590_s17 + $0x564] ss:$16 sps:$4 sm:$0xff]   ;;  %v3230_v62 = vld [vmem:[%s3590_s17 + $0x560] ss:$16 sps:$4 sm:$0xff]  }
  0x4a   : > { %2260 = vmatpush2.bf16.msra.mxu1 %v3147_v63  ;;  %2220 = vmatprep.subr.bf16.mxu0 %v3148_v0  ;;  %v3235_v61 = vld [vmem:[%s3590_s17 + $0x764] ss:$16 sps:$4 sm:$0xff]   ;;  %v3233_v63 = vld [vmem:[%s3590_s17 + $0x760] ss:$16 sps:$4 sm:$0xff]  }
  0x4b   : > { %2261 = vmatprep.subr.bf16.mxu1 %v3150_v1  ;;  %v3238_v0 = vld [vmem:[%s3590_s17 + $0x544] ss:$16 sps:$4 sm:$0xff]  }
  0x4c   : > { %v3241_v1 = vld [vmem:[%s3590_s17 + $0x744] ss:$16 sps:$4 sm:$0xff]  }
  0x4d   : > { %2221 = vmatpush2.bf16.msra.mxu0 %v3152_v2  ;;  %v3236_v2 = vld [vmem:[%s3590_s17 + $0x540] ss:$16 sps:$4 sm:$0xff]  }
  0x4e   : > { %2262 = vmatpush2.bf16.msra.mxu1 %v3153_v3  ;;  %2272 = vmatprep.subr.bf16.mxu0 %v3160_v4  ;;  %v3239_v3 = vld [vmem:[%s3590_s17 + $0x740] ss:$16 sps:$4 sm:$0xff]   ;;  %v3244_v4 = vld [vmem:[%s3590_s17 + $0x524] ss:$16 sps:$4 sm:$0xff]  }
  0x4f   : > { %2313 = vmatprep.subr.bf16.mxu1 %v3163_v5  ;;  %v3247_v5 = vld [vmem:[%s3590_s17 + $0x724] ss:$16 sps:$4 sm:$0xff]  }
  0x50   : > { %2223 = vmatmul.mubr.bf16.vlgmr.msra.gmra.mxu0 %v3672_v6 }
  0x51   : > { %2264 = vmatmul.mubr.bf16.vlgmr.msra.gmra.mxu1 %v3674_v7  ;;  %2273 = vmatpush1.bf16.msra.mxu0 %v3158_v8  ;;  %v3242_v8 = vld [vmem:[%s3590_s17 + $0x520] ss:$16 sps:$4 sm:$0xff]  }
  0x52   : > { %2314 = vmatpush1.bf16.msra.mxu1 %v3161_v9  ;;  %2274 = vmatprep.subr.bf16.mxu0 %v3166_v10  ;;  %v3245_v9 = vld [vmem:[%s3590_s17 + $0x720] ss:$16 sps:$4 sm:$0xff]   ;;  %v3250_v10 = vld [vmem:[%s3590_s17 + $0x504] ss:$16 sps:$4 sm:$0xff]  }
  0x53   : > { %2315 = vmatprep.subr.bf16.mxu1 %v3169_v11  ;;  %2304 = vmatprep.mubr.bf16.mxu0 %v3712_v36  ;;  %v3253_v11 = vld [vmem:[%s3590_s17 + $0x704] ss:$16 sps:$4 sm:$0xff]  }
  0x54   : > { %2345 = vmatprep.mubr.bf16.mxu1 %v3716_v37 }
  0x55   : > { %2275 = vmatpush1.bf16.msra.mxu0 %v3164_v12  ;;  %v3248_v12 = vld [vmem:[%s3590_s17 + $0x500] ss:$16 sps:$4 sm:$0xff]  }
  0x56   : > { %2316 = vmatpush1.bf16.msra.mxu1 %v3167_v13  ;;  %2276 = vmatprep.subr.bf16.mxu0 %v3172_v14  ;;  %v3251_v13 = vld [vmem:[%s3590_s17 + $0x700] ss:$16 sps:$4 sm:$0xff]   ;;  %v3260_v14 = vld [vmem:[%s3590_s17 + $0x8e4] ss:$16 sps:$4 sm:$0xff]  }
  0x57   : > { %2317 = vmatprep.subr.bf16.mxu1 %v3175_v15  ;;  %v3263_v15 = vld [vmem:[%s3590_s17 + $0xec] ss:$16 sps:$4 sm:$0xff]  }
  0x59   : > { %2277 = vmatpush1.bf16.msra.mxu0 %v3170_v16  ;;  %v3760_v16 = vcombine.low %v3703_v32, %v3703_v32  ;;  %v3276_v32 = vld [vmem:[%s3590_s17 + $0x880] ss:$16 sps:$4 sm:$0xff]  }
  0x5a   : > { %2318 = vmatpush1.bf16.msra.mxu1 %v3173_v17  ;;  %2278 = vmatprep.subr.bf16.mxu0 %v3178_v18  ;;  %v3764_v17 = vcombine.low %v3706_v33, %v3706_v33  ;;  %v3258_v18 = vld [vmem:[%s3590_s17 + $0x8e0] ss:$16 sps:$4 sm:$0xff]   ;;  %v3279_v33 = vld [vmem:[%s3590_s17 + $0x88] ss:$16 sps:$4 sm:$0xff]  }
  0x5b   : > { %2319 = vmatprep.subr.bf16.mxu1 %v3181_v19  ;;  %v3261_v19 = vld [vmem:[%s3590_s17 + $0xe8] ss:$16 sps:$4 sm:$0xff]  }
  0x5d   : > { %2279 = vmatpush1.bf16.msra.mxu0 %v3176_v20  ;;  %v3266_v20 = vld [vmem:[%s3590_s17 + $0x8c4] ss:$16 sps:$4 sm:$0xff]  }
  0x5e   : > { %2320 = vmatpush1.bf16.msra.mxu1 %v3179_v21  ;;  %2280 = vmatprep.subr.bf16.mxu0 %v3184_v22  ;;  %v3269_v21 = vld [vmem:[%s3590_s17 + $0xcc] ss:$16 sps:$4 sm:$0xff]   ;;  %v3771_v22 = vld [vmem:[%s3640_s21 + $0x20] sm:$0xff] }
  0x5f   : > { %2321 = vmatprep.subr.bf16.mxu1 %v3187_v23  ;;  %v3775_v23 = vcombine.high %v3771_v22, %v3771_v22 }
  0x61   : > { %2281 = vmatpush1.bf16.msra.mxu0 %v3182_v24  ;;  %v3264_v24 = vld [vmem:[%s3590_s17 + $0x8c0] ss:$16 sps:$4 sm:$0xff]  }
  0x62   : > { %2322 = vmatpush1.bf16.msra.mxu1 %v3185_v25  ;;  %2282 = vmatprep.subr.bf16.mxu0 %v3190_v26  ;;  %v3267_v25 = vld [vmem:[%s3590_s17 + $0xc8] ss:$16 sps:$4 sm:$0xff]   ;;  %v3272_v26 = vld [vmem:[%s3590_s17 + $0x8a4] ss:$16 sps:$4 sm:$0xff]  }
  0x63   : > { %2323 = vmatprep.subr.bf16.mxu1 %v3193_v27  ;;  %v3275_v27 = vld [vmem:[%s3590_s17 + $0xac] ss:$16 sps:$4 sm:$0xff]  }
  0x65   : > { %2283 = vmatpush1.bf16.msra.mxu0 %v3188_v28  ;;  %v3270_v28 = vld [vmem:[%s3590_s17 + $0x8a0] ss:$16 sps:$4 sm:$0xff]  }
  0x66   : > { %2324 = vmatpush1.bf16.msra.mxu1 %v3191_v29  ;;  %2284 = vmatprep.subr.bf16.mxu0 %v3196_v30  ;;  %v3273_v29 = vld [vmem:[%s3590_s17 + $0xa8] ss:$16 sps:$4 sm:$0xff]   ;;  %v3278_v30 = vld [vmem:[%s3590_s17 + $0x884] ss:$16 sps:$4 sm:$0xff]  }
  0x67   : > { %2325 = vmatprep.subr.bf16.mxu1 %v3199_v31  ;;  %v3281_v31 = vld [vmem:[%s3590_s17 + $0x8c] ss:$16 sps:$4 sm:$0xff]  }
  0x69   : > { %2285 = vmatpush1.bf16.msra.mxu0 %v3194_v34  ;;  %v3287_v34 = vld [vmem:[%s3590_s17 + $0x6c] ss:$16 sps:$4 sm:$0xff]  }
  0x6a   : > { %2326 = vmatpush1.bf16.msra.mxu1 %v3197_v35  ;;  %2286 = vmatprep.subr.bf16.mxu0 %v3202_v38  ;;  %v3282_v35 = vld [vmem:[%s3590_s17 + $0x860] ss:$16 sps:$4 sm:$0xff]   ;;  %v3285_v38 = vld [vmem:[%s3590_s17 + $0x68] ss:$16 sps:$4 sm:$0xff]  }
  0x6b   : > { %2327 = vmatprep.subr.bf16.mxu1 %v3205_v39  ;;  %v3290_v39 = vld [vmem:[%s3590_s17 + $0x844] ss:$16 sps:$4 sm:$0xff]  }
  0x6d   : > { %2287 = vmatpush1.bf16.msra.mxu0 %v3200_v40  ;;  %v3293_v40 = vld [vmem:[%s3590_s17 + $0x4c] ss:$16 sps:$4 sm:$0xff]  }
  0x6e   : > { %2328 = vmatpush1.bf16.msra.mxu1 %v3203_v41  ;;  %2288 = vmatprep.subr.bf16.mxu0 %v3208_v42  ;;  %v3288_v41 = vld [vmem:[%s3590_s17 + $0x840] ss:$16 sps:$4 sm:$0xff]   ;;  %v3291_v42 = vld [vmem:[%s3590_s17 + $0x48] ss:$16 sps:$4 sm:$0xff]  }
  0x6f   : > { %2329 = vmatprep.subr.bf16.mxu1 %v3211_v43  ;;  %v3296_v43 = vld [vmem:[%s3590_s17 + $0x824] ss:$16 sps:$4 sm:$0xff]  }
  0x71   : > { %2289 = vmatpush2.bf16.msra.mxu0 %v3206_v44  ;;  %v3299_v44 = vld [vmem:[%s3590_s17 + $0x2c] ss:$16 sps:$4 sm:$0xff]  }
  0x72   : > { %2330 = vmatpush2.bf16.msra.mxu1 %v3209_v45  ;;  %2290 = vmatprep.subr.bf16.mxu0 %v3214_v46  ;;  %v3294_v45 = vld [vmem:[%s3590_s17 + $0x820] ss:$16 sps:$4 sm:$0xff]   ;;  %v3297_v46 = vld [vmem:[%s3590_s17 + $0x28] ss:$16 sps:$4 sm:$0xff]  }
  0x73   : > { %2331 = vmatprep.subr.bf16.mxu1 %v3217_v48  ;;  %v3302_v48 = vld [vmem:[%s3590_s17 + $0x804] ss:$16 sps:$4 sm:$0xff]  }
  0x75   : > { %2291 = vmatpush2.bf16.msra.mxu0 %v3212_v49  ;;  %v3305_v49 = vld [vmem:[%s3590_s17 + $0xc] ss:$16 sps:$4 sm:$0xff]  }
  0x76   : > { %2332 = vmatpush2.bf16.msra.mxu1 %v3215_v50  ;;  %2292 = vmatprep.subr.bf16.mxu0 %v3220_v52  ;;  %v3300_v50 = vld [vmem:[%s3590_s17 + $0x800] ss:$16 sps:$4 sm:$0xff]   ;;  %v3303_v52 = vld [vmem:[%s3590_s17 + $0x8] ss:$16 sps:$4 sm:$0xff]  }
  0x77   : > { %2333 = vmatprep.subr.bf16.mxu1 %v3223_v53  ;;  %v3308_v53 = vld [vmem:[%s3590_s17 + $0x9e4] ss:$16 sps:$4 sm:$0xff]  }
  0x79   : > { %2293 = vmatpush2.bf16.msra.mxu0 %v3218_v54  ;;  %v3311_v54 = vld [vmem:[%s3590_s17 + $0x1ec] ss:$16 sps:$4 sm:$0xff]  }
  0x7a   : > { %2334 = vmatpush2.bf16.msra.mxu1 %v3221_v55  ;;  %2294 = vmatprep.subr.bf16.mxu0 %v3226_v56  ;;  %v3306_v55 = vld [vmem:[%s3590_s17 + $0x9e0] ss:$16 sps:$4 sm:$0xff]   ;;  %v3309_v56 = vld [vmem:[%s3590_s17 + $0x1e8] ss:$16 sps:$4 sm:$0xff]  }
  0x7b   : > { %2335 = vmatprep.subr.bf16.mxu1 %v3229_v57  ;;  %v3314_v57 = vld [vmem:[%s3590_s17 + $0x9c4] ss:$16 sps:$4 sm:$0xff]  }
  0x7d   : > { %2295 = vmatpush2.bf16.msra.mxu0 %v3224_v58  ;;  %v3317_v58 = vld [vmem:[%s3590_s17 + $0x1cc] ss:$16 sps:$4 sm:$0xff]  }
  0x7e   : > { %2336 = vmatpush2.bf16.msra.mxu1 %v3227_v59  ;;  %2296 = vmatprep.subr.bf16.mxu0 %v3232_v60  ;;  %v3312_v59 = vld [vmem:[%s3590_s17 + $0x9c0] ss:$16 sps:$4 sm:$0xff]   ;;  %v3315_v60 = vld [vmem:[%s3590_s17 + $0x1c8] ss:$16 sps:$4 sm:$0xff]  }
  0x7f   : > { %2337 = vmatprep.subr.bf16.mxu1 %v3235_v61  ;;  %v3320_v61 = vld [vmem:[%s3590_s17 + $0x9a4] ss:$16 sps:$4 sm:$0xff]  }
  0x81   : > { %2297 = vmatpush2.bf16.msra.mxu0 %v3230_v62  ;;  %v3323_v62 = vld [vmem:[%s3590_s17 + $0x1ac] ss:$16 sps:$4 sm:$0xff]  }
  0x82   : > { %2338 = vmatpush2.bf16.msra.mxu1 %v3233_v63  ;;  %2298 = vmatprep.subr.bf16.mxu0 %v3238_v0  ;;  %v3318_v63 = vld [vmem:[%s3590_s17 + $0x9a0] ss:$16 sps:$4 sm:$0xff]   ;;  %v3321_v0 = vld [vmem:[%s3590_s17 + $0x1a8] ss:$16 sps:$4 sm:$0xff]  }
  0x83   : > { %2339 = vmatprep.subr.bf16.mxu1 %v3241_v1  ;;  %v3326_v1 = vld [vmem:[%s3590_s17 + $0x984] ss:$16 sps:$4 sm:$0xff]  }
  0x85   : > { %2299 = vmatpush2.bf16.msra.mxu0 %v3236_v2  ;;  %v3329_v2 = vld [vmem:[%s3590_s17 + $0x18c] ss:$16 sps:$4 sm:$0xff]  }
  0x86   : > { %2340 = vmatpush2.bf16.msra.mxu1 %v3239_v3  ;;  %2300 = vmatprep.subr.bf16.mxu0 %v3244_v4  ;;  %v3324_v3 = vld [vmem:[%s3590_s17 + $0x980] ss:$16 sps:$4 sm:$0xff]   ;;  %v3327_v4 = vld [vmem:[%s3590_s17 + $0x188] ss:$16 sps:$4 sm:$0xff]  }
  0x87   : > { %2341 = vmatprep.subr.bf16.mxu1 %v3247_v5  ;;  %v3332_v5 = vld [vmem:[%s3590_s17 + $0x964] ss:$16 sps:$4 sm:$0xff]  }
  0x89   : > { %2301 = vmatpush2.bf16.msra.mxu0 %v3242_v8  ;;  %v3335_v8 = vld [vmem:[%s3590_s17 + $0x16c] ss:$16 sps:$4 sm:$0xff]  }
  0x8a   : > { %2342 = vmatpush2.bf16.msra.mxu1 %v3245_v9  ;;  %2302 = vmatprep.subr.bf16.mxu0 %v3250_v10  ;;  %v3330_v9 = vld [vmem:[%s3590_s17 + $0x960] ss:$16 sps:$4 sm:$0xff]   ;;  %v3333_v10 = vld [vmem:[%s3590_s17 + $0x168] ss:$16 sps:$4 sm:$0xff]  }
  0x8b   : > { %2343 = vmatprep.subr.bf16.mxu1 %v3253_v11  ;;  %v3338_v11 = vld [vmem:[%s3590_s17 + $0x944] ss:$16 sps:$4 sm:$0xff]  }
  0x8d   : > { %2303 = vmatpush2.bf16.msra.mxu0 %v3248_v12  ;;  %v3341_v12 = vld [vmem:[%s3590_s17 + $0x14c] ss:$16 sps:$4 sm:$0xff]  }
  0x8e   : > { %2344 = vmatpush2.bf16.msra.mxu1 %v3251_v13  ;;  %2354 = vmatprep.subr.bf16.mxu0 %v3260_v14  ;;  %v3336_v13 = vld [vmem:[%s3590_s17 + $0x940] ss:$16 sps:$4 sm:$0xff]   ;;  %v3339_v14 = vld [vmem:[%s3590_s17 + $0x148] ss:$16 sps:$4 sm:$0xff]  }
  0x8f   : > { %2395 = vmatprep.subr.bf16.mxu1 %v3263_v15  ;;  %v3344_v15 = vld [vmem:[%s3590_s17 + $0x924] ss:$16 sps:$4 sm:$0xff]  }
  0x90   : > { %2305 = vmatmul.mubr.bf16.vlgmr.msra.gmra.mxu0 %v3760_v16 }
  0x91   : > { %2346 = vmatmul.mubr.bf16.vlgmr.msra.gmra.mxu1 %v3764_v17  ;;  %2355 = vmatpush1.bf16.msra.mxu0 %v3258_v18  ;;  %v3347_v18 = vld [vmem:[%s3590_s17 + $0x12c] ss:$16 sps:$4 sm:$0xff]  }
  0x92   : > { %2396 = vmatpush1.bf16.msra.mxu1 %v3261_v19  ;;  %2356 = vmatprep.subr.bf16.mxu0 %v3266_v20  ;;  %v3342_v19 = vld [vmem:[%s3590_s17 + $0x920] ss:$16 sps:$4 sm:$0xff]   ;;  %v3345_v20 = vld [vmem:[%s3590_s17 + $0x128] ss:$16 sps:$4 sm:$0xff]  }
  0x93   : > { %2397 = vmatprep.subr.bf16.mxu1 %v3269_v21  ;;  %2386 = vmatprep.mubr.bf16.mxu0 %v3775_v23  ;;  %v3350_v21 = vld [vmem:[%s3590_s17 + $0x904] ss:$16 sps:$4 sm:$0xff]  }
  0x94   : > { %2427 = vmatprep.mubr.bf16.mxu1 %v3645_v47  ;;  %v3284_v47 = vld [vmem:[%s3590_s17 + $0x864] ss:$16 sps:$4 sm:$0xff]  }
  0x95   : > { %2357 = vmatpush1.bf16.msra.mxu0 %v3264_v24  ;;  %v3353_v24 = vld [vmem:[%s3590_s17 + $0x10c] ss:$16 sps:$4 sm:$0xff]  }
  0x96   : > { %2398 = vmatpush1.bf16.msra.mxu1 %v3267_v25  ;;  %2358 = vmatprep.subr.bf16.mxu0 %v3272_v26  ;;  %v3348_v25 = vld [vmem:[%s3590_s17 + $0x900] ss:$16 sps:$4 sm:$0xff]   ;;  %v3351_v26 = vld [vmem:[%s3590_s17 + $0x108] ss:$16 sps:$4 sm:$0xff]  }
  0x97   : > { %2399 = vmatprep.subr.bf16.mxu1 %v3275_v27  ;;  %v3358_v27 = vld [vmem:[%s3590_s17 + $0x2ec] ss:$16 sps:$4 sm:$0xff]  }
  0x99   : > { %2359 = vmatpush1.bf16.msra.mxu0 %v3270_v28  ;;  %v3361_v28 = vld [vmem:[%s3590_s17 + $0x4ec] ss:$16 sps:$4 sm:$0xff]  }
  0x9a   : > { %2400 = vmatpush1.bf16.msra.mxu1 %v3273_v29  ;;  %2360 = vmatprep.subr.bf16.mxu0 %v3278_v30  ;;  %v3843_v29 = vcombine.low %v3771_v22, %v3771_v22  ;;  %v3356_v30 = vld [vmem:[%s3590_s17 + $0x2e8] ss:$16 sps:$4 sm:$0xff]  }
  0x9b   : > { %2401 = vmatprep.subr.bf16.mxu1 %v3281_v31  ;;  %v3359_v31 = vld [vmem:[%s3590_s17 + $0x4e8] ss:$16 sps:$4 sm:$0xff]  }
  0x9c   : > { %v3362_v22 = vld [vmem:[%s3590_s17 + $0x2c8] ss:$16 sps:$4 sm:$0xff]  }
  0x9d   : > { %2361 = vmatpush1.bf16.msra.mxu0 %v3276_v32  ;;  %v3364_v32 = vld [vmem:[%s3590_s17 + $0x2cc] ss:$16 sps:$4 sm:$0xff]  }
  0x9e   : > { %2402 = vmatpush1.bf16.msra.mxu1 %v3279_v33  ;;  %2362 = vmatprep.subr.bf16.mxu0 %v3284_v47  ;;  %v3367_v33 = vld [vmem:[%s3590_s17 + $0x4cc] ss:$16 sps:$4 sm:$0xff]   ;;  %v3365_v47 = vld [vmem:[%s3590_s17 + $0x4c8] ss:$16 sps:$4 sm:$0xff]  }
  0x9f   : > { %2403 = vmatprep.subr.bf16.mxu1 %v3287_v34  ;;  %v3370_v34 = vld [vmem:[%s3590_s17 + $0x2ac] ss:$16 sps:$4 sm:$0xff]  }
  0xa1   : > { %2363 = vmatpush1.bf16.msra.mxu0 %v3282_v35  ;;  %v3373_v35 = vld [vmem:[%s3590_s17 + $0x4ac] ss:$16 sps:$4 sm:$0xff]  }
  0xa2   : > { %2404 = vmatpush1.bf16.msra.mxu1 %v3285_v38  ;;  %2364 = vmatprep.subr.bf16.mxu0 %v3290_v39  ;;  %v3371_v38 = vld [vmem:[%s3590_s17 + $0x4a8] ss:$16 sps:$4 sm:$0xff]   ;;  %v3376_v39 = vld [vmem:[%s3590_s17 + $0x28c] ss:$16 sps:$4 sm:$0xff]  }
  0xa3   : > { %2405 = vmatprep.subr.bf16.mxu1 %v3293_v40  ;;  %v3379_v40 = vld [vmem:[%s3590_s17 + $0x48c] ss:$16 sps:$4 sm:$0xff]  }
  0xa5   : > { %2365 = vmatpush1.bf16.msra.mxu0 %v3288_v41  ;;  %v3374_v41 = vld [vmem:[%s3590_s17 + $0x288] ss:$16 sps:$4 sm:$0xff]  }
  0xa6   : > { %2406 = vmatpush1.bf16.msra.mxu1 %v3291_v42  ;;  %2366 = vmatprep.subr.bf16.mxu0 %v3296_v43  ;;  %v3385_v42 = vld [vmem:[%s3590_s17 + $0x46c] ss:$16 sps:$4 sm:$0xff]   ;;  %v3380_v43 = vld [vmem:[%s3590_s17 + $0x268] ss:$16 sps:$4 sm:$0xff]  }
  0xa7   : > { %2407 = vmatprep.subr.bf16.mxu1 %v3299_v44  ;;  %v3383_v44 = vld [vmem:[%s3590_s17 + $0x468] ss:$16 sps:$4 sm:$0xff]  }
  0xa9   : > { %2367 = vmatpush1.bf16.msra.mxu0 %v3294_v45  ;;  %v3388_v45 = vld [vmem:[%s3590_s17 + $0x24c] ss:$16 sps:$4 sm:$0xff]  }
  0xaa   : > { %2408 = vmatpush1.bf16.msra.mxu1 %v3297_v46  ;;  %2368 = vmatprep.subr.bf16.mxu0 %v3302_v48  ;;  %v3391_v46 = vld [vmem:[%s3590_s17 + $0x44c] ss:$16 sps:$4 sm:$0xff]   ;;  %v3386_v48 = vld [vmem:[%s3590_s17 + $0x248] ss:$16 sps:$4 sm:$0xff]  }
  0xab   : > { %2409 = vmatprep.subr.bf16.mxu1 %v3305_v49  ;;  %v3389_v49 = vld [vmem:[%s3590_s17 + $0x448] ss:$16 sps:$4 sm:$0xff]  }
  0xad   : > { %2369 = vmatpush1.bf16.msra.mxu0 %v3300_v50  ;;  %v3394_v50 = vld [vmem:[%s3590_s17 + $0x22c] ss:$16 sps:$4 sm:$0xff]  }
  0xae   : > { %2410 = vmatpush1.bf16.msra.mxu1 %v3303_v52  ;;  %2370 = vmatprep.subr.bf16.mxu0 %v3308_v53  ;;  %v3397_v52 = vld [vmem:[%s3590_s17 + $0x42c] ss:$16 sps:$4 sm:$0xff]   ;;  %v3392_v53 = vld [vmem:[%s3590_s17 + $0x228] ss:$16 sps:$4 sm:$0xff]  }
  0xaf   : > { %2411 = vmatprep.subr.bf16.mxu1 %v3311_v54  ;;  %v3395_v54 = vld [vmem:[%s3590_s17 + $0x428] ss:$16 sps:$4 sm:$0xff]  }
  0xb1   : > { %2371 = vmatpush2.bf16.msra.mxu0 %v3306_v55  ;;  %v3400_v55 = vld [vmem:[%s3590_s17 + $0x20c] ss:$16 sps:$4 sm:$0xff]  }
  0xb2   : > { %2412 = vmatpush2.bf16.msra.mxu1 %v3309_v56  ;;  %2372 = vmatprep.subr.bf16.mxu0 %v3314_v57  ;;  %v3403_v56 = vld [vmem:[%s3590_s17 + $0x40c] ss:$16 sps:$4 sm:$0xff]   ;;  %v3398_v57 = vld [vmem:[%s3590_s17 + $0x208] ss:$16 sps:$4 sm:$0xff]  }
  0xb3   : > { %2413 = vmatprep.subr.bf16.mxu1 %v3317_v58  ;;  %v3401_v58 = vld [vmem:[%s3590_s17 + $0x408] ss:$16 sps:$4 sm:$0xff]  }
  0xb5   : > { %2373 = vmatpush2.bf16.msra.mxu0 %v3312_v59  ;;  %v3406_v59 = vld [vmem:[%s3590_s17 + $0x3ec] ss:$16 sps:$4 sm:$0xff]  }
  0xb6   : > { %2414 = vmatpush2.bf16.msra.mxu1 %v3315_v60  ;;  %2374 = vmatprep.subr.bf16.mxu0 %v3320_v61  ;;  %v3409_v60 = vld [vmem:[%s3590_s17 + $0x5ec] ss:$16 sps:$4 sm:$0xff]   ;;  %v3404_v61 = vld [vmem:[%s3590_s17 + $0x3e8] ss:$16 sps:$4 sm:$0xff]  }
  0xb7   : > { %2415 = vmatprep.subr.bf16.mxu1 %v3323_v62  ;;  %v3407_v62 = vld [vmem:[%s3590_s17 + $0x5e8] ss:$16 sps:$4 sm:$0xff]  }
  0xb9   : > { %2375 = vmatpush2.bf16.msra.mxu0 %v3318_v63  ;;  %v3412_v63 = vld [vmem:[%s3590_s17 + $0x3cc] ss:$16 sps:$4 sm:$0xff]  }
  0xba   : > { %2416 = vmatpush2.bf16.msra.mxu1 %v3321_v0  ;;  %2376 = vmatprep.subr.bf16.mxu0 %v3326_v1  ;;  %v3415_v0 = vld [vmem:[%s3590_s17 + $0x5cc] ss:$16 sps:$4 sm:$0xff]   ;;  %v3410_v1 = vld [vmem:[%s3590_s17 + $0x3c8] ss:$16 sps:$4 sm:$0xff]  }
  0xbb   : > { %2417 = vmatprep.subr.bf16.mxu1 %v3329_v2  ;;  %v3413_v2 = vld [vmem:[%s3590_s17 + $0x5c8] ss:$16 sps:$4 sm:$0xff]  }
  0xbd   : > { %2377 = vmatpush2.bf16.msra.mxu0 %v3324_v3  ;;  %v3418_v3 = vld [vmem:[%s3590_s17 + $0x3ac] ss:$16 sps:$4 sm:$0xff]  }
  0xbe   : > { %2418 = vmatpush2.bf16.msra.mxu1 %v3327_v4  ;;  %2378 = vmatprep.subr.bf16.mxu0 %v3332_v5  ;;  %v3421_v4 = vld [vmem:[%s3590_s17 + $0x5ac] ss:$16 sps:$4 sm:$0xff]   ;;  %v3416_v5 = vld [vmem:[%s3590_s17 + $0x3a8] ss:$16 sps:$4 sm:$0xff]  }
  0xbf   : > { %2419 = vmatprep.subr.bf16.mxu1 %v3335_v8  ;;  %v3419_v8 = vld [vmem:[%s3590_s17 + $0x5a8] ss:$16 sps:$4 sm:$0xff]  }
  0xc1   : > { %2379 = vmatpush2.bf16.msra.mxu0 %v3330_v9  ;;  %v3424_v9 = vld [vmem:[%s3590_s17 + $0x38c] ss:$16 sps:$4 sm:$0xff]  }
  0xc2   : > { %2420 = vmatpush2.bf16.msra.mxu1 %v3333_v10  ;;  %2380 = vmatprep.subr.bf16.mxu0 %v3338_v11  ;;  %v3427_v10 = vld [vmem:[%s3590_s17 + $0x58c] ss:$16 sps:$4 sm:$0xff]   ;;  %v3422_v11 = vld [vmem:[%s3590_s17 + $0x388] ss:$16 sps:$4 sm:$0xff]  }
  0xc3   : > { %2421 = vmatprep.subr.bf16.mxu1 %v3341_v12  ;;  %v3425_v12 = vld [vmem:[%s3590_s17 + $0x588] ss:$16 sps:$4 sm:$0xff]  }
  0xc5   : > { %2381 = vmatpush2.bf16.msra.mxu0 %v3336_v13  ;;  %v3430_v13 = vld [vmem:[%s3590_s17 + $0x36c] ss:$16 sps:$4 sm:$0xff]  }
  0xc6   : > { %2422 = vmatpush2.bf16.msra.mxu1 %v3339_v14  ;;  %2382 = vmatprep.subr.bf16.mxu0 %v3344_v15  ;;  %v3433_v14 = vld [vmem:[%s3590_s17 + $0x56c] ss:$16 sps:$4 sm:$0xff]   ;;  %v3428_v15 = vld [vmem:[%s3590_s17 + $0x368] ss:$16 sps:$4 sm:$0xff]  }
  0xc7   : > { %2423 = vmatprep.subr.bf16.mxu1 %v3347_v18  ;;  %v3431_v18 = vld [vmem:[%s3590_s17 + $0x568] ss:$16 sps:$4 sm:$0xff]  }
  0xc9   : > { %2383 = vmatpush2.bf16.msra.mxu0 %v3342_v19  ;;  %v3436_v19 = vld [vmem:[%s3590_s17 + $0x34c] ss:$16 sps:$4 sm:$0xff]  }
  0xca   : > { %2424 = vmatpush2.bf16.msra.mxu1 %v3345_v20  ;;  %2384 = vmatprep.subr.bf16.mxu0 %v3350_v21  ;;  %v3439_v20 = vld [vmem:[%s3590_s17 + $0x54c] ss:$16 sps:$4 sm:$0xff]   ;;  %v3434_v21 = vld [vmem:[%s3590_s17 + $0x348] ss:$16 sps:$4 sm:$0xff]  }
  0xcb   : > { %2425 = vmatprep.subr.bf16.mxu1 %v3353_v24  ;;  %v3437_v24 = vld [vmem:[%s3590_s17 + $0x548] ss:$16 sps:$4 sm:$0xff]  }
  0xcd   : > { %2385 = vmatpush2.bf16.msra.mxu0 %v3348_v25  ;;  %v535_v25 = vlaneseq }
  0xce   : > { %2426 = vmatpush2.bf16.msra.mxu1 %v3351_v26  ;;  %2436 = vmatprep.subr.bf16.mxu0 %v3358_v27  ;;  %v3442_v26 = vld [vmem:[%s3590_s17 + $0x32c] ss:$16 sps:$4 sm:$0xff]  }
  0xcf   : > { %2477 = vmatprep.subr.bf16.mxu1 %v3361_v28  ;;  %v3445_v27 = vld [vmem:[%s3590_s17 + $0x52c] ss:$16 sps:$4 sm:$0xff]   ;;  %v3440_v28 = vld [vmem:[%s3590_s17 + $0x328] ss:$16 sps:$4 sm:$0xff]  }
  0xd0   : > { %2387 = vmatmul.mubr.bf16.vlgmr.msra.gmra.mxu0 %v3843_v29 }
  0xd1   : > { %2428 = vmatmul.mubr.bf16.vlgmr.msra.gmra.mxu1 %v3672_v6  ;;  %2437 = vmatpush1.bf16.msra.mxu0 %v3356_v30  ;;  %v3368_v6 = vld [vmem:[%s3590_s17 + $0x2a8] ss:$16 sps:$4 sm:$0xff]  }
  0xd2   : > { %2478 = vmatpush1.bf16.msra.mxu1 %v3359_v31  ;;  %2438 = vmatprep.subr.bf16.mxu0 %v3364_v32  ;;  %v3443_v30 = vld [vmem:[%s3590_s17 + $0x528] ss:$16 sps:$4 sm:$0xff]   ;;  %v3908_v31 = vshrl.u32 %v535_v25, 7  ;;  %v3448_v32 = vld [vmem:[%s3590_s17 + $0x30c] ss:$16 sps:$4 sm:$0xff]  }
  0xd3   : > { %2479 = vmatprep.subr.bf16.mxu1 %v3367_v33  ;;  %2468 = vmatprep.mubr.bf16.mxu0 %v3650_v51  ;;  %v3377_v51 = vld [vmem:[%s3590_s17 + $0x488] ss:$16 sps:$4 sm:$0xff]   ;;  %v3451_v33 = vld [vmem:[%s3590_s17 + $0x50c] ss:$16 sps:$4 sm:$0xff]  }
  0xd4   : > { %2509 = vmatprep.mubr.bf16.mxu1 %v3712_v36  ;;  %v3382_v36 = vld [vmem:[%s3590_s17 + $0x26c] ss:$16 sps:$4 sm:$0xff]   ;;  %v3503_v25 = vld [vmem:[%s3590_s17 + $0x9e8] ss:$16 sps:$4 sm:$0xff]  }
  0xd5   : > { %2439 = vmatpush1.bf16.msra.mxu0 %v3362_v22  ;;  %v3446_v22 = vld [vmem:[%s3590_s17 + $0x308] ss:$16 sps:$4 sm:$0xff]  }
  0xd6   : > { %2480 = vmatpush1.bf16.msra.mxu1 %v3365_v47  ;;  %2440 = vmatprep.subr.bf16.mxu0 %v3370_v34  ;;  %v3449_v47 = vld [vmem:[%s3590_s17 + $0x508] ss:$16 sps:$4 sm:$0xff]   ;;  %v537_v34 = vsub.s32 0, %v3908_v31 }
  0xd7   : > { %2481 = vmatprep.subr.bf16.mxu1 %v3373_v35  ;;  %v3918_v35 = vld [vmem:[%s202_s25] sm:$0xf] }
  0xd9   : > { %2441 = vmatpush1.bf16.msra.mxu0 %v3368_v6  ;;  %v3454_v6 = vld [vmem:[%s3590_s17 + $0x6ec] ss:$16 sps:$4 sm:$0xff]  }
  0xda   : > { %2482 = vmatpush1.bf16.msra.mxu1 %v3371_v38  ;;  %2442 = vmatprep.subr.bf16.mxu0 %v3376_v39  ;;  %v3457_v38 = vld [vmem:[%s3590_s17 + $0x8ec] ss:$16 sps:$4 sm:$0xff]   ;;  %v541_v39 = vsub.s32 1, %v3908_v31 }
  0xdb   : > { %2483 = vmatprep.subr.bf16.mxu1 %v3379_v40  ;;  %v538_v40 = vrot.slane %v3918_v35, %v537_v34  ;;  %v3520_v34 = vld [vmem:[%s3590_s17 + $0x78c] ss:$16 sps:$4 sm:$0xff]  }
  0xdd   : > { %2443 = vmatpush1.bf16.msra.mxu0 %v3374_v41  ;;  %v3452_v41 = vld [vmem:[%s3590_s17 + $0x6e8] ss:$16 sps:$4 sm:$0xff]  }
  0xde   : > { %2484 = vmatpush1.bf16.msra.mxu1 %v3377_v51  ;;  %2444 = vmatprep.subr.bf16.mxu0 %v3382_v36  ;;  %v3455_v51 = vld [vmem:[%s3590_s17 + $0x8e8] ss:$16 sps:$4 sm:$0xff]   ;;  %v3460_v36 = vld [vmem:[%s3590_s17 + $0x6cc] ss:$16 sps:$4 sm:$0xff]  }
  0xdf   : > { %2485 = vmatprep.subr.bf16.mxu1 %v3385_v42  ;;  %v3463_v42 = vld [vmem:[%s3590_s17 + $0x8cc] ss:$16 sps:$4 sm:$0xff]  }
  0xe1   : > { %2445 = vmatpush1.bf16.msra.mxu0 %v3380_v43  ;;  %v542_v43 = vrot.slane %v3918_v35, %v541_v39  ;;  %v3521_v39 = vld [vmem:[%s3590_s17 + $0x988] ss:$16 sps:$4 sm:$0xff]  }
  0xe2   : > { %2486 = vmatpush1.bf16.msra.mxu1 %v3383_v44  ;;  %2446 = vmatprep.subr.bf16.mxu0 %v3388_v45 }
  0xe3   : > { %2487 = vmatprep.subr.bf16.mxu1 %v3391_v46 }
  0xe5   : > { %2447 = vmatpush1.bf16.msra.mxu0 %v3386_v48  ;;  %v3458_v48 = vld [vmem:[%s3590_s17 + $0x6c8] ss:$16 sps:$4 sm:$0xff]  }
  0xe6   : > { %2488 = vmatpush1.bf16.msra.mxu1 %v3389_v49  ;;  %2448 = vmatprep.subr.bf16.mxu0 %v3394_v50  ;;  %v3461_v49 = vld [vmem:[%s3590_s17 + $0x8c8] ss:$16 sps:$4 sm:$0xff]  }
  0xe7   : > { %2489 = vmatprep.subr.bf16.mxu1 %v3397_v52 }
  0xe9   : > { %2449 = vmatpush1.bf16.msra.mxu0 %v3392_v53  ;;  %v3466_v53 = vld [vmem:[%s3590_s17 + $0x6ac] ss:$16 sps:$4 sm:$0xff]  }
  0xea   : > { %2490 = vmatpush1.bf16.msra.mxu1 %v3395_v54  ;;  %2450 = vmatprep.subr.bf16.mxu0 %v3400_v55  ;;  %v3469_v54 = vld [vmem:[%s3590_s17 + $0x8ac] ss:$16 sps:$4 sm:$0xff]  }
  0xeb   : > { %2491 = vmatprep.subr.bf16.mxu1 %v3403_v56 }
  0xed   : > { %2451 = vmatpush1.bf16.msra.mxu0 %v3398_v57 }
  0xee   : > { %2492 = vmatpush1.bf16.msra.mxu1 %v3401_v58  ;;  %2452 = vmatprep.subr.bf16.mxu0 %v3406_v59  ;;  %v3464_v58 = vld [vmem:[%s3590_s17 + $0x6a8] ss:$16 sps:$4 sm:$0xff]  }
  0xef   : > { %2493 = vmatprep.subr.bf16.mxu1 %v3409_v60  ;;  %v3467_v59 = vld [vmem:[%s3590_s17 + $0x8a8] ss:$16 sps:$4 sm:$0xff]  }
  0xf1   : > { %2453 = vmatpush2.bf16.msra.mxu0 %v3404_v61 }
  0xf2   : > { %2494 = vmatpush2.bf16.msra.mxu1 %v3407_v62  ;;  %2454 = vmatprep.subr.bf16.mxu0 %v3412_v63  ;;  %v3470_v62 = vld [vmem:[%s3590_s17 + $0x688] ss:$16 sps:$4 sm:$0xff]  }
  0xf3   : > { %2495 = vmatprep.subr.bf16.mxu1 %v3415_v0  ;;  %v3473_v63 = vld [vmem:[%s3590_s17 + $0x888] ss:$16 sps:$4 sm:$0xff]   ;;  %v3478_v0 = vld [vmem:[%s3590_s17 + $0x66c] ss:$16 sps:$4 sm:$0xff]  }
  0xf5   : > { %2455 = vmatpush2.bf16.msra.mxu0 %v3410_v1  ;;  %v3481_v1 = vld [vmem:[%s3590_s17 + $0x86c] ss:$16 sps:$4 sm:$0xff]  }
  0xf6   : > { %2496 = vmatpush2.bf16.msra.mxu1 %v3413_v2  ;;  %2456 = vmatprep.subr.bf16.mxu0 %v3418_v3  ;;  %v3476_v2 = vld [vmem:[%s3590_s17 + $0x668] ss:$16 sps:$4 sm:$0xff]  }
  0xf7   : > { %2497 = vmatprep.subr.bf16.mxu1 %v3421_v4  ;;  %v3479_v3 = vld [vmem:[%s3590_s17 + $0x868] ss:$16 sps:$4 sm:$0xff]   ;;  %v3484_v4 = vld [vmem:[%s3590_s17 + $0x64c] ss:$16 sps:$4 sm:$0xff]  }
  0xf9   : > { %2457 = vmatpush2.bf16.msra.mxu0 %v3416_v5  ;;  %v3487_v5 = vld [vmem:[%s3590_s17 + $0x84c] ss:$16 sps:$4 sm:$0xff]  }
  0xfa   : > { %2498 = vmatpush2.bf16.msra.mxu1 %v3419_v8  ;;  %2458 = vmatprep.subr.bf16.mxu0 %v3424_v9  ;;  %v3482_v8 = vld [vmem:[%s3590_s17 + $0x648] ss:$16 sps:$4 sm:$0xff]  }
  0xfb   : > { %2499 = vmatprep.subr.bf16.mxu1 %v3427_v10  ;;  %v3485_v9 = vld [vmem:[%s3590_s17 + $0x848] ss:$16 sps:$4 sm:$0xff]   ;;  %v3490_v10 = vld [vmem:[%s3590_s17 + $0x62c] ss:$16 sps:$4 sm:$0xff]  }
  0xfd   : > { %2459 = vmatpush2.bf16.msra.mxu0 %v3422_v11  ;;  %v3493_v11 = vld [vmem:[%s3590_s17 + $0x82c] ss:$16 sps:$4 sm:$0xff]  }
  0xfe   : > { %2500 = vmatpush2.bf16.msra.mxu1 %v3425_v12  ;;  %2460 = vmatprep.subr.bf16.mxu0 %v3430_v13  ;;  %v3488_v12 = vld [vmem:[%s3590_s17 + $0x628] ss:$16 sps:$4 sm:$0xff]  }
  0xff   : > { %2501 = vmatprep.subr.bf16.mxu1 %v3433_v14  ;;  %v3491_v13 = vld [vmem:[%s3590_s17 + $0x828] ss:$16 sps:$4 sm:$0xff]   ;;  %v3496_v14 = vld [vmem:[%s3590_s17 + $0x60c] ss:$16 sps:$4 sm:$0xff]  }
 0x101   : > { %2461 = vmatpush2.bf16.msra.mxu0 %v3428_v15  ;;  %v3499_v15 = vld [vmem:[%s3590_s17 + $0x80c] ss:$16 sps:$4 sm:$0xff]  }
 0x102   : > { %2502 = vmatpush2.bf16.msra.mxu1 %v3431_v18  ;;  %2462 = vmatprep.subr.bf16.mxu0 %v3436_v19  ;;  %v3494_v18 = vld [vmem:[%s3590_s17 + $0x608] ss:$16 sps:$4 sm:$0xff]  }
 0x103   : > { %2503 = vmatprep.subr.bf16.mxu1 %v3439_v20  ;;  %v3497_v19 = vld [vmem:[%s3590_s17 + $0x808] ss:$16 sps:$4 sm:$0xff]   ;;  %v3502_v20 = vld [vmem:[%s3590_s17 + $0x7ec] ss:$16 sps:$4 sm:$0xff]  }
 0x105   : > { %2463 = vmatpush2.bf16.msra.mxu0 %v3434_v21  ;;  %v3505_v21 = vld [vmem:[%s3590_s17 + $0x9ec] ss:$16 sps:$4 sm:$0xff]  }
 0x106   : > { %2504 = vmatpush2.bf16.msra.mxu1 %v3437_v24  ;;  %2464 = vmatprep.subr.bf16.mxu0 %v3442_v26  ;;  %v3500_v24 = vld [vmem:[%s3590_s17 + $0x7e8] ss:$16 sps:$4 sm:$0xff]   ;;  %v3508_v26 = vld [vmem:[%s3590_s17 + $0x7cc] ss:$16 sps:$4 sm:$0xff]  }
 0x107   : > { %2505 = vmatprep.subr.bf16.mxu1 %v3445_v27  ;;  %v3511_v27 = vld [vmem:[%s3590_s17 + $0x9cc] ss:$16 sps:$4 sm:$0xff]  }
 0x109   : > { %2465 = vmatpush2.bf16.msra.mxu0 %v3440_v28  ;;  %v3506_v28 = vld [vmem:[%s3590_s17 + $0x7c8] ss:$16 sps:$4 sm:$0xff]  }
 0x10a   : > { %2506 = vmatpush2.bf16.msra.mxu1 %v3443_v30  ;;  %2466 = vmatprep.subr.bf16.mxu0 %v3448_v32  ;;  %v3509_v30 = vld [vmem:[%s3590_s17 + $0x9c8] ss:$16 sps:$4 sm:$0xff]   ;;  %v3514_v32 = vld [vmem:[%s3590_s17 + $0x7ac] ss:$16 sps:$4 sm:$0xff]  }
 0x10b   : > { %2507 = vmatprep.subr.bf16.mxu1 %v3451_v33  ;;  %v3517_v33 = vld [vmem:[%s3590_s17 + $0x9ac] ss:$16 sps:$4 sm:$0xff]  }
 0x10d   : > { %2467 = vmatpush2.bf16.msra.mxu0 %v3446_v22  ;;  %v3512_v22 = vld [vmem:[%s3590_s17 + $0x7a8] ss:$16 sps:$4 sm:$0xff]  }
 0x10e   : > { %2508 = vmatpush2.bf16.msra.mxu1 %v3449_v47  ;;  %2518 = vmatprep.subr.bf16.mxu0 %v3454_v6  ;;  %v3515_v47 = vld [vmem:[%s3590_s17 + $0x9a8] ss:$16 sps:$4 sm:$0xff]   ;;  %v3523_v6 = vld [vmem:[%s3590_s17 + $0x98c] ss:$16 sps:$4 sm:$0xff]  }
 0x10f   : > { %2559 = vmatprep.subr.bf16.mxu1 %v3457_v38  ;;  %v3518_v38 = vld [vmem:[%s3590_s17 + $0x788] ss:$16 sps:$4 sm:$0xff]  }
 0x110   : > { %v2224_v44 = vpop.f32.mrf.mxu0  ;;  %2469 = vmatmul.mubr.bf16.vlgmr.msra.gmra.mxu0 %v3674_v7 }
 0x111   : > { %v2265_v45 = vpop.f32.mrf.mxu1  ;;  %2510 = vmatmul.mubr.bf16.vlgmr.msra.gmra.mxu1 %v3760_v16  ;;  %v2225_v46 = vadd.f32 %v2224_v44, %v538_v40  ;;  %2519 = vmatpush1.bf16.msra.mxu0 %v3452_v41  ;;  %v3526_v40 = vld [vmem:[%s3590_s17 + $0x76c] ss:$16 sps:$4 sm:$0xff]   ;;  %v3530_v44 = vld [vmem:[%s3590_s17 + $0x748] ss:$16 sps:$4 sm:$0xff]  }
 0x112   : > { %2560 = vmatpush1.bf16.msra.mxu1 %v3455_v51  ;;  %v2226_v50 = vpop.f32.mrf.mxu0  ;;  %2520 = vmatprep.subr.bf16.mxu0 %v3460_v36  ;;  %v3529_v41 = vld [vmem:[%s3590_s17 + $0x96c] ss:$16 sps:$4 sm:$0xff]   ;;  %v3524_v51 = vld [vmem:[%s3590_s17 + $0x768] ss:$16 sps:$4 sm:$0xff]  }
 0x113   : > { %v2267_v52 = vpop.f32.mrf.mxu1  ;;  %2561 = vmatprep.subr.bf16.mxu1 %v3463_v42  ;;  %v3935_v55 = vadd.f32 %v2265_v45, %v2225_v46  ;;  %v2227_v7 = vadd.f32 %v2226_v50, %v542_v43  ;;  %2550 = vmatprep.mubr.bf16.mxu0 %v3716_v37  ;;  %v3472_v37 = vld [vmem:[%s3590_s17 + $0x68c] ss:$16 sps:$4 sm:$0xff]   ;;  %v3527_v36 = vld [vmem:[%s3590_s17 + $0x968] ss:$16 sps:$4 sm:$0xff]  }
 0x114   : > { %2591 = vmatprep.mubr.bf16.mxu1 %v3775_v23  ;;  %v2228_v16 = vpop.f32.mrf.mxu0  ;;  %v3475_v23 = vld [vmem:[%s3590_s17 + $0x88c] ss:$16 sps:$4 sm:$0xff]   ;;  %v3533_v45 = vld [vmem:[%s3590_s17 + $0x948] ss:$16 sps:$4 sm:$0xff]  }
 0x115   : > { %v2269_v56 = vpop.f32.mrf.mxu1  ;;  %v3939_v57 = vadd.f32 %v2267_v52, %v2227_v7  ;;  %2521 = vmatpush1.bf16.msra.mxu0 %v3458_v48  ;;  %v3532_v42 = vld [vmem:[%s3590_s17 + $0x74c] ss:$16 sps:$4 sm:$0xff]   ;;  %v3539_v50 = vld [vmem:[%s3590_s17 + $0x928] ss:$16 sps:$4 sm:$0xff]  }
 0x116   : > { %2562 = vmatpush1.bf16.msra.mxu1 %v3461_v49  ;;  %v2229_v60 = vpop.f32.mrf.mxu0  ;;  %2522 = vmatprep.subr.bf16.mxu0 %v3466_v53  ;;  %v3535_v43 = vld [vmem:[%s3590_s17 + $0x94c] ss:$16 sps:$4 sm:$0xff]   ;;  %v3536_v49 = vld [vmem:[%s3590_s17 + $0x728] ss:$16 sps:$4 sm:$0xff]  }
 0x117   : > { %v2270_v61 = vpop.f32.mrf.mxu1  ;;  %2563 = vmatprep.subr.bf16.mxu1 %v3469_v54  ;;  %v3538_v46 = vld [vmem:[%s3590_s17 + $0x72c] ss:$16 sps:$4 sm:$0xff]   ;;  %v3542_v54 = vld [vmem:[%s3590_s17 + $0x708] ss:$16 sps:$4 sm:$0xff]  }
 0x118   : > { %v3541_v48 = vld [vmem:[%s3590_s17 + $0x92c] ss:$16 sps:$4 sm:$0xff]   ;;  %v3545_v7 = vld [vmem:[%s3590_s17 + $0x908] ss:$16 sps:$4 sm:$0xff]  }
 0x119   : > { %2523 = vmatpush1.bf16.msra.mxu0 %v3464_v58  ;;  %v3544_v52 = vld [vmem:[%s3590_s17 + $0x70c] ss:$16 sps:$4 sm:$0xff]  }
 0x11a   : > { %2564 = vmatpush1.bf16.msra.mxu1 %v3467_v59  ;;  %2524 = vmatprep.subr.bf16.mxu0 %v3472_v37  ;;  %v3547_v53 = vld [vmem:[%s3590_s17 + $0x90c] ss:$16 sps:$4 sm:$0xff]  }
 0x11b   : > { %2565 = vmatprep.subr.bf16.mxu1 %v3475_v23 }
 0x11d   : > { %2525 = vmatpush1.bf16.msra.mxu0 %v3470_v62 }
 0x11e   : > { %2566 = vmatpush1.bf16.msra.mxu1 %v3473_v63  ;;  %2526 = vmatprep.subr.bf16.mxu0 %v3478_v0 }
 0x11f   : > { %2567 = vmatprep.subr.bf16.mxu1 %v3481_v1 }
 0x121   : > { %2527 = vmatpush1.bf16.msra.mxu0 %v3476_v2 }
 0x122   : > { %2568 = vmatpush1.bf16.msra.mxu1 %v3479_v3  ;;  %2528 = vmatprep.subr.bf16.mxu0 %v3484_v4 }
 0x123   : > { %2569 = vmatprep.subr.bf16.mxu1 %v3487_v5 }
 0x125   : > { %2529 = vmatpush1.bf16.msra.mxu0 %v3482_v8 }
 0x126   : > { %2570 = vmatpush1.bf16.msra.mxu1 %v3485_v9  ;;  %2530 = vmatprep.subr.bf16.mxu0 %v3490_v10 }
 0x127   : > { %2571 = vmatprep.subr.bf16.mxu1 %v3493_v11 }
 0x129   : > { %2531 = vmatpush1.bf16.msra.mxu0 %v3488_v12 }
 0x12a   : > { %2572 = vmatpush1.bf16.msra.mxu1 %v3491_v13  ;;  %2532 = vmatprep.subr.bf16.mxu0 %v3496_v14  ;;  %v545_v13 = vsub.s32 2, %v3908_v31 }
 0x12b   : > { %2573 = vmatprep.subr.bf16.mxu1 %v3499_v15 }
 0x12c   : > { %v546_v14 = vrot.slane %v3918_v35, %v545_v13 }
 0x12d   : > { %2533 = vmatpush1.bf16.msra.mxu0 %v3494_v18 }
 0x12e   : > { %2574 = vmatpush1.bf16.msra.mxu1 %v3497_v19  ;;  %2534 = vmatprep.subr.bf16.mxu0 %v3502_v20 }
 0x12f   : > { %2575 = vmatprep.subr.bf16.mxu1 %v3505_v21 }
 0x131   : > { %2535 = vmatpush2.bf16.msra.mxu0 %v3500_v24 }
 0x132   : > { %2576 = vmatpush2.bf16.msra.mxu1 %v3503_v25  ;;  %2536 = vmatprep.subr.bf16.mxu0 %v3508_v26 }
 0x133   : > { %2577 = vmatprep.subr.bf16.mxu1 %v3511_v27 }
 0x135   : > { %2537 = vmatpush2.bf16.msra.mxu0 %v3506_v28 }
 0x136   : > { %2578 = vmatpush2.bf16.msra.mxu1 %v3509_v30  ;;  %2538 = vmatprep.subr.bf16.mxu0 %v3514_v32  ;;  %v549_v32 = vsub.s32 3, %v3908_v31 }
 0x137   : > { %2579 = vmatprep.subr.bf16.mxu1 %v3517_v33 }
 0x138   : > { %v550_v33 = vrot.slane %v3918_v35, %v549_v32 }
 0x139   : > { %2539 = vmatpush2.bf16.msra.mxu0 %v3512_v22 }
 0x13a   : > { %2580 = vmatpush2.bf16.msra.mxu1 %v3515_v47  ;;  %2540 = vmatprep.subr.bf16.mxu0 %v3520_v34 }
 0x13b   : > { %2581 = vmatprep.subr.bf16.mxu1 %v3523_v6 }
 0x13d   : > { %2541 = vmatpush2.bf16.msra.mxu0 %v3518_v38 }
 0x13e   : > { %2582 = vmatpush2.bf16.msra.mxu1 %v3521_v39  ;;  %2542 = vmatprep.subr.bf16.mxu0 %v3526_v40 }
 0x13f   : > { %2583 = vmatprep.subr.bf16.mxu1 %v3529_v41 }
 0x141   : > { %2543 = vmatpush2.bf16.msra.mxu0 %v3524_v51 }
 0x142   : > { %2584 = vmatpush2.bf16.msra.mxu1 %v3527_v36  ;;  %2544 = vmatprep.subr.bf16.mxu0 %v3532_v42 }
 0x143   : > { %2585 = vmatprep.subr.bf16.mxu1 %v3535_v43 }
 0x145   : > { %2545 = vmatpush2.bf16.msra.mxu0 %v3530_v44 }
 0x146   : > { %2586 = vmatpush2.bf16.msra.mxu1 %v3533_v45  ;;  %2546 = vmatprep.subr.bf16.mxu0 %v3538_v46 }
 0x147   : > { %2587 = vmatprep.subr.bf16.mxu1 %v3541_v48 }
 0x149   : > { %2547 = vmatpush2.bf16.msra.mxu0 %v3536_v49 }
 0x14a   : > { %2588 = vmatpush2.bf16.msra.mxu1 %v3539_v50  ;;  %2548 = vmatprep.subr.bf16.mxu0 %v3544_v52 }
 0x14b   : > { %2589 = vmatprep.subr.bf16.mxu1 %v3547_v53 }
 0x14d   : > { %2549 = vmatpush2.bf16.msra.mxu0 %v3542_v54 }
 0x14e   : > { %2590 = vmatpush2.bf16.msra.mxu1 %v3545_v7 }
 0x150   : > { %v2306_v16 = vpop.f32.mrf.mxu0  ;;  %2551 = vmatmul.mubr.bf16.vlgmr.msra.gmra.mxu0 %v3764_v17 }
 0x151   : > { %v2347_v56 = vpop.f32.mrf.mxu1  ;;  %2592 = vmatmul.mubr.bf16.vlgmr.msra.gmra.mxu1 %v3843_v29  ;;  %v2307_v58 = vadd.f32 %v2306_v16, %v3935_v55 }
 0x152   : > { %v2308_v59 = vpop.f32.mrf.mxu0 }
 0x153   : > { %v2349_v60 = vpop.f32.mrf.mxu1  ;;  %v2348_v61 = vadd.f32 %v2347_v56, %v2307_v58  ;;  %v2309_v0 = vadd.f32 %v2308_v59, %v3939_v57 }
 0x154   : > { %v2310_v37 = vpop.f32.mrf.mxu0 }
 0x155   : > { %v2351_v23 = vpop.f32.mrf.mxu1  ;;  %v2350_v3 = vadd.f32 %v2349_v60, %v2309_v0 }
 0x156   : > { %v2311_v62 = vpop.f32.mrf.mxu0 }
 0x157   : > { %v2352_v63 = vpop.f32.mrf.mxu1 }
 0x190   : > { %v2388_v1 = vpop.f32.mrf.mxu0 }
 0x191   : > { %v2429_v2 = vpop.f32.mrf.mxu1  ;;  %v2389_v4 = vadd.f32 %v2388_v1, %v2348_v61 }
 0x192   : > { %v2390_v5 = vpop.f32.mrf.mxu0  ;;  %v2430_v15 = vadd.f32 %v2429_v2, %v546_v14 }
 0x193   : > { %v2431_v17 = vpop.f32.mrf.mxu1  ;;  %v2391_v29 = vadd.f32 %v2390_v5, %v2350_v3  ;;  %v2600_v55 = vmax.f32 %v2389_v4, 0.0 }
 0x194   : > { %v2392_v8 = vpop.f32.mrf.mxu0  ;;  %v2432_v22 = vadd.f32 %v2431_v17, %v550_v33 }
 0x195   : > { %v2433_v9 = vpop.f32.mrf.mxu1  ;;  %v2601_v10 = vmax.f32 %v2391_v29, 0.0 }
 0x196   : > { %v2393_v11 = vpop.f32.mrf.mxu0 }
 0x197   : > { %v2434_v57 = vpop.f32.mrf.mxu1  ;;  %v3046_v12 = vpack.c.bf16 %v2601_v10, %v2600_v55 }
 0x199   : > { %2620 = vst [vmem:[%s4003_s29] sm:$0xff] %v3046_v12 }
 0x1d0   : > { %v2470_v18 = vpop.f32.mrf.mxu0 }
 0x1d1   : > { %v2511_v19 = vpop.f32.mrf.mxu1  ;;  %v2471_v20 = vadd.f32 %v2470_v18, %v2430_v15 }
 0x1d2   : > { %v2472_v21 = vpop.f32.mrf.mxu0 }
 0x1d3   : > { %v2513_v24 = vpop.f32.mrf.mxu1  ;;  %v2512_v25 = vadd.f32 %v2511_v19, %v2471_v20  ;;  %v2473_v47 = vadd.f32 %v2472_v21, %v2432_v22 }
 0x1d4   : > { %v2474_v26 = vpop.f32.mrf.mxu0 }
 0x1d5   : > { %v2515_v27 = vpop.f32.mrf.mxu1  ;;  %v2514_v38 = vadd.f32 %v2513_v24, %v2473_v47 }
 0x1d6   : > { %v2475_v28 = vpop.f32.mrf.mxu0 }
 0x1d7   : > { %v2516_v30 = vpop.f32.mrf.mxu1 }
 0x210   : > { %v2552_v34 = vpop.f32.mrf.mxu0 }
 0x211   : > { %v2593_v6 = vpop.f32.mrf.mxu1  ;;  %v2553_v39 = vadd.f32 %v2552_v34, %v2512_v25 }
 0x212   : > { %v2554_v40 = vpop.f32.mrf.mxu0 }
 0x213   : > { %v2595_v41 = vpop.f32.mrf.mxu1  ;;  %v2594_v51 = vadd.f32 %v2593_v6, %v2553_v39  ;;  %v2555_v36 = vadd.f32 %v2554_v40, %v2514_v38 }
 0x214   : > { %v2556_v42 = vpop.f32.mrf.mxu0 }
 0x215   : > { %v2597_v43 = vpop.f32.mrf.mxu1  ;;  %v2596_v44 = vadd.f32 %v2595_v41, %v2555_v36  ;;  %v2602_v48 = vmax.f32 %v2594_v51, 0.0 }
 0x216   : > { %v2557_v45 = vpop.f32.mrf.mxu0 }
 0x217   : > { %v2598_v46 = vpop.f32.mrf.mxu1  ;;  %v2603_v31 = vmax.f32 %v2596_v44, 0.0 }
 0x219   : > { %v3047_v49 = vpack.c.bf16 %v2603_v31, %v2602_v48 }
 0x21b   : > { %2621 = vst [vmem:[%s4003_s29 + $0x8] sm:$0xff] %v3047_v49 }
 0x21c PF: > { %s13_s12 = sadd.s32 1, %s3554_s12  }
 0x21d   : > { %p10_p4 = scmp.ge.s32.totalorder %s13_s12, 4  }
 0x21f   :  { %12 = sbr.rel (!%p10_p4) target bundleno = 1 (0x1), region = 68 }

// kernel: squeeze.13
= control target key start
LH: loop header
LB: loop body
LE: loop exit
PB: predicated region body
PF: predicated region fallthrough
CT: control target
= control target key end

     0   :  { %vm388_vm0 = vcmask 523264   ;;  %s740_s0 = inlined_call_operand.vmem [shape: bf16[1,2,4,4,320], index: 0, kind: input, shape index: {}]   ;;  %s741_s1 = inlined_call_operand.vmem [shape: bf16[32,320], index: 1, kind: output, shape index: {}]  }
   0x1   :  { %v617_v0 = vld [vmem:[%s740_s0 + $0x28] sm:$0xff]   ;;  %v621_v1 = vld [vmem:[%s740_s0 + $0x20] sm:$0xff]   ;;  %v625_v2 = vld [vmem:[%s740_s0 + $0x18] sm:$0xff]  }
   0x2   :  { %v18_v3 = vunpack.c.h.bf16 %v617_v0  ;;  %v50_v4 = vunpack.c.l.bf16 %v617_v0  ;;  %v629_v5 = vld [vmem:[%s740_s0 + $0x10] sm:$0xff]   ;;  %v82_v6 = vunpack.c.h.bf16 %v621_v1  ;;  %v114_v7 = vunpack.c.l.bf16 %v621_v1  ;;  %v633_v8 = vld [vmem:[%s740_s0 + $0x8] sm:$0xff]   ;;  %v637_v11 = vld [vmem:[%s740_s0] sm:$0xff]  }
   0x3   :  { %v146_v9 = vunpack.c.h.bf16 %v625_v2  ;;  %v178_v10 = vunpack.c.l.bf16 %v625_v2  ;;  %v210_v12 = vunpack.c.h.bf16 %v629_v5  ;;  %v242_v13 = vunpack.c.l.bf16 %v629_v5 }
   0x4   :  { %21 = vst [vmem:[#allocation1 + $0xb8] ss:$-176 sps:$4 sm:$0xff] %v18_v3   ;;  %53 = vst [vmem:[#allocation1 + $0x70] ss:$56 sps:$4 sm:$0xff] %v50_v4   ;;  %v274_v14 = vunpack.c.h.bf16 %v633_v8  ;;  %v306_v15 = vunpack.c.l.bf16 %v633_v8  ;;  %v338_v16 = vunpack.c.h.bf16 %v637_v11  ;;  %v369_v17 = vunpack.c.l.bf16 %v637_v11 }
   0x5   :  { %85 = vst [vmem:[#allocation1 + $0x90] ss:$-56 sps:$4 sm:$0xff] %v82_v6   ;;  %117 = vst [vmem:[#allocation1 + $0x40] ss:$56 sps:$4 sm:$0xff] %v114_v7  }
   0x6   :  { %149 = vst [vmem:[#allocation1 + $0x28] ss:$8 sps:$4 sm:$0xff] %v146_v9   ;;  %181 = vst [vmem:[#allocation1 + $0x9c] sm:$0xf0] %v178_v10 }
   0x7   :  { %197 = vst [vmem:[#allocation1 + $0x20] sm:$0xf] %v178_v10  ;;  %213 = vst [vmem:[#allocation1 + $0x68] ss:$24 sps:$4 sm:$0xff] %v210_v12  }
   0x8   :  { %245 = vst [vmem:[#allocation1 + $0x18] ss:$48 sps:$4 sm:$0xff] %v242_v13   ;;  %277 = vst [vmem:[#allocation1 + $0xc] sm:$0xf0] %v274_v14 }
   0x9   :  { %293 = vst [vmem:[#allocation1 + $0x50] sm:$0xf] %v274_v14  ;;  %309 = vst [vmem:[#allocation1 + $0x60] ss:$40 sps:$4 sm:$0xff] %v306_v15  }
   0xa   :  { %341 = vst [vmem:[#allocation1] ss:$56 sps:$4 sm:$0xff] %v338_v16   ;;  %372 = vst [vmem:[#allocation1 + $0xb0] ss:$-24 sps:$4 sm:$0xff] %v369_v17  }
   0xb   :  { %v417_v18 = vld [vmem:[#allocation1 + $0x70] sm:$0xf]   ;;  %v422_v19 = vld [vmem:[#allocation1 + $0x8] sm:$0xf]   ;;  %v485_v41 = vld [vmem:[#allocation1 + $0xb8] sm:$0xf]  }
   0xc   :  { %v481_v20 = vld [vmem:[#allocation1 + $0xa8] sm:$0xf]   ;;  %v412_v21 = vld [vmem:[#allocation1 + $0x78] sm:$0xf]   ;;  %420 = vst.msk [vmem:[#allocation0 + $0x58] sm:$0xf] %vm388_vm0, %v417_v18  }
   0xd   :  { %425 = vst.msk [vmem:[#allocation0 + $0x5c] sm:$0xf] %vm388_vm0, %v422_v19   ;;  %v469_v22 = vld [vmem:[#allocation1 + $0x40] sm:$0xf]   ;;  %v473_v23 = vld [vmem:[#allocation1 + $0x90] sm:$0xf]  }
   0xe   :  { %483 = vst [vmem:[#allocation0 + $0x4c] sm:$0xf] %v481_v20   ;;  %v407_v24 = vld [vmem:[#allocation1 + $0x28] sm:$0xf]   ;;  %415 = vst.msk [vmem:[#allocation0 + $0x44] sm:$0xf] %vm388_vm0, %v412_v21  }
   0xf   :  { %v457_v25 = vld [vmem:[#allocation1 + $0x20] sm:$0xf]   ;;  %471 = vst [vmem:[#allocation0 + $0x3c] sm:$0xf] %v469_v22   ;;  %475 = vst [vmem:[#allocation0 + $0x48] sm:$0xf] %v473_v23  }
  0x10   :  { %v461_v26 = vld [vmem:[#allocation1 + $0xa0] sm:$0xf]   ;;  %v397_v27 = vld [vmem:[#allocation1 + $0x18] sm:$0xf]   ;;  %410 = vst.msk [vmem:[#allocation0 + $0x40] sm:$0xf] %vm388_vm0, %v407_v24  }
  0x11   :  { %v402_v28 = vld [vmem:[#allocation1 + $0x80] sm:$0xf]   ;;  %v449_v29 = vld [vmem:[#allocation1 + $0x48] sm:$0xf]   ;;  %459 = vst [vmem:[#allocation0 + $0x30] sm:$0xf] %v457_v25  }
  0x12   :  { %463 = vst [vmem:[#allocation0 + $0x38] sm:$0xf] %v461_v26   ;;  %v392_v30 = vld [vmem:[#allocation1 + $0x88] sm:$0xf]   ;;  %400 = vst.msk [vmem:[#allocation0 + $0x28] sm:$0xf] %vm388_vm0, %v397_v27  }
  0x13   :  { %405 = vst.msk [vmem:[#allocation0 + $0x2c] sm:$0xf] %vm388_vm0, %v402_v28   ;;  %v437_v31 = vld [vmem:[#allocation1 + $0x60] sm:$0xf]   ;;  %v441_v32 = vld [vmem:[#allocation1 + $0x50] sm:$0xf]  }
  0x14   :  { %451 = vst [vmem:[#allocation0 + $0x1c] sm:$0xf] %v449_v29   ;;  %v387_v33 = vld [vmem:[#allocation1] sm:$0xf]   ;;  %395 = vst.msk [vmem:[#allocation0 + $0x14] sm:$0xf] %vm388_vm0, %v392_v30  }
  0x15   :  { %v426_v34 = vld [vmem:[#allocation1 + $0xb0] sm:$0xf]   ;;  %v429_v35 = vld [vmem:[#allocation1 + $0x98] sm:$0xf]   ;;  %439 = vst [vmem:[#allocation0 + $0xc] sm:$0xf] %v437_v31  }
  0x16   :  { %443 = vst [vmem:[#allocation0 + $0x18] sm:$0xf] %v441_v32   ;;  %390 = vst.msk [vmem:[#allocation0 + $0x10] sm:$0xf] %vm388_vm0, %v387_v33   ;;  %v433_v36 = vld [vmem:[#allocation1 + $0x38] sm:$0xf]  }
  0x17   :  { %427 = vst [vmem:[#allocation0] sm:$0xf] %v426_v34   ;;  %431 = vst [vmem:[#allocation0 + $0x8] sm:$0xf] %v429_v35   ;;  %v445_v37 = vld [vmem:[#allocation1 + $0x10] sm:$0xf]  }
  0x18   :  { %v453_v38 = vld [vmem:[#allocation1 + $0x68] sm:$0xf]   ;;  %435 = vst [vmem:[#allocation0 + $0x4] sm:$0xf] %v433_v36   ;;  %447 = vst [vmem:[#allocation0 + $0x20] sm:$0xf] %v445_v37  }
  0x19   :  { %455 = vst [vmem:[#allocation0 + $0x24] sm:$0xf] %v453_v38   ;;  %v465_v39 = vld [vmem:[#allocation1 + $0x30] sm:$0xf]   ;;  %v477_v40 = vld [vmem:[#allocation1 + $0x58] sm:$0xf]  }
  0x1a   :  { %467 = vst [vmem:[#allocation0 + $0x34] sm:$0xf] %v465_v39   ;;  %479 = vst [vmem:[#allocation0 + $0x50] sm:$0xf] %v477_v40   ;;  %v562_v42 = vld [vmem:[#allocation0 + $0x48] sm:$0xff]  ;;  %v554_v43 = vld [vmem:[#allocation0 + $0x40] sm:$0xff] }
  0x1b   :  { %487 = vst [vmem:[#allocation0 + $0x54] sm:$0xf] %v485_v41   ;;  %v674_v44 = vpack.c.bf16 %v562_v42, %v554_v43  ;;  %v530_v46 = vld [vmem:[#allocation0 + $0x28] sm:$0xff]  ;;  %v578_v47 = vld [vmem:[#allocation0 + $0x58] sm:$0xff] }
  0x1c   :  { %v546_v50 = vld [vmem:[#allocation0 + $0x38] sm:$0xff] }
  0x1d   :  { %v514_v45 = vld [vmem:[#allocation0 + $0x18] sm:$0xff]  ;;  %v506_v49 = vld [vmem:[#allocation0 + $0x10] sm:$0xff]  ;;  %684 = vst [vmem:[%s741_s1 + $0x20] sm:$0xff] %v674_v44  }
  0x1e   :  { %v499_v48 = vld [vmem:[#allocation0 + $0x8] sm:$0xff]  ;;  %v659_v52 = vpack.c.bf16 %v514_v45, %v506_v49 }
  0x1f   :  { %v493_v51 = vld [vmem:[#allocation0] sm:$0xff] }
  0x20   :  { %v522_v53 = vld [vmem:[#allocation0 + $0x20] sm:$0xff]  ;;  %v654_v54 = vpack.c.bf16 %v499_v48, %v493_v51  ;;  %681 = vst [vmem:[%s741_s1 + $0x8] sm:$0xff] %v659_v52  }
  0x21   :  { %v664_v55 = vpack.c.bf16 %v530_v46, %v522_v53  ;;  %v538_v56 = vld [vmem:[#allocation0 + $0x30] sm:$0xff] }
  0x22   :  { %v570_v57 = vld [vmem:[#allocation0 + $0x50] sm:$0xff]  ;;  %v669_v58 = vpack.c.bf16 %v546_v50, %v538_v56  ;;  %655 = vst [vmem:[%s741_s1] sm:$0xff] %v654_v54  }
  0x23   :  { %v679_v59 = vpack.c.bf16 %v578_v47, %v570_v57  ;;  %682 = vst [vmem:[%s741_s1 + $0x10] sm:$0xff] %v664_v55  }
  0x24   :  { %683 = vst [vmem:[%s741_s1 + $0x18] sm:$0xff] %v669_v58  }
  0x25   :  { %685 = vst [vmem:[%s741_s1 + $0x28] sm:$0xff] %v679_v59  }

// kernel: fakenet_forward.26
= control target key start
LH: loop header
LB: loop body
LE: loop exit
PB: predicated region body
PF: predicated region fallthrough
CT: control target
= control target key end

     0   :  { %v1109_v1 = vmov 0   ;;  %vm470_vm0 = vcmask 523264   ;;  %vm818_vm1 = vcmask 519168   ;;  %s1429_s1 = inlined_call_operand.vmem [shape: bf16[320,320], index: 1, kind: input, shape index: {}]   ;;  %s1430_s0 = inlined_call_operand.vmem [shape: bf16[32,320], index: 0, kind: input, shape index: {}]   ;;  %s1431_s2 = inlined_call_operand.vmem [shape: f32[1,320], index: 2, kind: input, shape index: {}]   ;;  %s1432_s3 = inlined_call_operand.vmem [shape: bf16[32,320], index: 3, kind: output, shape index: {}]  }
   0x1   :  { %v975_v0 = vld [vmem:[%s1429_s1 + $0xac] ss:$12 sps:$4 sm:$0xff]   ;;  %562 = vmatprep.mubr.bf16.mxu1 %v1109_v1  ;;  %v979_v3 = vld [vmem:[%s1429_s1 + $0xa8] ss:$12 sps:$4 sm:$0xff]   ;;  %v985_v7 = vld [vmem:[%s1429_s1 + $0x90] ss:$12 sps:$4 sm:$0xff]  }
   0x2   :  { %v977_v2 = vld [vmem:[%s1429_s1 + $0x1cc] ss:$12 sps:$4 sm:$0xff]   ;;  %477 = vmatprep.subr.bf16.mxu0 %v975_v0  ;;  %v980_v4 = vld [vmem:[%s1429_s1 + $0x1c8] ss:$12 sps:$4 sm:$0xff]   ;;  %v986_v8 = vld [vmem:[%s1429_s1 + $0x1b0] ss:$12 sps:$4 sm:$0xff]  }
   0x3   :  { %538 = vmatprep.subr.bf16.mxu1 %v977_v2  ;;  %v981_v5 = vld [vmem:[%s1429_s1 + $0x94] ss:$12 sps:$4 sm:$0xff]   ;;  %478 = vmatpush1.bf16.msra.mxu0 %v979_v3  ;;  %v987_v9 = vld [vmem:[%s1429_s1 + $0x7c] ss:$12 sps:$4 sm:$0xff]   ;;  %v991_v11 = vld [vmem:[%s1429_s1 + $0x78] ss:$12 sps:$4 sm:$0xff]  }
   0x4   :  { %539 = vmatpush1.bf16.msra.mxu1 %v980_v4  ;;  %v983_v6 = vld [vmem:[%s1429_s1 + $0x1b4] ss:$12 sps:$4 sm:$0xff]   ;;  %479 = vmatprep.subr.bf16.mxu0 %v981_v5  ;;  %v989_v10 = vld [vmem:[%s1429_s1 + $0x19c] ss:$12 sps:$4 sm:$0xff]   ;;  %v992_v12 = vld [vmem:[%s1429_s1 + $0x198] ss:$12 sps:$4 sm:$0xff]  }
   0x5   :  { %540 = vmatprep.subr.bf16.mxu1 %v983_v6  ;;  %v993_v13 = vld [vmem:[%s1429_s1 + $0x64] ss:$12 sps:$4 sm:$0xff]   ;;  %v997_v15 = vld [vmem:[%s1429_s1 + $0x60] ss:$12 sps:$4 sm:$0xff]   ;;  %v1187_v19 = vld [vmem:[%s1430_s0 + $0x8] sm:$0xf] }
   0x6   :  { %v995_v14 = vld [vmem:[%s1429_s1 + $0x184] ss:$12 sps:$4 sm:$0xff]   ;;  %v998_v16 = vld [vmem:[%s1429_s1 + $0x180] ss:$12 sps:$4 sm:$0xff]   ;;  %v1192_v20 = vld [vmem:[%s1430_s0 + $0x14] sm:$0xf] }
   0x7   :  { %480 = vmatpush1.bf16.msra.mxu0 %v985_v7  ;;  %v999_v17 = vld [vmem:[%s1429_s1 + $0x4c] ss:$12 sps:$4 sm:$0xff]   ;;  %v1001_v18 = vld [vmem:[%s1429_s1 + $0x170] ss:$12 sps:$4 sm:$0xff]   ;;  %v1002_v21 = vld [vmem:[%s1429_s1 + $0x48] ss:$12 sps:$4 sm:$0xff]   ;;  %v1199_v22 = vcombine.low %v1187_v19, %v1192_v20 }
   0x8   :  { %541 = vmatpush1.bf16.msra.mxu1 %v986_v8  ;;  %481 = vmatprep.subr.bf16.mxu0 %v987_v9  ;;  %v1004_v23 = vld [vmem:[%s1429_s1 + $0xb0] ss:$12 sps:$4 sm:$0xff]   ;;  %v1005_v24 = vld [vmem:[%s1429_s1 + $0x34] ss:$12 sps:$4 sm:$0xff]   ;;  %v1007_v25 = vld [vmem:[%s1429_s1 + $0x158] ss:$12 sps:$4 sm:$0xff]  }
   0x9   :  { %542 = vmatprep.subr.bf16.mxu1 %v989_v10  ;;  %v1008_v26 = vld [vmem:[%s1429_s1 + $0x30] ss:$12 sps:$4 sm:$0xff]   ;;  %v1009_v27 = vld [vmem:[%s1429_s1 + $0x98] ss:$12 sps:$4 sm:$0xff]   ;;  %v1012_v29 = vld [vmem:[%s1429_s1 + $0x140] ss:$12 sps:$4 sm:$0xff]  }
   0xa   :  { %v1010_v28 = vld [vmem:[%s1429_s1 + $0x1c] ss:$12 sps:$4 sm:$0xff]   ;;  %v1013_v30 = vld [vmem:[%s1429_s1 + $0x18] ss:$12 sps:$4 sm:$0xff]   ;;  %v1014_v31 = vld [vmem:[%s1429_s1 + $0x80] ss:$12 sps:$4 sm:$0xff]  }
   0xb   :  { %482 = vmatpush1.bf16.msra.mxu0 %v991_v11  ;;  %v1015_v32 = vld [vmem:[%s1429_s1 + $0x4] ss:$12 sps:$4 sm:$0xff]   ;;  %v1017_v33 = vld [vmem:[%s1429_s1 + $0x128] ss:$12 sps:$4 sm:$0xff]   ;;  %v1018_v34 = vld [vmem:[%s1429_s1] ss:$12 sps:$4 sm:$0xff]  }
   0xc   :  { %543 = vmatpush1.bf16.msra.mxu1 %v992_v12  ;;  %483 = vmatprep.subr.bf16.mxu0 %v993_v13  ;;  %v1019_v35 = vld [vmem:[%s1429_s1 + $0x68] ss:$12 sps:$4 sm:$0xff]   ;;  %v1020_v36 = vld [vmem:[%s1429_s1 + $0x16c] ss:$12 sps:$4 sm:$0xff]   ;;  %v1022_v37 = vld [vmem:[%s1429_s1 + $0x110] ss:$12 sps:$4 sm:$0xff]  }
   0xd   :  { %544 = vmatprep.subr.bf16.mxu1 %v995_v14  ;;  %v1023_v38 = vld [vmem:[%s1429_s1 + $0x168] ss:$12 sps:$4 sm:$0xff]   ;;  %v1024_v39 = vld [vmem:[%s1429_s1 + $0x50] ss:$12 sps:$4 sm:$0xff]   ;;  %v1260_v41 = vld [vmem:[%s1430_s0 + $0x20] sm:$0xf] }
   0xe   :  { %v1025_v40 = vld [vmem:[%s1429_s1 + $0x154] ss:$12 sps:$4 sm:$0xff]   ;;  %v1265_v42 = vld [vmem:[%s1430_s0 + $0x2c] sm:$0xf]  ;;  %v1027_v43 = vld [vmem:[%s1429_s1 + $0xf8] ss:$12 sps:$4 sm:$0xff]  }
   0xf   :  { %484 = vmatpush1.bf16.msra.mxu0 %v997_v15  ;;  %v1272_v44 = vcombine.low %v1260_v41, %v1265_v42  ;;  %v1028_v45 = vld [vmem:[%s1429_s1 + $0x150] ss:$12 sps:$4 sm:$0xff]   ;;  %v1029_v46 = vld [vmem:[%s1429_s1 + $0x38] ss:$12 sps:$4 sm:$0xff]   ;;  %v1033_v48 = vld [vmem:[%s1429_s1 + $0xe0] ss:$12 sps:$4 sm:$0xff]  }
  0x10   :  { %545 = vmatpush1.bf16.msra.mxu1 %v998_v16  ;;  %485 = vmatprep.subr.bf16.mxu0 %v999_v17  ;;  %v1030_v47 = vld [vmem:[%s1429_s1 + $0x13c] ss:$12 sps:$4 sm:$0xff]   ;;  %v1034_v49 = vld [vmem:[%s1429_s1 + $0x138] ss:$12 sps:$4 sm:$0xff]   ;;  %v1299_v51 = vld [vmem:[%s1430_s0 + $0xc] sm:$0xff] }
  0x11   :  { %928 = vmatprep.subr.bf16.mxu1 %v1001_v18  ;;  %v1294_v50 = vld [vmem:[%s1430_s0] sm:$0xff]  ;;  %v1038_v55 = vld [vmem:[%s1429_s1 + $0xc8] ss:$12 sps:$4 sm:$0xff]   ;;  %v1042_v58 = vld [vmem:[%s1429_s1 + $0x10c] ss:$12 sps:$4 sm:$0xff]  }
  0x12   :  { %v1035_v52 = vld [vmem:[%s1429_s1 + $0x20] ss:$12 sps:$4 sm:$0xff]   ;;  %v831_v53 = vcombine.high %v1294_v50, %v1299_v51  ;;  %v1036_v54 = vld [vmem:[%s1429_s1 + $0x124] ss:$12 sps:$4 sm:$0xff]   ;;  %v1040_v57 = vld [vmem:[%s1429_s1 + $0x8] ss:$12 sps:$4 sm:$0xff]   ;;  %v830_v61 = vcombine.low %v1294_v50, %v1299_v51 }
  0x13   :  { %896 = vmatmul.mubr.msk.bf16.vlgmr.msra.gmra.mxu1 %vm470_vm0, %v1199_v22  ;;  %486 = vmatpush1.bf16.msra.mxu0 %v1002_v21  ;;  %v1039_v56 = vld [vmem:[%s1429_s1 + $0x120] ss:$12 sps:$4 sm:$0xff]   ;;  %v1045_v59 = vld [vmem:[%s1429_s1 + $0x1d0] ss:$12 sps:$4 sm:$0xff]   ;;  %v1334_v62 = vld [vmem:[%s1430_s0 + $0x24] sm:$0xff]  ;;  %v105_v21 = vlaneseq }
  0x14   :  { %929 = vmatpush3.bf16.msra.mxu1 %v1004_v23  ;;  %487 = vmatprep.subr.bf16.mxu0 %v1005_v24  ;;  %v1327_v60 = vld [vmem:[%s1430_s0 + $0x18] sm:$0xff]  ;;  %v1046_v63 = vld [vmem:[%s1429_s1 + $0x108] ss:$12 sps:$4 sm:$0xff]   ;;  %v1055_v5 = vld [vmem:[%s1429_s1 + $0x1a0] ss:$12 sps:$4 sm:$0xff]  }
  0x15   :  { %930 = vmatprep.subr.bf16.mxu1 %v1007_v25  ;;  %572 = vmatprep.mubr.bf16.mxu1 %v1109_v1  ;;  %v1047_v0 = vld [vmem:[%s1429_s1 + $0xf4] ss:$12 sps:$4 sm:$0xff]   ;;  %v1049_v1 = vld [vmem:[%s1429_s1 + $0x1b8] ss:$12 sps:$4 sm:$0xff]   ;;  %v834_v2 = vcombine.high %v1327_v60, %v1334_v62  ;;  %v1050_v3 = vld [vmem:[%s1429_s1 + $0xf0] ss:$12 sps:$4 sm:$0xff]   ;;  %v833_v6 = vcombine.low %v1327_v60, %v1334_v62 }
  0x16   :  { %509 = vmatprep.mubr.bf16.mxu0 %v831_v53  ;;  %v1052_v4 = vld [vmem:[%s1429_s1 + $0xdc] ss:$12 sps:$4 sm:$0xff]   ;;  %v1056_v7 = vld [vmem:[%s1429_s1 + $0xd8] ss:$12 sps:$4 sm:$0xff]   ;;  %v1060_v10 = vld [vmem:[%s1429_s1 + $0xc0] ss:$12 sps:$4 sm:$0xff]  }
  0x17   :  { %488 = vmatpush1.bf16.msra.mxu0 %v1008_v26  ;;  %v1057_v8 = vld [vmem:[%s1429_s1 + $0xc4] ss:$12 sps:$4 sm:$0xff]   ;;  %v1059_v9 = vld [vmem:[%s1429_s1 + $0x188] ss:$12 sps:$4 sm:$0xff]   ;;  %v106_v24 = vshrl.u32 %v105_v21, 7 }
  0x18   :  { %931 = vmatpush3.bf16.msra.mxu1 %v1009_v27  ;;  %489 = vmatprep.subr.bf16.mxu0 %v1010_v28 }
  0x19   :  { %932 = vmatprep.subr.bf16.mxu1 %v1012_v29  ;;  %v115_v27 = vsub.s32 2, %v106_v24  ;;  %v103_v29 = vld [vmem:[%s1431_s2] sm:$0x7] }
  0x1b   :  { %490 = vmatpush1.bf16.msra.mxu0 %v1013_v30  ;;  %897 = vmatmul.mubr.msk.bf16.gmra.mxu1 %vm470_vm0, %v1272_v44  ;;  %v107_v30 = vsub.s32 0, %v106_v24 }
  0x1c   :  { %933 = vmatpush3.bf16.msra.mxu1 %v1014_v31  ;;  %491 = vmatprep.subr.bf16.mxu0 %v1015_v32 }
  0x1d   :  { %934 = vmatprep.subr.bf16.mxu1 %v1017_v33  ;;  %615 = vmatprep.mubr.bf16.mxu1 %v831_v53  ;;  %v116_v33 = vrot.slane %v103_v29, %v115_v27 }
  0x1f   :  { %492 = vmatpush1.bf16.msra.mxu0 %v1018_v34  ;;  %v111_v34 = vsub.s32 1, %v106_v24 }
  0x20   :  { %935 = vmatpush3.bf16.msra.mxu1 %v1019_v35  ;;  %493 = vmatprep.subr.bf16.mxu0 %v1020_v36 }
  0x21   :  { %936 = vmatprep.subr.bf16.mxu1 %v1022_v37  ;;  %v108_v37 = vrot.slane %v103_v29, %v107_v30 }
  0x23   :  { %494 = vmatpush2.bf16.msra.mxu0 %v1023_v38 }
  0x24   :  { %937 = vmatpush3.bf16.msra.mxu1 %v1024_v39  ;;  %495 = vmatprep.subr.bf16.mxu0 %v1025_v40 }
  0x25   :  { %938 = vmatprep.subr.bf16.mxu1 %v1027_v43  ;;  %v112_v43 = vrot.slane %v103_v29, %v111_v34 }
  0x27   :  { %496 = vmatpush2.bf16.msra.mxu0 %v1028_v45 }
  0x28   :  { %939 = vmatpush3.bf16.msra.mxu1 %v1029_v46  ;;  %497 = vmatprep.subr.bf16.mxu0 %v1030_v47 }
  0x29   :  { %940 = vmatprep.subr.bf16.mxu1 %v1033_v48 }
  0x2b   :  { %498 = vmatpush2.bf16.msra.mxu0 %v1034_v49 }
  0x2c   :  { %941 = vmatpush3.bf16.msra.mxu1 %v1035_v52  ;;  %499 = vmatprep.subr.bf16.mxu0 %v1036_v54 }
  0x2d   :  { %942 = vmatprep.subr.bf16.mxu1 %v1038_v55 }
  0x2f   :  { %500 = vmatpush2.bf16.msra.mxu0 %v1039_v56 }
  0x30   :  { %943 = vmatpush3.bf16.msra.mxu1 %v1040_v57  ;;  %501 = vmatprep.subr.bf16.mxu0 %v1042_v58 }
  0x31   :  { %962 = vmatprep.subr.bf16.mxu1 %v1045_v59 }
  0x33   :  { %616 = vmatmul.mubr.bf16.vlgmr.msra.gmra.mxu1 %v830_v61  ;;  %502 = vmatpush2.bf16.msra.mxu0 %v1046_v63 }
  0x34   :  { %963 = vmatpush3.bf16.msra.mxu1 %v1045_v59  ;;  %503 = vmatprep.subr.bf16.mxu0 %v1047_v0 }
  0x35   :  { %964 = vmatprep.subr.bf16.mxu1 %v1049_v1  ;;  %623 = vmatprep.mubr.bf16.mxu1 %v834_v2 }
  0x37   :  { %504 = vmatpush2.bf16.msra.mxu0 %v1050_v3 }
  0x38   :  { %965 = vmatpush3.bf16.msra.mxu1 %v1049_v1  ;;  %505 = vmatprep.subr.bf16.mxu0 %v1052_v4 }
  0x39   :  { %966 = vmatprep.subr.bf16.mxu1 %v1055_v5 }
  0x3b   :  { %624 = vmatmul.mubr.bf16.gmra.mxu1 %v833_v6  ;;  %506 = vmatpush2.bf16.msra.mxu0 %v1056_v7 }
  0x3c   :  { %967 = vmatpush3.bf16.msra.mxu1 %v1055_v5  ;;  %507 = vmatprep.subr.bf16.mxu0 %v1057_v8 }
  0x3d   :  { %968 = vmatprep.subr.bf16.mxu1 %v1059_v9  ;;  %970 = vmatprep.mubr.msk.bf16.mxu1 %vm470_vm0, %v1199_v22 }
  0x3f   :  { %508 = vmatpush2.bf16.msra.mxu0 %v1060_v10 }
  0x40   :  { %969 = vmatpush3.bf16.msra.mxu1 %v1059_v9 }
  0x42   :  { %510 = vmatmul.mubr.bf16.vlgmr.msra.gmra.mxu0 %v830_v61 }
  0x43   :  { %971 = vmatmul.mubr.msk.bf16.vlgmr.msra.gmra.mxu1 %vm470_vm0, %v1272_v44  ;;  %519 = vmatprep.mubr.bf16.mxu0 %v834_v2 }
  0x4a   :  { %520 = vmatmul.mubr.bf16.gmra.mxu0 %v833_v6 }
  0xd3   :  { %v564_v11 = vpop.f32.mrf.mxu1 }
  0xd5   :  { %v566_v12 = vpop.f32.mrf.mxu1 }
  0xd7   :  { %v568_v13 = vpop.f32.mrf.mxu1 }
  0xd9   :  { %v570_v14 = vpop.f32.mrf.mxu1 }
  0xdb   :  { %v1374_v15 = vpop.f32.mrf.mxu1 }
  0xdd   :  { %v1376_v16 = vpop.f32.mrf.mxu1 }
  0xdf   :  { %v1378_v17 = vpop.f32.mrf.mxu1 }
  0xe1   :  { %v1380_v18 = vpop.f32.mrf.mxu1 }
  0xf3   :  { %v944_v22 = vpop.f32.mrf.mxu1 }
  0xf5   :  { %v945_v23 = vpop.f32.mrf.mxu1 }
  0xf6   :  { %v946_v36 = vadd.f32 %v945_v23, %v944_v22 }
  0xf7   :  { %v947_v25 = vpop.f32.mrf.mxu1 }
  0xf8   :  { %v618_v49 = vadd.f32 %v946_v36, %v116_v33 }
  0xf9   :  { %v948_v26 = vpop.f32.mrf.mxu1 }
  0xfa   :  { %v949_v44 = vadd.f32 %v948_v26, %v947_v25 }
  0xfb   :  { %v950_v28 = vpop.f32.mrf.mxu1 }
  0xfc   :  { %v621_v63 = vadd.f32 %v949_v44, %v116_v33 }
  0xfd   :  { %v951_v31 = vpop.f32.mrf.mxu1 }
  0xfe   :  { %v952_v32 = vadd.f32 %v951_v31, %v950_v28 }
  0xff   :  { %v953_v35 = vpop.f32.mrf.mxu1 }
 0x100   :  { %v626_v38 = vadd.f32 %v952_v32, %v116_v33 }
 0x101   :  { %v954_v39 = vpop.f32.mrf.mxu1 }
 0x102   :  { %v955_v40 = vadd.f32 %v954_v39, %v953_v35  ;;  %v511_v45 = vpop.f32.mrf.mxu0 }
 0x103   :  { %v972_v46 = vpop.f32.mrf.mxu1  ;;  %v512_v47 = vadd.f32 %v511_v45, %v108_v37 }
 0x104   :  { %v675_v48 = vadd.f32 %v972_v46, %v626_v38  ;;  %v513_v52 = vpop.f32.mrf.mxu0  ;;  %v629_v54 = vadd.f32 %v955_v40, %v116_v33 }
 0x105   :  { %v666_v53 = vpop.f32.mrf.mxu1  ;;  %v565_v55 = vadd.f32 %v564_v11, %v512_v47  ;;  %v514_v57 = vadd.f32 %v513_v52, %v112_v43 }
 0x106   :  { %v908_v56 = vmul.f32 -1.442695, %v675_v48  ;;  %v667_v58 = vadd.f32 %v666_v53, %v618_v49  ;;  %v515_v59 = vpop.f32.mrf.mxu0 }
 0x107   :  { %v973_v61 = vpop.f32.mrf.mxu1  ;;  %v900_v0 = vmul.f32 -1.442695, %v565_v55  ;;  %v567_v1 = vadd.f32 %v566_v12, %v514_v57  ;;  %v516_v3 = vadd.f32 %v515_v59, %v108_v37  ;;  %v689_v57 = vunpack.c.l.bf16 %v1260_v41 }
 0x108   :  { %1061 = vpow2.f32 %v908_v56  ;;  %v902_v2 = vmul.f32 -1.442695, %v667_v58  ;;  %v678_v4 = vadd.f32 %v973_v61, %v629_v54  ;;  %v517_v5 = vpop.f32.mrf.mxu0 }
 0x109   :  { %v669_v6 = vpop.f32.mrf.mxu1  ;;  %1063 = vpow2.f32 %v900_v0  ;;  %v901_v7 = vmul.f32 -1.442695, %v567_v1  ;;  %v518_v8 = vadd.f32 %v517_v5, %v112_v43  ;;  %v569_v10 = vadd.f32 %v568_v13, %v516_v3 }
 0x10a   :  { %v670_v9 = vadd.f32 %v669_v6, %v621_v63  ;;  %1065 = vpow2.f32 %v902_v2  ;;  %v911_v11 = vmul.f32 -1.442695, %v678_v4  ;;  %v521_v21 = vpop.f32.mrf.mxu0  ;;  %v683_v0 = vunpack.c.l.bf16 %v1187_v19 }
 0x10b   :  { %1067 = vpow2.f32 %v901_v7  ;;  %v571_v22 = vadd.f32 %v570_v14, %v518_v8  ;;  %v522_v24 = vadd.f32 %v521_v21, %v108_v37  ;;  %v903_v25 = vmul.f32 -1.442695, %v569_v10 }
 0x10c   :  { %v905_v23 = vmul.f32 -1.442695, %v670_v9  ;;  %1069 = vpow2.f32 %v911_v11  ;;  %v523_v12 = vpop.f32.mrf.mxu0  ;;  %v681_v2 = vunpack.c.l.bf16 %v1294_v50  ;;  %v682_v3 = vunpack.c.h.bf16 %v1294_v50 }
 0x10d   :  { %v904_v26 = vmul.f32 -1.442695, %v571_v22  ;;  %v575_v27 = vadd.f32 %v1374_v15, %v522_v24  ;;  %v524_v28 = vadd.f32 %v523_v12, %v112_v43  ;;  %v692_v6 = vunpack.c.l.bf16 %v1265_v42 }
 0x10e   :  { %1071 = vpow2.f32 %v905_v23  ;;  %v525_v29 = vpop.f32.mrf.mxu0  ;;  %v686_v8 = vunpack.c.l.bf16 %v1192_v20  ;;  %v684_v21 = vunpack.c.l.bf16 %v1299_v51  ;;  %v685_v22 = vunpack.c.h.bf16 %v1299_v51 }
 0x10f   :  { %1073 = vpow2.f32 %v903_v25  ;;  %v906_v30 = vmul.f32 -1.442695, %v575_v27  ;;  %v577_v13 = vadd.f32 %v1376_v16, %v524_v28  ;;  %v526_v31 = vadd.f32 %v525_v29, %v108_v37 }
 0x110   :  { %1075 = vpow2.f32 %v904_v26  ;;  %v527_v32 = vpop.f32.mrf.mxu0  ;;  %v687_v28 = vunpack.c.l.bf16 %v1327_v60  ;;  %v688_v29 = vunpack.c.h.bf16 %v1327_v60 }
 0x111   :  { %1077 = vpow2.f32 %v906_v30  ;;  %v907_v14 = vmul.f32 -1.442695, %v577_v13  ;;  %v579_v33 = vadd.f32 %v1378_v17, %v526_v31  ;;  %v528_v34 = vadd.f32 %v527_v32, %v112_v43 }
 0x113   :  { %1079 = vpow2.f32 %v907_v14  ;;  %v909_v35 = vmul.f32 -1.442695, %v579_v33  ;;  %v581_v36 = vadd.f32 %v1380_v18, %v528_v34 }
 0x115   :  { %v1062_v38 = vpop.eup %1061  ;;  %1081 = vpow2.f32 %v909_v35  ;;  %v910_v39 = vmul.f32 -1.442695, %v581_v36  ;;  %v690_v35 = vunpack.c.l.bf16 %v1334_v62  ;;  %v691_v36 = vunpack.c.h.bf16 %v1334_v62 }
 0x116   :  { %v737_v15 = vadd.f32 1.0, %v1062_v38  ;;  %v1064_v40 = vpop.eup %1063 }
 0x117   :  { %v1066_v44 = vpop.eup %1065  ;;  %v729_v45 = vadd.f32 1.0, %v1064_v40 }
 0x118   :  { %1083 = vrcp.f32 %v737_v15  ;;  %v1068_v16 = vpop.eup %1067  ;;  %v731_v37 = vadd.f32 1.0, %v1066_v44 }
 0x119   :  { %1085 = vpow2.f32 %v910_v39  ;;  %v1070_v46 = vpop.eup %1069  ;;  %v730_v47 = vadd.f32 1.0, %v1068_v16 }
 0x11a   :  { %1087 = vrcp.f32 %v729_v45  ;;  %v740_v43 = vadd.f32 1.0, %v1070_v46 }
 0x11b   :  { %v1072_v17 = vpop.eup %1071  ;;  %1089 = vrcp.f32 %v731_v37 }
 0x11c   :  { %v1074_v48 = vpop.eup %1073  ;;  %1091 = vrcp.f32 %v730_v47  ;;  %v734_v18 = vadd.f32 1.0, %v1072_v17 }
 0x11d   :  { %v1076_v49 = vpop.eup %1075  ;;  %v732_v52 = vadd.f32 1.0, %v1074_v48  ;;  %1093 = vrcp.f32 %v740_v43 }
 0x11e   :  { %v733_v53 = vadd.f32 1.0, %v1076_v49  ;;  %1095 = vrcp.f32 %v734_v18  ;;  %v1078_v54 = vpop.eup %1077 }
 0x11f   :  { %1097 = vrcp.f32 %v732_v52  ;;  %v735_v55 = vadd.f32 1.0, %v1078_v54 }
 0x120   :  { %1099 = vrcp.f32 %v733_v53  ;;  %v1080_v56 = vpop.eup %1079 }
 0x121   :  { %1101 = vrcp.f32 %v735_v55  ;;  %v736_v58 = vadd.f32 1.0, %v1080_v56 }
 0x122   :  { %v1082_v59 = vpop.eup %1081 }
 0x123   :  { %1103 = vrcp.f32 %v736_v58  ;;  %v738_v61 = vadd.f32 1.0, %v1082_v59 }
 0x125   :  { %v1084_v63 = vpop.eup %1083  ;;  %1105 = vrcp.f32 %v738_v61 }
 0x126   :  { %v1086_v1 = vpop.eup %1085  ;;  %v773_v4 = vmul.f32 %v1084_v63, %v689_v57 }
 0x127   :  { %v1088_v5 = vpop.eup %1087  ;;  %v739_v7 = vadd.f32 1.0, %v1086_v1 }
 0x128   :  { %v1090_v41 = vpop.eup %1089  ;;  %v925_v9 = vpack.c.bf16 %v773_v4, %v773_v4  ;;  %v765_v50 = vmul.f32 %v1088_v5, %v681_v2 }
 0x129   :  { %v1092_v10 = vpop.eup %1091  ;;  %v767_v11 = vmul.f32 %v1090_v41, %v683_v0  ;;  %1107 = vrcp.f32 %v739_v7 }
 0x12a   :  { %v1094_v19 = vpop.eup %1093  ;;  %823 = vst.msk [vmem:[%s1432_s3 + $0x20] sm:$0xf] %vm818_vm1, %v925_v9  ;;  %v766_v42 = vmul.f32 %v1092_v10, %v682_v3 }
 0x12b   :  { %v1096_v23 = vpop.eup %1095  ;;  %v921_v24 = vpack.c.bf16 %v767_v11, %v767_v11  ;;  %v776_v20 = vmul.f32 %v1094_v19, %v692_v6 }
 0x12c   :  { %v1098_v25 = vpop.eup %1097  ;;  %v920_v12 = vpack.c.bf16 %v766_v42, %v765_v50  ;;  %v770_v26 = vmul.f32 %v1096_v23, %v686_v8 }
 0x12d   :  { %v1100_v27 = vpop.eup %1099  ;;  %819 = vst.msk [vmem:[%s1432_s3 + $0x8] sm:$0xf] %vm818_vm1, %v921_v24  ;;  %v927_v51 = vpack.c.bf16 %v776_v20, %v776_v20  ;;  %v768_v30 = vmul.f32 %v1098_v25, %v684_v21 }
 0x12e   :  { %817 = vst [vmem:[%s1432_s3] sm:$0xff] %v920_v12  ;;  %v769_v13 = vmul.f32 %v1100_v27, %v685_v22  ;;  %v923_v31 = vpack.c.bf16 %v770_v26, %v770_v26  ;;  %v1102_v32 = vpop.eup %1101 }
 0x12f   :  { %825 = vst.msk [vmem:[%s1432_s3 + $0x2c] sm:$0xf] %vm818_vm1, %v927_v51  ;;  %v771_v33 = vmul.f32 %v1102_v32, %v687_v28 }
 0x130   :  { %v922_v14 = vpack.c.bf16 %v769_v13, %v768_v30  ;;  %821 = vst.msk [vmem:[%s1432_s3 + $0x14] sm:$0xf] %vm818_vm1, %v923_v31  ;;  %v1104_v60 = vpop.eup %1103 }
 0x131   :  { %v772_v34 = vmul.f32 %v1104_v60, %v688_v29 }
 0x132   :  { %820 = vst [vmem:[%s1432_s3 + $0xc] sm:$0xff] %v922_v14  ;;  %v1106_v38 = vpop.eup %1105 }
 0x133   :  { %v924_v15 = vpack.c.bf16 %v772_v34, %v771_v33  ;;  %v774_v40 = vmul.f32 %v1106_v38, %v690_v35 }
 0x135   :  { %822 = vst [vmem:[%s1432_s3 + $0x18] sm:$0xff] %v924_v15 }
 0x136   :  { %v1108_v39 = vpop.eup %1107 }
 0x137   :  { %v775_v44 = vmul.f32 %v1108_v39, %v691_v36 }
 0x139   :  { %v926_v45 = vpack.c.bf16 %v775_v44, %v774_v40 }
 0x13b   :  { %824 = vst [vmem:[%s1432_s3 + $0x24] sm:$0xff] %v926_v45 }

// kernel: fakenet_forward.23
= control target key start
LH: loop header
LB: loop body
LE: loop exit
PB: predicated region body
PF: predicated region fallthrough
CT: control target
= control target key end

     0   :  { %v978_v1 = vmov 0   ;;  %vm489_vm0 = vcmask 523264   ;;  %vm753_vm1 = vcmask 519168   ;;  %s1290_s2 = inlined_call_operand.vmem [shape: bf16[320,320], index: 2, kind: input, shape index: {}]   ;;  %s1291_s0 = inlined_call_operand.vmem [shape: bf16[32,320], index: 0, kind: input, shape index: {}]   ;;  %s1292_s1 = inlined_call_operand.vmem [shape: bf16[32,320], index: 1, kind: input, shape index: {}]   ;;  %s1293_s3 = inlined_call_operand.vmem [shape: f32[1,320], index: 3, kind: input, shape index: {}]   ;;  %s1294_s4 = inlined_call_operand.vmem [shape: bf16[32,320], index: 4, kind: output, shape index: {}]  }
   0x1   :  { %v898_v0 = vld [vmem:[%s1290_s2 + $0xac] ss:$12 sps:$4 sm:$0xff]   ;;  %581 = vmatprep.mubr.bf16.mxu1 %v978_v1  ;;  %v902_v3 = vld [vmem:[%s1290_s2 + $0xa8] ss:$12 sps:$4 sm:$0xff]   ;;  %v908_v7 = vld [vmem:[%s1290_s2 + $0x90] ss:$12 sps:$4 sm:$0xff]  }
   0x2   :  { %v900_v2 = vld [vmem:[%s1290_s2 + $0x1cc] ss:$12 sps:$4 sm:$0xff]   ;;  %496 = vmatprep.subr.bf16.mxu0 %v898_v0  ;;  %v903_v4 = vld [vmem:[%s1290_s2 + $0x1c8] ss:$12 sps:$4 sm:$0xff]   ;;  %v909_v8 = vld [vmem:[%s1290_s2 + $0x1b0] ss:$12 sps:$4 sm:$0xff]  }
   0x3   :  { %557 = vmatprep.subr.bf16.mxu1 %v900_v2  ;;  %v904_v5 = vld [vmem:[%s1290_s2 + $0x94] ss:$12 sps:$4 sm:$0xff]   ;;  %497 = vmatpush1.bf16.msra.mxu0 %v902_v3  ;;  %v910_v9 = vld [vmem:[%s1290_s2 + $0x7c] ss:$12 sps:$4 sm:$0xff]   ;;  %v914_v11 = vld [vmem:[%s1290_s2 + $0x78] ss:$12 sps:$4 sm:$0xff]  }
   0x4   :  { %558 = vmatpush1.bf16.msra.mxu1 %v903_v4  ;;  %v906_v6 = vld [vmem:[%s1290_s2 + $0x1b4] ss:$12 sps:$4 sm:$0xff]   ;;  %498 = vmatprep.subr.bf16.mxu0 %v904_v5  ;;  %v912_v10 = vld [vmem:[%s1290_s2 + $0x19c] ss:$12 sps:$4 sm:$0xff]   ;;  %v915_v12 = vld [vmem:[%s1290_s2 + $0x198] ss:$12 sps:$4 sm:$0xff]  }
   0x5   :  { %559 = vmatprep.subr.bf16.mxu1 %v906_v6  ;;  %v916_v13 = vld [vmem:[%s1290_s2 + $0x64] ss:$12 sps:$4 sm:$0xff]   ;;  %v920_v15 = vld [vmem:[%s1290_s2 + $0x60] ss:$12 sps:$4 sm:$0xff]   ;;  %v19_v19 = vld [vmem:[%s1291_s0 + $0x8] sm:$0xf] }
   0x6   :  { %v918_v14 = vld [vmem:[%s1290_s2 + $0x184] ss:$12 sps:$4 sm:$0xff]   ;;  %v921_v16 = vld [vmem:[%s1290_s2 + $0x180] ss:$12 sps:$4 sm:$0xff]   ;;  %v21_v20 = vld [vmem:[%s1291_s0 + $0x14] sm:$0xf] }
   0x7   :  { %499 = vmatpush1.bf16.msra.mxu0 %v908_v7  ;;  %v922_v17 = vld [vmem:[%s1290_s2 + $0x4c] ss:$12 sps:$4 sm:$0xff]   ;;  %v924_v18 = vld [vmem:[%s1290_s2 + $0x170] ss:$12 sps:$4 sm:$0xff]   ;;  %v27_v21 = vld [vmem:[%s1292_s1 + $0x8] sm:$0xf] }
   0x8   :  { %560 = vmatpush1.bf16.msra.mxu1 %v909_v8  ;;  %500 = vmatprep.subr.bf16.mxu0 %v910_v9  ;;  %v29_v22 = vld [vmem:[%s1292_s1 + $0x14] sm:$0xf]  ;;  %v35_v23 = vadd.bf16 %v27_v21, %v19_v19  ;;  %v926_v26 = vld [vmem:[%s1290_s2 + $0xb0] ss:$12 sps:$4 sm:$0xff]   ;;  %v929_v29 = vld [vmem:[%s1290_s2 + $0x158] ss:$12 sps:$4 sm:$0xff]  }
   0x9   :  { %561 = vmatprep.subr.bf16.mxu1 %v912_v10  ;;  %v925_v24 = vld [vmem:[%s1290_s2 + $0x48] ss:$12 sps:$4 sm:$0xff]   ;;  %v37_v25 = vadd.bf16 %v29_v22, %v21_v20  ;;  %v930_v30 = vld [vmem:[%s1290_s2 + $0x30] ss:$12 sps:$4 sm:$0xff]   ;;  %v931_v31 = vld [vmem:[%s1290_s2 + $0x98] ss:$12 sps:$4 sm:$0xff]  }
   0xa   :  { %v927_v28 = vld [vmem:[%s1290_s2 + $0x34] ss:$12 sps:$4 sm:$0xff]   ;;  %v932_v32 = vld [vmem:[%s1290_s2 + $0x1c] ss:$12 sps:$4 sm:$0xff]   ;;  %v935_v34 = vld [vmem:[%s1290_s2 + $0x18] ss:$12 sps:$4 sm:$0xff]  }
   0xb   :  { %501 = vmatpush1.bf16.msra.mxu0 %v914_v11  ;;  %v1076_v27 = vcombine.low %v35_v23, %v37_v25  ;;  %v934_v33 = vld [vmem:[%s1290_s2 + $0x140] ss:$12 sps:$4 sm:$0xff]   ;;  %v937_v36 = vld [vmem:[%s1290_s2 + $0x4] ss:$12 sps:$4 sm:$0xff]   ;;  %v939_v37 = vld [vmem:[%s1290_s2 + $0x128] ss:$12 sps:$4 sm:$0xff]  }
   0xc   :  { %562 = vmatpush1.bf16.msra.mxu1 %v915_v12  ;;  %502 = vmatprep.subr.bf16.mxu0 %v916_v13  ;;  %v936_v35 = vld [vmem:[%s1290_s2 + $0x80] ss:$12 sps:$4 sm:$0xff]   ;;  %v941_v39 = vld [vmem:[%s1290_s2 + $0x68] ss:$12 sps:$4 sm:$0xff]   ;;  %v944_v41 = vld [vmem:[%s1290_s2 + $0x110] ss:$12 sps:$4 sm:$0xff]  }
   0xd   :  { %563 = vmatprep.subr.bf16.mxu1 %v918_v14  ;;  %v940_v38 = vld [vmem:[%s1290_s2] ss:$12 sps:$4 sm:$0xff]   ;;  %v945_v42 = vld [vmem:[%s1290_s2 + $0x168] ss:$12 sps:$4 sm:$0xff]   ;;  %v946_v43 = vld [vmem:[%s1290_s2 + $0x50] ss:$12 sps:$4 sm:$0xff]  }
   0xe   :  { %v942_v40 = vld [vmem:[%s1290_s2 + $0x16c] ss:$12 sps:$4 sm:$0xff]   ;;  %v947_v44 = vld [vmem:[%s1290_s2 + $0x154] ss:$12 sps:$4 sm:$0xff]   ;;  %v950_v51 = vld [vmem:[%s1290_s2 + $0x150] ss:$12 sps:$4 sm:$0xff]  }
   0xf   :  { %503 = vmatpush1.bf16.msra.mxu0 %v920_v15  ;;  %v949_v45 = vld [vmem:[%s1290_s2 + $0xf8] ss:$12 sps:$4 sm:$0xff]   ;;  %v23_v46 = vld [vmem:[%s1291_s0 + $0x20] sm:$0xf]  ;;  %v25_v47 = vld [vmem:[%s1291_s0 + $0x2c] sm:$0xf] }
  0x10   :  { %564 = vmatpush1.bf16.msra.mxu1 %v921_v16  ;;  %504 = vmatprep.subr.bf16.mxu0 %v922_v17  ;;  %v31_v48 = vld [vmem:[%s1292_s1 + $0x20] sm:$0xf]  ;;  %v33_v49 = vld [vmem:[%s1292_s1 + $0x2c] sm:$0xf]  ;;  %v951_v52 = vld [vmem:[%s1290_s2 + $0x38] ss:$12 sps:$4 sm:$0xff]  }
  0x11   :  { %851 = vmatprep.subr.bf16.mxu1 %v924_v18  ;;  %v39_v50 = vadd.bf16 %v31_v48, %v23_v46  ;;  %v41_v53 = vadd.bf16 %v33_v49, %v25_v47  ;;  %v952_v54 = vld [vmem:[%s1290_s2 + $0x13c] ss:$12 sps:$4 sm:$0xff]   ;;  %v954_v56 = vld [vmem:[%s1290_s2 + $0xe0] ss:$12 sps:$4 sm:$0xff]   ;;  %v955_v57 = vld [vmem:[%s1290_s2 + $0x138] ss:$12 sps:$4 sm:$0xff]  }
  0x12   :  { %v956_v58 = vld [vmem:[%s1290_s2 + $0x20] ss:$12 sps:$4 sm:$0xff]   ;;  %v957_v59 = vld [vmem:[%s1290_s2 + $0x124] ss:$12 sps:$4 sm:$0xff]   ;;  %v959_v60 = vld [vmem:[%s1290_s2 + $0xc8] ss:$12 sps:$4 sm:$0xff]  }
  0x13   :  { %831 = vmatmul.mubr.msk.bf16.vlgmr.msra.gmra.mxu1 %vm489_vm0, %v1076_v27  ;;  %505 = vmatpush1.bf16.msra.mxu0 %v925_v24  ;;  %v1155_v55 = vcombine.low %v39_v50, %v41_v53  ;;  %v18_v61 = vld [vmem:[%s1291_s0] sm:$0xff]  ;;  %v20_v62 = vld [vmem:[%s1291_s0 + $0xc] sm:$0xff]  ;;  %v961_v4 = vld [vmem:[%s1290_s2 + $0x8] ss:$12 sps:$4 sm:$0xff]  }
  0x14   :  { %852 = vmatpush3.bf16.msra.mxu1 %v926_v26  ;;  %506 = vmatprep.subr.bf16.mxu0 %v927_v28  ;;  %v26_v63 = vld [vmem:[%s1292_s1] sm:$0xff]  ;;  %v28_v0 = vld [vmem:[%s1292_s1 + $0xc] sm:$0xff]  ;;  %v22_v8 = vld [vmem:[%s1291_s0 + $0x18] sm:$0xff] }
  0x15   :  { %853 = vmatprep.subr.bf16.mxu1 %v929_v29  ;;  %591 = vmatprep.mubr.bf16.mxu1 %v978_v1  ;;  %v34_v1 = vadd.bf16 %v26_v63, %v18_v61  ;;  %v36_v2 = vadd.bf16 %v28_v0, %v20_v62  ;;  %v960_v3 = vld [vmem:[%s1290_s2 + $0x120] ss:$12 sps:$4 sm:$0xff]   ;;  %v964_v7 = vld [vmem:[%s1290_s2 + $0x1d0] ss:$12 sps:$4 sm:$0xff]   ;;  %v24_v9 = vld [vmem:[%s1291_s0 + $0x24] sm:$0xff] }
  0x16   :  { %v962_v6 = vld [vmem:[%s1290_s2 + $0x10c] ss:$12 sps:$4 sm:$0xff]   ;;  %v32_v12 = vld [vmem:[%s1292_s1 + $0x24] sm:$0xff]  ;;  %v966_v16 = vld [vmem:[%s1290_s2 + $0xf4] ss:$12 sps:$4 sm:$0xff]  }
  0x17   :  { %507 = vmatpush1.bf16.msra.mxu0 %v930_v30  ;;  %v766_v5 = vcombine.high %v34_v1, %v36_v2  ;;  %v30_v10 = vld [vmem:[%s1292_s1 + $0x18] sm:$0xff]  ;;  %v765_v11 = vcombine.low %v34_v1, %v36_v2  ;;  %v965_v14 = vld [vmem:[%s1290_s2 + $0x108] ss:$12 sps:$4 sm:$0xff]   ;;  %v40_v15 = vadd.bf16 %v32_v12, %v24_v9  ;;  %v972_v21 = vld [vmem:[%s1290_s2 + $0x1a0] ss:$12 sps:$4 sm:$0xff]  }
  0x18   :  { %854 = vmatpush3.bf16.msra.mxu1 %v931_v31  ;;  %508 = vmatprep.subr.bf16.mxu0 %v932_v32  ;;  %v38_v13 = vadd.bf16 %v30_v10, %v22_v8  ;;  %v968_v17 = vld [vmem:[%s1290_s2 + $0x1b8] ss:$12 sps:$4 sm:$0xff]   ;;  %v969_v19 = vld [vmem:[%s1290_s2 + $0xf0] ss:$12 sps:$4 sm:$0xff]   ;;  %v976_v25 = vld [vmem:[%s1290_s2 + $0x188] ss:$12 sps:$4 sm:$0xff]  }
  0x19   :  { %855 = vmatprep.subr.bf16.mxu1 %v934_v33  ;;  %528 = vmatprep.mubr.bf16.mxu0 %v766_v5  ;;  %v970_v20 = vld [vmem:[%s1290_s2 + $0xdc] ss:$12 sps:$4 sm:$0xff]   ;;  %v973_v23 = vld [vmem:[%s1290_s2 + $0xd8] ss:$12 sps:$4 sm:$0xff]   ;;  %v977_v26 = vld [vmem:[%s1290_s2 + $0xc0] ss:$12 sps:$4 sm:$0xff]  }
  0x1a   :  { %v769_v18 = vcombine.high %v38_v13, %v40_v15  ;;  %v768_v22 = vcombine.low %v38_v13, %v40_v15  ;;  %v974_v24 = vld [vmem:[%s1290_s2 + $0xc4] ss:$12 sps:$4 sm:$0xff]  }
  0x1b   :  { %509 = vmatpush1.bf16.msra.mxu0 %v935_v34  ;;  %832 = vmatmul.mubr.msk.bf16.gmra.mxu1 %vm489_vm0, %v1155_v55 }
  0x1c   :  { %856 = vmatpush3.bf16.msra.mxu1 %v936_v35  ;;  %510 = vmatprep.subr.bf16.mxu0 %v937_v36  ;;  %v124_v35 = vlaneseq }
  0x1d   :  { %857 = vmatprep.subr.bf16.mxu1 %v939_v37  ;;  %634 = vmatprep.mubr.bf16.mxu1 %v766_v5 }
  0x1f   :  { %511 = vmatpush1.bf16.msra.mxu0 %v940_v38  ;;  %v125_v38 = vshrl.u32 %v124_v35, 7 }
  0x20   :  { %858 = vmatpush3.bf16.msra.mxu1 %v941_v39  ;;  %512 = vmatprep.subr.bf16.mxu0 %v942_v40 }
  0x21   :  { %859 = vmatprep.subr.bf16.mxu1 %v944_v41  ;;  %v134_v41 = vsub.s32 2, %v125_v38  ;;  %v130_v48 = vsub.s32 1, %v125_v38 }
  0x23   :  { %513 = vmatpush2.bf16.msra.mxu0 %v945_v42 }
  0x24   :  { %860 = vmatpush3.bf16.msra.mxu1 %v946_v43  ;;  %514 = vmatprep.subr.bf16.mxu0 %v947_v44  ;;  %v122_v43 = vld [vmem:[%s1293_s3] sm:$0x7]  ;;  %v126_v44 = vsub.s32 0, %v125_v38 }
  0x25   :  { %861 = vmatprep.subr.bf16.mxu1 %v949_v45  ;;  %v135_v47 = vrot.slane %v122_v43, %v134_v41 }
  0x27   :  { %515 = vmatpush2.bf16.msra.mxu0 %v950_v51  ;;  %v127_v51 = vrot.slane %v122_v43, %v126_v44 }
  0x28   :  { %862 = vmatpush3.bf16.msra.mxu1 %v951_v52  ;;  %516 = vmatprep.subr.bf16.mxu0 %v952_v54 }
  0x29   :  { %863 = vmatprep.subr.bf16.mxu1 %v954_v56 }
  0x2b   :  { %517 = vmatpush2.bf16.msra.mxu0 %v955_v57 }
  0x2c   :  { %864 = vmatpush3.bf16.msra.mxu1 %v956_v58  ;;  %518 = vmatprep.subr.bf16.mxu0 %v957_v59 }
  0x2d   :  { %865 = vmatprep.subr.bf16.mxu1 %v959_v60 }
  0x2f   :  { %519 = vmatpush2.bf16.msra.mxu0 %v960_v3 }
  0x30   :  { %866 = vmatpush3.bf16.msra.mxu1 %v961_v4  ;;  %520 = vmatprep.subr.bf16.mxu0 %v962_v6 }
  0x31   :  { %885 = vmatprep.subr.bf16.mxu1 %v964_v7 }
  0x33   :  { %635 = vmatmul.mubr.bf16.vlgmr.msra.gmra.mxu1 %v765_v11  ;;  %521 = vmatpush2.bf16.msra.mxu0 %v965_v14 }
  0x34   :  { %886 = vmatpush3.bf16.msra.mxu1 %v964_v7  ;;  %522 = vmatprep.subr.bf16.mxu0 %v966_v16 }
  0x35   :  { %887 = vmatprep.subr.bf16.mxu1 %v968_v17  ;;  %642 = vmatprep.mubr.bf16.mxu1 %v769_v18 }
  0x37   :  { %523 = vmatpush2.bf16.msra.mxu0 %v969_v19 }
  0x38   :  { %888 = vmatpush3.bf16.msra.mxu1 %v968_v17  ;;  %524 = vmatprep.subr.bf16.mxu0 %v970_v20 }
  0x39   :  { %889 = vmatprep.subr.bf16.mxu1 %v972_v21 }
  0x3b   :  { %643 = vmatmul.mubr.bf16.gmra.mxu1 %v768_v22  ;;  %525 = vmatpush2.bf16.msra.mxu0 %v973_v23 }
  0x3c   :  { %890 = vmatpush3.bf16.msra.mxu1 %v972_v21  ;;  %526 = vmatprep.subr.bf16.mxu0 %v974_v24 }
  0x3d   :  { %891 = vmatprep.subr.bf16.mxu1 %v976_v25  ;;  %893 = vmatprep.mubr.msk.bf16.mxu1 %vm489_vm0, %v1076_v27 }
  0x3f   :  { %527 = vmatpush2.bf16.msra.mxu0 %v977_v26 }
  0x40   :  { %892 = vmatpush3.bf16.msra.mxu1 %v976_v25 }
  0x42   :  { %529 = vmatmul.mubr.bf16.vlgmr.msra.gmra.mxu0 %v765_v11 }
  0x43   :  { %894 = vmatmul.mubr.msk.bf16.vlgmr.msra.gmra.mxu1 %vm489_vm0, %v1155_v55  ;;  %538 = vmatprep.mubr.bf16.mxu0 %v769_v18  ;;  %v131_v55 = vrot.slane %v122_v43, %v130_v48 }
  0x4a   :  { %539 = vmatmul.mubr.bf16.gmra.mxu0 %v768_v22 }
  0xd3   :  { %v583_v28 = vpop.f32.mrf.mxu1 }
  0xd5   :  { %v585_v29 = vpop.f32.mrf.mxu1 }
  0xd7   :  { %v587_v30 = vpop.f32.mrf.mxu1 }
  0xd9   :  { %v1244_v31 = vpop.f32.mrf.mxu1 }
  0xdb   :  { %v1246_v32 = vpop.f32.mrf.mxu1 }
  0xdd   :  { %v1248_v33 = vpop.f32.mrf.mxu1 }
  0xdf   :  { %v1250_v34 = vpop.f32.mrf.mxu1 }
  0xe1   :  { %v1252_v27 = vpop.f32.mrf.mxu1 }
  0xf3   :  { %v867_v36 = vpop.f32.mrf.mxu1 }
  0xf5   :  { %v868_v37 = vpop.f32.mrf.mxu1 }
  0xf6   :  { %v869_v50 = vadd.f32 %v868_v37, %v867_v36 }
  0xf7   :  { %v870_v39 = vpop.f32.mrf.mxu1 }
  0xf8   :  { %v637_v61 = vadd.f32 %v869_v50, %v135_v47 }
  0xf9   :  { %v871_v40 = vpop.f32.mrf.mxu1 }
  0xfa   :  { %v872_v58 = vadd.f32 %v871_v40, %v870_v39 }
  0xfb   :  { %v873_v42 = vpop.f32.mrf.mxu1 }
  0xfc   :  { %v640_v10 = vadd.f32 %v872_v58, %v135_v47 }
  0xfd   :  { %v874_v45 = vpop.f32.mrf.mxu1 }
  0xfe   :  { %v875_v46 = vadd.f32 %v874_v45, %v873_v42 }
  0xff   :  { %v876_v49 = vpop.f32.mrf.mxu1 }
 0x100   :  { %v645_v52 = vadd.f32 %v875_v46, %v135_v47 }
 0x101   :  { %v877_v53 = vpop.f32.mrf.mxu1 }
 0x102   :  { %v878_v54 = vadd.f32 %v877_v53, %v876_v49  ;;  %v530_v56 = vpop.f32.mrf.mxu0 }
 0x103   :  { %v895_v57 = vpop.f32.mrf.mxu1  ;;  %v531_v59 = vadd.f32 %v530_v56, %v127_v51 }
 0x104   :  { %v694_v60 = vadd.f32 %v895_v57, %v645_v52  ;;  %v532_v62 = vpop.f32.mrf.mxu0  ;;  %v648_v0 = vadd.f32 %v878_v54, %v135_v47 }
 0x105   :  { %v685_v63 = vpop.f32.mrf.mxu1  ;;  %v584_v1 = vadd.f32 %v583_v28, %v531_v59  ;;  %v533_v3 = vadd.f32 %v532_v62, %v131_v55 }
 0x106   :  { %v708_v2 = vmax.f32 %v694_v60, 0.0  ;;  %v686_v4 = vadd.f32 %v685_v63, %v637_v61  ;;  %v534_v5 = vpop.f32.mrf.mxu0 }
 0x107   :  { %v896_v6 = vpop.f32.mrf.mxu1  ;;  %v586_v8 = vadd.f32 %v585_v29, %v533_v3  ;;  %v700_v11 = vmax.f32 %v584_v1, 0.0  ;;  %v535_v12 = vadd.f32 %v534_v5, %v127_v51 }
 0x108   :  { %v848_v7 = vpack.c.bf16 %v708_v2, %v708_v2  ;;  %v702_v9 = vmax.f32 %v686_v4, 0.0  ;;  %v697_v13 = vadd.f32 %v896_v6, %v648_v0  ;;  %v536_v14 = vpop.f32.mrf.mxu0 }
 0x109   :  { %v688_v15 = vpop.f32.mrf.mxu1  ;;  %v701_v16 = vmax.f32 %v586_v8, 0.0  ;;  %v537_v18 = vadd.f32 %v536_v14, %v131_v55  ;;  %v588_v20 = vadd.f32 %v587_v30, %v535_v12 }
 0x10a   :  { %758 = vst.msk [vmem:[%s1294_s4 + $0x20] sm:$0xf] %vm753_vm1, %v848_v7  ;;  %v844_v17 = vpack.c.bf16 %v702_v9, %v702_v9  ;;  %v689_v19 = vadd.f32 %v688_v15, %v640_v10  ;;  %v711_v21 = vmax.f32 %v697_v13, 0.0  ;;  %v540_v22 = vpop.f32.mrf.mxu0 }
 0x10b   :  { %v843_v23 = vpack.c.bf16 %v701_v16, %v700_v11  ;;  %v590_v24 = vadd.f32 %v1244_v31, %v537_v18  ;;  %v541_v26 = vadd.f32 %v540_v22, %v127_v51  ;;  %v703_v28 = vmax.f32 %v588_v20, 0.0 }
 0x10c   :  { %754 = vst.msk [vmem:[%s1294_s4 + $0x8] sm:$0xf] %vm753_vm1, %v844_v17  ;;  %v705_v25 = vmax.f32 %v689_v19, 0.0  ;;  %v850_v29 = vpack.c.bf16 %v711_v21, %v711_v21  ;;  %v542_v35 = vpop.f32.mrf.mxu0 }
 0x10d   :  { %752 = vst [vmem:[%s1294_s4] sm:$0xff] %v843_v23  ;;  %v704_v30 = vmax.f32 %v590_v24, 0.0  ;;  %v594_v37 = vadd.f32 %v1246_v32, %v541_v26  ;;  %v543_v38 = vadd.f32 %v542_v35, %v131_v55 }
 0x10e   :  { %v846_v36 = vpack.c.bf16 %v705_v25, %v705_v25  ;;  %760 = vst.msk [vmem:[%s1294_s4 + $0x2c] sm:$0xf] %vm753_vm1, %v850_v29  ;;  %v544_v31 = vpop.f32.mrf.mxu0 }
 0x10f   :  { %v845_v39 = vpack.c.bf16 %v704_v30, %v703_v28  ;;  %v596_v40 = vadd.f32 %v1248_v33, %v543_v38  ;;  %v545_v41 = vadd.f32 %v544_v31, %v127_v51  ;;  %v706_v32 = vmax.f32 %v594_v37, 0.0 }
 0x110   :  { %756 = vst.msk [vmem:[%s1294_s4 + $0x14] sm:$0xf] %vm753_vm1, %v846_v36  ;;  %v546_v42 = vpop.f32.mrf.mxu0 }
 0x111   :  { %755 = vst [vmem:[%s1294_s4 + $0xc] sm:$0xff] %v845_v39  ;;  %v707_v43 = vmax.f32 %v596_v40, 0.0  ;;  %v598_v44 = vadd.f32 %v1250_v34, %v545_v41  ;;  %v547_v45 = vadd.f32 %v546_v42, %v131_v55 }
 0x113   :  { %v847_v46 = vpack.c.bf16 %v707_v43, %v706_v32  ;;  %v600_v47 = vadd.f32 %v1252_v27, %v547_v45  ;;  %v709_v48 = vmax.f32 %v598_v44, 0.0 }
 0x115   :  { %757 = vst [vmem:[%s1294_s4 + $0x18] sm:$0xff] %v847_v46  ;;  %v710_v33 = vmax.f32 %v600_v47, 0.0 }
 0x117   :  { %v849_v49 = vpack.c.bf16 %v710_v33, %v709_v48 }
 0x119   :  { %759 = vst [vmem:[%s1294_s4 + $0x24] sm:$0xff] %v849_v49 }

// kernel: fakenet_forward.22
= control target key start
LH: loop header
LB: loop body
LE: loop exit
PB: predicated region body
PF: predicated region fallthrough
CT: control target
= control target key end

     0   :  { %s722_s2 = inlined_call_operand.vmem [shape: bf16[128,128], index: 2, kind: input, shape index: {}]   ;;  %s723_s0 = inlined_call_operand.vmem [shape: bf16[128,128], index: 0, kind: input, shape index: {}]   ;;  %s724_s1 = inlined_call_operand.vmem [shape: bf16[128,128], index: 1, kind: input, shape index: {}]   ;;  %s725_s3 = inlined_call_operand.vmem [shape: f32[1,128], index: 3, kind: input, shape index: {}]   ;;  %s726_s4 = inlined_call_operand.vmem [shape: bf16[128,128], index: 4, kind: output, shape index: {}]  }
   0x1   :  { %v542_v0 = vld [vmem:[%s722_s2 + $0x38] sm:$0xff]   ;;  %v543_v1 = vld [vmem:[%s722_s2 + $0x30] sm:$0xff]   ;;  %v544_v2 = vld [vmem:[%s722_s2 + $0x28] sm:$0xff]  }
   0x2   :  { %494 = vmatprep.subr.bf16.mxu0 %v542_v0  ;;  %526 = vmatprep.subr.bf16.mxu1 %v542_v0  ;;  %v545_v3 = vld [vmem:[%s722_s2 + $0x20] sm:$0xff]   ;;  %v546_v16 = vld [vmem:[%s722_s2 + $0x18] sm:$0xff]   ;;  %v547_v19 = vld [vmem:[%s722_s2 + $0x10] sm:$0xff]  }
   0x3   :  { %495 = vmatpush3.bf16.msra.mxu0 %v542_v0  ;;  %534 = vmatpush3.bf16.msra.mxu1 %v542_v0  ;;  %v18_v4 = vld [vmem:[%s723_s0] sm:$0xf]  ;;  %v19_v5 = vld [vmem:[%s723_s0 + $0x4] sm:$0xf]  ;;  %v548_v20 = vld [vmem:[%s722_s2 + $0x8] sm:$0xff]  }
   0x4   :  { %496 = vmatprep.subr.bf16.mxu0 %v543_v1  ;;  %527 = vmatprep.subr.bf16.mxu1 %v543_v1  ;;  %v34_v6 = vld [vmem:[%s724_s1] sm:$0xf]  ;;  %v35_v7 = vld [vmem:[%s724_s1 + $0x4] sm:$0xf]  ;;  %v20_v21 = vld [vmem:[%s723_s0 + $0x8] sm:$0xf] }
   0x5   :  { %v50_v8 = vadd.bf16 %v34_v6, %v18_v4  ;;  %v26_v9 = vld [vmem:[%s723_s0 + $0x20] sm:$0xf]  ;;  %v27_v10 = vld [vmem:[%s723_s0 + $0x24] sm:$0xf]  ;;  %v51_v11 = vadd.bf16 %v35_v7, %v19_v5  ;;  %v36_v22 = vld [vmem:[%s724_s1 + $0x8] sm:$0xf] }
   0x6   :  { %v42_v12 = vld [vmem:[%s724_s1 + $0x20] sm:$0xf]  ;;  %v43_v13 = vld [vmem:[%s724_s1 + $0x24] sm:$0xf]  ;;  %v21_v23 = vld [vmem:[%s723_s0 + $0xc] sm:$0xf]  ;;  %v52_v38 = vadd.bf16 %v36_v22, %v20_v21 }
   0x7   :  { %497 = vmatpush3.bf16.msra.mxu0 %v543_v1  ;;  %535 = vmatpush3.bf16.msra.mxu1 %v543_v1  ;;  %v58_v14 = vadd.bf16 %v42_v12, %v26_v9  ;;  %v59_v15 = vadd.bf16 %v43_v13, %v27_v10  ;;  %v383_v17 = vcombine.low %v50_v8, %v51_v11  ;;  %v37_v24 = vld [vmem:[%s724_s1 + $0xc] sm:$0xf]  ;;  %v28_v25 = vld [vmem:[%s723_s0 + $0x28] sm:$0xf]  ;;  %v549_v28 = vld [vmem:[%s722_s2] sm:$0xff]  }
   0x8   :  { %498 = vmatprep.subr.bf16.mxu0 %v544_v2  ;;  %528 = vmatprep.subr.bf16.mxu1 %v544_v2  ;;  %v29_v26 = vld [vmem:[%s723_s0 + $0x2c] sm:$0xf]  ;;  %v44_v27 = vld [vmem:[%s724_s1 + $0x28] sm:$0xf]  ;;  %v22_v30 = vld [vmem:[%s723_s0 + $0x10] sm:$0xf]  ;;  %v53_v39 = vadd.bf16 %v37_v24, %v21_v23 }
   0x9   :  { %v387_v18 = vcombine.low %v58_v14, %v59_v15  ;;  %510 = vmatprep.mubr.bf16.mxu0 %v383_v17  ;;  %v45_v29 = vld [vmem:[%s724_s1 + $0x2c] sm:$0xf]  ;;  %v23_v31 = vld [vmem:[%s723_s0 + $0x14] sm:$0xf]  ;;  %v38_v32 = vld [vmem:[%s724_s1 + $0x10] sm:$0xf]  ;;  %v60_v40 = vadd.bf16 %v44_v27, %v28_v25 }
   0xa   :  { %v39_v33 = vld [vmem:[%s724_s1 + $0x14] sm:$0xf]  ;;  %v30_v34 = vld [vmem:[%s723_s0 + $0x30] sm:$0xf]  ;;  %v61_v41 = vadd.bf16 %v45_v29, %v29_v26  ;;  %v54_v42 = vadd.bf16 %v38_v32, %v22_v30  ;;  %v24_v46 = vld [vmem:[%s723_s0 + $0x18] sm:$0xf]  ;;  %v384_v48 = vcombine.low %v52_v38, %v53_v39 }
   0xb   :  { %499 = vmatpush3.bf16.msra.mxu0 %v544_v2  ;;  %536 = vmatpush3.bf16.msra.mxu1 %v544_v2  ;;  %v31_v35 = vld [vmem:[%s723_s0 + $0x34] sm:$0xf]  ;;  %v46_v36 = vld [vmem:[%s724_s1 + $0x30] sm:$0xf]  ;;  %v55_v43 = vadd.bf16 %v39_v33, %v23_v31  ;;  %v25_v47 = vld [vmem:[%s723_s0 + $0x1c] sm:$0xf] }
   0xc   :  { %500 = vmatprep.subr.bf16.mxu0 %v545_v3  ;;  %529 = vmatprep.subr.bf16.mxu1 %v545_v3  ;;  %v47_v37 = vld [vmem:[%s724_s1 + $0x34] sm:$0xf]  ;;  %v62_v44 = vadd.bf16 %v46_v36, %v30_v34  ;;  %v388_v49 = vcombine.low %v60_v40, %v61_v41  ;;  %v40_v50 = vld [vmem:[%s724_s1 + $0x18] sm:$0xf]  ;;  %v41_v51 = vld [vmem:[%s724_s1 + $0x1c] sm:$0xf] }
   0xd   :  { %518 = vmatprep.mubr.bf16.mxu1 %v387_v18  ;;  %v63_v45 = vadd.bf16 %v47_v37, %v31_v35  ;;  %v32_v52 = vld [vmem:[%s723_s0 + $0x38] sm:$0xf]  ;;  %v385_v53 = vcombine.low %v54_v42, %v55_v43  ;;  %v33_v55 = vld [vmem:[%s723_s0 + $0x3c] sm:$0xf]  ;;  %v56_v58 = vadd.bf16 %v40_v50, %v24_v46  ;;  %v57_v59 = vadd.bf16 %v41_v51, %v25_v47  ;;  %v382_v0 = vld [vmem:[%s725_s3] ss:$0 sm:$0xff] }
   0xe   :  { %v48_v56 = vld [vmem:[%s724_s1 + $0x38] sm:$0xf]  ;;  %v49_v57 = vld [vmem:[%s724_s1 + $0x3c] sm:$0xf] }
   0xf   :  { %501 = vmatpush3.bf16.msra.mxu0 %v545_v3  ;;  %537 = vmatpush3.bf16.msra.mxu1 %v545_v3  ;;  %v389_v54 = vcombine.low %v62_v44, %v63_v45  ;;  %v64_v60 = vadd.bf16 %v48_v56, %v32_v52  ;;  %v65_v61 = vadd.bf16 %v49_v57, %v33_v55 }
  0x10   :  { %502 = vmatprep.subr.bf16.mxu0 %v546_v16  ;;  %530 = vmatprep.subr.bf16.mxu1 %v546_v16  ;;  %v386_v62 = vcombine.low %v56_v58, %v57_v59 }
  0x11   :  { %v390_v63 = vcombine.low %v64_v60, %v65_v61 }
  0x13   :  { %503 = vmatpush3.bf16.msra.mxu0 %v546_v16  ;;  %538 = vmatpush3.bf16.msra.mxu1 %v546_v16 }
  0x14   :  { %504 = vmatprep.subr.bf16.mxu0 %v547_v19  ;;  %531 = vmatprep.subr.bf16.mxu1 %v547_v19 }
  0x17   :  { %505 = vmatpush3.bf16.msra.mxu0 %v547_v19  ;;  %539 = vmatpush3.bf16.msra.mxu1 %v547_v19 }
  0x18   :  { %506 = vmatprep.subr.bf16.mxu0 %v548_v20  ;;  %532 = vmatprep.subr.bf16.mxu1 %v548_v20 }
  0x1b   :  { %507 = vmatpush3.bf16.msra.mxu0 %v548_v20  ;;  %540 = vmatpush3.bf16.msra.mxu1 %v548_v20 }
  0x1c   :  { %508 = vmatprep.subr.bf16.mxu0 %v549_v28  ;;  %533 = vmatprep.subr.bf16.mxu1 %v549_v28 }
  0x1f   :  { %509 = vmatpush3.bf16.msra.mxu0 %v549_v28  ;;  %541 = vmatpush3.bf16.msra.mxu1 %v549_v28 }
  0x22   :  { %511 = vmatmul.mubr.bf16.vlgmr.msra.gmra.mxu0 %v384_v48  ;;  %519 = vmatmul.mubr.bf16.vlgmr.msra.gmra.mxu1 %v388_v49 }
  0x23   :  { %514 = vmatprep.mubr.bf16.mxu0 %v385_v53  ;;  %522 = vmatprep.mubr.bf16.mxu1 %v389_v54 }
  0x2a   :  { %515 = vmatmul.mubr.bf16.gmra.mxu0 %v386_v62  ;;  %523 = vmatmul.mubr.bf16.gmra.mxu1 %v390_v63 }
  0xe2   :  { %v512_v1 = vpop.f32.mrf.mxu0  ;;  %v520_v2 = vpop.f32.mrf.mxu1 }
  0xe3   :  { %v228_v3 = vadd.f32 %v512_v1, %v382_v0  ;;  %v260_v4 = vadd.f32 %v520_v2, %v382_v0 }
  0xe4   :  { %v219_v5 = vpop.f32.mrf.mxu0  ;;  %v251_v6 = vpop.f32.mrf.mxu1 }
  0xe5   :  { %v220_v7 = vadd.f32 %v382_v0, %v219_v5  ;;  %v252_v8 = vadd.f32 %v382_v0, %v251_v6  ;;  %v284_v13 = vmax.f32 %v228_v3, 0.0  ;;  %v292_v14 = vmax.f32 %v260_v4, 0.0 }
  0xe6   :  { %v513_v9 = vpop.f32.mrf.mxu0  ;;  %v521_v10 = vpop.f32.mrf.mxu1 }
  0xe7   :  { %v231_v11 = vadd.f32 %v513_v9, %v382_v0  ;;  %v263_v12 = vadd.f32 %v521_v10, %v382_v0  ;;  %v282_v21 = vmax.f32 %v220_v7, 0.0  ;;  %v290_v22 = vmax.f32 %v252_v8, 0.0 }
  0xe8   :  { %v222_v15 = vpop.f32.mrf.mxu0  ;;  %v254_v16 = vpop.f32.mrf.mxu1 }
  0xe9   :  { %v285_v17 = vmax.f32 %v231_v11, 0.0  ;;  %v293_v18 = vmax.f32 %v263_v12, 0.0  ;;  %v223_v19 = vadd.f32 %v382_v0, %v222_v15  ;;  %v255_v20 = vadd.f32 %v382_v0, %v254_v16 }
  0xea   :  { %v516_v23 = vpop.f32.mrf.mxu0  ;;  %v524_v24 = vpop.f32.mrf.mxu1 }
  0xeb   :  { %v439_v25 = vpack.c.bf16 %v285_v17, %v284_v13  ;;  %v459_v26 = vpack.c.bf16 %v293_v18, %v292_v14  ;;  %v283_v27 = vmax.f32 %v223_v19, 0.0  ;;  %v291_v28 = vmax.f32 %v255_v20, 0.0 }
  0xec   :  { %v244_v29 = vadd.f32 %v516_v23, %v382_v0  ;;  %v276_v30 = vadd.f32 %v524_v24, %v382_v0  ;;  %v235_v31 = vpop.f32.mrf.mxu0  ;;  %v267_v32 = vpop.f32.mrf.mxu1 }
  0xed   :  { %471 = vst [vmem:[%s726_s4 + $0x8] sm:$0xff] %v439_v25   ;;  %475 = vst [vmem:[%s726_s4 + $0x28] sm:$0xff] %v459_v26   ;;  %v434_v33 = vpack.c.bf16 %v283_v27, %v282_v21  ;;  %v454_v34 = vpack.c.bf16 %v291_v28, %v290_v22  ;;  %v236_v35 = vadd.f32 %v382_v0, %v235_v31 }
  0xee   :  { %v268_v36 = vadd.f32 %v382_v0, %v267_v32  ;;  %v517_v37 = vpop.f32.mrf.mxu0  ;;  %v525_v38 = vpop.f32.mrf.mxu1  ;;  %v288_v41 = vmax.f32 %v244_v29, 0.0  ;;  %v296_v42 = vmax.f32 %v276_v30, 0.0 }
  0xef   :  { %435 = vst [vmem:[%s726_s4] sm:$0xff] %v434_v33   ;;  %474 = vst [vmem:[%s726_s4 + $0x20] sm:$0xff] %v454_v34   ;;  %v247_v39 = vadd.f32 %v517_v37, %v382_v0  ;;  %v279_v40 = vadd.f32 %v525_v38, %v382_v0  ;;  %v286_v49 = vmax.f32 %v236_v35, 0.0 }
  0xf0   :  { %v238_v43 = vpop.f32.mrf.mxu0  ;;  %v270_v44 = vpop.f32.mrf.mxu1  ;;  %v294_v50 = vmax.f32 %v268_v36, 0.0 }
  0xf1   :  { %v289_v45 = vmax.f32 %v247_v39, 0.0  ;;  %v297_v46 = vmax.f32 %v279_v40, 0.0  ;;  %v239_v47 = vadd.f32 %v382_v0, %v238_v43  ;;  %v271_v48 = vadd.f32 %v382_v0, %v270_v44 }
  0xf3   :  { %v449_v51 = vpack.c.bf16 %v289_v45, %v288_v41  ;;  %v469_v52 = vpack.c.bf16 %v297_v46, %v296_v42  ;;  %v287_v53 = vmax.f32 %v239_v47, 0.0  ;;  %v295_v54 = vmax.f32 %v271_v48, 0.0 }
  0xf5   :  { %473 = vst [vmem:[%s726_s4 + $0x18] sm:$0xff] %v449_v51   ;;  %477 = vst [vmem:[%s726_s4 + $0x38] sm:$0xff] %v469_v52   ;;  %v444_v55 = vpack.c.bf16 %v287_v53, %v286_v49  ;;  %v464_v56 = vpack.c.bf16 %v295_v54, %v294_v50 }
  0xf7   :  { %472 = vst [vmem:[%s726_s4 + $0x10] sm:$0xff] %v444_v55   ;;  %476 = vst [vmem:[%s726_s4 + $0x30] sm:$0xff] %v464_v56  }

// kernel: fakenet_forward.28
= control target key start
LH: loop header
LB: loop body
LE: loop exit
PB: predicated region body
PF: predicated region fallthrough
CT: control target
= control target key end

     0   :  { %s1182_s18 = smov 0   ;;  %s1319_s0 = inlined_call_operand.vmem [shape: bf16[64,16], index: 0, kind: input, shape index: {}]   ;;  %s1320_s1 = inlined_call_operand.vmem [shape: bf16[2,16,320], index: 1, kind: input, shape index: {}]   ;;  %s1321_s2 = inlined_call_operand.vmem [shape: bf16[320,128], index: 2, kind: input, shape index: {}]   ;;  %s1322_s3 = inlined_call_operand.vmem [shape: f32[1,128], index: 3, kind: input, shape index: {}]   ;;  %s1323_s4 = inlined_call_operand.vmem [shape: bf16[2,64,128], index: 4, kind: input, shape index: {}]   ;;  %s1324_s5 = inlined_call_operand.vmem [shape: bf16[2,64,128], index: 5, kind: output, shape index: {}]  }
   0x1 LB: > { %s914_s19 = sadd.s32 4294967295, %s1149_s18   ;;  %p918_p0 = scmp.ge.s32.totalorder %s1149_s18, 1  ;;  %s1149_s18 = sphi %s1182_s18, %s15_s18  }
   0x2   : > { %p197_p1 = scmp.lt.s32.totalorder %s1149_s18, 3 }
   0x4   : > { %p198_p2 = pnand %p918_p0, %p197_p1 }
   0x5   : > { %p230_p3 = scmp.lt.s32.totalorder (!%p198_p2), %s914_s19, 1 }
   0x6   : > { %201 = sbr.rel (%p198_p2) target bundleno = 460 (0x1cc), region = 40 }
   0xb   : > { %v1151_v0 = vmov 0   ;;  %v1118_v1 = vld [vmem:[%s1319_s0] sm:$0xff]   ;;  %s1326_s19 = smov (!%p230_p3, %s914_s19), 1  ;;  %vm294_vm0 = vcmask 130048   ;;  %v1123_v2 = vld [vmem:[%s1321_s2 + $0x78] sm:$0xff]   ;;  %v1120_v6 = vld [vmem:[%s1319_s0 + $0x8] sm:$0xff]  }
   0xc   : > { %339 = vmatprep.mubr.bf16.mxu0 %v1151_v0  ;;  %1081 = vmatprep.mubr.msk.bf16.mxu1 %vm294_vm0, %v1118_v1  ;;  %s1105_s22 = smul.u32 24, %s1326_s19  ;;  %v1124_v7 = vld [vmem:[%s1321_s2 + $0x38] sm:$0xff]   ;;  %v1125_v8 = vld [vmem:[%s1321_s2 + $0x70] sm:$0xff]   ;;  %v1127_v11 = vld [vmem:[%s1321_s2 + $0x68] sm:$0xff]   ;;  %vm624_vm1 = vcmask 523264   ;;  %s974_s26 = sshll.u32 %s1326_s19, 5 }
   0xd   : > { %v1121_v9 = vld [vmem:[%s1319_s0 + $0x10] sm:$0xff]   ;;  %v1122_v12 = vld [vmem:[%s1319_s0 + $0x18] sm:$0xff]   ;;  %v1128_v13 = vld [vmem:[%s1321_s2 + $0x28] sm:$0xff]   ;;  %s1291_s6 = scalar_lea.vmem %s1323_s4, %s974_s26  ;;  %s1304_s9 = scalar_lea.vmem %s1324_s5, %s974_s26 }
   0xe   : > { %s234_s25 = scalar_lea.vmem %s1320_s1, %s1105_s22  ;;  %v1126_v10 = vld [vmem:[%s1321_s2 + $0x30] sm:$0xff]   ;;  %v1129_v14 = vld [vmem:[%s1321_s2 + $0x60] sm:$0xff]   ;;  %v1135_v15 = vld [vmem:[%s1321_s2 + $0x98] sm:$0xff]  }
   0xf   : > { %v1115_v3 = vld [vmem:[%s234_s25 + $0x4] ss:$12 sps:$4 sm:$0xff]   ;;  %v1117_v4 = vld [vmem:[%s234_s25] ss:$12 sps:$4 sm:$0xff]   ;;  %v1119_v5 = vld [vmem:[%s234_s25 + $0x8] ss:$12 sps:$4 sm:$0xff]  }
  0x10   : > { %321 = vmatprep.subr.bf16.mxu0 %v1115_v3  ;;  %1079 = vmatprep.subr.bf16.mxu1 %v1119_v5  ;;  %v1130_v16 = vld [vmem:[%s1321_s2 + $0x20] sm:$0xff]   ;;  %v1131_v17 = vld [vmem:[%s1321_s2 + $0x58] sm:$0xff]   ;;  %v1133_v19 = vld [vmem:[%s1321_s2 + $0x50] sm:$0xff]  }
  0x11   : > { %322 = vmatpush1.bf16.msra.mxu0 %v1117_v4  ;;  %1080 = vmatpush3.bf16.msra.mxu1 %v1119_v5  ;;  %v1132_v18 = vld [vmem:[%s1321_s2 + $0x18] sm:$0xff]   ;;  %v1134_v20 = vld [vmem:[%s1321_s2 + $0x10] sm:$0xff]   ;;  %v1136_v21 = vld [vmem:[%s1321_s2 + $0x48] sm:$0xff]  }
  0x12   : > { %1031 = vmatprep.subr.bf16.mxu0 %v1123_v2  ;;  %1089 = vmatprep.subr.bf16.mxu1 %v1135_v15  ;;  %v1138_v22 = vld [vmem:[%s1321_s2 + $0x90] sm:$0xff]   ;;  %v1137_v23 = vld [vmem:[%s1321_s2 + $0x8] sm:$0xff]   ;;  %v1139_v24 = vld [vmem:[%s1321_s2 + $0x40] sm:$0xff]  }
  0x13   : > { %v1141_v25 = vld [vmem:[%s1321_s2 + $0x88] sm:$0xff]   ;;  %v1140_v26 = vld [vmem:[%s1321_s2] sm:$0xff]  }
  0x14   : > { %931 = vmatmul.mubr.msk.bf16.vlgmr.msra.gmra.mxu0 %vm294_vm0, %v1118_v1  ;;  %1082 = vmatmul.mubr.msk.bf16.vlgmr.msra.gmra.mxu1 %vm294_vm0, %v1120_v6  ;;  %v1142_v27 = vld [vmem:[%s1321_s2 + $0x80] sm:$0xff]  }
  0x15   : > { %349 = vmatprep.mubr.bf16.mxu0 %v1151_v0  ;;  %1032 = vmatpush3.bf16.msra.mxu0 %v1124_v7  ;;  %v1284_v3 = vld [vmem:[%s1322_s3] ss:$0 sm:$0xff] }
  0x16   : > { %1033 = vmatprep.subr.bf16.mxu0 %v1125_v8  ;;  %1085 = vmatprep.mubr.msk.bf16.mxu1 %vm294_vm0, %v1121_v9 }
  0x17   : > { %1090 = vmatpush3.bf16.msra.mxu1 %v1135_v15 }
  0x18   : > { %1091 = vmatprep.subr.bf16.mxu1 %v1138_v22 }
  0x19   : > { %1034 = vmatpush3.bf16.msra.mxu0 %v1126_v10 }
  0x1a   : > { %1035 = vmatprep.subr.bf16.mxu0 %v1127_v11 }
  0x1b   : > { %1092 = vmatpush3.bf16.msra.mxu1 %v1138_v22 }
  0x1c   : > { %932 = vmatmul.mubr.msk.bf16.gmra.mxu0 %vm294_vm0, %v1120_v6  ;;  %1086 = vmatmul.mubr.msk.bf16.gmra.mxu1 %vm294_vm0, %v1122_v12 }
  0x1d   : > { %359 = vmatprep.mubr.bf16.mxu0 %v1151_v0  ;;  %1036 = vmatpush3.bf16.msra.mxu0 %v1128_v13 }
  0x1e   : > { %1037 = vmatprep.subr.bf16.mxu0 %v1129_v14  ;;  %1093 = vmatprep.subr.bf16.mxu1 %v1141_v25 }
  0x1f   : > { %1094 = vmatpush3.bf16.msra.mxu1 %v1141_v25  ;;  %v1020_v25 = vld [vmem:[%s1291_s6 + $0x8] sm:$0xff]  }
  0x20   : > { %1095 = vmatprep.subr.bf16.mxu1 %v1142_v27 }
  0x21   : > { %1038 = vmatpush3.bf16.msra.mxu0 %v1130_v16 }
  0x22   : > { %1039 = vmatprep.subr.bf16.mxu0 %v1131_v17 }
  0x23   : > { %1096 = vmatpush3.bf16.msra.mxu1 %v1142_v27 }
  0x24   : > { %933 = vmatmul.mubr.msk.bf16.gmra.mxu0 %vm294_vm0, %v1121_v9  ;;  %v985_v9 = vld [vmem:[%s1291_s6] sm:$0xff]  }
  0x25   : > { %369 = vmatprep.mubr.bf16.mxu0 %v1151_v0  ;;  %1040 = vmatpush3.bf16.msra.mxu0 %v1132_v18  ;;  %v986_v16 = vunpack.c.l.bf16 %v985_v9 }
  0x26   : > { %1041 = vmatprep.subr.bf16.mxu0 %v1133_v19 }
  0x29   : > { %1042 = vmatpush3.bf16.msra.mxu0 %v1134_v20 }
  0x2a   : > { %1043 = vmatprep.subr.bf16.mxu0 %v1136_v21  ;;  %v987_v21 = vunpack.c.h.bf16 %v985_v9 }
  0x2c   : > { %934 = vmatmul.mubr.msk.bf16.gmra.mxu0 %vm294_vm0, %v1122_v12 }
  0x2d   : > { %1044 = vmatpush3.bf16.msra.mxu0 %v1137_v23 }
  0x2e   : > { %1045 = vmatprep.subr.bf16.mxu0 %v1139_v24 }
  0x31   : > { %1046 = vmatpush3.bf16.msra.mxu0 %v1140_v26 }
  0xd4   : > { %v341_v28 = vpop.f32.mrf.mxu0  ;;  %v1083_v30 = vpop.f32.mrf.mxu1 }
  0xd6   : > { %v343_v29 = vpop.f32.mrf.mxu0  ;;  %v414_v32 = vpop.f32.mrf.mxu1 }
  0xd8   : > { %v345_v31 = vpop.f32.mrf.mxu0  ;;  %v1084_v34 = vpop.f32.mrf.mxu1 }
  0xd9   : > { %v445_v36 = vpack.c.bf16 %v345_v31, %v341_v28  ;;  %v450_v38 = vpack.c.bf16 %v1084_v34, %v1083_v30 }
  0xda   : > { %v347_v33 = vpop.f32.mrf.mxu0  ;;  %v417_v39 = vpop.f32.mrf.mxu1 }
  0xdb   : > { %v446_v35 = vpack.c.bf16 %v347_v33, %v343_v29  ;;  %v447_v40 = vpack.c.bf16 %v417_v39, %v414_v32  ;;  %v990_v32 = vunpack.c.l.bf16 %v1020_v25 }
  0xdc   : > { %v351_v37 = vpop.f32.mrf.mxu0  ;;  %v1087_v42 = vpop.f32.mrf.mxu1 }
  0xdd   : > { %669 = vmatprep.mubr.bf16.mxu0 %v446_v35  ;;  %1097 = vmatprep.mubr.msk.bf16.mxu1 %vm624_vm1, %v447_v40 }
  0xde   : > { %v353_v41 = vpop.f32.mrf.mxu0  ;;  %670 = vmatmul.mubr.bf16.vlgmr.msra.gmra.mxu0 %v445_v36  ;;  %1098 = vmatmul.mubr.msk.bf16.vlgmr.msra.gmra.mxu1 %vm624_vm1, %v450_v38  ;;  %v430_v44 = vpop.f32.mrf.mxu1 }
  0xe0   : > { %v355_v43 = vpop.f32.mrf.mxu0  ;;  %v1088_v46 = vpop.f32.mrf.mxu1 }
  0xe1   : > { %v448_v48 = vpack.c.bf16 %v355_v43, %v351_v37  ;;  %v456_v50 = vpack.c.bf16 %v1088_v46, %v1087_v42  ;;  %v991_v42 = vunpack.c.h.bf16 %v1020_v25 }
  0xe2   : > { %v357_v45 = vpop.f32.mrf.mxu0  ;;  %v433_v51 = vpop.f32.mrf.mxu1 }
  0xe3   : > { %v449_v47 = vpack.c.bf16 %v357_v45, %v353_v41  ;;  %v453_v52 = vpack.c.bf16 %v433_v51, %v430_v44 }
  0xe4   : > { %v361_v49 = vpop.f32.mrf.mxu0 }
  0xe5   : > { %677 = vmatprep.mubr.bf16.mxu0 %v449_v47  ;;  %1101 = vmatprep.mubr.msk.bf16.mxu1 %vm624_vm1, %v453_v52 }
  0xe6   : > { %v363_v53 = vpop.f32.mrf.mxu0  ;;  %678 = vmatmul.mubr.bf16.gmra.mxu0 %v448_v48  ;;  %1102 = vmatmul.mubr.msk.bf16.gmra.mxu1 %vm624_vm1, %v456_v50  ;;  %v1021_v48 = vld [vmem:[%s1291_s6 + $0x10] sm:$0xff]  }
  0xe8   : > { %v365_v54 = vpop.f32.mrf.mxu0 }
  0xe9   : > { %v451_v57 = vpack.c.bf16 %v365_v54, %v361_v49  ;;  %v994_v54 = vunpack.c.l.bf16 %v1021_v48 }
  0xea   : > { %v367_v55 = vpop.f32.mrf.mxu0 }
  0xeb   : > { %v452_v56 = vpack.c.bf16 %v367_v55, %v363_v53 }
  0xec   : > { %v371_v58 = vpop.f32.mrf.mxu0 }
  0xed   : > { %685 = vmatprep.mubr.bf16.mxu0 %v452_v56 }
  0xee   : > { %v373_v59 = vpop.f32.mrf.mxu0  ;;  %686 = vmatmul.mubr.bf16.gmra.mxu0 %v451_v57 }
  0xf0   : > { %v375_v60 = vpop.f32.mrf.mxu0 }
  0xf1   : > { %v454_v63 = vpack.c.bf16 %v375_v60, %v371_v58 }
  0xf2   : > { %v377_v61 = vpop.f32.mrf.mxu0 }
  0xf3   : > { %v455_v62 = vpack.c.bf16 %v377_v61, %v373_v59 }
  0xf5   : > { %693 = vmatprep.mubr.bf16.mxu0 %v455_v62 }
  0xf6   : > { %694 = vmatmul.mubr.bf16.gmra.mxu0 %v454_v63 }
 0x19e   : > { %v1047_v0 = vpop.f32.mrf.mxu0  ;;  %v1099_v2 = vpop.f32.mrf.mxu1 }
 0x1a0   : > { %v1048_v1 = vpop.f32.mrf.mxu0  ;;  %v736_v6 = vpop.f32.mrf.mxu1 }
 0x1a1   : > { %v1049_v4 = vadd.f32 %v1048_v1, %v1047_v0  ;;  %v995_v0 = vunpack.c.h.bf16 %v1021_v48 }
 0x1a2   : > { %v1050_v5 = vpop.f32.mrf.mxu0  ;;  %v1100_v10 = vpop.f32.mrf.mxu1 }
 0x1a3   : > { %v672_v7 = vadd.f32 %v1049_v4, %v1284_v3 }
 0x1a4   : > { %v1051_v8 = vpop.f32.mrf.mxu0  ;;  %v739_v14 = vpop.f32.mrf.mxu1 }
 0x1a5   : > { %v1052_v11 = vadd.f32 %v1051_v8, %v1050_v5  ;;  %v737_v12 = vadd.f32 %v736_v6, %v672_v7  ;;  %v1022_v7 = vld [vmem:[%s1291_s6 + $0x18] sm:$0xff]  }
 0x1a6   : > { %v1053_v13 = vpop.f32.mrf.mxu0  ;;  %v1103_v28 = vpop.f32.mrf.mxu1 }
 0x1a7   : > { %v767_v15 = vmax.f32 %v737_v12, 0.0  ;;  %v675_v17 = vadd.f32 %v1052_v11, %v1284_v3  ;;  %v998_v12 = vunpack.c.l.bf16 %v1022_v7 }
 0x1a8   : > { %v1054_v18 = vpop.f32.mrf.mxu0  ;;  %v752_v38 = vpop.f32.mrf.mxu1 }
 0x1a9   : > { %v1055_v19 = vadd.f32 %v1054_v18, %v1053_v13  ;;  %v740_v20 = vadd.f32 %v739_v14, %v675_v17  ;;  %v791_v23 = vmul.f32 %v986_v16, %v767_v15 }
 0x1aa   : > { %v1056_v22 = vpop.f32.mrf.mxu0  ;;  %v1104_v49 = vpop.f32.mrf.mxu1 }
 0x1ab   : > { %v680_v24 = vadd.f32 %v1055_v19, %v1284_v3  ;;  %v768_v26 = vmax.f32 %v740_v20, 0.0  ;;  %v799_v34 = vadd.f32 %v986_v16, %v791_v23  ;;  %v999_v19 = vunpack.c.h.bf16 %v1022_v7 }
 0x1ac   : > { %v1057_v27 = vpop.f32.mrf.mxu0  ;;  %v755_v60 = vpop.f32.mrf.mxu1 }
 0x1ad   : > { %v745_v29 = vadd.f32 %v1099_v2, %v680_v24  ;;  %v792_v30 = vmul.f32 %v987_v21, %v768_v26  ;;  %v1058_v31 = vadd.f32 %v1057_v27, %v1056_v22 }
 0x1ae   : > { %v1059_v33 = vpop.f32.mrf.mxu0 }
 0x1af   : > { %v769_v35 = vmax.f32 %v745_v29, 0.0  ;;  %v800_v36 = vadd.f32 %v987_v21, %v792_v30  ;;  %v683_v37 = vadd.f32 %v1058_v31, %v1284_v3 }
 0x1b0   : > { %v1060_v39 = vpop.f32.mrf.mxu0 }
 0x1b1   : > { %v1003_v40 = vpack.c.bf16 %v800_v36, %v799_v34  ;;  %v748_v41 = vadd.f32 %v1100_v10, %v683_v37  ;;  %v1061_v43 = vadd.f32 %v1060_v39, %v1059_v33  ;;  %v793_v45 = vmul.f32 %v990_v32, %v769_v35 }
 0x1b2   : > { %v1062_v44 = vpop.f32.mrf.mxu0 }
 0x1b3   : > { %1004 = vst [vmem:[%s1304_s9] sm:$0xff] %v1003_v40   ;;  %v770_v46 = vmax.f32 %v748_v41, 0.0  ;;  %v688_v47 = vadd.f32 %v1061_v43, %v1284_v3  ;;  %v801_v56 = vadd.f32 %v990_v32, %v793_v45 }
 0x1b4   : > { %v1063_v50 = vpop.f32.mrf.mxu0 }
 0x1b5   : > { %v794_v51 = vmul.f32 %v991_v42, %v770_v46  ;;  %v753_v52 = vadd.f32 %v752_v38, %v688_v47  ;;  %v1064_v53 = vadd.f32 %v1063_v50, %v1062_v44 }
 0x1b6   : > { %v1065_v55 = vpop.f32.mrf.mxu0 }
 0x1b7   : > { %v802_v57 = vadd.f32 %v991_v42, %v794_v51  ;;  %v771_v58 = vmax.f32 %v753_v52, 0.0  ;;  %v691_v59 = vadd.f32 %v1064_v53, %v1284_v3 }
 0x1b8   : > { %v1066_v61 = vpop.f32.mrf.mxu0 }
 0x1b9   : > { %v1008_v62 = vpack.c.bf16 %v802_v57, %v801_v56  ;;  %v756_v63 = vadd.f32 %v755_v60, %v691_v59  ;;  %v1067_v1 = vadd.f32 %v1066_v61, %v1065_v55  ;;  %v795_v4 = vmul.f32 %v994_v54, %v771_v58 }
 0x1ba   : > { %v1068_v2 = vpop.f32.mrf.mxu0 }
 0x1bb   : > { %1023 = vst [vmem:[%s1304_s9 + $0x8] sm:$0xff] %v1008_v62   ;;  %v772_v5 = vmax.f32 %v756_v63, 0.0  ;;  %v696_v6 = vadd.f32 %v1067_v1, %v1284_v3  ;;  %v803_v13 = vadd.f32 %v994_v54, %v795_v4 }
 0x1bc   : > { %v1069_v8 = vpop.f32.mrf.mxu0 }
 0x1bd   : > { %v796_v9 = vmul.f32 %v995_v0, %v772_v5  ;;  %v761_v10 = vadd.f32 %v1103_v28, %v696_v6  ;;  %v1070_v11 = vadd.f32 %v1069_v8, %v1068_v2 }
 0x1bf   : > { %v804_v14 = vadd.f32 %v995_v0, %v796_v9  ;;  %v773_v15 = vmax.f32 %v761_v10, 0.0  ;;  %v699_v16 = vadd.f32 %v1070_v11, %v1284_v3 }
 0x1c1   : > { %v1013_v17 = vpack.c.bf16 %v804_v14, %v803_v13  ;;  %v764_v18 = vadd.f32 %v1104_v49, %v699_v16  ;;  %v797_v20 = vmul.f32 %v998_v12, %v773_v15 }
 0x1c3   : > { %1024 = vst [vmem:[%s1304_s9 + $0x10] sm:$0xff] %v1013_v17   ;;  %v774_v21 = vmax.f32 %v764_v18, 0.0  ;;  %v805_v23 = vadd.f32 %v998_v12, %v797_v20 }
 0x1c5   : > { %v798_v22 = vmul.f32 %v999_v19, %v774_v21 }
 0x1c7   : > { %v806_v24 = vadd.f32 %v999_v19, %v798_v22 }
 0x1c9   : > { %v1018_v25 = vpack.c.bf16 %v806_v24, %v805_v23 }
 0x1cb   : > { %1025 = vst [vmem:[%s1304_s9 + $0x18] sm:$0xff] %v1018_v25  }
 0x1cc PF: > { %s15_s18 = sadd.s32 1, %s1149_s18  }
 0x1cd   : > { %p12_p4 = scmp.ge.s32.totalorder %s15_s18, 4  }
 0x1cf   :  { %14 = sbr.rel (!%p12_p4) target bundleno = 1 (0x1), region = 73 }

// kernel: fakenet_forward.27
= control target key start
LH: loop header
LB: loop body
LE: loop exit
PB: predicated region body
PF: predicated region fallthrough
CT: control target
= control target key end

     0   :  { %s1670_s18 = smov 0   ;;  %s2017_s0 = inlined_call_operand.vmem [shape: bf16[16,4], index: 0, kind: input, shape index: {}]   ;;  %s2018_s1 = inlined_call_operand.vmem [shape: bf16[2,4,512], index: 1, kind: input, shape index: {}]   ;;  %s2019_s2 = inlined_call_operand.vmem [shape: bf16[512,320], index: 2, kind: input, shape index: {}]   ;;  %s2020_s3 = inlined_call_operand.vmem [shape: f32[1,320], index: 3, kind: input, shape index: {}]   ;;  %s2021_s4 = inlined_call_operand.vmem [shape: bf16[2,16,320], index: 4, kind: input, shape index: {}]   ;;  %s2022_s5 = inlined_call_operand.vmem [shape: bf16[2,16,320], index: 5, kind: output, shape index: {}]  }
   0x1 LB: > { %s1324_s19 = sadd.s32 4294967295, %s1636_s18   ;;  %p1328_p0 = scmp.ge.s32.totalorder %s1636_s18, 1  ;;  %s1636_s18 = sphi %s1670_s18, %s15_s18  }
   0x2   : > { %p197_p1 = scmp.lt.s32.totalorder %s1636_s18, 3 }
   0x4   : > { %p198_p2 = pnand %p1328_p0, %p197_p1 }
   0x5   : > { %p230_p3 = scmp.lt.s32.totalorder (!%p198_p2), %s1324_s19, 1 }
   0x6   : > { %201 = sbr.rel (%p198_p2) target bundleno = 474 (0x1da), region = 40 }
   0xb   : > { %v259_v0 = vlaneseq  ;;  %v1638_v1 = vmov 1983009808   ;;  %v1639_v3 = vmov 0   ;;  %s2024_s19 = smov (!%p230_p3, %s1324_s19), 1  ;;  %vm276_vm0 = vcmask 1041408   ;;  %v1501_v14 = vld [vmem:[%s2017_s0] sm:$0xff]  }
   0xc   : > { %v257_v2 = vunpack.c.l.s4 %v1638_v1  ;;  %321 = vmatprep.mubr.bf16.mxu0 %v1639_v3  ;;  %364 = vmatprep.mubr.bf16.mxu1 %v1639_v3  ;;  %s1440_s20 = sshll.u32 %s2024_s19, 3  ;;  %v1504_v13 = vld [vmem:[%s2019_s2 + $0xac] ss:$12 sps:$4 sm:$0xff]   ;;  %vm272_vm1 = vcmask 31744   ;;  %v1502_v18 = vld [vmem:[%s2019_s2 + $0xa8] ss:$12 sps:$4 sm:$0xff]  }
   0xd   : > { %v1680_v4 = vshrl.u32 %v259_v0, 7  ;;  %s234_s23 = scalar_lea.vmem %s2018_s1, %s1440_s20  ;;  %v1507_v17 = vld [vmem:[%s2019_s2 + $0x22c] ss:$12 sps:$4 sm:$0xff]   ;;  %v1510_v19 = vld [vmem:[%s2019_s2 + $0x94] ss:$12 sps:$4 sm:$0xff]   ;;  %s1489_s9 = smul.u32 24, %s2024_s19 }
   0xe   : > { %v258_v5 = vunpack.c.0.s8 %v257_v2  ;;  %v248_v7 = vld [vmem:[%s234_s23] sm:$0xff]  ;;  %v1505_v20 = vld [vmem:[%s2019_s2 + $0x228] ss:$12 sps:$4 sm:$0xff]   ;;  %v1508_v22 = vld [vmem:[%s2019_s2 + $0x90] ss:$12 sps:$4 sm:$0xff]   ;;  %vm1253_vm2 = vcmask 519168  }
   0xf   : > { %v255_v9 = vcombine.high %v248_v7, %v248_v7  ;;  %v1513_v21 = vld [vmem:[%s2019_s2 + $0x214] ss:$12 sps:$4 sm:$0xff]   ;;  %v1516_v23 = vld [vmem:[%s2019_s2 + $0x7c] ss:$12 sps:$4 sm:$0xff]   ;;  %v1514_v26 = vld [vmem:[%s2019_s2 + $0x78] ss:$12 sps:$4 sm:$0xff]   ;;  %s1997_s14 = scalar_lea.vmem %s2021_s4, %s1489_s9  ;;  %s2006_s17 = scalar_lea.vmem %s2022_s5, %s1489_s9 }
  0x10   : > { %v261_v6 = vsub.s32 %v258_v5, %v1680_v4  ;;  %v1511_v24 = vld [vmem:[%s2019_s2 + $0x210] ss:$12 sps:$4 sm:$0xff]   ;;  %v1517_v28 = vld [vmem:[%s2019_s2 + $0x1f8] ss:$12 sps:$4 sm:$0xff]   ;;  %v1520_v30 = vld [vmem:[%s2019_s2 + $0x60] ss:$12 sps:$4 sm:$0xff]  }
  0x11   : > { %v1519_v25 = vld [vmem:[%s2019_s2 + $0x1fc] ss:$12 sps:$4 sm:$0xff]   ;;  %v1522_v27 = vld [vmem:[%s2019_s2 + $0x64] ss:$12 sps:$4 sm:$0xff]   ;;  %v1528_v31 = vld [vmem:[%s2019_s2 + $0x4c] ss:$12 sps:$4 sm:$0xff]  }
  0x12   : > { %v262_v8 = vrot.slane %v248_v7, %v261_v6  ;;  %v269_v12 = vrot.slane %v255_v9, %v261_v6  ;;  %v1525_v29 = vld [vmem:[%s2019_s2 + $0x1e4] ss:$12 sps:$4 sm:$0xff]   ;;  %v1523_v32 = vld [vmem:[%s2019_s2 + $0x1e0] ss:$12 sps:$4 sm:$0xff]   ;;  %v1526_v34 = vld [vmem:[%s2019_s2 + $0x48] ss:$12 sps:$4 sm:$0xff]  }
  0x13   : > { %v1531_v33 = vld [vmem:[%s2019_s2 + $0x1cc] ss:$12 sps:$4 sm:$0xff]   ;;  %v1534_v35 = vld [vmem:[%s2019_s2 + $0x34] ss:$12 sps:$4 sm:$0xff]   ;;  %v1532_v38 = vld [vmem:[%s2019_s2 + $0x30] ss:$12 sps:$4 sm:$0xff]  }
  0x14   : > { %v270_v10 = vcombine.high %v262_v8, %v262_v8  ;;  %v278_v11 = vsel %vm276_vm0, %v262_v8, 0  ;;  %v271_v15 = vcombine.high %v269_v12, %v269_v12  ;;  %v284_v16 = vsel %vm276_vm0, %v269_v12, 0  ;;  %v1529_v36 = vld [vmem:[%s2019_s2 + $0x1c8] ss:$12 sps:$4 sm:$0xff]   ;;  %v1535_v40 = vld [vmem:[%s2019_s2 + $0x1b0] ss:$12 sps:$4 sm:$0xff]  }
  0x15   : > { %v1537_v37 = vld [vmem:[%s2019_s2 + $0x1b4] ss:$12 sps:$4 sm:$0xff]   ;;  %v1540_v39 = vld [vmem:[%s2019_s2 + $0x1c] ss:$12 sps:$4 sm:$0xff]   ;;  %v1538_v42 = vld [vmem:[%s2019_s2 + $0x18] ss:$12 sps:$4 sm:$0xff]  }
  0x16   : > { %1334 = vmatprep.subr.msk.bf16.mxu0 %vm276_vm0, %v270_v10  ;;  %1336 = vmatprep.subr.msk.bf16.mxu1 %vm276_vm0, %v271_v15  ;;  %v1543_v41 = vld [vmem:[%s2019_s2 + $0x19c] ss:$12 sps:$4 sm:$0xff]   ;;  %v1541_v43 = vld [vmem:[%s2019_s2 + $0x198] ss:$12 sps:$4 sm:$0xff]   ;;  %v1544_v45 = vld [vmem:[%s2019_s2] ss:$12 sps:$4 sm:$0xff]  }
  0x17   : > { %304 = vmatpush1.bf16.msra.mxu0 %v278_v11  ;;  %347 = vmatpush1.bf16.msra.mxu1 %v284_v16  ;;  %v1546_v44 = vld [vmem:[%s2019_s2 + $0x4] ss:$12 sps:$4 sm:$0xff]   ;;  %v1552_v47 = vld [vmem:[%s2019_s2 + $0x16c] ss:$12 sps:$4 sm:$0xff]   ;;  %v1550_v50 = vld [vmem:[%s2019_s2 + $0x168] ss:$12 sps:$4 sm:$0xff]  }
  0x18   : > { %1036 = vmatprep.subr.bf16.mxu0 %v1504_v13  ;;  %1079 = vmatprep.subr.bf16.mxu1 %v1507_v17  ;;  %v1549_v46 = vld [vmem:[%s2019_s2 + $0x184] ss:$12 sps:$4 sm:$0xff]   ;;  %v1547_v48 = vld [vmem:[%s2019_s2 + $0x180] ss:$12 sps:$4 sm:$0xff]   ;;  %v1553_v52 = vld [vmem:[%s2019_s2 + $0x2e8] ss:$12 sps:$4 sm:$0xff]  }
  0x19   : > { %v1555_v49 = vld [vmem:[%s2019_s2 + $0x2ec] ss:$12 sps:$4 sm:$0xff]   ;;  %v1558_v51 = vld [vmem:[%s2019_s2 + $0x154] ss:$12 sps:$4 sm:$0xff]   ;;  %v1556_v54 = vld [vmem:[%s2019_s2 + $0x150] ss:$12 sps:$4 sm:$0xff]  }
  0x1a   : > { %1335 = vmatmul.mubr.msk.bf16.vlgmr.msra.gmra.mxu0 %vm272_vm1, %v1501_v14  ;;  %1337 = vmatmul.mubr.msk.bf16.vlgmr.msra.gmra.mxu1 %vm272_vm1, %v1501_v14  ;;  %v1561_v53 = vld [vmem:[%s2019_s2 + $0x2d4] ss:$12 sps:$4 sm:$0xff]   ;;  %v1564_v55 = vld [vmem:[%s2019_s2 + $0x13c] ss:$12 sps:$4 sm:$0xff]   ;;  %v1562_v58 = vld [vmem:[%s2019_s2 + $0x138] ss:$12 sps:$4 sm:$0xff]  }
  0x1b   : > { %1037 = vmatpush1.bf16.msra.mxu0 %v1502_v18  ;;  %1080 = vmatpush1.bf16.msra.mxu1 %v1505_v20  ;;  %v1559_v56 = vld [vmem:[%s2019_s2 + $0x2d0] ss:$12 sps:$4 sm:$0xff]   ;;  %v1565_v60 = vld [vmem:[%s2019_s2 + $0x2b8] ss:$12 sps:$4 sm:$0xff]   ;;  %v1568_v62 = vld [vmem:[%s2019_s2 + $0x120] ss:$12 sps:$4 sm:$0xff]  }
  0x1c   : > { %1038 = vmatprep.subr.bf16.mxu0 %v1510_v19  ;;  %1081 = vmatprep.subr.bf16.mxu1 %v1513_v21  ;;  %v1567_v57 = vld [vmem:[%s2019_s2 + $0x2bc] ss:$12 sps:$4 sm:$0xff]   ;;  %v1570_v59 = vld [vmem:[%s2019_s2 + $0x124] ss:$12 sps:$4 sm:$0xff]   ;;  %v1576_v63 = vld [vmem:[%s2019_s2 + $0x10c] ss:$12 sps:$4 sm:$0xff]  }
  0x1d   : > { %v1573_v61 = vld [vmem:[%s2019_s2 + $0x2a4] ss:$12 sps:$4 sm:$0xff]   ;;  %v1571_v0 = vld [vmem:[%s2019_s2 + $0x2a0] ss:$12 sps:$4 sm:$0xff]   ;;  %v1574_v2 = vld [vmem:[%s2019_s2 + $0x108] ss:$12 sps:$4 sm:$0xff]  }
  0x1e   : > { %v1579_v1 = vld [vmem:[%s2019_s2 + $0x28c] ss:$12 sps:$4 sm:$0xff]   ;;  %v1582_v3 = vld [vmem:[%s2019_s2 + $0xf4] ss:$12 sps:$4 sm:$0xff]   ;;  %v1580_v7 = vld [vmem:[%s2019_s2 + $0xf0] ss:$12 sps:$4 sm:$0xff]  }
  0x1f   : > { %1039 = vmatpush1.bf16.msra.mxu0 %v1508_v22  ;;  %1082 = vmatpush1.bf16.msra.mxu1 %v1511_v24  ;;  %v1577_v5 = vld [vmem:[%s2019_s2 + $0x288] ss:$12 sps:$4 sm:$0xff]   ;;  %v1583_v8 = vld [vmem:[%s2019_s2 + $0x270] ss:$12 sps:$4 sm:$0xff]   ;;  %v1586_v10 = vld [vmem:[%s2019_s2 + $0xd8] ss:$12 sps:$4 sm:$0xff]  }
  0x20   : > { %1040 = vmatprep.subr.bf16.mxu0 %v1516_v23  ;;  %1083 = vmatprep.subr.bf16.mxu1 %v1519_v25  ;;  %v1585_v6 = vld [vmem:[%s2019_s2 + $0x274] ss:$12 sps:$4 sm:$0xff]   ;;  %v1588_v9 = vld [vmem:[%s2019_s2 + $0xdc] ss:$12 sps:$4 sm:$0xff]   ;;  %v1589_v12 = vld [vmem:[%s2019_s2 + $0x258] ss:$12 sps:$4 sm:$0xff]  }
  0x21   : > { %v1591_v11 = vld [vmem:[%s2019_s2 + $0x25c] ss:$12 sps:$4 sm:$0xff]   ;;  %v1594_v13 = vld [vmem:[%s2019_s2 + $0xc4] ss:$12 sps:$4 sm:$0xff]   ;;  %v1592_v14 = vld [vmem:[%s2019_s2 + $0xc0] ss:$12 sps:$4 sm:$0xff]  }
  0x22   : > { %v1597_v15 = vld [vmem:[%s2019_s2 + $0x244] ss:$12 sps:$4 sm:$0xff]   ;;  %v1595_v16 = vld [vmem:[%s2019_s2 + $0x240] ss:$12 sps:$4 sm:$0xff]  }
  0x23   : > { %1041 = vmatpush1.bf16.msra.mxu0 %v1514_v26  ;;  %1084 = vmatpush1.bf16.msra.mxu1 %v1517_v28  ;;  %v1598_v17 = vld [vmem:[%s2019_s2 + $0x170] ss:$12 sps:$4 sm:$0xff]  }
  0x24   : > { %1042 = vmatprep.subr.bf16.mxu0 %v1522_v27  ;;  %1085 = vmatprep.subr.bf16.mxu1 %v1525_v29  ;;  %v1600_v18 = vld [vmem:[%s2019_s2 + $0x2f0] ss:$12 sps:$4 sm:$0xff]  }
  0x25   : > { %v1599_v27 = vld [vmem:[%s2019_s2 + $0xb0] ss:$12 sps:$4 sm:$0xff]  }
  0x27   : > { %1043 = vmatpush1.bf16.msra.mxu0 %v1520_v30  ;;  %1086 = vmatpush1.bf16.msra.mxu1 %v1523_v32  ;;  %v1602_v32 = vld [vmem:[%s2019_s2 + $0x158] ss:$12 sps:$4 sm:$0xff]  }
  0x28   : > { %1044 = vmatprep.subr.bf16.mxu0 %v1528_v31  ;;  %1087 = vmatprep.subr.bf16.mxu1 %v1531_v33  ;;  %v1601_v31 = vld [vmem:[%s2019_s2 + $0x230] ss:$12 sps:$4 sm:$0xff]  }
  0x2b   : > { %1045 = vmatpush1.bf16.msra.mxu0 %v1526_v34  ;;  %1088 = vmatpush1.bf16.msra.mxu1 %v1529_v36  ;;  %v1604_v34 = vld [vmem:[%s2019_s2 + $0x2d8] ss:$12 sps:$4 sm:$0xff]   ;;  %v1606_v36 = vld [vmem:[%s2019_s2 + $0x140] ss:$12 sps:$4 sm:$0xff]  }
  0x2c   : > { %1046 = vmatprep.subr.bf16.mxu0 %v1534_v35  ;;  %1089 = vmatprep.subr.bf16.mxu1 %v1537_v37  ;;  %v1603_v35 = vld [vmem:[%s2019_s2 + $0x98] ss:$12 sps:$4 sm:$0xff]  }
  0x2d   : > { %v1605_v37 = vld [vmem:[%s2019_s2 + $0x218] ss:$12 sps:$4 sm:$0xff]  }
  0x2f   : > { %1047 = vmatpush1.bf16.msra.mxu0 %v1532_v38  ;;  %1090 = vmatpush1.bf16.msra.mxu1 %v1535_v40  ;;  %v1608_v38 = vld [vmem:[%s2019_s2 + $0x2c0] ss:$12 sps:$4 sm:$0xff]   ;;  %v1610_v40 = vld [vmem:[%s2019_s2 + $0x128] ss:$12 sps:$4 sm:$0xff]  }
  0x30   : > { %1048 = vmatprep.subr.bf16.mxu0 %v1540_v39  ;;  %1091 = vmatprep.subr.bf16.mxu1 %v1543_v41  ;;  %v1607_v39 = vld [vmem:[%s2019_s2 + $0x80] ss:$12 sps:$4 sm:$0xff]  }
  0x31   : > { %v1609_v41 = vld [vmem:[%s2019_s2 + $0x200] ss:$12 sps:$4 sm:$0xff]  }
  0x33   : > { %1049 = vmatpush1.bf16.msra.mxu0 %v1538_v42  ;;  %1092 = vmatpush1.bf16.msra.mxu1 %v1541_v43  ;;  %v1612_v42 = vld [vmem:[%s2019_s2 + $0x2a8] ss:$12 sps:$4 sm:$0xff]  }
  0x34   : > { %1050 = vmatprep.subr.bf16.mxu0 %v1546_v44  ;;  %1093 = vmatprep.subr.bf16.mxu1 %v1549_v46  ;;  %v1611_v43 = vld [vmem:[%s2019_s2 + $0x68] ss:$12 sps:$4 sm:$0xff]   ;;  %v1614_v44 = vld [vmem:[%s2019_s2 + $0x110] ss:$12 sps:$4 sm:$0xff]  }
  0x35   : > { %v1616_v46 = vld [vmem:[%s2019_s2 + $0x290] ss:$12 sps:$4 sm:$0xff]  }
  0x37   : > { %1051 = vmatpush1.bf16.msra.mxu0 %v1544_v45  ;;  %1094 = vmatpush1.bf16.msra.mxu1 %v1547_v48  ;;  %v1613_v45 = vld [vmem:[%s2019_s2 + $0x1e8] ss:$12 sps:$4 sm:$0xff]   ;;  %v1618_v48 = vld [vmem:[%s2019_s2 + $0xf8] ss:$12 sps:$4 sm:$0xff]  }
  0x38   : > { %1052 = vmatprep.subr.bf16.mxu0 %v1552_v47  ;;  %1095 = vmatprep.subr.bf16.mxu1 %v1555_v49  ;;  %v1615_v47 = vld [vmem:[%s2019_s2 + $0x50] ss:$12 sps:$4 sm:$0xff]  }
  0x39   : > { %v1617_v49 = vld [vmem:[%s2019_s2 + $0x1d0] ss:$12 sps:$4 sm:$0xff]  }
  0x3b   : > { %1053 = vmatpush2.bf16.msra.mxu0 %v1550_v50  ;;  %1096 = vmatpush2.bf16.msra.mxu1 %v1553_v52  ;;  %v1620_v50 = vld [vmem:[%s2019_s2 + $0x278] ss:$12 sps:$4 sm:$0xff]   ;;  %v1622_v52 = vld [vmem:[%s2019_s2 + $0xe0] ss:$12 sps:$4 sm:$0xff]  }
  0x3c   : > { %1054 = vmatprep.subr.bf16.mxu0 %v1558_v51  ;;  %1097 = vmatprep.subr.bf16.mxu1 %v1561_v53  ;;  %v1619_v51 = vld [vmem:[%s2019_s2 + $0x38] ss:$12 sps:$4 sm:$0xff]  }
  0x3d   : > { %v1621_v53 = vld [vmem:[%s2019_s2 + $0x1b8] ss:$12 sps:$4 sm:$0xff]  }
  0x3f   : > { %1055 = vmatpush2.bf16.msra.mxu0 %v1556_v54  ;;  %1098 = vmatpush2.bf16.msra.mxu1 %v1559_v56  ;;  %v1624_v54 = vld [vmem:[%s2019_s2 + $0x260] ss:$12 sps:$4 sm:$0xff]   ;;  %v1626_v56 = vld [vmem:[%s2019_s2 + $0xc8] ss:$12 sps:$4 sm:$0xff]  }
  0x40   : > { %1056 = vmatprep.subr.bf16.mxu0 %v1564_v55  ;;  %1099 = vmatprep.subr.bf16.mxu1 %v1567_v57  ;;  %v1623_v55 = vld [vmem:[%s2019_s2 + $0x20] ss:$12 sps:$4 sm:$0xff]  }
  0x41   : > { %v1625_v57 = vld [vmem:[%s2019_s2 + $0x1a0] ss:$12 sps:$4 sm:$0xff]  }
  0x43   : > { %1057 = vmatpush2.bf16.msra.mxu0 %v1562_v58  ;;  %1100 = vmatpush2.bf16.msra.mxu1 %v1565_v60  ;;  %v1628_v58 = vld [vmem:[%s2019_s2 + $0x248] ss:$12 sps:$4 sm:$0xff]  }
  0x44   : > { %1058 = vmatprep.subr.bf16.mxu0 %v1570_v59  ;;  %1101 = vmatprep.subr.bf16.mxu1 %v1573_v61  ;;  %v1627_v59 = vld [vmem:[%s2019_s2 + $0x8] ss:$12 sps:$4 sm:$0xff]   ;;  %v511_v61 = vsub.s32 0, %v1680_v4 }
  0x45   : > { %v1629_v60 = vld [vmem:[%s2019_s2 + $0x188] ss:$12 sps:$4 sm:$0xff]  }
  0x47   : > { %1059 = vmatpush2.bf16.msra.mxu0 %v1568_v62  ;;  %1102 = vmatpush2.bf16.msra.mxu1 %v1571_v0  ;;  %v507_v62 = vld [vmem:[%s2020_s3] sm:$0x7] }
  0x48   : > { %1060 = vmatprep.subr.bf16.mxu0 %v1576_v63  ;;  %1103 = vmatprep.subr.bf16.mxu1 %v1579_v1  ;;  %v515_v63 = vsub.s32 1, %v1680_v4  ;;  %v512_v0 = vrot.slane %v507_v62, %v511_v61 }
  0x4a   : > { %v516_v1 = vrot.slane %v507_v62, %v515_v63 }
  0x4b   : > { %1061 = vmatpush2.bf16.msra.mxu0 %v1574_v2  ;;  %1104 = vmatpush2.bf16.msra.mxu1 %v1577_v5 }
  0x4c   : > { %1062 = vmatprep.subr.bf16.mxu0 %v1582_v3  ;;  %1105 = vmatprep.subr.bf16.mxu1 %v1585_v6  ;;  %v1210_v3 = vld [vmem:[%s1997_s14] sm:$0xff] }
  0x4f   : > { %1063 = vmatpush2.bf16.msra.mxu0 %v1580_v7  ;;  %1106 = vmatpush2.bf16.msra.mxu1 %v1583_v8 }
  0x50   : > { %1064 = vmatprep.subr.bf16.mxu0 %v1588_v9  ;;  %1107 = vmatprep.subr.bf16.mxu1 %v1591_v11  ;;  %v1212_v11 = vld [vmem:[%s1997_s14 + $0xc] sm:$0xff] }
  0x53   : > { %1065 = vmatpush2.bf16.msra.mxu0 %v1586_v10  ;;  %1108 = vmatpush2.bf16.msra.mxu1 %v1589_v12  ;;  %v1214_v10 = vunpack.c.l.bf16 %v1210_v3 }
  0x54   : > { %1066 = vmatprep.subr.bf16.mxu0 %v1594_v13  ;;  %1109 = vmatprep.subr.bf16.mxu1 %v1597_v15 }
  0x57   : > { %1067 = vmatpush2.bf16.msra.mxu0 %v1592_v14  ;;  %1110 = vmatpush2.bf16.msra.mxu1 %v1595_v16 }
  0x58   : > { %1445 = vmatprep.subr.bf16.mxu0 %v1598_v17  ;;  %1467 = vmatprep.subr.bf16.mxu1 %v1600_v18  ;;  %v1215_v17 = vunpack.c.h.bf16 %v1210_v3 }
  0xda   : > { %v323_v19 = vpop.f32.mrf.mxu0  ;;  %v366_v21 = vpop.f32.mrf.mxu1 }
  0xdc   : > { %v325_v20 = vpop.f32.mrf.mxu0  ;;  %v368_v23 = vpop.f32.mrf.mxu1 }
  0xde   : > { %v327_v22 = vpop.f32.mrf.mxu0  ;;  %v370_v25 = vpop.f32.mrf.mxu1 }
  0xdf   : > { %v1891_v28 = vpack.c.bf16 %v327_v22, %v323_v19  ;;  %v1899_v33 = vpack.c.bf16 %v370_v25, %v366_v21 }
  0xe0   : > { %v329_v24 = vpop.f32.mrf.mxu0  ;;  %v372_v29 = vpop.f32.mrf.mxu1 }
  0xe1   : > { %v376_v26 = vpack.c.bf16 %v329_v24, %v325_v20  ;;  %v378_v30 = vpack.c.bf16 %v372_v29, %v368_v23  ;;  %v1217_v20 = vunpack.c.l.bf16 %v1212_v11  ;;  %v1218_v29 = vunpack.c.h.bf16 %v1212_v11 }
  0xe3   : > { %1068 = vmatprep.mubr.bf16.mxu0 %v376_v26  ;;  %1111 = vmatprep.mubr.bf16.mxu1 %v378_v30 }
  0xe4   : > { %1069 = vmatmul.mubr.bf16.vlgmr.msra.gmra.mxu0 %v1891_v28  ;;  %1112 = vmatmul.mubr.bf16.vlgmr.msra.gmra.mxu1 %v1899_v33 }
  0xe5   : > { %1446 = vmatpush3.bf16.msra.mxu0 %v1599_v27  ;;  %1154 = vmatprep.mubr.bf16.mxu0 %v376_v26 }
  0xe6   : > { %1468 = vmatpush3.bf16.msra.mxu1 %v1601_v31  ;;  %1447 = vmatprep.subr.bf16.mxu0 %v1602_v32 }
  0xe7   : > { %1195 = vmatprep.mubr.bf16.mxu1 %v378_v30  ;;  %1469 = vmatprep.subr.bf16.mxu1 %v1604_v34 }
  0xe9   : > { %1448 = vmatpush3.bf16.msra.mxu0 %v1603_v35 }
  0xea   : > { %1449 = vmatprep.subr.bf16.mxu0 %v1606_v36  ;;  %1470 = vmatpush3.bf16.msra.mxu1 %v1605_v37 }
  0xeb   : > { %1471 = vmatprep.subr.bf16.mxu1 %v1608_v38 }
  0xed   : > { %1450 = vmatpush3.bf16.msra.mxu0 %v1607_v39  ;;  %v519_v39 = vsub.s32 2, %v1680_v4 }
  0xee   : > { %1451 = vmatprep.subr.bf16.mxu0 %v1610_v40  ;;  %1472 = vmatpush3.bf16.msra.mxu1 %v1609_v41 }
  0xef   : > { %1473 = vmatprep.subr.bf16.mxu1 %v1612_v42  ;;  %v520_v41 = vrot.slane %v507_v62, %v519_v39 }
  0xf1   : > { %1452 = vmatpush3.bf16.msra.mxu0 %v1611_v43 }
  0xf2   : > { %1453 = vmatprep.subr.bf16.mxu0 %v1614_v44  ;;  %1474 = vmatpush3.bf16.msra.mxu1 %v1613_v45 }
  0xf3   : > { %1475 = vmatprep.subr.bf16.mxu1 %v1616_v46 }
  0xf5   : > { %1454 = vmatpush3.bf16.msra.mxu0 %v1615_v47  ;;  %v1211_v47 = vld [vmem:[%s1997_s14 + $0x8] ss:$12 sps:$4 sm:$0xff]  }
  0xf6   : > { %1455 = vmatprep.subr.bf16.mxu0 %v1618_v48  ;;  %1476 = vmatpush3.bf16.msra.mxu1 %v1617_v49 }
  0xf7   : > { %1477 = vmatprep.subr.bf16.mxu1 %v1620_v50 }
  0xf9   : > { %1456 = vmatpush3.bf16.msra.mxu0 %v1619_v51 }
  0xfa   : > { %1457 = vmatprep.subr.bf16.mxu0 %v1622_v52  ;;  %1478 = vmatpush3.bf16.msra.mxu1 %v1621_v53  ;;  %v1216_v53 = vunpack.c.l.bf16 %v1211_v47 }
  0xfb   : > { %1479 = vmatprep.subr.bf16.mxu1 %v1624_v54 }
  0xfd   : > { %1458 = vmatpush3.bf16.msra.mxu0 %v1623_v55 }
  0xfe   : > { %1459 = vmatprep.subr.bf16.mxu0 %v1626_v56  ;;  %1480 = vmatpush3.bf16.msra.mxu1 %v1625_v57 }
  0xff   : > { %1481 = vmatprep.subr.bf16.mxu1 %v1628_v58 }
 0x101   : > { %1460 = vmatpush3.bf16.msra.mxu0 %v1627_v59 }
 0x102   : > { %1482 = vmatpush3.bf16.msra.mxu1 %v1629_v60  ;;  %v1219_v60 = vunpack.c.h.bf16 %v1211_v47 }
 0x104   : > { %1155 = vmatmul.mubr.bf16.vlgmr.msra.gmra.mxu0 %v1891_v28 }
 0x105   : > { %1196 = vmatmul.mubr.bf16.vlgmr.msra.gmra.mxu1 %v1899_v33 }
 0x1a4   : > { %v1070_v2 = vpop.f32.mrf.mxu0  ;;  %v1113_v7 = vpop.f32.mrf.mxu1 }
 0x1a5   : > { %v1071_v5 = vadd.f32 %v1070_v2, %v512_v0 }
 0x1a6   : > { %v1072_v6 = vpop.f32.mrf.mxu0  ;;  %v1115_v13 = vpop.f32.mrf.mxu1 }
 0x1a7   : > { %v1073_v8 = vadd.f32 %v1072_v6, %v516_v1  ;;  %v1114_v9 = vadd.f32 %v1113_v7, %v1071_v5 }
 0x1a8   : > { %v1074_v12 = vpop.f32.mrf.mxu0  ;;  %v1117_v19 = vpop.f32.mrf.mxu1 }
 0x1a9   : > { %v1204_v14 = vmax.f32 %v1114_v9, 0.0  ;;  %v1075_v15 = vadd.f32 %v1074_v12, %v512_v0  ;;  %v1116_v16 = vadd.f32 %v1115_v13, %v1073_v8 }
 0x1aa   : > { %v1076_v18 = vpop.f32.mrf.mxu0  ;;  %v1119_v25 = vpop.f32.mrf.mxu1 }
 0x1ab   : > { %v1220_v21 = vmul.f32 %v1214_v10, %v1204_v14  ;;  %v1205_v22 = vmax.f32 %v1116_v16, 0.0  ;;  %v1077_v23 = vadd.f32 %v1076_v18, %v516_v1  ;;  %v1118_v24 = vadd.f32 %v1117_v19, %v1075_v15 }
 0x1ad   : > { %v1221_v26 = vmul.f32 %v1215_v17, %v1205_v22  ;;  %v1207_v27 = vmax.f32 %v1118_v24, 0.0  ;;  %v1120_v28 = vadd.f32 %v1119_v25, %v1077_v23  ;;  %v1226_v30 = vadd.f32 %v1220_v21, %v1214_v10 }
 0x1af   : > { %v1227_v31 = vadd.f32 %v1221_v26, %v1215_v17  ;;  %v1223_v32 = vmul.f32 %v1217_v20, %v1207_v27  ;;  %v1208_v33 = vmax.f32 %v1120_v28, 0.0 }
 0x1b1   : > { %v1441_v34 = vpack.c.bf16 %v1227_v31, %v1226_v30  ;;  %v1224_v35 = vmul.f32 %v1218_v29, %v1208_v33  ;;  %v1229_v36 = vadd.f32 %v1223_v32, %v1217_v20 }
 0x1b3   : > { %1252 = vst [vmem:[%s2006_s17] sm:$0xff] %v1441_v34  ;;  %v1230_v37 = vadd.f32 %v1224_v35, %v1218_v29 }
 0x1b5   : > { %v1443_v38 = vpack.c.bf16 %v1230_v37, %v1229_v36 }
 0x1b7   : > { %1255 = vst [vmem:[%s2006_s17 + $0xc] sm:$0xff] %v1443_v38 }
 0x1c4   : > { %v1461_v40 = vpop.f32.mrf.mxu0 }
 0x1c5   : > { %v1483_v43 = vpop.f32.mrf.mxu1 }
 0x1c6   : > { %v1462_v42 = vpop.f32.mrf.mxu0 }
 0x1c7   : > { %v1463_v44 = vadd.f32 %v1462_v42, %v1461_v40  ;;  %v1484_v46 = vpop.f32.mrf.mxu1 }
 0x1c8   : > { %v1464_v45 = vpop.f32.mrf.mxu0  ;;  %v1485_v49 = vadd.f32 %v1484_v46, %v1483_v43 }
 0x1c9   : > { %v1157_v48 = vadd.f32 %v1463_v44, %v520_v41  ;;  %v1486_v51 = vpop.f32.mrf.mxu1 }
 0x1ca   : > { %v1465_v50 = vpop.f32.mrf.mxu0 }
 0x1cb   : > { %v1198_v52 = vadd.f32 %v1485_v49, %v1157_v48  ;;  %v1466_v54 = vadd.f32 %v1465_v50, %v1464_v45  ;;  %v1487_v55 = vpop.f32.mrf.mxu1 }
 0x1cc   : > { %v1488_v57 = vadd.f32 %v1487_v55, %v1486_v51 }
 0x1cd   : > { %v1206_v56 = vmax.f32 %v1198_v52, 0.0  ;;  %v1160_v4 = vadd.f32 %v1466_v54, %v520_v41 }
 0x1cf   : > { %v1222_v58 = vmul.f32 %v1216_v53, %v1206_v56  ;;  %v1201_v59 = vadd.f32 %v1488_v57, %v1160_v4 }
 0x1d1   : > { %v1228_v61 = vadd.f32 %v1222_v58, %v1216_v53  ;;  %v1209_v62 = vmax.f32 %v1201_v59, 0.0 }
 0x1d3   : > { %v1442_v63 = vpack.c.bf16 %v1228_v61, %v1228_v61  ;;  %v1225_v0 = vmul.f32 %v1219_v60, %v1209_v62 }
 0x1d5   : > { %1254 = vst.msk [vmem:[%s2006_s17 + $0x8] sm:$0xf] %vm1253_vm2, %v1442_v63  ;;  %v1231_v1 = vadd.f32 %v1225_v0, %v1219_v60 }
 0x1d7   : > { %v1444_v2 = vpack.c.bf16 %v1231_v1, %v1231_v1 }
 0x1d9   : > { %1256 = vst.msk [vmem:[%s2006_s17 + $0x14] sm:$0xf] %vm1253_vm2, %v1444_v2 }
 0x1da PF: > { %s15_s18 = sadd.s32 1, %s1636_s18  }
 0x1db   : > { %p12_p4 = scmp.ge.s32.totalorder %s15_s18, 4  }
 0x1dd   :  { %14 = sbr.rel (!%p12_p4) target bundleno = 1 (0x1), region = 73 }

// kernel: fakenet_forward.21
= control target key start
LH: loop header
LB: loop body
LE: loop exit
PB: predicated region body
PF: predicated region fallthrough
CT: control target
= control target key end

     0   :  { %vm409_vm0 = vcmask 523264   ;;  %vm1115_vm1 = vcmask 519168   ;;  %s2279_s2 = inlined_call_operand.vmem [shape: bf16[64,64], index: 2, kind: input, shape index: {}]   ;;  %s2280_s0 = inlined_call_operand.vmem [shape: bf16[512,64], index: 0, kind: input, shape index: {}]   ;;  %s2281_s1 = inlined_call_operand.vmem [shape: bf16[512,64], index: 1, kind: input, shape index: {}]   ;;  %s2282_s3 = inlined_call_operand.vmem [shape: f32[1,64], index: 3, kind: input, shape index: {}]   ;;  %s2283_s4 = inlined_call_operand.vmem [shape: bf16[512,64], index: 4, kind: output, shape index: {}]  }
   0x1   :  { %v1497_v0 = vld [vmem:[%s2279_s2 + $0x18] sm:$0xff]   ;;  %v1498_v1 = vld [vmem:[%s2279_s2 + $0x10] sm:$0xff]   ;;  %v1499_v2 = vld [vmem:[%s2279_s2 + $0x8] sm:$0xff]  }
   0x2   :  { %1417 = vmatprep.subr.bf16.mxu0 %v1497_v0  ;;  %1489 = vmatprep.subr.bf16.mxu1 %v1497_v0  ;;  %v18_v3 = vld [vmem:[%s2280_s0] sm:$0xf]  ;;  %v19_v4 = vld [vmem:[%s2280_s0 + $0x4] sm:$0xf]  ;;  %v20_v14 = vld [vmem:[%s2280_s0 + $0x8] sm:$0xf] }
   0x3   :  { %1418 = vmatpush3.bf16.msra.mxu0 %v1497_v0  ;;  %1493 = vmatpush3.bf16.msra.mxu1 %v1497_v0  ;;  %v82_v5 = vld [vmem:[%s2281_s1] sm:$0xf]  ;;  %v83_v6 = vld [vmem:[%s2281_s1 + $0x4] sm:$0xf]  ;;  %v21_v17 = vld [vmem:[%s2280_s0 + $0xc] sm:$0xf] }
   0x4   :  { %1419 = vmatprep.subr.bf16.mxu0 %v1498_v1  ;;  %1490 = vmatprep.subr.bf16.mxu1 %v1498_v1  ;;  %v146_v7 = vadd.bf16 %v82_v5, %v18_v3  ;;  %v50_v8 = vld [vmem:[%s2280_s0 + $0x80] sm:$0xf]  ;;  %v51_v9 = vld [vmem:[%s2280_s0 + $0x84] sm:$0xf]  ;;  %v147_v11 = vadd.bf16 %v83_v6, %v19_v4  ;;  %v84_v18 = vld [vmem:[%s2281_s1 + $0x8] sm:$0xf] }
   0x5   :  { %v1500_v10 = vld [vmem:[%s2279_s2] sm:$0xff]   ;;  %v85_v19 = vld [vmem:[%s2281_s1 + $0xc] sm:$0xf]  ;;  %v52_v21 = vld [vmem:[%s2280_s0 + $0x88] sm:$0xf]  ;;  %v148_v28 = vadd.bf16 %v84_v18, %v20_v14 }
   0x6   :  { %v114_v12 = vld [vmem:[%s2281_s1 + $0x80] sm:$0xf]  ;;  %v115_v13 = vld [vmem:[%s2281_s1 + $0x84] sm:$0xf]  ;;  %v1185_v20 = vcombine.low %v146_v7, %v147_v11  ;;  %v53_v22 = vld [vmem:[%s2280_s0 + $0x8c] sm:$0xf]  ;;  %v149_v29 = vadd.bf16 %v85_v19, %v21_v17 }
   0x7   :  { %1420 = vmatpush3.bf16.msra.mxu0 %v1498_v1  ;;  %1494 = vmatpush3.bf16.msra.mxu1 %v1498_v1  ;;  %v178_v15 = vadd.bf16 %v114_v12, %v50_v8  ;;  %v179_v16 = vadd.bf16 %v115_v13, %v51_v9  ;;  %v116_v23 = vld [vmem:[%s2281_s1 + $0x88] sm:$0xf]  ;;  %v117_v25 = vld [vmem:[%s2281_s1 + $0x8c] sm:$0xf]  ;;  %v22_v26 = vld [vmem:[%s2280_s0 + $0x10] sm:$0xf] }
   0x8   :  { %1421 = vmatprep.subr.bf16.mxu0 %v1499_v2  ;;  %1491 = vmatprep.subr.bf16.mxu1 %v1499_v2  ;;  %v23_v27 = vld [vmem:[%s2280_s0 + $0x14] sm:$0xf]  ;;  %v180_v30 = vadd.bf16 %v116_v23, %v52_v21  ;;  %v181_v31 = vadd.bf16 %v117_v25, %v53_v22  ;;  %v86_v32 = vld [vmem:[%s2281_s1 + $0x10] sm:$0xf]  ;;  %v24_v42 = vld [vmem:[%s2280_s0 + $0x18] sm:$0xf]  ;;  %v1186_v48 = vcombine.low %v148_v28, %v149_v29 }
   0x9   :  { %v1201_v24 = vcombine.low %v178_v15, %v179_v16  ;;  %1425 = vmatprep.mubr.msk.bf16.mxu0 %vm409_vm0, %v1185_v20  ;;  %v87_v33 = vld [vmem:[%s2281_s1 + $0x14] sm:$0xf]  ;;  %v54_v34 = vld [vmem:[%s2280_s0 + $0x90] sm:$0xf]  ;;  %v150_v35 = vadd.bf16 %v86_v32, %v22_v26  ;;  %v25_v43 = vld [vmem:[%s2280_s0 + $0x1c] sm:$0xf] }
   0xa   :  { %v151_v36 = vadd.bf16 %v87_v33, %v23_v27  ;;  %v55_v37 = vld [vmem:[%s2280_s0 + $0x94] sm:$0xf]  ;;  %v118_v38 = vld [vmem:[%s2281_s1 + $0x90] sm:$0xf]  ;;  %v88_v44 = vld [vmem:[%s2281_s1 + $0x18] sm:$0xf]  ;;  %v1202_v49 = vcombine.low %v180_v30, %v181_v31 }
   0xb   :  { %1422 = vmatpush3.bf16.msra.mxu0 %v1499_v2  ;;  %1495 = vmatpush3.bf16.msra.mxu1 %v1499_v2  ;;  %v119_v39 = vld [vmem:[%s2281_s1 + $0x94] sm:$0xf]  ;;  %v182_v40 = vadd.bf16 %v118_v38, %v54_v34  ;;  %v89_v45 = vld [vmem:[%s2281_s1 + $0x1c] sm:$0xf]  ;;  %v56_v46 = vld [vmem:[%s2280_s0 + $0x98] sm:$0xf]  ;;  %v152_v61 = vadd.bf16 %v88_v44, %v24_v42 }
   0xc   :  { %1423 = vmatprep.subr.bf16.mxu0 %v1500_v10  ;;  %1492 = vmatprep.subr.bf16.mxu1 %v1500_v10  ;;  %v183_v41 = vadd.bf16 %v119_v39, %v55_v37  ;;  %v57_v47 = vld [vmem:[%s2280_s0 + $0x9c] sm:$0xf]  ;;  %v120_v50 = vld [vmem:[%s2281_s1 + $0x98] sm:$0xf]  ;;  %v26_v52 = vld [vmem:[%s2280_s0 + $0x20] sm:$0xf]  ;;  %v1187_v53 = vcombine.low %v150_v35, %v151_v36  ;;  %v153_v62 = vadd.bf16 %v89_v45, %v25_v43 }
   0xd   :  { %1457 = vmatprep.mubr.msk.bf16.mxu1 %vm409_vm0, %v1201_v24  ;;  %v121_v51 = vld [vmem:[%s2281_s1 + $0x9c] sm:$0xf]  ;;  %v27_v55 = vld [vmem:[%s2280_s0 + $0x24] sm:$0xf]  ;;  %v90_v56 = vld [vmem:[%s2281_s1 + $0x20] sm:$0xf]  ;;  %v184_v0 = vadd.bf16 %v120_v50, %v56_v46 }
   0xe   :  { %v1203_v54 = vcombine.low %v182_v40, %v183_v41  ;;  %v91_v57 = vld [vmem:[%s2281_s1 + $0x24] sm:$0xf]  ;;  %v58_v58 = vld [vmem:[%s2280_s0 + $0xa0] sm:$0xf]  ;;  %v185_v1 = vadd.bf16 %v121_v51, %v57_v47  ;;  %v154_v2 = vadd.bf16 %v90_v56, %v26_v52  ;;  %v28_v6 = vld [vmem:[%s2280_s0 + $0x28] sm:$0xf]  ;;  %v1188_v13 = vcombine.low %v152_v61, %v153_v62 }
   0xf   :  { %1424 = vmatpush3.bf16.msra.mxu0 %v1500_v10  ;;  %1496 = vmatpush3.bf16.msra.mxu1 %v1500_v10  ;;  %v59_v59 = vld [vmem:[%s2280_s0 + $0xa4] sm:$0xf]  ;;  %v122_v60 = vld [vmem:[%s2281_s1 + $0xa0] sm:$0xf]  ;;  %v155_v3 = vadd.bf16 %v91_v57, %v27_v55  ;;  %v29_v7 = vld [vmem:[%s2280_s0 + $0x2c] sm:$0xf] }
  0x10   :  { %v123_v63 = vld [vmem:[%s2281_s1 + $0xa4] sm:$0xf]  ;;  %v186_v4 = vadd.bf16 %v122_v60, %v58_v58  ;;  %v92_v8 = vld [vmem:[%s2281_s1 + $0x28] sm:$0xf]  ;;  %v93_v9 = vld [vmem:[%s2281_s1 + $0x2c] sm:$0xf]  ;;  %v1204_v14 = vcombine.low %v184_v0, %v185_v1 }
  0x11   :  { %v187_v5 = vadd.bf16 %v123_v63, %v59_v59  ;;  %v60_v10 = vld [vmem:[%s2280_s0 + $0xa8] sm:$0xf]  ;;  %v61_v11 = vld [vmem:[%s2280_s0 + $0xac] sm:$0xf]  ;;  %v30_v16 = vld [vmem:[%s2280_s0 + $0x30] sm:$0xf]  ;;  %v1189_v18 = vcombine.low %v154_v2, %v155_v3  ;;  %v156_v26 = vadd.bf16 %v92_v8, %v28_v6  ;;  %v157_v27 = vadd.bf16 %v93_v9, %v29_v7 }
  0x12   :  { %1426 = vmatmul.mubr.msk.bf16.vlgmr.msra.gmra.mxu0 %vm409_vm0, %v1186_v48  ;;  %1458 = vmatmul.mubr.msk.bf16.vlgmr.msra.gmra.mxu1 %vm409_vm0, %v1202_v49  ;;  %v124_v12 = vld [vmem:[%s2281_s1 + $0xa8] sm:$0xf]  ;;  %v125_v15 = vld [vmem:[%s2281_s1 + $0xac] sm:$0xf]  ;;  %v31_v17 = vld [vmem:[%s2280_s0 + $0x34] sm:$0xf] }
  0x13   :  { %1429 = vmatprep.mubr.msk.bf16.mxu0 %vm409_vm0, %v1187_v53  ;;  %1461 = vmatprep.mubr.msk.bf16.mxu1 %vm409_vm0, %v1203_v54  ;;  %v1205_v19 = vcombine.low %v186_v4, %v187_v5  ;;  %v94_v20 = vld [vmem:[%s2281_s1 + $0x30] sm:$0xf]  ;;  %v95_v21 = vld [vmem:[%s2281_s1 + $0x34] sm:$0xf]  ;;  %v188_v28 = vadd.bf16 %v124_v12, %v60_v10  ;;  %v189_v29 = vadd.bf16 %v125_v15, %v61_v11  ;;  %v32_v34 = vld [vmem:[%s2280_s0 + $0x38] sm:$0xf] }
  0x14   :  { %v62_v22 = vld [vmem:[%s2280_s0 + $0xb0] sm:$0xf]  ;;  %v63_v23 = vld [vmem:[%s2280_s0 + $0xb4] sm:$0xf]  ;;  %v158_v30 = vadd.bf16 %v94_v20, %v30_v16  ;;  %v159_v31 = vadd.bf16 %v95_v21, %v31_v17  ;;  %v33_v35 = vld [vmem:[%s2280_s0 + $0x3c] sm:$0xf]  ;;  %v1190_v41 = vcombine.low %v156_v26, %v157_v27 }
  0x15   :  { %v126_v24 = vld [vmem:[%s2281_s1 + $0xb0] sm:$0xf]  ;;  %v127_v25 = vld [vmem:[%s2281_s1 + $0xb4] sm:$0xf]  ;;  %v96_v36 = vld [vmem:[%s2281_s1 + $0x38] sm:$0xf]  ;;  %v1206_v42 = vcombine.low %v188_v28, %v189_v29 }
  0x16   :  { %v190_v32 = vadd.bf16 %v126_v24, %v62_v22  ;;  %v191_v33 = vadd.bf16 %v127_v25, %v63_v23  ;;  %v97_v37 = vld [vmem:[%s2281_s1 + $0x3c] sm:$0xf]  ;;  %v64_v38 = vld [vmem:[%s2280_s0 + $0xb8] sm:$0xf]  ;;  %v34_v44 = vld [vmem:[%s2280_s0 + $0x40] sm:$0xf]  ;;  %v1191_v46 = vcombine.low %v158_v30, %v159_v31  ;;  %v160_v54 = vadd.bf16 %v96_v36, %v32_v34 }
  0x17   :  { %v65_v39 = vld [vmem:[%s2280_s0 + $0xbc] sm:$0xf]  ;;  %v128_v40 = vld [vmem:[%s2281_s1 + $0xb8] sm:$0xf]  ;;  %v35_v45 = vld [vmem:[%s2280_s0 + $0x44] sm:$0xf]  ;;  %v161_v55 = vadd.bf16 %v97_v37, %v33_v35 }
  0x18   :  { %v129_v43 = vld [vmem:[%s2281_s1 + $0xbc] sm:$0xf]  ;;  %v1207_v47 = vcombine.low %v190_v32, %v191_v33  ;;  %v98_v48 = vld [vmem:[%s2281_s1 + $0x40] sm:$0xf]  ;;  %v99_v49 = vld [vmem:[%s2281_s1 + $0x44] sm:$0xf]  ;;  %v192_v56 = vadd.bf16 %v128_v40, %v64_v38 }
  0x19   :  { %v66_v50 = vld [vmem:[%s2280_s0 + $0xc0] sm:$0xf]  ;;  %v67_v51 = vld [vmem:[%s2280_s0 + $0xc4] sm:$0xf]  ;;  %v193_v57 = vadd.bf16 %v129_v43, %v65_v39  ;;  %v162_v58 = vadd.bf16 %v98_v48, %v34_v44  ;;  %v163_v59 = vadd.bf16 %v99_v49, %v35_v45  ;;  %v36_v62 = vld [vmem:[%s2280_s0 + $0x48] sm:$0xf]  ;;  %v1192_v5 = vcombine.low %v160_v54, %v161_v55 }
  0x1a   :  { %1430 = vmatmul.mubr.msk.bf16.gmra.mxu0 %vm409_vm0, %v1188_v13  ;;  %1462 = vmatmul.mubr.msk.bf16.gmra.mxu1 %vm409_vm0, %v1204_v14  ;;  %v130_v52 = vld [vmem:[%s2281_s1 + $0xc0] sm:$0xf]  ;;  %v131_v53 = vld [vmem:[%s2281_s1 + $0xc4] sm:$0xf]  ;;  %v37_v63 = vld [vmem:[%s2280_s0 + $0x4c] sm:$0xf] }
  0x1b   :  { %1433 = vmatprep.mubr.msk.bf16.mxu0 %vm409_vm0, %v1189_v18  ;;  %1465 = vmatprep.mubr.msk.bf16.mxu1 %vm409_vm0, %v1205_v19  ;;  %v194_v60 = vadd.bf16 %v130_v52, %v66_v50  ;;  %v195_v61 = vadd.bf16 %v131_v53, %v67_v51  ;;  %v100_v0 = vld [vmem:[%s2281_s1 + $0x48] sm:$0xf]  ;;  %v101_v1 = vld [vmem:[%s2281_s1 + $0x4c] sm:$0xf]  ;;  %v1208_v6 = vcombine.low %v192_v56, %v193_v57  ;;  %v38_v8 = vld [vmem:[%s2280_s0 + $0x50] sm:$0xf] }
  0x1c   :  { %v68_v2 = vld [vmem:[%s2280_s0 + $0xc8] sm:$0xf]  ;;  %v69_v3 = vld [vmem:[%s2280_s0 + $0xcc] sm:$0xf]  ;;  %v39_v9 = vld [vmem:[%s2280_s0 + $0x54] sm:$0xf]  ;;  %v1193_v10 = vcombine.low %v162_v58, %v163_v59  ;;  %v164_v18 = vadd.bf16 %v100_v0, %v36_v62  ;;  %v165_v19 = vadd.bf16 %v101_v1, %v37_v63 }
  0x1d   :  { %v132_v4 = vld [vmem:[%s2281_s1 + $0xc8] sm:$0xf]  ;;  %v133_v7 = vld [vmem:[%s2281_s1 + $0xcc] sm:$0xf]  ;;  %v1209_v11 = vcombine.low %v194_v60, %v195_v61  ;;  %v102_v12 = vld [vmem:[%s2281_s1 + $0x50] sm:$0xf] }
  0x1e   :  { %v103_v13 = vld [vmem:[%s2281_s1 + $0x54] sm:$0xf]  ;;  %v70_v14 = vld [vmem:[%s2280_s0 + $0xd0] sm:$0xf]  ;;  %v196_v20 = vadd.bf16 %v132_v4, %v68_v2  ;;  %v197_v21 = vadd.bf16 %v133_v7, %v69_v3  ;;  %v166_v22 = vadd.bf16 %v102_v12, %v38_v8  ;;  %v40_v26 = vld [vmem:[%s2280_s0 + $0x58] sm:$0xf] }
  0x1f   :  { %v71_v15 = vld [vmem:[%s2280_s0 + $0xd4] sm:$0xf]  ;;  %v134_v16 = vld [vmem:[%s2281_s1 + $0xd0] sm:$0xf]  ;;  %v167_v23 = vadd.bf16 %v103_v13, %v39_v9  ;;  %v41_v27 = vld [vmem:[%s2280_s0 + $0x5c] sm:$0xf] }
  0x20   :  { %v135_v17 = vld [vmem:[%s2281_s1 + $0xd4] sm:$0xf]  ;;  %v198_v24 = vadd.bf16 %v134_v16, %v70_v14  ;;  %v104_v28 = vld [vmem:[%s2281_s1 + $0x58] sm:$0xf]  ;;  %v105_v29 = vld [vmem:[%s2281_s1 + $0x5c] sm:$0xf]  ;;  %v1210_v43 = vcombine.low %v196_v20, %v197_v21 }
  0x21   :  { %v199_v25 = vadd.bf16 %v135_v17, %v71_v15  ;;  %v48_v30 = vld [vmem:[%s2280_s0 + $0x78] sm:$0xf]  ;;  %v49_v31 = vld [vmem:[%s2280_s0 + $0x7c] sm:$0xf]  ;;  %v42_v37 = vld [vmem:[%s2280_s0 + $0x60] sm:$0xf]  ;;  %v1195_v48 = vcombine.low %v166_v22, %v167_v23  ;;  %v168_v59 = vadd.bf16 %v104_v28, %v40_v26  ;;  %v169_v60 = vadd.bf16 %v105_v29, %v41_v27 }
  0x22   :  { %1434 = vmatmul.mubr.msk.bf16.gmra.mxu0 %vm409_vm0, %v1190_v41  ;;  %1466 = vmatmul.mubr.msk.bf16.gmra.mxu1 %vm409_vm0, %v1206_v42  ;;  %v112_v32 = vld [vmem:[%s2281_s1 + $0x78] sm:$0xf]  ;;  %v73_v34 = vld [vmem:[%s2280_s0 + $0xdc] sm:$0xf]  ;;  %v1194_v42 = vcombine.low %v164_v18, %v165_v19  ;;  %v43_v44 = vld [vmem:[%s2280_s0 + $0x64] sm:$0xf] }
  0x23   :  { %1437 = vmatprep.mubr.msk.bf16.mxu0 %vm409_vm0, %v1191_v46  ;;  %1469 = vmatprep.mubr.msk.bf16.mxu1 %vm409_vm0, %v1207_v47  ;;  %v72_v33 = vld [vmem:[%s2280_s0 + $0xd8] sm:$0xf]  ;;  %v137_v36 = vld [vmem:[%s2281_s1 + $0xdc] sm:$0xf]  ;;  %v176_v39 = vadd.bf16 %v112_v32, %v48_v30  ;;  %v1211_v49 = vcombine.low %v198_v24, %v199_v25  ;;  %v106_v50 = vld [vmem:[%s2281_s1 + $0x60] sm:$0xf] }
  0x24   :  { %v136_v35 = vld [vmem:[%s2281_s1 + $0xd8] sm:$0xf]  ;;  %v113_v38 = vld [vmem:[%s2281_s1 + $0x7c] sm:$0xf]  ;;  %v107_v51 = vld [vmem:[%s2281_s1 + $0x64] sm:$0xf]  ;;  %v201_v63 = vadd.bf16 %v137_v36, %v73_v34  ;;  %v170_v0 = vadd.bf16 %v106_v50, %v42_v37 }
  0x25   :  { %v80_v40 = vld [vmem:[%s2280_s0 + $0xf8] sm:$0xf]  ;;  %v81_v41 = vld [vmem:[%s2280_s0 + $0xfc] sm:$0xf]  ;;  %v177_v45 = vadd.bf16 %v113_v38, %v49_v31  ;;  %v74_v52 = vld [vmem:[%s2280_s0 + $0xe0] sm:$0xf]  ;;  %v200_v62 = vadd.bf16 %v136_v35, %v72_v33  ;;  %v171_v1 = vadd.bf16 %v107_v51, %v43_v44 }
  0x26   :  { %v144_v46 = vld [vmem:[%s2281_s1 + $0xf8] sm:$0xf]  ;;  %v145_v47 = vld [vmem:[%s2281_s1 + $0xfc] sm:$0xf]  ;;  %v75_v55 = vld [vmem:[%s2280_s0 + $0xe4] sm:$0xf] }
  0x27   :  { %v208_v53 = vadd.bf16 %v144_v46, %v80_v40  ;;  %v209_v54 = vadd.bf16 %v145_v47, %v81_v41  ;;  %v138_v56 = vld [vmem:[%s2281_s1 + $0xe0] sm:$0xf]  ;;  %v139_v57 = vld [vmem:[%s2281_s1 + $0xe4] sm:$0xf]  ;;  %v1200_v58 = vcombine.low %v176_v39, %v177_v45  ;;  %v44_v4 = vld [vmem:[%s2280_s0 + $0x68] sm:$0xf]  ;;  %v1212_v12 = vcombine.low %v200_v62, %v201_v63 }
  0x28   :  { %v202_v2 = vadd.bf16 %v138_v56, %v74_v52  ;;  %v203_v3 = vadd.bf16 %v139_v57, %v75_v55  ;;  %v109_v7 = vld [vmem:[%s2281_s1 + $0x6c] sm:$0xf]  ;;  %v76_v8 = vld [vmem:[%s2280_s0 + $0xe8] sm:$0xf]  ;;  %v46_v14 = vld [vmem:[%s2280_s0 + $0x70] sm:$0xf]  ;;  %v1197_v16 = vcombine.low %v170_v0, %v171_v1 }
  0x29   :  { %v1216_v61 = vcombine.low %v208_v53, %v209_v54  ;;  %v77_v9 = vld [vmem:[%s2280_s0 + $0xec] sm:$0xf]  ;;  %v47_v15 = vld [vmem:[%s2280_s0 + $0x74] sm:$0xf]  ;;  %v110_v18 = vld [vmem:[%s2281_s1 + $0x70] sm:$0xf] }
  0x2a   :  { %1438 = vmatmul.mubr.msk.bf16.gmra.mxu0 %vm409_vm0, %v1192_v5  ;;  %1470 = vmatmul.mubr.msk.bf16.gmra.mxu1 %vm409_vm0, %v1208_v6  ;;  %v45_v5 = vld [vmem:[%s2280_s0 + $0x6c] sm:$0xf]  ;;  %v108_v6 = vld [vmem:[%s2281_s1 + $0x68] sm:$0xf]  ;;  %v1213_v17 = vcombine.low %v202_v2, %v203_v3  ;;  %v111_v19 = vld [vmem:[%s2281_s1 + $0x74] sm:$0xf]  ;;  %v174_v28 = vadd.bf16 %v110_v18, %v46_v14 }
  0x2b   :  { %1441 = vmatprep.mubr.msk.bf16.mxu0 %vm409_vm0, %v1193_v10  ;;  %1473 = vmatprep.mubr.msk.bf16.mxu1 %vm409_vm0, %v1209_v11  ;;  %v140_v10 = vld [vmem:[%s2281_s1 + $0xe8] sm:$0xf]  ;;  %v1196_v11 = vcombine.low %v168_v59, %v169_v60  ;;  %v141_v13 = vld [vmem:[%s2281_s1 + $0xec] sm:$0xf]  ;;  %v78_v20 = vld [vmem:[%s2280_s0 + $0xf0] sm:$0xf]  ;;  %v172_v24 = vadd.bf16 %v108_v6, %v44_v4  ;;  %v173_v25 = vadd.bf16 %v109_v7, %v45_v5 }
  0x2c   :  { %v79_v21 = vld [vmem:[%s2280_s0 + $0xf4] sm:$0xf]  ;;  %v142_v22 = vld [vmem:[%s2281_s1 + $0xf0] sm:$0xf]  ;;  %v204_v26 = vadd.bf16 %v140_v10, %v76_v8  ;;  %v205_v27 = vadd.bf16 %v141_v13, %v77_v9  ;;  %v175_v29 = vadd.bf16 %v111_v19, %v47_v15  ;;  %v1957_v36 = vld [vmem:[%s2282_s3] ss:$0 sm:$0xff] }
  0x2d   :  { %v143_v23 = vld [vmem:[%s2281_s1 + $0xf4] sm:$0xf]  ;;  %v206_v30 = vadd.bf16 %v142_v22, %v78_v20  ;;  %v1198_v32 = vcombine.low %v172_v24, %v173_v25 }
  0x2e   :  { %v207_v31 = vadd.bf16 %v143_v23, %v79_v21  ;;  %v1214_v33 = vcombine.low %v204_v26, %v205_v27  ;;  %v1199_v34 = vcombine.low %v174_v28, %v175_v29 }
  0x30   :  { %v1215_v35 = vcombine.low %v206_v30, %v207_v31 }
  0x32   :  { %1442 = vmatmul.mubr.msk.bf16.gmra.mxu0 %vm409_vm0, %v1194_v42  ;;  %1474 = vmatmul.mubr.msk.bf16.gmra.mxu1 %vm409_vm0, %v1210_v43 }
  0x33   :  { %1445 = vmatprep.mubr.msk.bf16.mxu0 %vm409_vm0, %v1195_v48  ;;  %1477 = vmatprep.mubr.msk.bf16.mxu1 %vm409_vm0, %v1211_v49 }
  0x3a   :  { %1446 = vmatmul.mubr.msk.bf16.gmra.mxu0 %vm409_vm0, %v1196_v11  ;;  %1478 = vmatmul.mubr.msk.bf16.gmra.mxu1 %vm409_vm0, %v1212_v12 }
  0x3b   :  { %1449 = vmatprep.mubr.msk.bf16.mxu0 %vm409_vm0, %v1197_v16  ;;  %1481 = vmatprep.mubr.msk.bf16.mxu1 %vm409_vm0, %v1213_v17 }
  0x42   :  { %1450 = vmatmul.mubr.msk.bf16.gmra.mxu0 %vm409_vm0, %v1198_v32  ;;  %1482 = vmatmul.mubr.msk.bf16.gmra.mxu1 %vm409_vm0, %v1214_v33 }
  0x43   :  { %1453 = vmatprep.mubr.msk.bf16.mxu0 %vm409_vm0, %v1199_v34  ;;  %1485 = vmatprep.mubr.msk.bf16.mxu1 %vm409_vm0, %v1215_v35 }
  0x4a   :  { %1454 = vmatmul.mubr.msk.bf16.gmra.mxu0 %vm409_vm0, %v1200_v58  ;;  %1486 = vmatmul.mubr.msk.bf16.gmra.mxu1 %vm409_vm0, %v1216_v61 }
  0xd2   :  { %v1427_v37 = vpop.f32.mrf.mxu0  ;;  %v1459_v38 = vpop.f32.mrf.mxu1 }
  0xd3   :  { %v549_v39 = vadd.f32 %v1427_v37, %v1957_v36  ;;  %v677_v40 = vadd.f32 %v1459_v38, %v1957_v36 }
  0xd4   :  { %v540_v41 = vpop.f32.mrf.mxu0  ;;  %v668_v42 = vpop.f32.mrf.mxu1 }
  0xd5   :  { %v797_v43 = vmax.f32 %v549_v39, 0.0  ;;  %v829_v44 = vmax.f32 %v677_v40, 0.0  ;;  %v541_v45 = vadd.f32 %v1957_v36, %v540_v41  ;;  %v669_v46 = vadd.f32 %v1957_v36, %v668_v42 }
  0xd6   :  { %v1428_v47 = vpop.f32.mrf.mxu0  ;;  %v1460_v48 = vpop.f32.mrf.mxu1 }
  0xd7   :  { %v1319_v49 = vpack.c.bf16 %v797_v43, %v797_v43  ;;  %v1351_v50 = vpack.c.bf16 %v829_v44, %v829_v44  ;;  %v795_v51 = vmax.f32 %v541_v45, 0.0  ;;  %v827_v52 = vmax.f32 %v669_v46, 0.0 }
  0xd8   :  { %v552_v53 = vadd.f32 %v1428_v47, %v1957_v36  ;;  %v680_v54 = vadd.f32 %v1460_v48, %v1957_v36  ;;  %v543_v55 = vpop.f32.mrf.mxu0  ;;  %v671_v56 = vpop.f32.mrf.mxu1 }
  0xd9   :  { %1118 = vst.msk [vmem:[%s2283_s4 + $0x8] sm:$0xf] %vm1115_vm1, %v1319_v49  ;;  %1150 = vst.msk [vmem:[%s2283_s4 + $0x88] sm:$0xf] %vm1115_vm1, %v1351_v50  ;;  %v1317_v57 = vpack.c.bf16 %v795_v51, %v795_v51  ;;  %v1349_v58 = vpack.c.bf16 %v827_v52, %v827_v52  ;;  %v544_v59 = vadd.f32 %v1957_v36, %v543_v55 }
  0xda   :  { %v672_v60 = vadd.f32 %v1957_v36, %v671_v56  ;;  %v798_v61 = vmax.f32 %v552_v53, 0.0  ;;  %v830_v62 = vmax.f32 %v680_v54, 0.0  ;;  %v1431_v63 = vpop.f32.mrf.mxu0  ;;  %v1463_v0 = vpop.f32.mrf.mxu1 }
  0xdb   :  { %1116 = vst.msk [vmem:[%s2283_s4] sm:$0xf] %vm1115_vm1, %v1317_v57  ;;  %1148 = vst.msk [vmem:[%s2283_s4 + $0x80] sm:$0xf] %vm1115_vm1, %v1349_v58  ;;  %v796_v1 = vmax.f32 %v544_v59, 0.0  ;;  %v565_v3 = vadd.f32 %v1431_v63, %v1957_v36  ;;  %v693_v4 = vadd.f32 %v1463_v0, %v1957_v36 }
  0xdc   :  { %v828_v2 = vmax.f32 %v672_v60, 0.0  ;;  %v1320_v5 = vpack.c.bf16 %v798_v61, %v798_v61  ;;  %v1352_v6 = vpack.c.bf16 %v830_v62, %v830_v62  ;;  %v556_v7 = vpop.f32.mrf.mxu0  ;;  %v684_v8 = vpop.f32.mrf.mxu1 }
  0xdd   :  { %v1318_v9 = vpack.c.bf16 %v796_v1, %v796_v1  ;;  %v801_v11 = vmax.f32 %v565_v3, 0.0  ;;  %v833_v12 = vmax.f32 %v693_v4, 0.0  ;;  %v557_v13 = vadd.f32 %v1957_v36, %v556_v7 }
  0xde   :  { %v1350_v10 = vpack.c.bf16 %v828_v2, %v828_v2  ;;  %1119 = vst.msk [vmem:[%s2283_s4 + $0xc] sm:$0xf] %vm1115_vm1, %v1320_v5  ;;  %1151 = vst.msk [vmem:[%s2283_s4 + $0x8c] sm:$0xf] %vm1115_vm1, %v1352_v6  ;;  %v685_v14 = vadd.f32 %v1957_v36, %v684_v8  ;;  %v1432_v15 = vpop.f32.mrf.mxu0  ;;  %v1464_v16 = vpop.f32.mrf.mxu1 }
  0xdf   :  { %1117 = vst.msk [vmem:[%s2283_s4 + $0x4] sm:$0xf] %vm1115_vm1, %v1318_v9  ;;  %v1323_v17 = vpack.c.bf16 %v801_v11, %v801_v11  ;;  %v1355_v18 = vpack.c.bf16 %v833_v12, %v833_v12  ;;  %v568_v19 = vadd.f32 %v1432_v15, %v1957_v36  ;;  %v696_v20 = vadd.f32 %v1464_v16, %v1957_v36 }
  0xe0   :  { %1149 = vst.msk [vmem:[%s2283_s4 + $0x84] sm:$0xf] %vm1115_vm1, %v1350_v10  ;;  %v799_v21 = vmax.f32 %v557_v13, 0.0  ;;  %v831_v22 = vmax.f32 %v685_v14, 0.0  ;;  %v559_v23 = vpop.f32.mrf.mxu0  ;;  %v687_v24 = vpop.f32.mrf.mxu1 }
  0xe1   :  { %1122 = vst.msk [vmem:[%s2283_s4 + $0x18] sm:$0xf] %vm1115_vm1, %v1323_v17  ;;  %1154 = vst.msk [vmem:[%s2283_s4 + $0x98] sm:$0xf] %vm1115_vm1, %v1355_v18  ;;  %v802_v25 = vmax.f32 %v568_v19, 0.0  ;;  %v834_v26 = vmax.f32 %v696_v20, 0.0  ;;  %v560_v27 = vadd.f32 %v1957_v36, %v559_v23  ;;  %v688_v28 = vadd.f32 %v1957_v36, %v687_v24 }
  0xe2   :  { %v1321_v29 = vpack.c.bf16 %v799_v21, %v799_v21  ;;  %v1353_v30 = vpack.c.bf16 %v831_v22, %v831_v22  ;;  %v1435_v31 = vpop.f32.mrf.mxu0  ;;  %v1467_v32 = vpop.f32.mrf.mxu1 }
  0xe3   :  { %v1324_v33 = vpack.c.bf16 %v802_v25, %v802_v25  ;;  %v1356_v34 = vpack.c.bf16 %v834_v26, %v834_v26  ;;  %v800_v35 = vmax.f32 %v560_v27, 0.0  ;;  %v832_v37 = vmax.f32 %v688_v28, 0.0 }
  0xe4   :  { %1120 = vst.msk [vmem:[%s2283_s4 + $0x10] sm:$0xf] %vm1115_vm1, %v1321_v29  ;;  %1152 = vst.msk [vmem:[%s2283_s4 + $0x90] sm:$0xf] %vm1115_vm1, %v1353_v30  ;;  %v581_v38 = vadd.f32 %v1435_v31, %v1957_v36  ;;  %v709_v39 = vadd.f32 %v1467_v32, %v1957_v36  ;;  %v572_v40 = vpop.f32.mrf.mxu0  ;;  %v700_v41 = vpop.f32.mrf.mxu1 }
  0xe5   :  { %1123 = vst.msk [vmem:[%s2283_s4 + $0x1c] sm:$0xf] %vm1115_vm1, %v1324_v33  ;;  %1155 = vst.msk [vmem:[%s2283_s4 + $0x9c] sm:$0xf] %vm1115_vm1, %v1356_v34  ;;  %v1322_v42 = vpack.c.bf16 %v800_v35, %v800_v35  ;;  %v1354_v43 = vpack.c.bf16 %v832_v37, %v832_v37  ;;  %v573_v44 = vadd.f32 %v1957_v36, %v572_v40 }
  0xe6   :  { %v701_v45 = vadd.f32 %v1957_v36, %v700_v41  ;;  %v805_v46 = vmax.f32 %v581_v38, 0.0  ;;  %v837_v47 = vmax.f32 %v709_v39, 0.0  ;;  %v1436_v48 = vpop.f32.mrf.mxu0  ;;  %v1468_v49 = vpop.f32.mrf.mxu1 }
  0xe7   :  { %1121 = vst.msk [vmem:[%s2283_s4 + $0x14] sm:$0xf] %vm1115_vm1, %v1322_v42  ;;  %1153 = vst.msk [vmem:[%s2283_s4 + $0x94] sm:$0xf] %vm1115_vm1, %v1354_v43  ;;  %v803_v50 = vmax.f32 %v573_v44, 0.0  ;;  %v584_v52 = vadd.f32 %v1436_v48, %v1957_v36  ;;  %v712_v53 = vadd.f32 %v1468_v49, %v1957_v36 }
  0xe8   :  { %v835_v51 = vmax.f32 %v701_v45, 0.0  ;;  %v1327_v54 = vpack.c.bf16 %v805_v46, %v805_v46  ;;  %v1359_v55 = vpack.c.bf16 %v837_v47, %v837_v47  ;;  %v575_v56 = vpop.f32.mrf.mxu0  ;;  %v703_v57 = vpop.f32.mrf.mxu1 }
  0xe9   :  { %v1325_v58 = vpack.c.bf16 %v803_v50, %v803_v50  ;;  %v806_v60 = vmax.f32 %v584_v52, 0.0  ;;  %v838_v61 = vmax.f32 %v712_v53, 0.0  ;;  %v576_v62 = vadd.f32 %v1957_v36, %v575_v56 }
  0xea   :  { %v1357_v59 = vpack.c.bf16 %v835_v51, %v835_v51  ;;  %1126 = vst.msk [vmem:[%s2283_s4 + $0x28] sm:$0xf] %vm1115_vm1, %v1327_v54  ;;  %1158 = vst.msk [vmem:[%s2283_s4 + $0xa8] sm:$0xf] %vm1115_vm1, %v1359_v55  ;;  %v704_v63 = vadd.f32 %v1957_v36, %v703_v57  ;;  %v1439_v0 = vpop.f32.mrf.mxu0  ;;  %v1471_v1 = vpop.f32.mrf.mxu1 }
  0xeb   :  { %1124 = vst.msk [vmem:[%s2283_s4 + $0x20] sm:$0xf] %vm1115_vm1, %v1325_v58  ;;  %v1328_v2 = vpack.c.bf16 %v806_v60, %v806_v60  ;;  %v1360_v3 = vpack.c.bf16 %v838_v61, %v838_v61  ;;  %v597_v4 = vadd.f32 %v1439_v0, %v1957_v36  ;;  %v725_v5 = vadd.f32 %v1471_v1, %v1957_v36 }
  0xec   :  { %1156 = vst.msk [vmem:[%s2283_s4 + $0xa0] sm:$0xf] %vm1115_vm1, %v1357_v59  ;;  %v804_v6 = vmax.f32 %v576_v62, 0.0  ;;  %v836_v7 = vmax.f32 %v704_v63, 0.0  ;;  %v588_v8 = vpop.f32.mrf.mxu0  ;;  %v716_v9 = vpop.f32.mrf.mxu1 }
  0xed   :  { %1127 = vst.msk [vmem:[%s2283_s4 + $0x2c] sm:$0xf] %vm1115_vm1, %v1328_v2  ;;  %1159 = vst.msk [vmem:[%s2283_s4 + $0xac] sm:$0xf] %vm1115_vm1, %v1360_v3  ;;  %v809_v10 = vmax.f32 %v597_v4, 0.0  ;;  %v841_v11 = vmax.f32 %v725_v5, 0.0  ;;  %v589_v12 = vadd.f32 %v1957_v36, %v588_v8  ;;  %v717_v13 = vadd.f32 %v1957_v36, %v716_v9 }
  0xee   :  { %v1326_v14 = vpack.c.bf16 %v804_v6, %v804_v6  ;;  %v1358_v15 = vpack.c.bf16 %v836_v7, %v836_v7  ;;  %v1440_v16 = vpop.f32.mrf.mxu0  ;;  %v1472_v17 = vpop.f32.mrf.mxu1 }
  0xef   :  { %v1331_v18 = vpack.c.bf16 %v809_v10, %v809_v10  ;;  %v1363_v19 = vpack.c.bf16 %v841_v11, %v841_v11  ;;  %v807_v20 = vmax.f32 %v589_v12, 0.0  ;;  %v839_v21 = vmax.f32 %v717_v13, 0.0 }
  0xf0   :  { %1125 = vst.msk [vmem:[%s2283_s4 + $0x24] sm:$0xf] %vm1115_vm1, %v1326_v14  ;;  %1157 = vst.msk [vmem:[%s2283_s4 + $0xa4] sm:$0xf] %vm1115_vm1, %v1358_v15  ;;  %v600_v22 = vadd.f32 %v1440_v16, %v1957_v36  ;;  %v728_v23 = vadd.f32 %v1472_v17, %v1957_v36  ;;  %v591_v24 = vpop.f32.mrf.mxu0  ;;  %v719_v25 = vpop.f32.mrf.mxu1 }
  0xf1   :  { %1130 = vst.msk [vmem:[%s2283_s4 + $0x38] sm:$0xf] %vm1115_vm1, %v1331_v18  ;;  %1162 = vst.msk [vmem:[%s2283_s4 + $0xb8] sm:$0xf] %vm1115_vm1, %v1363_v19  ;;  %v1329_v26 = vpack.c.bf16 %v807_v20, %v807_v20  ;;  %v1361_v27 = vpack.c.bf16 %v839_v21, %v839_v21  ;;  %v592_v28 = vadd.f32 %v1957_v36, %v591_v24 }
  0xf2   :  { %v720_v29 = vadd.f32 %v1957_v36, %v719_v25  ;;  %v810_v30 = vmax.f32 %v600_v22, 0.0  ;;  %v842_v31 = vmax.f32 %v728_v23, 0.0  ;;  %v1443_v32 = vpop.f32.mrf.mxu0  ;;  %v1475_v33 = vpop.f32.mrf.mxu1 }
  0xf3   :  { %1128 = vst.msk [vmem:[%s2283_s4 + $0x30] sm:$0xf] %vm1115_vm1, %v1329_v26  ;;  %1160 = vst.msk [vmem:[%s2283_s4 + $0xb0] sm:$0xf] %vm1115_vm1, %v1361_v27  ;;  %v808_v34 = vmax.f32 %v592_v28, 0.0  ;;  %v613_v37 = vadd.f32 %v1443_v32, %v1957_v36  ;;  %v741_v38 = vadd.f32 %v1475_v33, %v1957_v36 }
  0xf4   :  { %v840_v35 = vmax.f32 %v720_v29, 0.0  ;;  %v1332_v39 = vpack.c.bf16 %v810_v30, %v810_v30  ;;  %v1364_v40 = vpack.c.bf16 %v842_v31, %v842_v31  ;;  %v604_v41 = vpop.f32.mrf.mxu0  ;;  %v732_v42 = vpop.f32.mrf.mxu1 }
  0xf5   :  { %v1330_v43 = vpack.c.bf16 %v808_v34, %v808_v34  ;;  %v813_v45 = vmax.f32 %v613_v37, 0.0  ;;  %v845_v46 = vmax.f32 %v741_v38, 0.0  ;;  %v605_v47 = vadd.f32 %v1957_v36, %v604_v41 }
  0xf6   :  { %v1362_v44 = vpack.c.bf16 %v840_v35, %v840_v35  ;;  %1131 = vst.msk [vmem:[%s2283_s4 + $0x3c] sm:$0xf] %vm1115_vm1, %v1332_v39  ;;  %1163 = vst.msk [vmem:[%s2283_s4 + $0xbc] sm:$0xf] %vm1115_vm1, %v1364_v40  ;;  %v733_v48 = vadd.f32 %v1957_v36, %v732_v42  ;;  %v1444_v49 = vpop.f32.mrf.mxu0  ;;  %v1476_v50 = vpop.f32.mrf.mxu1 }
  0xf7   :  { %1129 = vst.msk [vmem:[%s2283_s4 + $0x34] sm:$0xf] %vm1115_vm1, %v1330_v43  ;;  %v1335_v51 = vpack.c.bf16 %v813_v45, %v813_v45  ;;  %v1367_v52 = vpack.c.bf16 %v845_v46, %v845_v46  ;;  %v616_v53 = vadd.f32 %v1444_v49, %v1957_v36  ;;  %v744_v54 = vadd.f32 %v1476_v50, %v1957_v36 }
  0xf8   :  { %1161 = vst.msk [vmem:[%s2283_s4 + $0xb4] sm:$0xf] %vm1115_vm1, %v1362_v44  ;;  %v811_v55 = vmax.f32 %v605_v47, 0.0  ;;  %v843_v56 = vmax.f32 %v733_v48, 0.0  ;;  %v607_v57 = vpop.f32.mrf.mxu0  ;;  %v735_v58 = vpop.f32.mrf.mxu1 }
  0xf9   :  { %1134 = vst.msk [vmem:[%s2283_s4 + $0x48] sm:$0xf] %vm1115_vm1, %v1335_v51  ;;  %1166 = vst.msk [vmem:[%s2283_s4 + $0xc8] sm:$0xf] %vm1115_vm1, %v1367_v52  ;;  %v814_v59 = vmax.f32 %v616_v53, 0.0  ;;  %v846_v60 = vmax.f32 %v744_v54, 0.0  ;;  %v608_v61 = vadd.f32 %v1957_v36, %v607_v57  ;;  %v736_v62 = vadd.f32 %v1957_v36, %v735_v58 }
  0xfa   :  { %v1333_v63 = vpack.c.bf16 %v811_v55, %v811_v55  ;;  %v1365_v0 = vpack.c.bf16 %v843_v56, %v843_v56  ;;  %v1447_v1 = vpop.f32.mrf.mxu0  ;;  %v1479_v2 = vpop.f32.mrf.mxu1 }
  0xfb   :  { %v1336_v3 = vpack.c.bf16 %v814_v59, %v814_v59  ;;  %v1368_v4 = vpack.c.bf16 %v846_v60, %v846_v60  ;;  %v812_v5 = vmax.f32 %v608_v61, 0.0  ;;  %v844_v6 = vmax.f32 %v736_v62, 0.0 }
  0xfc   :  { %1132 = vst.msk [vmem:[%s2283_s4 + $0x40] sm:$0xf] %vm1115_vm1, %v1333_v63  ;;  %1164 = vst.msk [vmem:[%s2283_s4 + $0xc0] sm:$0xf] %vm1115_vm1, %v1365_v0  ;;  %v629_v7 = vadd.f32 %v1447_v1, %v1957_v36  ;;  %v757_v8 = vadd.f32 %v1479_v2, %v1957_v36  ;;  %v620_v9 = vpop.f32.mrf.mxu0  ;;  %v748_v10 = vpop.f32.mrf.mxu1 }
  0xfd   :  { %1135 = vst.msk [vmem:[%s2283_s4 + $0x4c] sm:$0xf] %vm1115_vm1, %v1336_v3  ;;  %1167 = vst.msk [vmem:[%s2283_s4 + $0xcc] sm:$0xf] %vm1115_vm1, %v1368_v4  ;;  %v1334_v11 = vpack.c.bf16 %v812_v5, %v812_v5  ;;  %v1366_v12 = vpack.c.bf16 %v844_v6, %v844_v6  ;;  %v621_v13 = vadd.f32 %v1957_v36, %v620_v9 }
  0xfe   :  { %v749_v14 = vadd.f32 %v1957_v36, %v748_v10  ;;  %v817_v15 = vmax.f32 %v629_v7, 0.0  ;;  %v849_v16 = vmax.f32 %v757_v8, 0.0  ;;  %v1448_v17 = vpop.f32.mrf.mxu0  ;;  %v1480_v18 = vpop.f32.mrf.mxu1 }
  0xff   :  { %1133 = vst.msk [vmem:[%s2283_s4 + $0x44] sm:$0xf] %vm1115_vm1, %v1334_v11  ;;  %1165 = vst.msk [vmem:[%s2283_s4 + $0xc4] sm:$0xf] %vm1115_vm1, %v1366_v12  ;;  %v815_v19 = vmax.f32 %v621_v13, 0.0  ;;  %v632_v21 = vadd.f32 %v1448_v17, %v1957_v36  ;;  %v760_v22 = vadd.f32 %v1480_v18, %v1957_v36 }
 0x100   :  { %v847_v20 = vmax.f32 %v749_v14, 0.0  ;;  %v1339_v23 = vpack.c.bf16 %v817_v15, %v817_v15  ;;  %v1371_v24 = vpack.c.bf16 %v849_v16, %v849_v16  ;;  %v623_v25 = vpop.f32.mrf.mxu0  ;;  %v751_v26 = vpop.f32.mrf.mxu1 }
 0x101   :  { %v1337_v27 = vpack.c.bf16 %v815_v19, %v815_v19  ;;  %v818_v29 = vmax.f32 %v632_v21, 0.0  ;;  %v850_v30 = vmax.f32 %v760_v22, 0.0  ;;  %v624_v31 = vadd.f32 %v1957_v36, %v623_v25 }
 0x102   :  { %v1369_v28 = vpack.c.bf16 %v847_v20, %v847_v20  ;;  %1138 = vst.msk [vmem:[%s2283_s4 + $0x58] sm:$0xf] %vm1115_vm1, %v1339_v23  ;;  %1170 = vst.msk [vmem:[%s2283_s4 + $0xd8] sm:$0xf] %vm1115_vm1, %v1371_v24  ;;  %v752_v32 = vadd.f32 %v1957_v36, %v751_v26  ;;  %v1451_v33 = vpop.f32.mrf.mxu0  ;;  %v1483_v34 = vpop.f32.mrf.mxu1 }
 0x103   :  { %1136 = vst.msk [vmem:[%s2283_s4 + $0x50] sm:$0xf] %vm1115_vm1, %v1337_v27  ;;  %v1340_v35 = vpack.c.bf16 %v818_v29, %v818_v29  ;;  %v1372_v37 = vpack.c.bf16 %v850_v30, %v850_v30  ;;  %v645_v38 = vadd.f32 %v1451_v33, %v1957_v36  ;;  %v773_v39 = vadd.f32 %v1483_v34, %v1957_v36 }
 0x104   :  { %1168 = vst.msk [vmem:[%s2283_s4 + $0xd0] sm:$0xf] %vm1115_vm1, %v1369_v28  ;;  %v816_v40 = vmax.f32 %v624_v31, 0.0  ;;  %v848_v41 = vmax.f32 %v752_v32, 0.0  ;;  %v636_v42 = vpop.f32.mrf.mxu0  ;;  %v764_v43 = vpop.f32.mrf.mxu1 }
 0x105   :  { %1139 = vst.msk [vmem:[%s2283_s4 + $0x5c] sm:$0xf] %vm1115_vm1, %v1340_v35  ;;  %1171 = vst.msk [vmem:[%s2283_s4 + $0xdc] sm:$0xf] %vm1115_vm1, %v1372_v37  ;;  %v821_v44 = vmax.f32 %v645_v38, 0.0  ;;  %v853_v45 = vmax.f32 %v773_v39, 0.0  ;;  %v637_v46 = vadd.f32 %v1957_v36, %v636_v42  ;;  %v765_v47 = vadd.f32 %v1957_v36, %v764_v43 }
 0x106   :  { %v1338_v48 = vpack.c.bf16 %v816_v40, %v816_v40  ;;  %v1370_v49 = vpack.c.bf16 %v848_v41, %v848_v41  ;;  %v1452_v50 = vpop.f32.mrf.mxu0  ;;  %v1484_v51 = vpop.f32.mrf.mxu1 }
 0x107   :  { %v1343_v52 = vpack.c.bf16 %v821_v44, %v821_v44  ;;  %v1375_v53 = vpack.c.bf16 %v853_v45, %v853_v45  ;;  %v819_v54 = vmax.f32 %v637_v46, 0.0  ;;  %v851_v55 = vmax.f32 %v765_v47, 0.0 }
 0x108   :  { %1137 = vst.msk [vmem:[%s2283_s4 + $0x54] sm:$0xf] %vm1115_vm1, %v1338_v48  ;;  %1169 = vst.msk [vmem:[%s2283_s4 + $0xd4] sm:$0xf] %vm1115_vm1, %v1370_v49  ;;  %v648_v56 = vadd.f32 %v1452_v50, %v1957_v36  ;;  %v776_v57 = vadd.f32 %v1484_v51, %v1957_v36  ;;  %v639_v58 = vpop.f32.mrf.mxu0  ;;  %v767_v59 = vpop.f32.mrf.mxu1 }
 0x109   :  { %1142 = vst.msk [vmem:[%s2283_s4 + $0x68] sm:$0xf] %vm1115_vm1, %v1343_v52  ;;  %1174 = vst.msk [vmem:[%s2283_s4 + $0xe8] sm:$0xf] %vm1115_vm1, %v1375_v53  ;;  %v1341_v60 = vpack.c.bf16 %v819_v54, %v819_v54  ;;  %v1373_v61 = vpack.c.bf16 %v851_v55, %v851_v55  ;;  %v640_v62 = vadd.f32 %v1957_v36, %v639_v58 }
 0x10a   :  { %v768_v63 = vadd.f32 %v1957_v36, %v767_v59  ;;  %v822_v0 = vmax.f32 %v648_v56, 0.0  ;;  %v854_v1 = vmax.f32 %v776_v57, 0.0  ;;  %v1455_v2 = vpop.f32.mrf.mxu0  ;;  %v1487_v3 = vpop.f32.mrf.mxu1 }
 0x10b   :  { %1140 = vst.msk [vmem:[%s2283_s4 + $0x60] sm:$0xf] %vm1115_vm1, %v1341_v60  ;;  %1172 = vst.msk [vmem:[%s2283_s4 + $0xe0] sm:$0xf] %vm1115_vm1, %v1373_v61  ;;  %v820_v4 = vmax.f32 %v640_v62, 0.0  ;;  %v661_v6 = vadd.f32 %v1455_v2, %v1957_v36  ;;  %v789_v7 = vadd.f32 %v1487_v3, %v1957_v36 }
 0x10c   :  { %v852_v5 = vmax.f32 %v768_v63, 0.0  ;;  %v1344_v8 = vpack.c.bf16 %v822_v0, %v822_v0  ;;  %v1376_v9 = vpack.c.bf16 %v854_v1, %v854_v1  ;;  %v652_v10 = vpop.f32.mrf.mxu0  ;;  %v780_v11 = vpop.f32.mrf.mxu1 }
 0x10d   :  { %v1342_v12 = vpack.c.bf16 %v820_v4, %v820_v4  ;;  %v825_v14 = vmax.f32 %v661_v6, 0.0  ;;  %v857_v15 = vmax.f32 %v789_v7, 0.0  ;;  %v653_v16 = vadd.f32 %v1957_v36, %v652_v10 }
 0x10e   :  { %v1374_v13 = vpack.c.bf16 %v852_v5, %v852_v5  ;;  %1143 = vst.msk [vmem:[%s2283_s4 + $0x6c] sm:$0xf] %vm1115_vm1, %v1344_v8  ;;  %1175 = vst.msk [vmem:[%s2283_s4 + $0xec] sm:$0xf] %vm1115_vm1, %v1376_v9  ;;  %v781_v17 = vadd.f32 %v1957_v36, %v780_v11  ;;  %v1456_v18 = vpop.f32.mrf.mxu0  ;;  %v1488_v19 = vpop.f32.mrf.mxu1 }
 0x10f   :  { %1141 = vst.msk [vmem:[%s2283_s4 + $0x64] sm:$0xf] %vm1115_vm1, %v1342_v12  ;;  %v1347_v20 = vpack.c.bf16 %v825_v14, %v825_v14  ;;  %v1379_v21 = vpack.c.bf16 %v857_v15, %v857_v15  ;;  %v664_v22 = vadd.f32 %v1456_v18, %v1957_v36  ;;  %v792_v23 = vadd.f32 %v1488_v19, %v1957_v36 }
 0x110   :  { %1173 = vst.msk [vmem:[%s2283_s4 + $0xe4] sm:$0xf] %vm1115_vm1, %v1374_v13  ;;  %v823_v24 = vmax.f32 %v653_v16, 0.0  ;;  %v855_v25 = vmax.f32 %v781_v17, 0.0  ;;  %v655_v26 = vpop.f32.mrf.mxu0  ;;  %v783_v27 = vpop.f32.mrf.mxu1 }
 0x111   :  { %1146 = vst.msk [vmem:[%s2283_s4 + $0x78] sm:$0xf] %vm1115_vm1, %v1347_v20  ;;  %1178 = vst.msk [vmem:[%s2283_s4 + $0xf8] sm:$0xf] %vm1115_vm1, %v1379_v21  ;;  %v826_v28 = vmax.f32 %v664_v22, 0.0  ;;  %v858_v29 = vmax.f32 %v792_v23, 0.0  ;;  %v656_v30 = vadd.f32 %v1957_v36, %v655_v26  ;;  %v784_v31 = vadd.f32 %v1957_v36, %v783_v27 }
 0x112   :  { %v1345_v32 = vpack.c.bf16 %v823_v24, %v823_v24  ;;  %v1377_v33 = vpack.c.bf16 %v855_v25, %v855_v25 }
 0x113   :  { %v1348_v34 = vpack.c.bf16 %v826_v28, %v826_v28  ;;  %v1380_v35 = vpack.c.bf16 %v858_v29, %v858_v29  ;;  %v824_v37 = vmax.f32 %v656_v30, 0.0  ;;  %v856_v38 = vmax.f32 %v784_v31, 0.0 }
 0x114   :  { %1144 = vst.msk [vmem:[%s2283_s4 + $0x70] sm:$0xf] %vm1115_vm1, %v1345_v32  ;;  %1176 = vst.msk [vmem:[%s2283_s4 + $0xf0] sm:$0xf] %vm1115_vm1, %v1377_v33 }
 0x115   :  { %1147 = vst.msk [vmem:[%s2283_s4 + $0x7c] sm:$0xf] %vm1115_vm1, %v1348_v34  ;;  %1179 = vst.msk [vmem:[%s2283_s4 + $0xfc] sm:$0xf] %vm1115_vm1, %v1380_v35  ;;  %v1346_v36 = vpack.c.bf16 %v824_v37, %v824_v37  ;;  %v1378_v39 = vpack.c.bf16 %v856_v38, %v856_v38 }
 0x117   :  { %1145 = vst.msk [vmem:[%s2283_s4 + $0x74] sm:$0xf] %vm1115_vm1, %v1346_v36  ;;  %1177 = vst.msk [vmem:[%s2283_s4 + $0xf4] sm:$0xf] %vm1115_vm1, %v1378_v39 }

// kernel: fakenet_forward.29
= control target key start
LH: loop header
LB: loop body
LE: loop exit
PB: predicated region body
PF: predicated region fallthrough
CT: control target
= control target key end

     0   :  { %s1662_s18 = smov 0   ;;  %s1895_s0 = inlined_call_operand.vmem [shape: bf16[256,64], index: 0, kind: input, shape index: {}]   ;;  %s1896_s1 = inlined_call_operand.vmem [shape: bf16[2,64,128], index: 1, kind: input, shape index: {}]   ;;  %s1897_s2 = inlined_call_operand.vmem [shape: bf16[128,64], index: 2, kind: input, shape index: {}]   ;;  %s1898_s3 = inlined_call_operand.vmem [shape: f32[1,64], index: 3, kind: input, shape index: {}]   ;;  %s1899_s4 = inlined_call_operand.vmem [shape: bf16[2,256,64], index: 4, kind: input, shape index: {}]   ;;  %s1900_s5 = inlined_call_operand.vmem [shape: bf16[2,256,64], index: 5, kind: output, shape index: {}]  }
   0x1 LB: > { %s1236_s19 = sadd.s32 4294967295, %s1630_s18   ;;  %p1240_p0 = scmp.ge.s32.totalorder %s1630_s18, 1  ;;  %s1630_s18 = sphi %s1662_s18, %s15_s18  }
   0x2   : > { %p197_p1 = scmp.lt.s32.totalorder %s1630_s18, 3 }
   0x4   : > { %p198_p2 = pnand %p1240_p0, %p197_p1 }
   0x5   : > { %p230_p3 = scmp.lt.s32.totalorder (!%p198_p2), %s1236_s19, 1 }
   0x6   : > { %201 = sbr.rel (%p198_p2) target bundleno = 499 (0x1f3), region = 40 }
   0xb   : > { %v1600_v0 = vld [vmem:[%s1895_s0] sm:$0xff]   ;;  %vm390_vm0 = vcmask 523264   ;;  %s1902_s19 = smov (!%p230_p3, %s1236_s19), 1  ;;  %v1601_v5 = vld [vmem:[%s1895_s0 + $0x8] sm:$0xff]   ;;  %v1602_v6 = vld [vmem:[%s1895_s0 + $0x10] sm:$0xff]   ;;  %vm1136_vm1 = vcmask 519168  }
   0xc   : > { %1492 = vmatprep.mubr.msk.bf16.mxu0 %vm390_vm0, %v1600_v0  ;;  %s1326_s22 = sshll.u32 %s1902_s19, 5  ;;  %v1616_v7 = vld [vmem:[%s1897_s2 + $0x38] sm:$0xff]   ;;  %v1617_v8 = vld [vmem:[%s1897_s2 + $0x30] sm:$0xff]   ;;  %v1618_v9 = vld [vmem:[%s1897_s2 + $0x28] sm:$0xff]   ;;  %s1327_s26 = sshll.u32 %s1902_s19, 7 }
   0xd   : > { %s234_s25 = scalar_lea.vmem %s1896_s1, %s1326_s22  ;;  %1572 = vmatprep.subr.bf16.mxu1 %v1616_v7  ;;  %v1603_v10 = vld [vmem:[%s1895_s0 + $0x18] sm:$0xff]   ;;  %v1604_v11 = vld [vmem:[%s1895_s0 + $0x20] sm:$0xff]   ;;  %v1605_v14 = vld [vmem:[%s1895_s0 + $0x28] sm:$0xff]   ;;  %s1768_s29 = scalar_lea.vmem %s1899_s4, %s1327_s26 }
   0xe   : > { %v1596_v1 = vld [vmem:[%s234_s25 + $0x18] sm:$0xff]   ;;  %v1597_v2 = vld [vmem:[%s234_s25 + $0x10] sm:$0xff]   ;;  %v1598_v3 = vld [vmem:[%s234_s25 + $0x8] sm:$0xff]   ;;  %1580 = vmatpush3.bf16.msra.mxu1 %v1616_v7  ;;  %s1786_s8 = scalar_lea.vmem %s1900_s5, %s1327_s26 }
   0xf   : > { %1484 = vmatprep.subr.bf16.mxu0 %v1596_v1  ;;  %v1599_v4 = vld [vmem:[%s234_s25] sm:$0xff]   ;;  %1573 = vmatprep.subr.bf16.mxu1 %v1617_v8  ;;  %v1620_v13 = vld [vmem:[%s1897_s2 + $0x18] sm:$0xff]   ;;  %v1606_v15 = vld [vmem:[%s1895_s0 + $0x30] sm:$0xff]  }
  0x10   : > { %1485 = vmatpush3.bf16.msra.mxu0 %v1596_v1  ;;  %v1619_v12 = vld [vmem:[%s1897_s2 + $0x20] sm:$0xff]   ;;  %v1621_v16 = vld [vmem:[%s1897_s2 + $0x10] sm:$0xff]   ;;  %v1607_v17 = vld [vmem:[%s1895_s0 + $0x38] sm:$0xff]  }
  0x11   : > { %1486 = vmatprep.subr.bf16.mxu0 %v1597_v2  ;;  %v1608_v18 = vld [vmem:[%s1895_s0 + $0x40] sm:$0xff]   ;;  %v1609_v19 = vld [vmem:[%s1895_s0 + $0x48] sm:$0xff]   ;;  %v1610_v20 = vld [vmem:[%s1895_s0 + $0x50] sm:$0xff]  }
  0x12   : > { %1581 = vmatpush3.bf16.msra.mxu1 %v1617_v8  ;;  %v1611_v21 = vld [vmem:[%s1895_s0 + $0x58] sm:$0xff]   ;;  %v1612_v22 = vld [vmem:[%s1895_s0 + $0x60] sm:$0xff]   ;;  %v1613_v23 = vld [vmem:[%s1895_s0 + $0x68] sm:$0xff]  }
  0x13   : > { %1574 = vmatprep.subr.bf16.mxu1 %v1618_v9  ;;  %v1614_v24 = vld [vmem:[%s1895_s0 + $0x70] sm:$0xff]   ;;  %v1615_v25 = vld [vmem:[%s1895_s0 + $0x78] sm:$0xff]   ;;  %v1622_v26 = vld [vmem:[%s1897_s2 + $0x8] sm:$0xff]  }
  0x14   : > { %1487 = vmatpush3.bf16.msra.mxu0 %v1597_v2  ;;  %v1623_v27 = vld [vmem:[%s1897_s2] sm:$0xff]  }
  0x15   : > { %1488 = vmatprep.subr.bf16.mxu0 %v1598_v3 }
  0x16   : > { %1582 = vmatpush3.bf16.msra.mxu1 %v1618_v9 }
  0x17   : > { %1575 = vmatprep.subr.bf16.mxu1 %v1619_v12 }
  0x18   : > { %1489 = vmatpush3.bf16.msra.mxu0 %v1598_v3 }
  0x19   : > { %1490 = vmatprep.subr.bf16.mxu0 %v1599_v4 }
  0x1a   : > { %1583 = vmatpush3.bf16.msra.mxu1 %v1619_v12 }
  0x1b   : > { %1576 = vmatprep.subr.bf16.mxu1 %v1620_v13 }
  0x1c   : > { %1491 = vmatpush3.bf16.msra.mxu0 %v1599_v4 }
  0x1d   : > { %1524 = vmatprep.subr.bf16.mxu0 %v1616_v7 }
  0x1e   : > { %1584 = vmatpush3.bf16.msra.mxu1 %v1620_v13 }
  0x1f   : > { %1493 = vmatmul.mubr.msk.bf16.vlgmr.msra.gmra.mxu0 %vm390_vm0, %v1601_v5  ;;  %1577 = vmatprep.subr.bf16.mxu1 %v1621_v16 }
  0x20   : > { %1496 = vmatprep.mubr.msk.bf16.mxu0 %vm390_vm0, %v1602_v6  ;;  %1525 = vmatpush3.bf16.msra.mxu0 %v1616_v7 }
  0x21   : > { %1526 = vmatprep.subr.bf16.mxu0 %v1617_v8 }
  0x22   : > { %1585 = vmatpush3.bf16.msra.mxu1 %v1621_v16 }
  0x23   : > { %1578 = vmatprep.subr.bf16.mxu1 %v1622_v26 }
  0x24   : > { %1527 = vmatpush3.bf16.msra.mxu0 %v1617_v8 }
  0x25   : > { %1528 = vmatprep.subr.bf16.mxu0 %v1618_v9 }
  0x26   : > { %1586 = vmatpush3.bf16.msra.mxu1 %v1622_v26 }
  0x27   : > { %1497 = vmatmul.mubr.msk.bf16.gmra.mxu0 %vm390_vm0, %v1603_v10  ;;  %1579 = vmatprep.subr.bf16.mxu1 %v1623_v27 }
  0x28   : > { %1500 = vmatprep.mubr.msk.bf16.mxu0 %vm390_vm0, %v1604_v11  ;;  %1529 = vmatpush3.bf16.msra.mxu0 %v1618_v9 }
  0x29   : > { %1530 = vmatprep.subr.bf16.mxu0 %v1619_v12 }
  0x2a   : > { %1587 = vmatpush3.bf16.msra.mxu1 %v1623_v27 }
  0x2c   : > { %1531 = vmatpush3.bf16.msra.mxu0 %v1619_v12  ;;  %v1773_v12 = vld [vmem:[%s1898_s3] ss:$0 sm:$0xff] }
  0x2d   : > { %1532 = vmatprep.subr.bf16.mxu0 %v1620_v13 }
  0x2f   : > { %1501 = vmatmul.mubr.msk.bf16.gmra.mxu0 %vm390_vm0, %v1605_v14 }
  0x30   : > { %1504 = vmatprep.mubr.msk.bf16.mxu0 %vm390_vm0, %v1606_v15  ;;  %1533 = vmatpush3.bf16.msra.mxu0 %v1620_v13  ;;  %v1425_v13 = vld [vmem:[%s1768_s29 + $0x8] sm:$0xff]   ;;  %v1362_v15 = vld [vmem:[%s1768_s29] sm:$0xff]  }
  0x31   : > { %1534 = vmatprep.subr.bf16.mxu0 %v1621_v16 }
  0x34   : > { %1535 = vmatpush3.bf16.msra.mxu0 %v1621_v16 }
  0x35   : > { %1536 = vmatprep.subr.bf16.mxu0 %v1622_v26 }
  0x37   : > { %1505 = vmatmul.mubr.msk.bf16.gmra.mxu0 %vm390_vm0, %v1607_v17  ;;  %v1367_v17 = vunpack.c.l.bf16 %v1425_v13 }
  0x38   : > { %1508 = vmatprep.mubr.msk.bf16.mxu0 %vm390_vm0, %v1608_v18  ;;  %1537 = vmatpush3.bf16.msra.mxu0 %v1622_v26  ;;  %v1368_v26 = vunpack.c.h.bf16 %v1425_v13 }
  0x39   : > { %1538 = vmatprep.subr.bf16.mxu0 %v1623_v27 }
  0x3c   : > { %1539 = vmatpush3.bf16.msra.mxu0 %v1623_v27 }
  0x3f   : > { %1509 = vmatmul.mubr.msk.bf16.gmra.mxu0 %vm390_vm0, %v1609_v19 }
  0x40   : > { %1512 = vmatprep.mubr.msk.bf16.mxu0 %vm390_vm0, %v1610_v20 }
  0x47   : > { %1513 = vmatmul.mubr.msk.bf16.gmra.mxu0 %vm390_vm0, %v1611_v21  ;;  %v1363_v21 = vunpack.c.l.bf16 %v1362_v15 }
  0x48   : > { %1516 = vmatprep.mubr.msk.bf16.mxu0 %vm390_vm0, %v1612_v22 }
  0x4f   : > { %1517 = vmatmul.mubr.msk.bf16.gmra.mxu0 %vm390_vm0, %v1613_v23 }
  0x50   : > { %1520 = vmatprep.mubr.msk.bf16.mxu0 %vm390_vm0, %v1614_v24 }
  0x57   : > { %1521 = vmatmul.mubr.msk.bf16.gmra.mxu0 %vm390_vm0, %v1615_v25 }
  0xdf   : > { %v1494_v28 = vpop.f32.mrf.mxu0 }
  0xe1   : > { %v473_v29 = vpop.f32.mrf.mxu0 }
  0xe3   : > { %v1495_v30 = vpop.f32.mrf.mxu0 }
  0xe4   : > { %v601_v33 = vpack.c.bf16 %v1495_v30, %v1494_v28  ;;  %v1364_v28 = vunpack.c.h.bf16 %v1362_v15 }
  0xe5   : > { %v476_v31 = vpop.f32.mrf.mxu0 }
  0xe6   : > { %v600_v32 = vpack.c.bf16 %v476_v31, %v473_v29 }
  0xe7   : > { %v1498_v34 = vpop.f32.mrf.mxu0 }
  0xe8   : > { %1540 = vmatprep.mubr.bf16.mxu0 %v600_v32 }
  0xe9   : > { %v489_v35 = vpop.f32.mrf.mxu0  ;;  %1541 = vmatmul.mubr.bf16.vlgmr.msra.gmra.mxu0 %v601_v33  ;;  %v1427_v33 = vld [vmem:[%s1768_s29 + $0x18] sm:$0xff]  }
  0xeb   : > { %v1499_v36 = vpop.f32.mrf.mxu0 }
  0xec   : > { %v603_v39 = vpack.c.bf16 %v1499_v36, %v1498_v34  ;;  %v1426_v34 = vld [vmem:[%s1768_s29 + $0x10] sm:$0xff]  }
  0xed   : > { %v492_v37 = vpop.f32.mrf.mxu0 }
  0xee   : > { %v602_v38 = vpack.c.bf16 %v492_v37, %v489_v35 }
  0xef   : > { %v1502_v40 = vpop.f32.mrf.mxu0 }
  0xf0   : > { %1544 = vmatprep.mubr.bf16.mxu1 %v602_v38 }
  0xf1   : > { %v505_v41 = vpop.f32.mrf.mxu0  ;;  %1545 = vmatmul.mubr.bf16.vlgmr.msra.gmra.mxu1 %v603_v39 }
  0xf3   : > { %v1503_v42 = vpop.f32.mrf.mxu0 }
  0xf4   : > { %v605_v45 = vpack.c.bf16 %v1503_v42, %v1502_v40 }
  0xf5   : > { %v508_v43 = vpop.f32.mrf.mxu0 }
  0xf6   : > { %v604_v44 = vpack.c.bf16 %v508_v43, %v505_v41  ;;  %v1375_v41 = vunpack.c.l.bf16 %v1427_v33  ;;  %v1371_v43 = vunpack.c.l.bf16 %v1426_v34 }
  0xf7   : > { %v1506_v46 = vpop.f32.mrf.mxu0 }
  0xf8   : > { %1548 = vmatprep.mubr.bf16.mxu1 %v604_v44 }
  0xf9   : > { %v521_v47 = vpop.f32.mrf.mxu0  ;;  %1549 = vmatmul.mubr.bf16.gmra.mxu1 %v605_v45 }
  0xfb   : > { %v1507_v48 = vpop.f32.mrf.mxu0 }
  0xfc   : > { %v607_v51 = vpack.c.bf16 %v1507_v48, %v1506_v46 }
  0xfd   : > { %v524_v49 = vpop.f32.mrf.mxu0 }
  0xfe   : > { %v606_v50 = vpack.c.bf16 %v524_v49, %v521_v47 }
  0xff   : > { %v1510_v52 = vpop.f32.mrf.mxu0 }
 0x100   : > { %1552 = vmatprep.mubr.bf16.mxu1 %v606_v50  ;;  %v1376_v50 = vunpack.c.h.bf16 %v1427_v33 }
 0x101   : > { %v537_v53 = vpop.f32.mrf.mxu0  ;;  %1553 = vmatmul.mubr.bf16.gmra.mxu1 %v607_v51 }
 0x103   : > { %v1511_v54 = vpop.f32.mrf.mxu0 }
 0x104   : > { %v609_v57 = vpack.c.bf16 %v1511_v54, %v1510_v52 }
 0x105   : > { %v540_v55 = vpop.f32.mrf.mxu0 }
 0x106   : > { %v608_v56 = vpack.c.bf16 %v540_v55, %v537_v53  ;;  %v1429_v55 = vld [vmem:[%s1768_s29 + $0x28] sm:$0xff]  }
 0x107   : > { %v1514_v58 = vpop.f32.mrf.mxu0 }
 0x108   : > { %1556 = vmatprep.mubr.bf16.mxu1 %v608_v56 }
 0x109   : > { %v553_v59 = vpop.f32.mrf.mxu0  ;;  %1557 = vmatmul.mubr.bf16.gmra.mxu1 %v609_v57 }
 0x10b   : > { %v1515_v60 = vpop.f32.mrf.mxu0 }
 0x10c   : > { %v611_v63 = vpack.c.bf16 %v1515_v60, %v1514_v58  ;;  %v1372_v58 = vunpack.c.h.bf16 %v1426_v34 }
 0x10d   : > { %v556_v61 = vpop.f32.mrf.mxu0 }
 0x10e   : > { %v610_v62 = vpack.c.bf16 %v556_v61, %v553_v59 }
 0x10f   : > { %v1518_v0 = vpop.f32.mrf.mxu0 }
 0x110   : > { %1560 = vmatprep.mubr.bf16.mxu1 %v610_v62 }
 0x111   : > { %v569_v1 = vpop.f32.mrf.mxu0  ;;  %1561 = vmatmul.mubr.bf16.gmra.mxu1 %v611_v63 }
 0x113   : > { %v1519_v2 = vpop.f32.mrf.mxu0 }
 0x114   : > { %v613_v5 = vpack.c.bf16 %v1519_v2, %v1518_v0 }
 0x115   : > { %v572_v3 = vpop.f32.mrf.mxu0 }
 0x116   : > { %v612_v4 = vpack.c.bf16 %v572_v3, %v569_v1  ;;  %v1383_v1 = vunpack.c.l.bf16 %v1429_v55 }
 0x117   : > { %v1522_v6 = vpop.f32.mrf.mxu0 }
 0x118   : > { %1564 = vmatprep.mubr.bf16.mxu1 %v612_v4 }
 0x119   : > { %v585_v7 = vpop.f32.mrf.mxu0  ;;  %1565 = vmatmul.mubr.bf16.gmra.mxu1 %v613_v5 }
 0x11b   : > { %v1523_v8 = vpop.f32.mrf.mxu0 }
 0x11c   : > { %v615_v11 = vpack.c.bf16 %v1523_v8, %v1522_v6  ;;  %v1428_v6 = vld [vmem:[%s1768_s29 + $0x20] sm:$0xff]  }
 0x11d   : > { %v588_v9 = vpop.f32.mrf.mxu0  ;;  %v1379_v15 = vunpack.c.l.bf16 %v1428_v6 }
 0x11e   : > { %v614_v10 = vpack.c.bf16 %v588_v9, %v585_v7 }
 0x120   : > { %1568 = vmatprep.mubr.bf16.mxu1 %v614_v10 }
 0x121   : > { %1569 = vmatmul.mubr.bf16.gmra.mxu1 %v615_v11 }
 0x1a9   : > { %v1542_v14 = vpop.f32.mrf.mxu0 }
 0x1aa   : > { %v730_v16 = vadd.f32 %v1542_v14, %v1773_v12 }
 0x1ab   : > { %v721_v18 = vpop.f32.mrf.mxu0 }
 0x1ac   : > { %v850_v19 = vmax.f32 %v730_v16, 0.0  ;;  %v722_v20 = vadd.f32 %v1773_v12, %v721_v18 }
 0x1ad   : > { %v1543_v22 = vpop.f32.mrf.mxu0 }
 0x1ae   : > { %v946_v23 = vmul.f32 %v1367_v17, %v850_v19  ;;  %v848_v24 = vmax.f32 %v722_v20, 0.0  ;;  %v733_v25 = vadd.f32 %v1543_v22, %v1773_v12  ;;  %v1431_v22 = vld [vmem:[%s1768_s29 + $0x38] sm:$0xff]  }
 0x1af   : > { %v724_v27 = vpop.f32.mrf.mxu0  ;;  %v1391_v33 = vunpack.c.l.bf16 %v1431_v22 }
 0x1b0   : > { %v978_v29 = vadd.f32 %v1367_v17, %v946_v23  ;;  %v944_v30 = vmul.f32 %v1363_v21, %v848_v24  ;;  %v851_v31 = vmax.f32 %v733_v25, 0.0  ;;  %v725_v32 = vadd.f32 %v1773_v12, %v724_v27 }
 0x1b1   : > { %v1546_v35 = vpop.f32.mrf.mxu1  ;;  %v1384_v17 = vunpack.c.h.bf16 %v1429_v55  ;;  %v1380_v25 = vunpack.c.h.bf16 %v1428_v6 }
 0x1b2   : > { %v1331_v36 = vpack.c.bf16 %v978_v29, %v978_v29  ;;  %v976_v37 = vadd.f32 %v1363_v21, %v944_v30  ;;  %v947_v38 = vmul.f32 %v1368_v26, %v851_v31  ;;  %v849_v39 = vmax.f32 %v725_v32, 0.0  ;;  %v1430_v30 = vld [vmem:[%s1768_s29 + $0x30] sm:$0xff]  }
 0x1b3   : > { %v746_v40 = vadd.f32 %v1546_v35, %v1773_v12  ;;  %v737_v42 = vpop.f32.mrf.mxu1  ;;  %v1388_v55 = vunpack.c.h.bf16 %v1430_v30 }
 0x1b4   : > { %1139 = vst.msk [vmem:[%s1786_s8 + $0x8] sm:$0xf] %vm1136_vm1, %v1331_v36  ;;  %v1329_v44 = vpack.c.bf16 %v976_v37, %v976_v37  ;;  %v979_v45 = vadd.f32 %v1368_v26, %v947_v38  ;;  %v945_v46 = vmul.f32 %v1364_v28, %v849_v39  ;;  %v738_v47 = vadd.f32 %v1773_v12, %v737_v42 }
 0x1b5   : > { %v854_v48 = vmax.f32 %v746_v40, 0.0  ;;  %v1547_v49 = vpop.f32.mrf.mxu1  ;;  %v1387_v40 = vunpack.c.l.bf16 %v1430_v30 }
 0x1b6   : > { %1137 = vst.msk [vmem:[%s1786_s8] sm:$0xf] %vm1136_vm1, %v1329_v44  ;;  %v1332_v51 = vpack.c.bf16 %v979_v45, %v979_v45  ;;  %v977_v52 = vadd.f32 %v1364_v28, %v945_v46  ;;  %v852_v53 = vmax.f32 %v738_v47, 0.0  ;;  %v749_v54 = vadd.f32 %v1547_v49, %v1773_v12 }
 0x1b7   : > { %v950_v56 = vmul.f32 %v1375_v41, %v854_v48  ;;  %v740_v57 = vpop.f32.mrf.mxu1 }
 0x1b8   : > { %1140 = vst.msk [vmem:[%s1786_s8 + $0xc] sm:$0xf] %vm1136_vm1, %v1332_v51  ;;  %v1330_v59 = vpack.c.bf16 %v977_v52, %v977_v52  ;;  %v948_v60 = vmul.f32 %v1371_v43, %v852_v53  ;;  %v855_v61 = vmax.f32 %v749_v54, 0.0  ;;  %v741_v62 = vadd.f32 %v1773_v12, %v740_v57  ;;  %v1433_v51 = vld [vmem:[%s1768_s29 + $0x48] sm:$0xff]  }
 0x1b9   : > { %v982_v63 = vadd.f32 %v1375_v41, %v950_v56  ;;  %v1550_v0 = vpop.f32.mrf.mxu1  ;;  %v1392_v53 = vunpack.c.h.bf16 %v1431_v22 }
 0x1ba   : > { %1138 = vst.msk [vmem:[%s1786_s8 + $0x4] sm:$0xf] %vm1136_vm1, %v1330_v59  ;;  %v980_v2 = vadd.f32 %v1371_v43, %v948_v60  ;;  %v951_v3 = vmul.f32 %v1376_v50, %v855_v61  ;;  %v853_v4 = vmax.f32 %v741_v62, 0.0  ;;  %v762_v5 = vadd.f32 %v1550_v0, %v1773_v12  ;;  %v1432_v60 = vld [vmem:[%s1768_s29 + $0x40] sm:$0xff]  }
 0x1bb   : > { %v1335_v7 = vpack.c.bf16 %v982_v63, %v982_v63  ;;  %v753_v8 = vpop.f32.mrf.mxu1  ;;  %v1399_v63 = vunpack.c.l.bf16 %v1433_v51  ;;  %v1395_v6 = vunpack.c.l.bf16 %v1432_v60 }
 0x1bc   : > { %v1333_v9 = vpack.c.bf16 %v980_v2, %v980_v2  ;;  %v983_v10 = vadd.f32 %v1376_v50, %v951_v3  ;;  %v949_v11 = vmul.f32 %v1372_v58, %v853_v4  ;;  %v858_v13 = vmax.f32 %v762_v5, 0.0 }
 0x1bd   : > { %1143 = vst.msk [vmem:[%s1786_s8 + $0x18] sm:$0xf] %vm1136_vm1, %v1335_v7  ;;  %v754_v14 = vadd.f32 %v1773_v12, %v753_v8  ;;  %v1551_v16 = vpop.f32.mrf.mxu1 }
 0x1be   : > { %1141 = vst.msk [vmem:[%s1786_s8 + $0x10] sm:$0xf] %vm1136_vm1, %v1333_v9  ;;  %v1336_v18 = vpack.c.bf16 %v983_v10, %v983_v10  ;;  %v981_v19 = vadd.f32 %v1372_v58, %v949_v11  ;;  %v954_v20 = vmul.f32 %v1383_v1, %v858_v13  ;;  %v765_v21 = vadd.f32 %v1551_v16, %v1773_v12 }
 0x1bf   : > { %v856_v23 = vmax.f32 %v754_v14, 0.0  ;;  %v756_v24 = vpop.f32.mrf.mxu1  ;;  %v1400_v14 = vunpack.c.h.bf16 %v1433_v51 }
 0x1c0   : > { %1144 = vst.msk [vmem:[%s1786_s8 + $0x1c] sm:$0xf] %vm1136_vm1, %v1336_v18  ;;  %v1334_v26 = vpack.c.bf16 %v981_v19, %v981_v19  ;;  %v986_v27 = vadd.f32 %v1383_v1, %v954_v20  ;;  %v859_v28 = vmax.f32 %v765_v21, 0.0  ;;  %v757_v29 = vadd.f32 %v1773_v12, %v756_v24  ;;  %v1435_v19 = vld [vmem:[%s1768_s29 + $0x58] sm:$0xff]  }
 0x1c1   : > { %v952_v31 = vmul.f32 %v1379_v15, %v856_v23  ;;  %v1554_v32 = vpop.f32.mrf.mxu1  ;;  %v1407_v30 = vunpack.c.l.bf16 %v1435_v19 }
 0x1c2   : > { %1142 = vst.msk [vmem:[%s1786_s8 + $0x14] sm:$0xf] %vm1136_vm1, %v1334_v26  ;;  %v1339_v34 = vpack.c.bf16 %v986_v27, %v986_v27  ;;  %v955_v35 = vmul.f32 %v1384_v17, %v859_v28  ;;  %v857_v36 = vmax.f32 %v757_v29, 0.0  ;;  %v778_v37 = vadd.f32 %v1554_v32, %v1773_v12  ;;  %v1434_v26 = vld [vmem:[%s1768_s29 + $0x50] sm:$0xff]  }
 0x1c3   : > { %v984_v38 = vadd.f32 %v1379_v15, %v952_v31  ;;  %v769_v39 = vpop.f32.mrf.mxu1  ;;  %v1396_v28 = vunpack.c.h.bf16 %v1432_v60  ;;  %v1404_v51 = vunpack.c.h.bf16 %v1434_v26 }
 0x1c4   : > { %1147 = vst.msk [vmem:[%s1786_s8 + $0x28] sm:$0xf] %vm1136_vm1, %v1339_v34  ;;  %v987_v41 = vadd.f32 %v1384_v17, %v955_v35  ;;  %v953_v42 = vmul.f32 %v1380_v25, %v857_v36  ;;  %v862_v43 = vmax.f32 %v778_v37, 0.0  ;;  %v770_v44 = vadd.f32 %v1773_v12, %v769_v39 }
 0x1c5   : > { %v1337_v45 = vpack.c.bf16 %v984_v38, %v984_v38  ;;  %v1555_v46 = vpop.f32.mrf.mxu1  ;;  %v1403_v37 = vunpack.c.l.bf16 %v1434_v26 }
 0x1c6   : > { %v1340_v47 = vpack.c.bf16 %v987_v41, %v987_v41  ;;  %v985_v48 = vadd.f32 %v1380_v25, %v953_v42  ;;  %v958_v49 = vmul.f32 %v1391_v33, %v862_v43  ;;  %v860_v50 = vmax.f32 %v770_v44, 0.0 }
 0x1c7   : > { %1145 = vst.msk [vmem:[%s1786_s8 + $0x20] sm:$0xf] %vm1136_vm1, %v1337_v45  ;;  %v781_v52 = vadd.f32 %v1555_v46, %v1773_v12  ;;  %v772_v54 = vpop.f32.mrf.mxu1  ;;  %v1408_v44 = vunpack.c.h.bf16 %v1435_v19 }
 0x1c8   : > { %1148 = vst.msk [vmem:[%s1786_s8 + $0x2c] sm:$0xf] %vm1136_vm1, %v1340_v47  ;;  %v1338_v56 = vpack.c.bf16 %v985_v48, %v985_v48  ;;  %v990_v57 = vadd.f32 %v1391_v33, %v958_v49  ;;  %v956_v58 = vmul.f32 %v1387_v40, %v860_v50  ;;  %v773_v59 = vadd.f32 %v1773_v12, %v772_v54 }
 0x1c9   : > { %v863_v61 = vmax.f32 %v781_v52, 0.0  ;;  %v1558_v62 = vpop.f32.mrf.mxu1 }
 0x1ca   : > { %1146 = vst.msk [vmem:[%s1786_s8 + $0x24] sm:$0xf] %vm1136_vm1, %v1338_v56  ;;  %v1343_v0 = vpack.c.bf16 %v990_v57, %v990_v57  ;;  %v988_v1 = vadd.f32 %v1387_v40, %v956_v58  ;;  %v861_v2 = vmax.f32 %v773_v59, 0.0  ;;  %v794_v3 = vadd.f32 %v1558_v62, %v1773_v12  ;;  %v1437_v56 = vld [vmem:[%s1768_s29 + $0x68] sm:$0xff]   ;;  %v1436_v57 = vld [vmem:[%s1768_s29 + $0x60] sm:$0xff]  }
 0x1cb   : > { %v959_v4 = vmul.f32 %v1392_v53, %v863_v61  ;;  %v785_v5 = vpop.f32.mrf.mxu1  ;;  %v1412_v19 = vunpack.c.h.bf16 %v1436_v57 }
 0x1cc   : > { %1151 = vst.msk [vmem:[%s1786_s8 + $0x38] sm:$0xf] %vm1136_vm1, %v1343_v0  ;;  %v1341_v7 = vpack.c.bf16 %v988_v1, %v988_v1  ;;  %v957_v8 = vmul.f32 %v1388_v55, %v861_v2  ;;  %v866_v9 = vmax.f32 %v794_v3, 0.0  ;;  %v786_v10 = vadd.f32 %v1773_v12, %v785_v5 }
 0x1cd   : > { %v991_v11 = vadd.f32 %v1392_v53, %v959_v4  ;;  %v1559_v13 = vpop.f32.mrf.mxu1  ;;  %v1415_v1 = vunpack.c.l.bf16 %v1437_v56  ;;  %v1411_v3 = vunpack.c.l.bf16 %v1436_v57 }
 0x1ce   : > { %1149 = vst.msk [vmem:[%s1786_s8 + $0x30] sm:$0xf] %vm1136_vm1, %v1341_v7  ;;  %v989_v15 = vadd.f32 %v1388_v55, %v957_v8  ;;  %v962_v16 = vmul.f32 %v1399_v63, %v866_v9  ;;  %v864_v17 = vmax.f32 %v786_v10, 0.0  ;;  %v797_v18 = vadd.f32 %v1559_v13, %v1773_v12 }
 0x1cf   : > { %v1344_v20 = vpack.c.bf16 %v991_v11, %v991_v11  ;;  %v788_v21 = vpop.f32.mrf.mxu1  ;;  %v1416_v10 = vunpack.c.h.bf16 %v1437_v56 }
 0x1d0   : > { %v1342_v22 = vpack.c.bf16 %v989_v15, %v989_v15  ;;  %v994_v23 = vadd.f32 %v1399_v63, %v962_v16  ;;  %v960_v24 = vmul.f32 %v1395_v6, %v864_v17  ;;  %v867_v25 = vmax.f32 %v797_v18, 0.0  ;;  %v1439_v16 = vld [vmem:[%s1768_s29 + $0x78] sm:$0xff]  }
 0x1d1   : > { %1152 = vst.msk [vmem:[%s1786_s8 + $0x3c] sm:$0xf] %vm1136_vm1, %v1344_v20  ;;  %v789_v27 = vadd.f32 %v1773_v12, %v788_v21  ;;  %v1562_v29 = vpop.f32.mrf.mxu1  ;;  %v1423_v26 = vunpack.c.l.bf16 %v1439_v16 }
 0x1d2   : > { %1150 = vst.msk [vmem:[%s1786_s8 + $0x34] sm:$0xf] %vm1136_vm1, %v1342_v22  ;;  %v1347_v31 = vpack.c.bf16 %v994_v23, %v994_v23  ;;  %v992_v32 = vadd.f32 %v1395_v6, %v960_v24  ;;  %v963_v33 = vmul.f32 %v1400_v14, %v867_v25  ;;  %v810_v34 = vadd.f32 %v1562_v29, %v1773_v12 }
 0x1d3   : > { %v865_v35 = vmax.f32 %v789_v27, 0.0  ;;  %v801_v36 = vpop.f32.mrf.mxu1 }
 0x1d4   : > { %1155 = vst.msk [vmem:[%s1786_s8 + $0x48] sm:$0xf] %vm1136_vm1, %v1347_v31  ;;  %v1345_v38 = vpack.c.bf16 %v992_v32, %v992_v32  ;;  %v995_v39 = vadd.f32 %v1400_v14, %v963_v33  ;;  %v870_v40 = vmax.f32 %v810_v34, 0.0  ;;  %v802_v41 = vadd.f32 %v1773_v12, %v801_v36  ;;  %v1438_v31 = vld [vmem:[%s1768_s29 + $0x70] sm:$0xff]  }
 0x1d5   : > { %v961_v42 = vmul.f32 %v1396_v28, %v865_v35  ;;  %v1563_v43 = vpop.f32.mrf.mxu1 }
 0x1d6   : > { %1153 = vst.msk [vmem:[%s1786_s8 + $0x40] sm:$0xf] %vm1136_vm1, %v1345_v38  ;;  %v1348_v45 = vpack.c.bf16 %v995_v39, %v995_v39  ;;  %v966_v46 = vmul.f32 %v1407_v30, %v870_v40  ;;  %v868_v47 = vmax.f32 %v802_v41, 0.0  ;;  %v813_v48 = vadd.f32 %v1563_v43, %v1773_v12 }
 0x1d7   : > { %v993_v49 = vadd.f32 %v1396_v28, %v961_v42  ;;  %v804_v50 = vpop.f32.mrf.mxu1  ;;  %v1419_v39 = vunpack.c.l.bf16 %v1438_v31  ;;  %v1424_v41 = vunpack.c.h.bf16 %v1439_v16 }
 0x1d8   : > { %1156 = vst.msk [vmem:[%s1786_s8 + $0x4c] sm:$0xf] %vm1136_vm1, %v1348_v45  ;;  %v998_v52 = vadd.f32 %v1407_v30, %v966_v46  ;;  %v964_v53 = vmul.f32 %v1403_v37, %v868_v47  ;;  %v871_v54 = vmax.f32 %v813_v48, 0.0  ;;  %v805_v55 = vadd.f32 %v1773_v12, %v804_v50 }
 0x1d9   : > { %v1346_v58 = vpack.c.bf16 %v993_v49, %v993_v49  ;;  %v1566_v59 = vpop.f32.mrf.mxu1  ;;  %v1420_v48 = vunpack.c.h.bf16 %v1438_v31 }
 0x1da   : > { %v1351_v60 = vpack.c.bf16 %v998_v52, %v998_v52  ;;  %v996_v61 = vadd.f32 %v1403_v37, %v964_v53  ;;  %v967_v62 = vmul.f32 %v1408_v44, %v871_v54  ;;  %v869_v63 = vmax.f32 %v805_v55, 0.0 }
 0x1db   : > { %1154 = vst.msk [vmem:[%s1786_s8 + $0x44] sm:$0xf] %vm1136_vm1, %v1346_v58  ;;  %v826_v0 = vadd.f32 %v1566_v59, %v1773_v12  ;;  %v817_v2 = vpop.f32.mrf.mxu1 }
 0x1dc   : > { %1159 = vst.msk [vmem:[%s1786_s8 + $0x58] sm:$0xf] %vm1136_vm1, %v1351_v60  ;;  %v1349_v4 = vpack.c.bf16 %v996_v61, %v996_v61  ;;  %v999_v5 = vadd.f32 %v1408_v44, %v967_v62  ;;  %v965_v6 = vmul.f32 %v1404_v51, %v869_v63  ;;  %v818_v7 = vadd.f32 %v1773_v12, %v817_v2 }
 0x1dd   : > { %v874_v8 = vmax.f32 %v826_v0, 0.0  ;;  %v1567_v9 = vpop.f32.mrf.mxu1 }
 0x1de   : > { %1157 = vst.msk [vmem:[%s1786_s8 + $0x50] sm:$0xf] %vm1136_vm1, %v1349_v4  ;;  %v1352_v11 = vpack.c.bf16 %v999_v5, %v999_v5  ;;  %v997_v13 = vadd.f32 %v1404_v51, %v965_v6  ;;  %v872_v14 = vmax.f32 %v818_v7, 0.0  ;;  %v829_v15 = vadd.f32 %v1567_v9, %v1773_v12 }
 0x1df   : > { %v970_v17 = vmul.f32 %v1415_v1, %v874_v8  ;;  %v820_v18 = vpop.f32.mrf.mxu1 }
 0x1e0   : > { %1160 = vst.msk [vmem:[%s1786_s8 + $0x5c] sm:$0xf] %vm1136_vm1, %v1352_v11  ;;  %v1350_v20 = vpack.c.bf16 %v997_v13, %v997_v13  ;;  %v968_v21 = vmul.f32 %v1411_v3, %v872_v14  ;;  %v875_v22 = vmax.f32 %v829_v15, 0.0  ;;  %v821_v23 = vadd.f32 %v1773_v12, %v820_v18 }
 0x1e1   : > { %v1002_v24 = vadd.f32 %v1415_v1, %v970_v17  ;;  %v1570_v25 = vpop.f32.mrf.mxu1 }
 0x1e2   : > { %1158 = vst.msk [vmem:[%s1786_s8 + $0x54] sm:$0xf] %vm1136_vm1, %v1350_v20  ;;  %v1000_v27 = vadd.f32 %v1411_v3, %v968_v21  ;;  %v971_v28 = vmul.f32 %v1416_v10, %v875_v22  ;;  %v873_v29 = vmax.f32 %v821_v23, 0.0  ;;  %v842_v30 = vadd.f32 %v1570_v25, %v1773_v12 }
 0x1e3   : > { %v1355_v32 = vpack.c.bf16 %v1002_v24, %v1002_v24  ;;  %v833_v33 = vpop.f32.mrf.mxu1 }
 0x1e4   : > { %v1353_v34 = vpack.c.bf16 %v1000_v27, %v1000_v27  ;;  %v1003_v35 = vadd.f32 %v1416_v10, %v971_v28  ;;  %v969_v36 = vmul.f32 %v1412_v19, %v873_v29  ;;  %v878_v37 = vmax.f32 %v842_v30, 0.0 }
 0x1e5   : > { %1163 = vst.msk [vmem:[%s1786_s8 + $0x68] sm:$0xf] %vm1136_vm1, %v1355_v32  ;;  %v834_v38 = vadd.f32 %v1773_v12, %v833_v33  ;;  %v1571_v40 = vpop.f32.mrf.mxu1 }
 0x1e6   : > { %1161 = vst.msk [vmem:[%s1786_s8 + $0x60] sm:$0xf] %vm1136_vm1, %v1353_v34  ;;  %v1356_v42 = vpack.c.bf16 %v1003_v35, %v1003_v35  ;;  %v1001_v43 = vadd.f32 %v1412_v19, %v969_v36  ;;  %v974_v44 = vmul.f32 %v1423_v26, %v878_v37  ;;  %v845_v45 = vadd.f32 %v1571_v40, %v1773_v12 }
 0x1e7   : > { %v876_v46 = vmax.f32 %v834_v38, 0.0  ;;  %v836_v47 = vpop.f32.mrf.mxu1 }
 0x1e8   : > { %1164 = vst.msk [vmem:[%s1786_s8 + $0x6c] sm:$0xf] %vm1136_vm1, %v1356_v42  ;;  %v1354_v49 = vpack.c.bf16 %v1001_v43, %v1001_v43  ;;  %v1006_v50 = vadd.f32 %v1423_v26, %v974_v44  ;;  %v879_v51 = vmax.f32 %v845_v45, 0.0  ;;  %v837_v52 = vadd.f32 %v1773_v12, %v836_v47 }
 0x1e9   : > { %v972_v53 = vmul.f32 %v1419_v39, %v876_v46 }
 0x1ea   : > { %1162 = vst.msk [vmem:[%s1786_s8 + $0x64] sm:$0xf] %vm1136_vm1, %v1354_v49  ;;  %v1359_v54 = vpack.c.bf16 %v1006_v50, %v1006_v50  ;;  %v975_v55 = vmul.f32 %v1424_v41, %v879_v51  ;;  %v877_v56 = vmax.f32 %v837_v52, 0.0 }
 0x1eb   : > { %v1004_v57 = vadd.f32 %v1419_v39, %v972_v53 }
 0x1ec   : > { %1167 = vst.msk [vmem:[%s1786_s8 + $0x78] sm:$0xf] %vm1136_vm1, %v1359_v54  ;;  %v1007_v58 = vadd.f32 %v1424_v41, %v975_v55  ;;  %v973_v59 = vmul.f32 %v1420_v48, %v877_v56 }
 0x1ed   : > { %v1357_v60 = vpack.c.bf16 %v1004_v57, %v1004_v57 }
 0x1ee   : > { %v1360_v61 = vpack.c.bf16 %v1007_v58, %v1007_v58  ;;  %v1005_v62 = vadd.f32 %v1420_v48, %v973_v59 }
 0x1ef   : > { %1165 = vst.msk [vmem:[%s1786_s8 + $0x70] sm:$0xf] %vm1136_vm1, %v1357_v60 }
 0x1f0   : > { %1168 = vst.msk [vmem:[%s1786_s8 + $0x7c] sm:$0xf] %vm1136_vm1, %v1360_v61  ;;  %v1358_v12 = vpack.c.bf16 %v1005_v62, %v1005_v62 }
 0x1f2   : > { %1166 = vst.msk [vmem:[%s1786_s8 + $0x74] sm:$0xf] %vm1136_vm1, %v1358_v12 }
 0x1f3 PF: > { %s15_s18 = sadd.s32 1, %s1630_s18  }
 0x1f4   : > { %p12_p4 = scmp.ge.s32.totalorder %s15_s18, 4  }
 0x1f6   :  { %14 = sbr.rel (!%p12_p4) target bundleno = 1 (0x1), region = 73 }

// kernel: fakenet_forward.33
= control target key start
LH: loop header
LB: loop body
LE: loop exit
PB: predicated region body
PF: predicated region fallthrough
CT: control target
= control target key end

     0   :  { %s3147_s15 = smov 0   ;;  %s4055_s0 = inlined_call_operand.vmem [shape: bf16[2,16,1024], index: 0, kind: input, shape index: {}]   ;;  %s4056_s1 = inlined_call_operand.vmem [shape: bf16[1024,512], index: 1, kind: input, shape index: {}]   ;;  %s4057_s2 = inlined_call_operand.vmem [shape: bf16[64,16], index: 2, kind: input, shape index: {}]   ;;  %s4058_s3 = inlined_call_operand.vmem [shape: f32[1,512], index: 3, kind: input, shape index: {}]   ;;  %s4059_s4 = inlined_call_operand.vmem [shape: f32[2,64,512], index: 4, kind: output, shape index: {}]  }
   0x1 LB: > { %s2427_s16 = sadd.s32 4294967295, %s3119_s15   ;;  %p2431_p0 = scmp.ge.s32.totalorder %s3119_s15, 1  ;;  %s3119_s15 = sphi %s3147_s15, %s14_s15  }
   0x2   : > { %p162_p1 = scmp.lt.s32.totalorder %s3119_s15, 3 }
   0x4   : > { %p163_p2 = pnand %p2431_p0, %p162_p1 }
   0x5   : > { %p188_p3 = scmp.lt.s32.totalorder (!%p163_p2), %s2427_s16, 1 }
   0x6   : > { %166 = sbr.rel (%p163_p2) target bundleno = 703 (0x2bf), region = 36 }
   0xb   : > { %v2725_v0 = vld [vmem:[%s4056_s1 + $0xe4] ss:$16 sps:$4 sm:$0xff]   ;;  %v2729_v2 = vld [vmem:[%s4056_s1 + $0xe0] ss:$16 sps:$4 sm:$0xff]   ;;  %s4061_s16 = smov (!%p188_p3, %s2427_s16), 1  ;;  %vm2181_vm0 = vcmask 130048  }
   0xc   : > { %v2727_v1 = vld [vmem:[%s4056_s1 + $0x2e4] ss:$16 sps:$4 sm:$0xff]   ;;  %1783 = vmatprep.subr.bf16.mxu0 %v2725_v0  ;;  %v2730_v3 = vld [vmem:[%s4056_s1 + $0x2e0] ss:$16 sps:$4 sm:$0xff]   ;;  %s2714_s27 = sshll.u32 %s4061_s16, 6  ;;  %s2715_s19 = sshll.u32 %s4061_s16, 8 }
   0xd   : > { %1826 = vmatprep.subr.bf16.mxu1 %v2727_v1  ;;  %v2731_v4 = vld [vmem:[%s4056_s1 + $0xc4] ss:$16 sps:$4 sm:$0xff]   ;;  %1784 = vmatpush1.bf16.msra.mxu0 %v2729_v2  ;;  %v2735_v6 = vld [vmem:[%s4056_s1 + $0xc0] ss:$16 sps:$4 sm:$0xff]   ;;  %s3297_s10 = scalar_lea.vmem %s4055_s0, %s2714_s27  ;;  %s4018_s21 = scalar_lea.vmem %s4059_s4, %s2715_s19 }
   0xe   : > { %1827 = vmatpush1.bf16.msra.mxu1 %v2730_v3  ;;  %v2733_v5 = vld [vmem:[%s4056_s1 + $0x2c4] ss:$16 sps:$4 sm:$0xff]   ;;  %1785 = vmatprep.subr.bf16.mxu0 %v2731_v4  ;;  %v2736_v7 = vld [vmem:[%s4056_s1 + $0x2c0] ss:$16 sps:$4 sm:$0xff]   ;;  %v200_v50 = vld [vmem:[%s3297_s10 + $0x8] sm:$0xff] }
   0xf   : > { %1828 = vmatprep.subr.bf16.mxu1 %v2733_v5  ;;  %v2737_v8 = vld [vmem:[%s4056_s1 + $0xa4] ss:$16 sps:$4 sm:$0xff]   ;;  %v2741_v10 = vld [vmem:[%s4056_s1 + $0xa0] ss:$16 sps:$4 sm:$0xff]   ;;  %v204_v51 = vld [vmem:[%s3297_s10 + $0x28] sm:$0xff] }
  0x10   : > { %v2739_v9 = vld [vmem:[%s4056_s1 + $0x2a4] ss:$16 sps:$4 sm:$0xff]   ;;  %v2742_v11 = vld [vmem:[%s4056_s1 + $0x2a0] ss:$16 sps:$4 sm:$0xff]   ;;  %v3323_v55 = vcombine.high %v200_v50, %v204_v51 }
  0x11   : > { %1786 = vmatpush1.bf16.msra.mxu0 %v2735_v6  ;;  %v2743_v12 = vld [vmem:[%s4056_s1 + $0x84] ss:$16 sps:$4 sm:$0xff]   ;;  %v2747_v14 = vld [vmem:[%s4056_s1 + $0x80] ss:$16 sps:$4 sm:$0xff]  }
  0x12   : > { %1829 = vmatpush1.bf16.msra.mxu1 %v2736_v7  ;;  %1787 = vmatprep.subr.bf16.mxu0 %v2737_v8  ;;  %v2745_v13 = vld [vmem:[%s4056_s1 + $0x284] ss:$16 sps:$4 sm:$0xff]   ;;  %v2748_v15 = vld [vmem:[%s4056_s1 + $0x280] ss:$16 sps:$4 sm:$0xff]  }
  0x13   : > { %1830 = vmatprep.subr.bf16.mxu1 %v2739_v9  ;;  %v2749_v16 = vld [vmem:[%s4056_s1 + $0x64] ss:$16 sps:$4 sm:$0xff]   ;;  %v2753_v18 = vld [vmem:[%s4056_s1 + $0x60] ss:$16 sps:$4 sm:$0xff]   ;;  %1858 = vmatprep.mubr.bf16.mxu1 %v3323_v55  ;;  %v3377_v9 = vcombine.low %v200_v50, %v204_v51 }
  0x14   : > { %v2751_v17 = vld [vmem:[%s4056_s1 + $0x264] ss:$16 sps:$4 sm:$0xff]   ;;  %v2754_v19 = vld [vmem:[%s4056_s1 + $0x260] ss:$16 sps:$4 sm:$0xff]  }
  0x15   : > { %1788 = vmatpush1.bf16.msra.mxu0 %v2741_v10  ;;  %v2755_v20 = vld [vmem:[%s4056_s1 + $0x44] ss:$16 sps:$4 sm:$0xff]   ;;  %v2759_v22 = vld [vmem:[%s4056_s1 + $0x40] ss:$16 sps:$4 sm:$0xff]  }
  0x16   : > { %1831 = vmatpush1.bf16.msra.mxu1 %v2742_v11  ;;  %1789 = vmatprep.subr.bf16.mxu0 %v2743_v12  ;;  %v2757_v21 = vld [vmem:[%s4056_s1 + $0x244] ss:$16 sps:$4 sm:$0xff]   ;;  %v2760_v23 = vld [vmem:[%s4056_s1 + $0x240] ss:$16 sps:$4 sm:$0xff]  }
  0x17   : > { %1832 = vmatprep.subr.bf16.mxu1 %v2745_v13  ;;  %v2761_v24 = vld [vmem:[%s4056_s1 + $0x24] ss:$16 sps:$4 sm:$0xff]   ;;  %v2765_v26 = vld [vmem:[%s4056_s1 + $0x20] ss:$16 sps:$4 sm:$0xff]  }
  0x18   : > { %v2763_v25 = vld [vmem:[%s4056_s1 + $0x224] ss:$16 sps:$4 sm:$0xff]   ;;  %v2766_v27 = vld [vmem:[%s4056_s1 + $0x220] ss:$16 sps:$4 sm:$0xff]  }
  0x19   : > { %1790 = vmatpush1.bf16.msra.mxu0 %v2747_v14  ;;  %v2767_v28 = vld [vmem:[%s4056_s1 + $0x4] ss:$16 sps:$4 sm:$0xff]   ;;  %v2771_v30 = vld [vmem:[%s4056_s1] ss:$16 sps:$4 sm:$0xff]  }
  0x1a   : > { %1833 = vmatpush1.bf16.msra.mxu1 %v2748_v15  ;;  %1791 = vmatprep.subr.bf16.mxu0 %v2749_v16  ;;  %v2769_v29 = vld [vmem:[%s4056_s1 + $0x204] ss:$16 sps:$4 sm:$0xff]   ;;  %v2772_v31 = vld [vmem:[%s4056_s1 + $0x200] ss:$16 sps:$4 sm:$0xff]  }
  0x1b   : > { %1834 = vmatprep.subr.bf16.mxu1 %v2751_v17  ;;  %v2773_v32 = vld [vmem:[%s4056_s1 + $0x1e4] ss:$16 sps:$4 sm:$0xff]   ;;  %v2777_v34 = vld [vmem:[%s4056_s1 + $0x1e0] ss:$16 sps:$4 sm:$0xff]  }
  0x1c   : > { %v2775_v33 = vld [vmem:[%s4056_s1 + $0x3e4] ss:$16 sps:$4 sm:$0xff]   ;;  %v2778_v35 = vld [vmem:[%s4056_s1 + $0x3e0] ss:$16 sps:$4 sm:$0xff]  }
  0x1d   : > { %1792 = vmatpush1.bf16.msra.mxu0 %v2753_v18  ;;  %v2779_v36 = vld [vmem:[%s4056_s1 + $0x1c4] ss:$16 sps:$4 sm:$0xff]   ;;  %v2783_v38 = vld [vmem:[%s4056_s1 + $0x1c0] ss:$16 sps:$4 sm:$0xff]  }
  0x1e   : > { %1835 = vmatpush1.bf16.msra.mxu1 %v2754_v19  ;;  %1793 = vmatprep.subr.bf16.mxu0 %v2755_v20  ;;  %v2781_v37 = vld [vmem:[%s4056_s1 + $0x3c4] ss:$16 sps:$4 sm:$0xff]   ;;  %v2784_v39 = vld [vmem:[%s4056_s1 + $0x3c0] ss:$16 sps:$4 sm:$0xff]  }
  0x1f   : > { %1836 = vmatprep.subr.bf16.mxu1 %v2757_v21  ;;  %v2785_v40 = vld [vmem:[%s4056_s1 + $0x1a4] ss:$16 sps:$4 sm:$0xff]   ;;  %v2789_v42 = vld [vmem:[%s4056_s1 + $0x1a0] ss:$16 sps:$4 sm:$0xff]  }
  0x20   : > { %v2787_v41 = vld [vmem:[%s4056_s1 + $0x3a4] ss:$16 sps:$4 sm:$0xff]   ;;  %v2790_v43 = vld [vmem:[%s4056_s1 + $0x3a0] ss:$16 sps:$4 sm:$0xff]  }
  0x21   : > { %1794 = vmatpush1.bf16.msra.mxu0 %v2759_v22  ;;  %v2791_v44 = vld [vmem:[%s4056_s1 + $0x184] ss:$16 sps:$4 sm:$0xff]   ;;  %v2795_v46 = vld [vmem:[%s4056_s1 + $0x180] ss:$16 sps:$4 sm:$0xff]  }
  0x22   : > { %1837 = vmatpush1.bf16.msra.mxu1 %v2760_v23  ;;  %1795 = vmatprep.subr.bf16.mxu0 %v2761_v24  ;;  %v2793_v45 = vld [vmem:[%s4056_s1 + $0x384] ss:$16 sps:$4 sm:$0xff]   ;;  %v2796_v47 = vld [vmem:[%s4056_s1 + $0x380] ss:$16 sps:$4 sm:$0xff]  }
  0x23   : > { %1838 = vmatprep.subr.bf16.mxu1 %v2763_v25  ;;  %v199_v48 = vld [vmem:[%s3297_s10] sm:$0xff] }
  0x24   : > { %v203_v49 = vld [vmem:[%s3297_s10 + $0x20] sm:$0xff] }
  0x25   : > { %1796 = vmatpush1.bf16.msra.mxu0 %v2765_v26  ;;  %v2797_v52 = vld [vmem:[%s4056_s1 + $0x164] ss:$16 sps:$4 sm:$0xff]   ;;  %v3318_v53 = vcombine.high %v199_v48, %v203_v49  ;;  %v2801_v56 = vld [vmem:[%s4056_s1 + $0x160] ss:$16 sps:$4 sm:$0xff]   ;;  %v3375_v8 = vcombine.low %v199_v48, %v203_v49 }
  0x26   : > { %1839 = vmatpush1.bf16.msra.mxu1 %v2766_v27  ;;  %1797 = vmatprep.subr.bf16.mxu0 %v2767_v28  ;;  %v2799_v54 = vld [vmem:[%s4056_s1 + $0x364] ss:$16 sps:$4 sm:$0xff]   ;;  %v2802_v57 = vld [vmem:[%s4056_s1 + $0x360] ss:$16 sps:$4 sm:$0xff]  }
  0x27   : > { %1840 = vmatprep.subr.bf16.mxu1 %v2769_v29  ;;  %1815 = vmatprep.mubr.bf16.mxu0 %v3318_v53  ;;  %v2803_v58 = vld [vmem:[%s4056_s1 + $0x144] ss:$16 sps:$4 sm:$0xff]   ;;  %v2807_v60 = vld [vmem:[%s4056_s1 + $0x140] ss:$16 sps:$4 sm:$0xff]  }
  0x28   : > { %v2805_v59 = vld [vmem:[%s4056_s1 + $0x344] ss:$16 sps:$4 sm:$0xff]   ;;  %v2808_v61 = vld [vmem:[%s4056_s1 + $0x340] ss:$16 sps:$4 sm:$0xff]  }
  0x29   : > { %1798 = vmatpush1.bf16.msra.mxu0 %v2771_v30  ;;  %v2809_v62 = vld [vmem:[%s4056_s1 + $0x124] ss:$16 sps:$4 sm:$0xff]   ;;  %v2813_v0 = vld [vmem:[%s4056_s1 + $0x120] ss:$16 sps:$4 sm:$0xff]  }
  0x2a   : > { %1841 = vmatpush1.bf16.msra.mxu1 %v2772_v31  ;;  %1799 = vmatprep.subr.bf16.mxu0 %v2773_v32  ;;  %v2811_v63 = vld [vmem:[%s4056_s1 + $0x324] ss:$16 sps:$4 sm:$0xff]   ;;  %v2814_v1 = vld [vmem:[%s4056_s1 + $0x320] ss:$16 sps:$4 sm:$0xff]  }
  0x2b   : > { %1842 = vmatprep.subr.bf16.mxu1 %v2775_v33  ;;  %v2815_v2 = vld [vmem:[%s4056_s1 + $0x104] ss:$16 sps:$4 sm:$0xff]   ;;  %v2819_v4 = vld [vmem:[%s4056_s1 + $0x100] ss:$16 sps:$4 sm:$0xff]  }
  0x2c   : > { %v2817_v3 = vld [vmem:[%s4056_s1 + $0x304] ss:$16 sps:$4 sm:$0xff]   ;;  %v2820_v5 = vld [vmem:[%s4056_s1 + $0x300] ss:$16 sps:$4 sm:$0xff]  }
  0x2d   : > { %1800 = vmatpush2.bf16.msra.mxu0 %v2777_v34  ;;  %v2823_v6 = vld [vmem:[%s4056_s1 + $0x4e4] ss:$16 sps:$4 sm:$0xff]   ;;  %v2821_v10 = vld [vmem:[%s4056_s1 + $0x4e0] ss:$16 sps:$4 sm:$0xff]  }
  0x2e   : > { %1843 = vmatpush2.bf16.msra.mxu1 %v2778_v35  ;;  %1801 = vmatprep.subr.bf16.mxu0 %v2779_v36  ;;  %v2826_v7 = vld [vmem:[%s4056_s1 + $0x6e4] ss:$16 sps:$4 sm:$0xff]   ;;  %v2824_v11 = vld [vmem:[%s4056_s1 + $0x6e0] ss:$16 sps:$4 sm:$0xff]  }
  0x2f   : > { %1844 = vmatprep.subr.bf16.mxu1 %v2781_v37  ;;  %v2829_v12 = vld [vmem:[%s4056_s1 + $0x4c4] ss:$16 sps:$4 sm:$0xff]   ;;  %v2827_v14 = vld [vmem:[%s4056_s1 + $0x4c0] ss:$16 sps:$4 sm:$0xff]  }
  0x30   : > { %v2832_v13 = vld [vmem:[%s4056_s1 + $0x6c4] ss:$16 sps:$4 sm:$0xff]   ;;  %v2830_v15 = vld [vmem:[%s4056_s1 + $0x6c0] ss:$16 sps:$4 sm:$0xff]  }
  0x31   : > { %1802 = vmatpush2.bf16.msra.mxu0 %v2783_v38  ;;  %v2835_v16 = vld [vmem:[%s4056_s1 + $0x4a4] ss:$16 sps:$4 sm:$0xff]   ;;  %v2833_v18 = vld [vmem:[%s4056_s1 + $0x4a0] ss:$16 sps:$4 sm:$0xff]   ;;  %v3466_v38 = vld [vmem:[%s3297_s10 + $0x18] sm:$0xff] }
  0x32   : > { %1845 = vmatpush2.bf16.msra.mxu1 %v2784_v39  ;;  %1803 = vmatprep.subr.bf16.mxu0 %v2785_v40  ;;  %v2838_v17 = vld [vmem:[%s4056_s1 + $0x6a4] ss:$16 sps:$4 sm:$0xff]   ;;  %v2836_v19 = vld [vmem:[%s4056_s1 + $0x6a0] ss:$16 sps:$4 sm:$0xff]   ;;  %v3469_v39 = vld [vmem:[%s3297_s10 + $0x38] sm:$0xff] }
  0x33   : > { %1846 = vmatprep.subr.bf16.mxu1 %v2787_v41  ;;  %v2841_v20 = vld [vmem:[%s4056_s1 + $0x484] ss:$16 sps:$4 sm:$0xff]   ;;  %v2839_v22 = vld [vmem:[%s4056_s1 + $0x480] ss:$16 sps:$4 sm:$0xff]  }
  0x34   : > { %v2844_v21 = vld [vmem:[%s4056_s1 + $0x684] ss:$16 sps:$4 sm:$0xff]   ;;  %v2842_v23 = vld [vmem:[%s4056_s1 + $0x680] ss:$16 sps:$4 sm:$0xff]  }
  0x35   : > { %1804 = vmatpush2.bf16.msra.mxu0 %v2789_v42  ;;  %v2847_v24 = vld [vmem:[%s4056_s1 + $0x464] ss:$16 sps:$4 sm:$0xff]   ;;  %v2845_v26 = vld [vmem:[%s4056_s1 + $0x460] ss:$16 sps:$4 sm:$0xff]  }
  0x36   : > { %1847 = vmatpush2.bf16.msra.mxu1 %v2790_v43  ;;  %1805 = vmatprep.subr.bf16.mxu0 %v2791_v44  ;;  %v2850_v25 = vld [vmem:[%s4056_s1 + $0x664] ss:$16 sps:$4 sm:$0xff]   ;;  %v2848_v27 = vld [vmem:[%s4056_s1 + $0x660] ss:$16 sps:$4 sm:$0xff]   ;;  %v3483_v43 = vcombine.high %v3466_v38, %v3469_v39 }
  0x37   : > { %1848 = vmatprep.subr.bf16.mxu1 %v2793_v45  ;;  %v2853_v28 = vld [vmem:[%s4056_s1 + $0x444] ss:$16 sps:$4 sm:$0xff]   ;;  %v2851_v30 = vld [vmem:[%s4056_s1 + $0x440] ss:$16 sps:$4 sm:$0xff]  }
  0x38   : > { %v2856_v29 = vld [vmem:[%s4056_s1 + $0x644] ss:$16 sps:$4 sm:$0xff]   ;;  %v2854_v31 = vld [vmem:[%s4056_s1 + $0x640] ss:$16 sps:$4 sm:$0xff]  }
  0x39   : > { %1806 = vmatpush2.bf16.msra.mxu0 %v2795_v46  ;;  %v2859_v32 = vld [vmem:[%s4056_s1 + $0x424] ss:$16 sps:$4 sm:$0xff]   ;;  %v2857_v34 = vld [vmem:[%s4056_s1 + $0x420] ss:$16 sps:$4 sm:$0xff]  }
  0x3a   : > { %1849 = vmatpush2.bf16.msra.mxu1 %v2796_v47  ;;  %1807 = vmatprep.subr.bf16.mxu0 %v2797_v52  ;;  %v2862_v33 = vld [vmem:[%s4056_s1 + $0x624] ss:$16 sps:$4 sm:$0xff]   ;;  %v2860_v35 = vld [vmem:[%s4056_s1 + $0x620] ss:$16 sps:$4 sm:$0xff]  }
  0x3b   : > { %1850 = vmatprep.subr.bf16.mxu1 %v2799_v54  ;;  %v3460_v36 = vld [vmem:[%s3297_s10 + $0x10] sm:$0xff] }
  0x3c   : > { %v3463_v37 = vld [vmem:[%s3297_s10 + $0x30] sm:$0xff] }
  0x3d   : > { %1808 = vmatpush2.bf16.msra.mxu0 %v2801_v56  ;;  %v2865_v40 = vld [vmem:[%s4056_s1 + $0x404] ss:$16 sps:$4 sm:$0xff]   ;;  %v3476_v41 = vcombine.high %v3460_v36, %v3463_v37  ;;  %v2863_v44 = vld [vmem:[%s4056_s1 + $0x400] ss:$16 sps:$4 sm:$0xff]  }
  0x3e   : > { %1851 = vmatpush2.bf16.msra.mxu1 %v2802_v57  ;;  %1809 = vmatprep.subr.bf16.mxu0 %v2803_v58  ;;  %v2868_v42 = vld [vmem:[%s4056_s1 + $0x604] ss:$16 sps:$4 sm:$0xff]   ;;  %v2866_v45 = vld [vmem:[%s4056_s1 + $0x600] ss:$16 sps:$4 sm:$0xff]  }
  0x3f   : > { %1852 = vmatprep.subr.bf16.mxu1 %v2805_v59  ;;  %v2871_v46 = vld [vmem:[%s4056_s1 + $0x5e4] ss:$16 sps:$4 sm:$0xff]   ;;  %v2869_v48 = vld [vmem:[%s4056_s1 + $0x5e0] ss:$16 sps:$4 sm:$0xff]  }
  0x40   : > { %v2874_v47 = vld [vmem:[%s4056_s1 + $0x7e4] ss:$16 sps:$4 sm:$0xff]   ;;  %v2872_v49 = vld [vmem:[%s4056_s1 + $0x7e0] ss:$16 sps:$4 sm:$0xff]  }
  0x41   : > { %1810 = vmatpush2.bf16.msra.mxu0 %v2807_v60  ;;  %v2877_v50 = vld [vmem:[%s4056_s1 + $0x5c4] ss:$16 sps:$4 sm:$0xff]   ;;  %v2875_v52 = vld [vmem:[%s4056_s1 + $0x5c0] ss:$16 sps:$4 sm:$0xff]  }
  0x42   : > { %1853 = vmatpush2.bf16.msra.mxu1 %v2808_v61  ;;  %1811 = vmatprep.subr.bf16.mxu0 %v2809_v62  ;;  %v2880_v51 = vld [vmem:[%s4056_s1 + $0x7c4] ss:$16 sps:$4 sm:$0xff]   ;;  %v2878_v54 = vld [vmem:[%s4056_s1 + $0x7c0] ss:$16 sps:$4 sm:$0xff]  }
  0x43   : > { %1854 = vmatprep.subr.bf16.mxu1 %v2811_v63  ;;  %v2883_v56 = vld [vmem:[%s4056_s1 + $0x5a4] ss:$16 sps:$4 sm:$0xff]   ;;  %v2881_v58 = vld [vmem:[%s4056_s1 + $0x5a0] ss:$16 sps:$4 sm:$0xff]  }
  0x44   : > { %v2886_v57 = vld [vmem:[%s4056_s1 + $0x7a4] ss:$16 sps:$4 sm:$0xff]   ;;  %v2884_v59 = vld [vmem:[%s4056_s1 + $0x7a0] ss:$16 sps:$4 sm:$0xff]  }
  0x45   : > { %1812 = vmatpush2.bf16.msra.mxu0 %v2813_v0  ;;  %v2889_v60 = vld [vmem:[%s4056_s1 + $0x584] ss:$16 sps:$4 sm:$0xff]   ;;  %v2887_v62 = vld [vmem:[%s4056_s1 + $0x580] ss:$16 sps:$4 sm:$0xff]  }
  0x46   : > { %1855 = vmatpush2.bf16.msra.mxu1 %v2814_v1  ;;  %1813 = vmatprep.subr.bf16.mxu0 %v2815_v2  ;;  %v2892_v61 = vld [vmem:[%s4056_s1 + $0x784] ss:$16 sps:$4 sm:$0xff]   ;;  %v2890_v63 = vld [vmem:[%s4056_s1 + $0x780] ss:$16 sps:$4 sm:$0xff]  }
  0x47   : > { %1856 = vmatprep.subr.bf16.mxu1 %v2817_v3  ;;  %v2895_v0 = vld [vmem:[%s4056_s1 + $0x564] ss:$16 sps:$4 sm:$0xff]   ;;  %v2893_v2 = vld [vmem:[%s4056_s1 + $0x560] ss:$16 sps:$4 sm:$0xff]  }
  0x48   : > { %v2898_v1 = vld [vmem:[%s4056_s1 + $0x764] ss:$16 sps:$4 sm:$0xff]   ;;  %v2896_v3 = vld [vmem:[%s4056_s1 + $0x760] ss:$16 sps:$4 sm:$0xff]  }
  0x49   : > { %1814 = vmatpush2.bf16.msra.mxu0 %v2819_v4  ;;  %v2901_v4 = vld [vmem:[%s4056_s1 + $0x544] ss:$16 sps:$4 sm:$0xff]  }
  0x4a   : > { %1857 = vmatpush2.bf16.msra.mxu1 %v2820_v5  ;;  %1869 = vmatprep.subr.bf16.mxu0 %v2823_v6  ;;  %v2904_v5 = vld [vmem:[%s4056_s1 + $0x744] ss:$16 sps:$4 sm:$0xff]   ;;  %v2899_v6 = vld [vmem:[%s4056_s1 + $0x540] ss:$16 sps:$4 sm:$0xff]  }
  0x4b   : > { %1912 = vmatprep.subr.bf16.mxu1 %v2826_v7  ;;  %v2902_v7 = vld [vmem:[%s4056_s1 + $0x740] ss:$16 sps:$4 sm:$0xff]  }
  0x4c   : > { %1816 = vmatmul.mubr.bf16.vlgmr.msra.gmra.mxu0 %v3375_v8 }
  0x4d   : > { %1859 = vmatmul.mubr.bf16.vlgmr.msra.gmra.mxu1 %v3377_v9  ;;  %1870 = vmatpush1.bf16.msra.mxu0 %v2821_v10  ;;  %v2907_v10 = vld [vmem:[%s4056_s1 + $0x524] ss:$16 sps:$4 sm:$0xff]  }
  0x4e   : > { %1913 = vmatpush1.bf16.msra.mxu1 %v2824_v11  ;;  %1871 = vmatprep.subr.bf16.mxu0 %v2829_v12  ;;  %v2910_v11 = vld [vmem:[%s4056_s1 + $0x724] ss:$16 sps:$4 sm:$0xff]   ;;  %v2905_v12 = vld [vmem:[%s4056_s1 + $0x520] ss:$16 sps:$4 sm:$0xff]  }
  0x4f   : > { %1914 = vmatprep.subr.bf16.mxu1 %v2832_v13  ;;  %1901 = vmatprep.mubr.bf16.mxu0 %v3476_v41  ;;  %v2908_v13 = vld [vmem:[%s4056_s1 + $0x720] ss:$16 sps:$4 sm:$0xff]  }
  0x50   : > { %1944 = vmatprep.mubr.bf16.mxu1 %v3483_v43 }
  0x51   : > { %1872 = vmatpush1.bf16.msra.mxu0 %v2827_v14  ;;  %v2913_v14 = vld [vmem:[%s4056_s1 + $0x504] ss:$16 sps:$4 sm:$0xff]  }
  0x52   : > { %1915 = vmatpush1.bf16.msra.mxu1 %v2830_v15  ;;  %1873 = vmatprep.subr.bf16.mxu0 %v2835_v16  ;;  %v2916_v15 = vld [vmem:[%s4056_s1 + $0x704] ss:$16 sps:$4 sm:$0xff]   ;;  %v2911_v16 = vld [vmem:[%s4056_s1 + $0x500] ss:$16 sps:$4 sm:$0xff]  }
  0x53   : > { %1916 = vmatprep.subr.bf16.mxu1 %v2838_v17  ;;  %v2914_v17 = vld [vmem:[%s4056_s1 + $0x700] ss:$16 sps:$4 sm:$0xff]  }
  0x55   : > { %1874 = vmatpush1.bf16.msra.mxu0 %v2833_v18  ;;  %v2919_v18 = vld [vmem:[%s4056_s1 + $0xec] ss:$16 sps:$4 sm:$0xff]  }
  0x56   : > { %1917 = vmatpush1.bf16.msra.mxu1 %v2836_v19  ;;  %1875 = vmatprep.subr.bf16.mxu0 %v2841_v20  ;;  %v2922_v19 = vld [vmem:[%s4056_s1 + $0x2ec] ss:$16 sps:$4 sm:$0xff]   ;;  %v3597_v20 = vcombine.low %v3460_v36, %v3463_v37  ;;  %v2941_v36 = vld [vmem:[%s4056_s1 + $0x68] ss:$16 sps:$4 sm:$0xff]  }
  0x57   : > { %1918 = vmatprep.subr.bf16.mxu1 %v2844_v21  ;;  %v3601_v21 = vcombine.low %v3466_v38, %v3469_v39  ;;  %v2944_v37 = vld [vmem:[%s4056_s1 + $0x268] ss:$16 sps:$4 sm:$0xff]   ;;  %v2949_v38 = vld [vmem:[%s4056_s1 + $0x4c] ss:$16 sps:$4 sm:$0xff]  }
  0x58   : > { %v2952_v39 = vld [vmem:[%s4056_s1 + $0x24c] ss:$16 sps:$4 sm:$0xff]  }
  0x59   : > { %1876 = vmatpush1.bf16.msra.mxu0 %v2839_v22  ;;  %v2917_v22 = vld [vmem:[%s4056_s1 + $0xe8] ss:$16 sps:$4 sm:$0xff]  }
  0x5a   : > { %1919 = vmatpush1.bf16.msra.mxu1 %v2842_v23  ;;  %1877 = vmatprep.subr.bf16.mxu0 %v2847_v24  ;;  %v2920_v23 = vld [vmem:[%s4056_s1 + $0x2e8] ss:$16 sps:$4 sm:$0xff]   ;;  %v2925_v24 = vld [vmem:[%s4056_s1 + $0xcc] ss:$16 sps:$4 sm:$0xff]  }
  0x5b   : > { %1920 = vmatprep.subr.bf16.mxu1 %v2850_v25  ;;  %v2928_v25 = vld [vmem:[%s4056_s1 + $0x2cc] ss:$16 sps:$4 sm:$0xff]  }
  0x5d   : > { %1878 = vmatpush1.bf16.msra.mxu0 %v2845_v26  ;;  %v2923_v26 = vld [vmem:[%s4056_s1 + $0xc8] ss:$16 sps:$4 sm:$0xff]  }
  0x5e   : > { %1921 = vmatpush1.bf16.msra.mxu1 %v2848_v27  ;;  %1879 = vmatprep.subr.bf16.mxu0 %v2853_v28  ;;  %v2926_v27 = vld [vmem:[%s4056_s1 + $0x2c8] ss:$16 sps:$4 sm:$0xff]   ;;  %v2931_v28 = vld [vmem:[%s4056_s1 + $0xac] ss:$16 sps:$4 sm:$0xff]  }
  0x5f   : > { %1922 = vmatprep.subr.bf16.mxu1 %v2856_v29  ;;  %v2934_v29 = vld [vmem:[%s4056_s1 + $0x2ac] ss:$16 sps:$4 sm:$0xff]  }
  0x61   : > { %1880 = vmatpush1.bf16.msra.mxu0 %v2851_v30  ;;  %v2929_v30 = vld [vmem:[%s4056_s1 + $0xa8] ss:$16 sps:$4 sm:$0xff]  }
  0x62   : > { %1923 = vmatpush1.bf16.msra.mxu1 %v2854_v31  ;;  %1881 = vmatprep.subr.bf16.mxu0 %v2859_v32  ;;  %v2932_v31 = vld [vmem:[%s4056_s1 + $0x2a8] ss:$16 sps:$4 sm:$0xff]   ;;  %v2937_v32 = vld [vmem:[%s4056_s1 + $0x8c] ss:$16 sps:$4 sm:$0xff]  }
  0x63   : > { %1924 = vmatprep.subr.bf16.mxu1 %v2862_v33  ;;  %v2938_v33 = vld [vmem:[%s4056_s1 + $0x288] ss:$16 sps:$4 sm:$0xff]  }
  0x65   : > { %1882 = vmatpush1.bf16.msra.mxu0 %v2857_v34  ;;  %v2943_v34 = vld [vmem:[%s4056_s1 + $0x6c] ss:$16 sps:$4 sm:$0xff]  }
  0x66   : > { %1925 = vmatpush1.bf16.msra.mxu1 %v2860_v35  ;;  %1883 = vmatprep.subr.bf16.mxu0 %v2865_v40  ;;  %v2946_v35 = vld [vmem:[%s4056_s1 + $0x26c] ss:$16 sps:$4 sm:$0xff]   ;;  %v2947_v40 = vld [vmem:[%s4056_s1 + $0x48] ss:$16 sps:$4 sm:$0xff]  }
  0x67   : > { %1926 = vmatprep.subr.bf16.mxu1 %v2868_v42  ;;  %v2950_v42 = vld [vmem:[%s4056_s1 + $0x248] ss:$16 sps:$4 sm:$0xff]  }
  0x69   : > { %1884 = vmatpush1.bf16.msra.mxu0 %v2863_v44  ;;  %v2955_v44 = vld [vmem:[%s4056_s1 + $0x2c] ss:$16 sps:$4 sm:$0xff]  }
  0x6a   : > { %1927 = vmatpush1.bf16.msra.mxu1 %v2866_v45  ;;  %1885 = vmatprep.subr.bf16.mxu0 %v2871_v46  ;;  %v2958_v45 = vld [vmem:[%s4056_s1 + $0x22c] ss:$16 sps:$4 sm:$0xff]   ;;  %v2953_v46 = vld [vmem:[%s4056_s1 + $0x28] ss:$16 sps:$4 sm:$0xff]  }
  0x6b   : > { %1928 = vmatprep.subr.bf16.mxu1 %v2874_v47  ;;  %v2956_v47 = vld [vmem:[%s4056_s1 + $0x228] ss:$16 sps:$4 sm:$0xff]  }
  0x6d   : > { %1886 = vmatpush2.bf16.msra.mxu0 %v2869_v48  ;;  %v2961_v48 = vld [vmem:[%s4056_s1 + $0xc] ss:$16 sps:$4 sm:$0xff]  }
  0x6e   : > { %1929 = vmatpush2.bf16.msra.mxu1 %v2872_v49  ;;  %1887 = vmatprep.subr.bf16.mxu0 %v2877_v50  ;;  %v2964_v49 = vld [vmem:[%s4056_s1 + $0x20c] ss:$16 sps:$4 sm:$0xff]   ;;  %v2959_v50 = vld [vmem:[%s4056_s1 + $0x8] ss:$16 sps:$4 sm:$0xff]  }
  0x6f   : > { %1930 = vmatprep.subr.bf16.mxu1 %v2880_v51  ;;  %v2962_v51 = vld [vmem:[%s4056_s1 + $0x208] ss:$16 sps:$4 sm:$0xff]  }
  0x71   : > { %1888 = vmatpush2.bf16.msra.mxu0 %v2875_v52  ;;  %v2967_v52 = vld [vmem:[%s4056_s1 + $0x1ec] ss:$16 sps:$4 sm:$0xff]  }
  0x72   : > { %1931 = vmatpush2.bf16.msra.mxu1 %v2878_v54  ;;  %1889 = vmatprep.subr.bf16.mxu0 %v2883_v56  ;;  %v2970_v54 = vld [vmem:[%s4056_s1 + $0x3ec] ss:$16 sps:$4 sm:$0xff]   ;;  %v2965_v56 = vld [vmem:[%s4056_s1 + $0x1e8] ss:$16 sps:$4 sm:$0xff]  }
  0x73   : > { %1932 = vmatprep.subr.bf16.mxu1 %v2886_v57  ;;  %v2968_v57 = vld [vmem:[%s4056_s1 + $0x3e8] ss:$16 sps:$4 sm:$0xff]  }
  0x75   : > { %1890 = vmatpush2.bf16.msra.mxu0 %v2881_v58  ;;  %v2973_v58 = vld [vmem:[%s4056_s1 + $0x1cc] ss:$16 sps:$4 sm:$0xff]  }
  0x76   : > { %1933 = vmatpush2.bf16.msra.mxu1 %v2884_v59  ;;  %1891 = vmatprep.subr.bf16.mxu0 %v2889_v60  ;;  %v2976_v59 = vld [vmem:[%s4056_s1 + $0x3cc] ss:$16 sps:$4 sm:$0xff]   ;;  %v2971_v60 = vld [vmem:[%s4056_s1 + $0x1c8] ss:$16 sps:$4 sm:$0xff]  }
  0x77   : > { %1934 = vmatprep.subr.bf16.mxu1 %v2892_v61  ;;  %v2974_v61 = vld [vmem:[%s4056_s1 + $0x3c8] ss:$16 sps:$4 sm:$0xff]  }
  0x79   : > { %1892 = vmatpush2.bf16.msra.mxu0 %v2887_v62  ;;  %v2979_v62 = vld [vmem:[%s4056_s1 + $0x1ac] ss:$16 sps:$4 sm:$0xff]  }
  0x7a   : > { %1935 = vmatpush2.bf16.msra.mxu1 %v2890_v63  ;;  %1893 = vmatprep.subr.bf16.mxu0 %v2895_v0  ;;  %v2982_v63 = vld [vmem:[%s4056_s1 + $0x3ac] ss:$16 sps:$4 sm:$0xff]   ;;  %v2977_v0 = vld [vmem:[%s4056_s1 + $0x1a8] ss:$16 sps:$4 sm:$0xff]  }
  0x7b   : > { %1936 = vmatprep.subr.bf16.mxu1 %v2898_v1  ;;  %v2980_v1 = vld [vmem:[%s4056_s1 + $0x3a8] ss:$16 sps:$4 sm:$0xff]  }
  0x7d   : > { %1894 = vmatpush2.bf16.msra.mxu0 %v2893_v2  ;;  %v2985_v2 = vld [vmem:[%s4056_s1 + $0x18c] ss:$16 sps:$4 sm:$0xff]  }
  0x7e   : > { %1937 = vmatpush2.bf16.msra.mxu1 %v2896_v3  ;;  %1895 = vmatprep.subr.bf16.mxu0 %v2901_v4  ;;  %v2988_v3 = vld [vmem:[%s4056_s1 + $0x38c] ss:$16 sps:$4 sm:$0xff]   ;;  %v2983_v4 = vld [vmem:[%s4056_s1 + $0x188] ss:$16 sps:$4 sm:$0xff]  }
  0x7f   : > { %1938 = vmatprep.subr.bf16.mxu1 %v2904_v5  ;;  %v2986_v5 = vld [vmem:[%s4056_s1 + $0x388] ss:$16 sps:$4 sm:$0xff]  }
  0x81   : > { %1896 = vmatpush2.bf16.msra.mxu0 %v2899_v6  ;;  %v2991_v6 = vld [vmem:[%s4056_s1 + $0x16c] ss:$16 sps:$4 sm:$0xff]  }
  0x82   : > { %1939 = vmatpush2.bf16.msra.mxu1 %v2902_v7  ;;  %1897 = vmatprep.subr.bf16.mxu0 %v2907_v10  ;;  %v2994_v7 = vld [vmem:[%s4056_s1 + $0x36c] ss:$16 sps:$4 sm:$0xff]   ;;  %v2989_v10 = vld [vmem:[%s4056_s1 + $0x168] ss:$16 sps:$4 sm:$0xff]  }
  0x83   : > { %1940 = vmatprep.subr.bf16.mxu1 %v2910_v11  ;;  %v2992_v11 = vld [vmem:[%s4056_s1 + $0x368] ss:$16 sps:$4 sm:$0xff]  }
  0x85   : > { %1898 = vmatpush2.bf16.msra.mxu0 %v2905_v12  ;;  %v2997_v12 = vld [vmem:[%s4056_s1 + $0x14c] ss:$16 sps:$4 sm:$0xff]  }
  0x86   : > { %1941 = vmatpush2.bf16.msra.mxu1 %v2908_v13  ;;  %1899 = vmatprep.subr.bf16.mxu0 %v2913_v14  ;;  %v3000_v13 = vld [vmem:[%s4056_s1 + $0x34c] ss:$16 sps:$4 sm:$0xff]   ;;  %v2995_v14 = vld [vmem:[%s4056_s1 + $0x148] ss:$16 sps:$4 sm:$0xff]  }
  0x87   : > { %1942 = vmatprep.subr.bf16.mxu1 %v2916_v15  ;;  %v2998_v15 = vld [vmem:[%s4056_s1 + $0x348] ss:$16 sps:$4 sm:$0xff]  }
  0x89   : > { %1900 = vmatpush2.bf16.msra.mxu0 %v2911_v16  ;;  %v3003_v16 = vld [vmem:[%s4056_s1 + $0x12c] ss:$16 sps:$4 sm:$0xff]  }
  0x8a   : > { %1943 = vmatpush2.bf16.msra.mxu1 %v2914_v17  ;;  %1955 = vmatprep.subr.bf16.mxu0 %v2919_v18  ;;  %v3006_v17 = vld [vmem:[%s4056_s1 + $0x32c] ss:$16 sps:$4 sm:$0xff]   ;;  %v3001_v18 = vld [vmem:[%s4056_s1 + $0x128] ss:$16 sps:$4 sm:$0xff]  }
  0x8b   : > { %1998 = vmatprep.subr.bf16.mxu1 %v2922_v19  ;;  %v3004_v19 = vld [vmem:[%s4056_s1 + $0x328] ss:$16 sps:$4 sm:$0xff]  }
  0x8c   : > { %1902 = vmatmul.mubr.bf16.vlgmr.msra.gmra.mxu0 %v3597_v20 }
  0x8d   : > { %1945 = vmatmul.mubr.bf16.vlgmr.msra.gmra.mxu1 %v3601_v21  ;;  %1956 = vmatpush1.bf16.msra.mxu0 %v2917_v22  ;;  %v3009_v22 = vld [vmem:[%s4056_s1 + $0x10c] ss:$16 sps:$4 sm:$0xff]  }
  0x8e   : > { %1999 = vmatpush1.bf16.msra.mxu1 %v2920_v23  ;;  %1957 = vmatprep.subr.bf16.mxu0 %v2925_v24  ;;  %v3012_v23 = vld [vmem:[%s4056_s1 + $0x30c] ss:$16 sps:$4 sm:$0xff]   ;;  %v3007_v24 = vld [vmem:[%s4056_s1 + $0x108] ss:$16 sps:$4 sm:$0xff]  }
  0x8f   : > { %2000 = vmatprep.subr.bf16.mxu1 %v2928_v25  ;;  %1987 = vmatprep.mubr.bf16.mxu0 %v3318_v53  ;;  %v2940_v53 = vld [vmem:[%s4056_s1 + $0x28c] ss:$16 sps:$4 sm:$0xff]   ;;  %v3010_v25 = vld [vmem:[%s4056_s1 + $0x308] ss:$16 sps:$4 sm:$0xff]  }
  0x90   : > { %2030 = vmatprep.mubr.bf16.mxu1 %v3323_v55  ;;  %v2935_v55 = vld [vmem:[%s4056_s1 + $0x88] ss:$16 sps:$4 sm:$0xff]  }
  0x91   : > { %1958 = vmatpush1.bf16.msra.mxu0 %v2923_v26  ;;  %v3015_v26 = vld [vmem:[%s4056_s1 + $0x4ec] ss:$16 sps:$4 sm:$0xff]  }
  0x92   : > { %2001 = vmatpush1.bf16.msra.mxu1 %v2926_v27  ;;  %1959 = vmatprep.subr.bf16.mxu0 %v2931_v28  ;;  %v3018_v27 = vld [vmem:[%s4056_s1 + $0x6ec] ss:$16 sps:$4 sm:$0xff]   ;;  %v3013_v28 = vld [vmem:[%s4056_s1 + $0x4e8] ss:$16 sps:$4 sm:$0xff]  }
  0x93   : > { %2002 = vmatprep.subr.bf16.mxu1 %v2934_v29  ;;  %v3016_v29 = vld [vmem:[%s4056_s1 + $0x6e8] ss:$16 sps:$4 sm:$0xff]  }
  0x95   : > { %1960 = vmatpush1.bf16.msra.mxu0 %v2929_v30  ;;  %v3021_v30 = vld [vmem:[%s4056_s1 + $0x4cc] ss:$16 sps:$4 sm:$0xff]  }
  0x96   : > { %2003 = vmatpush1.bf16.msra.mxu1 %v2932_v31  ;;  %1961 = vmatprep.subr.bf16.mxu0 %v2937_v32  ;;  %v3024_v31 = vld [vmem:[%s4056_s1 + $0x6cc] ss:$16 sps:$4 sm:$0xff]   ;;  %v3019_v32 = vld [vmem:[%s4056_s1 + $0x4c8] ss:$16 sps:$4 sm:$0xff]  }
  0x97   : > { %2004 = vmatprep.subr.bf16.mxu1 %v2940_v53  ;;  %v3022_v53 = vld [vmem:[%s4056_s1 + $0x6c8] ss:$16 sps:$4 sm:$0xff]  }
  0x99   : > { %1962 = vmatpush1.bf16.msra.mxu0 %v2935_v55  ;;  %v3027_v55 = vld [vmem:[%s4056_s1 + $0x4ac] ss:$16 sps:$4 sm:$0xff]  }
  0x9a   : > { %2005 = vmatpush1.bf16.msra.mxu1 %v2938_v33  ;;  %1963 = vmatprep.subr.bf16.mxu0 %v2943_v34  ;;  %v3028_v33 = vld [vmem:[%s4056_s1 + $0x6a8] ss:$16 sps:$4 sm:$0xff]   ;;  %v3033_v34 = vld [vmem:[%s4056_s1 + $0x48c] ss:$16 sps:$4 sm:$0xff]  }
  0x9b   : > { %2006 = vmatprep.subr.bf16.mxu1 %v2946_v35  ;;  %v3034_v35 = vld [vmem:[%s4056_s1 + $0x688] ss:$16 sps:$4 sm:$0xff]  }
  0x9d   : > { %1964 = vmatpush1.bf16.msra.mxu0 %v2941_v36  ;;  %v3039_v36 = vld [vmem:[%s4056_s1 + $0x46c] ss:$16 sps:$4 sm:$0xff]  }
  0x9e   : > { %2007 = vmatpush1.bf16.msra.mxu1 %v2944_v37  ;;  %1965 = vmatprep.subr.bf16.mxu0 %v2949_v38  ;;  %v3042_v37 = vld [vmem:[%s4056_s1 + $0x66c] ss:$16 sps:$4 sm:$0xff]   ;;  %v3037_v38 = vld [vmem:[%s4056_s1 + $0x468] ss:$16 sps:$4 sm:$0xff]  }
  0x9f   : > { %2008 = vmatprep.subr.bf16.mxu1 %v2952_v39  ;;  %v3040_v39 = vld [vmem:[%s4056_s1 + $0x668] ss:$16 sps:$4 sm:$0xff]  }
  0xa1   : > { %1966 = vmatpush1.bf16.msra.mxu0 %v2947_v40  ;;  %v3045_v40 = vld [vmem:[%s4056_s1 + $0x44c] ss:$16 sps:$4 sm:$0xff]  }
  0xa2   : > { %2009 = vmatpush1.bf16.msra.mxu1 %v2950_v42  ;;  %1967 = vmatprep.subr.bf16.mxu0 %v2955_v44  ;;  %v3048_v42 = vld [vmem:[%s4056_s1 + $0x64c] ss:$16 sps:$4 sm:$0xff]   ;;  %v3043_v44 = vld [vmem:[%s4056_s1 + $0x448] ss:$16 sps:$4 sm:$0xff]  }
  0xa3   : > { %2010 = vmatprep.subr.bf16.mxu1 %v2958_v45  ;;  %v3046_v45 = vld [vmem:[%s4056_s1 + $0x648] ss:$16 sps:$4 sm:$0xff]  }
  0xa5   : > { %1968 = vmatpush1.bf16.msra.mxu0 %v2953_v46  ;;  %v3051_v46 = vld [vmem:[%s4056_s1 + $0x42c] ss:$16 sps:$4 sm:$0xff]  }
  0xa6   : > { %2011 = vmatpush1.bf16.msra.mxu1 %v2956_v47  ;;  %1969 = vmatprep.subr.bf16.mxu0 %v2961_v48  ;;  %v3054_v47 = vld [vmem:[%s4056_s1 + $0x62c] ss:$16 sps:$4 sm:$0xff]   ;;  %v3049_v48 = vld [vmem:[%s4056_s1 + $0x428] ss:$16 sps:$4 sm:$0xff]  }
  0xa7   : > { %2012 = vmatprep.subr.bf16.mxu1 %v2964_v49  ;;  %v3052_v49 = vld [vmem:[%s4056_s1 + $0x628] ss:$16 sps:$4 sm:$0xff]  }
  0xa9   : > { %1970 = vmatpush1.bf16.msra.mxu0 %v2959_v50  ;;  %v3057_v50 = vld [vmem:[%s4056_s1 + $0x40c] ss:$16 sps:$4 sm:$0xff]  }
  0xaa   : > { %2013 = vmatpush1.bf16.msra.mxu1 %v2962_v51  ;;  %1971 = vmatprep.subr.bf16.mxu0 %v2967_v52  ;;  %v3060_v51 = vld [vmem:[%s4056_s1 + $0x60c] ss:$16 sps:$4 sm:$0xff]   ;;  %v3055_v52 = vld [vmem:[%s4056_s1 + $0x408] ss:$16 sps:$4 sm:$0xff]  }
  0xab   : > { %2014 = vmatprep.subr.bf16.mxu1 %v2970_v54  ;;  %v3058_v54 = vld [vmem:[%s4056_s1 + $0x608] ss:$16 sps:$4 sm:$0xff]  }
  0xad   : > { %1972 = vmatpush2.bf16.msra.mxu0 %v2965_v56  ;;  %v3063_v56 = vld [vmem:[%s4056_s1 + $0x5ec] ss:$16 sps:$4 sm:$0xff]  }
  0xae   : > { %2015 = vmatpush2.bf16.msra.mxu1 %v2968_v57  ;;  %1973 = vmatprep.subr.bf16.mxu0 %v2973_v58  ;;  %v3066_v57 = vld [vmem:[%s4056_s1 + $0x7ec] ss:$16 sps:$4 sm:$0xff]   ;;  %v3061_v58 = vld [vmem:[%s4056_s1 + $0x5e8] ss:$16 sps:$4 sm:$0xff]  }
  0xaf   : > { %2016 = vmatprep.subr.bf16.mxu1 %v2976_v59  ;;  %v3064_v59 = vld [vmem:[%s4056_s1 + $0x7e8] ss:$16 sps:$4 sm:$0xff]  }
  0xb1   : > { %1974 = vmatpush2.bf16.msra.mxu0 %v2971_v60  ;;  %v3069_v60 = vld [vmem:[%s4056_s1 + $0x5cc] ss:$16 sps:$4 sm:$0xff]  }
  0xb2   : > { %2017 = vmatpush2.bf16.msra.mxu1 %v2974_v61  ;;  %1975 = vmatprep.subr.bf16.mxu0 %v2979_v62  ;;  %v3072_v61 = vld [vmem:[%s4056_s1 + $0x7cc] ss:$16 sps:$4 sm:$0xff]   ;;  %v3067_v62 = vld [vmem:[%s4056_s1 + $0x5c8] ss:$16 sps:$4 sm:$0xff]  }
  0xb3   : > { %2018 = vmatprep.subr.bf16.mxu1 %v2982_v63  ;;  %v3070_v63 = vld [vmem:[%s4056_s1 + $0x7c8] ss:$16 sps:$4 sm:$0xff]  }
  0xb5   : > { %1976 = vmatpush2.bf16.msra.mxu0 %v2977_v0  ;;  %v3075_v0 = vld [vmem:[%s4056_s1 + $0x5ac] ss:$16 sps:$4 sm:$0xff]  }
  0xb6   : > { %2019 = vmatpush2.bf16.msra.mxu1 %v2980_v1  ;;  %1977 = vmatprep.subr.bf16.mxu0 %v2985_v2  ;;  %v3078_v1 = vld [vmem:[%s4056_s1 + $0x7ac] ss:$16 sps:$4 sm:$0xff]   ;;  %v3073_v2 = vld [vmem:[%s4056_s1 + $0x5a8] ss:$16 sps:$4 sm:$0xff]  }
  0xb7   : > { %2020 = vmatprep.subr.bf16.mxu1 %v2988_v3  ;;  %v3076_v3 = vld [vmem:[%s4056_s1 + $0x7a8] ss:$16 sps:$4 sm:$0xff]  }
  0xb9   : > { %1978 = vmatpush2.bf16.msra.mxu0 %v2983_v4  ;;  %v3081_v4 = vld [vmem:[%s4056_s1 + $0x58c] ss:$16 sps:$4 sm:$0xff]  }
  0xba   : > { %2021 = vmatpush2.bf16.msra.mxu1 %v2986_v5  ;;  %1979 = vmatprep.subr.bf16.mxu0 %v2991_v6  ;;  %v3084_v5 = vld [vmem:[%s4056_s1 + $0x78c] ss:$16 sps:$4 sm:$0xff]   ;;  %v3079_v6 = vld [vmem:[%s4056_s1 + $0x588] ss:$16 sps:$4 sm:$0xff]  }
  0xbb   : > { %2022 = vmatprep.subr.bf16.mxu1 %v2994_v7  ;;  %v3082_v7 = vld [vmem:[%s4056_s1 + $0x788] ss:$16 sps:$4 sm:$0xff]  }
  0xbd   : > { %1980 = vmatpush2.bf16.msra.mxu0 %v2989_v10  ;;  %v3087_v10 = vld [vmem:[%s4056_s1 + $0x56c] ss:$16 sps:$4 sm:$0xff]  }
  0xbe   : > { %2023 = vmatpush2.bf16.msra.mxu1 %v2992_v11  ;;  %1981 = vmatprep.subr.bf16.mxu0 %v2997_v12  ;;  %v3090_v11 = vld [vmem:[%s4056_s1 + $0x76c] ss:$16 sps:$4 sm:$0xff]   ;;  %v3085_v12 = vld [vmem:[%s4056_s1 + $0x568] ss:$16 sps:$4 sm:$0xff]  }
  0xbf   : > { %2024 = vmatprep.subr.bf16.mxu1 %v3000_v13  ;;  %v3088_v13 = vld [vmem:[%s4056_s1 + $0x768] ss:$16 sps:$4 sm:$0xff]  }
  0xc1   : > { %1982 = vmatpush2.bf16.msra.mxu0 %v2995_v14  ;;  %v3093_v14 = vld [vmem:[%s4056_s1 + $0x54c] ss:$16 sps:$4 sm:$0xff]  }
  0xc2   : > { %2025 = vmatpush2.bf16.msra.mxu1 %v2998_v15  ;;  %1983 = vmatprep.subr.bf16.mxu0 %v3003_v16  ;;  %v3096_v15 = vld [vmem:[%s4056_s1 + $0x74c] ss:$16 sps:$4 sm:$0xff]   ;;  %v3091_v16 = vld [vmem:[%s4056_s1 + $0x548] ss:$16 sps:$4 sm:$0xff]  }
  0xc3   : > { %2026 = vmatprep.subr.bf16.mxu1 %v3006_v17  ;;  %v3094_v17 = vld [vmem:[%s4056_s1 + $0x748] ss:$16 sps:$4 sm:$0xff]  }
  0xc5   : > { %1984 = vmatpush2.bf16.msra.mxu0 %v3001_v18  ;;  %v3099_v18 = vld [vmem:[%s4056_s1 + $0x52c] ss:$16 sps:$4 sm:$0xff]  }
  0xc6   : > { %2027 = vmatpush2.bf16.msra.mxu1 %v3004_v19  ;;  %1985 = vmatprep.subr.bf16.mxu0 %v3009_v22  ;;  %v3102_v19 = vld [vmem:[%s4056_s1 + $0x72c] ss:$16 sps:$4 sm:$0xff]   ;;  %v3097_v22 = vld [vmem:[%s4056_s1 + $0x528] ss:$16 sps:$4 sm:$0xff]  }
  0xc7   : > { %2028 = vmatprep.subr.bf16.mxu1 %v3012_v23  ;;  %v3100_v23 = vld [vmem:[%s4056_s1 + $0x728] ss:$16 sps:$4 sm:$0xff]  }
  0xc9   : > { %1986 = vmatpush2.bf16.msra.mxu0 %v3007_v24  ;;  %v3105_v24 = vld [vmem:[%s4056_s1 + $0x50c] ss:$16 sps:$4 sm:$0xff]  }
  0xca   : > { %2029 = vmatpush2.bf16.msra.mxu1 %v3010_v25  ;;  %2041 = vmatprep.subr.bf16.mxu0 %v3015_v26  ;;  %v3108_v25 = vld [vmem:[%s4056_s1 + $0x70c] ss:$16 sps:$4 sm:$0xff]   ;;  %v3103_v26 = vld [vmem:[%s4056_s1 + $0x508] ss:$16 sps:$4 sm:$0xff]  }
  0xcb   : > { %2084 = vmatprep.subr.bf16.mxu1 %v3018_v27  ;;  %v3106_v27 = vld [vmem:[%s4056_s1 + $0x708] ss:$16 sps:$4 sm:$0xff]  }
  0xcc   : > { %1988 = vmatmul.mubr.bf16.vlgmr.msra.gmra.mxu0 %v3375_v8  ;;  %v3030_v8 = vld [vmem:[%s4056_s1 + $0x6ac] ss:$16 sps:$4 sm:$0xff]  }
  0xcd   : > { %2031 = vmatmul.mubr.bf16.vlgmr.msra.gmra.mxu1 %v3377_v9  ;;  %2042 = vmatpush1.bf16.msra.mxu0 %v3013_v28  ;;  %v3025_v9 = vld [vmem:[%s4056_s1 + $0x4a8] ss:$16 sps:$4 sm:$0xff]  }
  0xce   : > { %2085 = vmatpush1.bf16.msra.mxu1 %v3016_v29  ;;  %2043 = vmatprep.subr.bf16.mxu0 %v3021_v30 }
  0xcf   : > { %2086 = vmatprep.subr.bf16.mxu1 %v3024_v31  ;;  %2073 = vmatprep.mubr.bf16.mxu0 %v3476_v41  ;;  %v3036_v41 = vld [vmem:[%s4056_s1 + $0x68c] ss:$16 sps:$4 sm:$0xff]  }
  0xd0   : > { %2116 = vmatprep.mubr.bf16.mxu1 %v3483_v43  ;;  %v3031_v43 = vld [vmem:[%s4056_s1 + $0x488] ss:$16 sps:$4 sm:$0xff]  }
  0xd1   : > { %2044 = vmatpush1.bf16.msra.mxu0 %v3019_v32 }
  0xd2   : > { %2087 = vmatpush1.bf16.msra.mxu1 %v3022_v53  ;;  %2045 = vmatprep.subr.bf16.mxu0 %v3027_v55 }
  0xd3   : > { %2088 = vmatprep.subr.bf16.mxu1 %v3030_v8 }
  0xd5   : > { %2046 = vmatpush1.bf16.msra.mxu0 %v3025_v9 }
  0xd6   : > { %2089 = vmatpush1.bf16.msra.mxu1 %v3028_v33  ;;  %2047 = vmatprep.subr.bf16.mxu0 %v3033_v34 }
  0xd7   : > { %2090 = vmatprep.subr.bf16.mxu1 %v3036_v41 }
  0xd9   : > { %2048 = vmatpush1.bf16.msra.mxu0 %v3031_v43 }
  0xda   : > { %2091 = vmatpush1.bf16.msra.mxu1 %v3034_v35  ;;  %2049 = vmatprep.subr.bf16.mxu0 %v3039_v36 }
  0xdb   : > { %2092 = vmatprep.subr.bf16.mxu1 %v3042_v37 }
  0xdd   : > { %2050 = vmatpush1.bf16.msra.mxu0 %v3037_v38 }
  0xde   : > { %2093 = vmatpush1.bf16.msra.mxu1 %v3040_v39  ;;  %2051 = vmatprep.subr.bf16.mxu0 %v3045_v40 }
  0xdf   : > { %2094 = vmatprep.subr.bf16.mxu1 %v3048_v42 }
  0xe1   : > { %2052 = vmatpush1.bf16.msra.mxu0 %v3043_v44 }
  0xe2   : > { %2095 = vmatpush1.bf16.msra.mxu1 %v3046_v45  ;;  %2053 = vmatprep.subr.bf16.mxu0 %v3051_v46 }
  0xe3   : > { %2096 = vmatprep.subr.bf16.mxu1 %v3054_v47 }
  0xe5   : > { %2054 = vmatpush1.bf16.msra.mxu0 %v3049_v48 }
  0xe6   : > { %2097 = vmatpush1.bf16.msra.mxu1 %v3052_v49  ;;  %2055 = vmatprep.subr.bf16.mxu0 %v3057_v50  ;;  %v3121_v50 = vmov 0  }
  0xe7   : > { %2098 = vmatprep.subr.bf16.mxu1 %v3060_v51 }
  0xe9   : > { %2056 = vmatpush1.bf16.msra.mxu0 %v3055_v52 }
  0xea   : > { %2099 = vmatpush1.bf16.msra.mxu1 %v3058_v54  ;;  %2057 = vmatprep.subr.bf16.mxu0 %v3063_v56  ;;  %v3109_v54 = vld [vmem:[%s4057_s2] sm:$0xff]   ;;  %v3110_v56 = vld [vmem:[%s4057_s2 + $0x8] sm:$0xff]  }
  0xeb   : > { %2100 = vmatprep.subr.bf16.mxu1 %v3066_v57  ;;  %v3111_v57 = vld [vmem:[%s4057_s2 + $0x10] sm:$0xff]  }
  0xed   : > { %2058 = vmatpush2.bf16.msra.mxu0 %v3061_v58  ;;  %v3112_v58 = vld [vmem:[%s4057_s2 + $0x18] sm:$0xff]  }
  0xee   : > { %2101 = vmatpush2.bf16.msra.mxu1 %v3064_v59  ;;  %2059 = vmatprep.subr.bf16.mxu0 %v3069_v60 }
  0xef   : > { %2102 = vmatprep.subr.bf16.mxu1 %v3072_v61 }
  0xf1   : > { %2060 = vmatpush2.bf16.msra.mxu0 %v3067_v62 }
  0xf2   : > { %2103 = vmatpush2.bf16.msra.mxu1 %v3070_v63  ;;  %2061 = vmatprep.subr.bf16.mxu0 %v3075_v0 }
  0xf3   : > { %2104 = vmatprep.subr.bf16.mxu1 %v3078_v1 }
  0xf5   : > { %2062 = vmatpush2.bf16.msra.mxu0 %v3073_v2 }
  0xf6   : > { %2105 = vmatpush2.bf16.msra.mxu1 %v3076_v3  ;;  %2063 = vmatprep.subr.bf16.mxu0 %v3081_v4 }
  0xf7   : > { %2106 = vmatprep.subr.bf16.mxu1 %v3084_v5 }
  0xf9   : > { %2064 = vmatpush2.bf16.msra.mxu0 %v3079_v6 }
  0xfa   : > { %2107 = vmatpush2.bf16.msra.mxu1 %v3082_v7  ;;  %2065 = vmatprep.subr.bf16.mxu0 %v3087_v10 }
  0xfb   : > { %2108 = vmatprep.subr.bf16.mxu1 %v3090_v11 }
  0xfd   : > { %2066 = vmatpush2.bf16.msra.mxu0 %v3085_v12 }
  0xfe   : > { %2109 = vmatpush2.bf16.msra.mxu1 %v3088_v13  ;;  %2067 = vmatprep.subr.bf16.mxu0 %v3093_v14 }
  0xff   : > { %2110 = vmatprep.subr.bf16.mxu1 %v3096_v15 }
 0x101   : > { %2068 = vmatpush2.bf16.msra.mxu0 %v3091_v16 }
 0x102   : > { %2111 = vmatpush2.bf16.msra.mxu1 %v3094_v17  ;;  %2069 = vmatprep.subr.bf16.mxu0 %v3099_v18 }
 0x103   : > { %2112 = vmatprep.subr.bf16.mxu1 %v3102_v19 }
 0x105   : > { %2070 = vmatpush2.bf16.msra.mxu0 %v3097_v22 }
 0x106   : > { %2113 = vmatpush2.bf16.msra.mxu1 %v3100_v23  ;;  %2071 = vmatprep.subr.bf16.mxu0 %v3105_v24 }
 0x107   : > { %2114 = vmatprep.subr.bf16.mxu1 %v3108_v25 }
 0x109   : > { %2072 = vmatpush2.bf16.msra.mxu0 %v3103_v26 }
 0x10a   : > { %2115 = vmatpush2.bf16.msra.mxu1 %v3106_v27 }
 0x10c   : > { %2074 = vmatmul.mubr.bf16.vlgmr.msra.gmra.mxu0 %v3597_v20  ;;  %v1817_v28 = vpop.f32.mrf.mxu0 }
 0x10d   : > { %2117 = vmatmul.mubr.bf16.vlgmr.msra.gmra.mxu1 %v3601_v21  ;;  %v1860_v29 = vpop.f32.mrf.mxu1  ;;  %2226 = vmatprep.mubr.bf16.mxu0 %v3121_v50 }
 0x10e   : > { %v1819_v30 = vpop.f32.mrf.mxu0  ;;  %v1861_v36 = vadd.f32 %v1860_v29, %v1817_v28  ;;  %2299 = vmatprep.mubr.bf16.mxu1 %v3121_v50  ;;  %v2141_v29 = vlaneseq }
 0x10f   : > { %v1862_v31 = vpop.f32.mrf.mxu1 }
 0x110   : > { %v1821_v32 = vpop.f32.mrf.mxu0  ;;  %v1863_v43 = vadd.f32 %v1862_v31, %v1819_v30  ;;  %v2142_v30 = vshrl.u32 %v2141_v29, 7 }
 0x111   : > { %v1864_v53 = vpop.f32.mrf.mxu1 }
 0x112   : > { %v1823_v55 = vpop.f32.mrf.mxu0  ;;  %v1865_v35 = vadd.f32 %v1864_v53, %v1821_v32  ;;  %v2143_v31 = vsub.s32 0, %v2142_v30  ;;  %v2139_v32 = vld [vmem:[%s4058_s3] sm:$0xf] }
 0x113   : > { %v1866_v8 = vpop.f32.mrf.mxu1 }
 0x114   : > { %v1867_v20 = vadd.f32 %v1866_v8, %v1823_v55  ;;  %v2144_v53 = vrot.slane %v2139_v32, %v2143_v31  ;;  %v2147_v55 = vsub.s32 1, %v2142_v30 }
 0x116   : > { %v2148_v8 = vrot.slane %v2139_v32, %v2147_v55 }
 0x14c   : > { %v1903_v9 = vpop.f32.mrf.mxu0 }
 0x14d   : > { %v1946_v33 = vpop.f32.mrf.mxu1  ;;  %v1904_v40 = vadd.f32 %v1903_v9, %v1861_v36 }
 0x14e   : > { %v1905_v34 = vpop.f32.mrf.mxu0 }
 0x14f   : > { %v1948_v41 = vpop.f32.mrf.mxu1  ;;  %v1906_v39 = vadd.f32 %v1905_v34, %v1863_v43  ;;  %v1947_v49 = vadd.f32 %v1946_v33, %v1904_v40 }
 0x150   : > { %v1907_v37 = vpop.f32.mrf.mxu0 }
 0x151   : > { %v1950_v38 = vpop.f32.mrf.mxu1  ;;  %v1908_v21 = vadd.f32 %v1907_v37, %v1865_v35  ;;  %v1949_v47 = vadd.f32 %v1948_v41, %v1906_v39 }
 0x152   : > { %v1909_v42 = vpop.f32.mrf.mxu0 }
 0x153   : > { %v1910_v44 = vadd.f32 %v1909_v42, %v1867_v20  ;;  %v1951_v45 = vadd.f32 %v1950_v38, %v1908_v21  ;;  %v1952_v46 = vpop.f32.mrf.mxu1 }
 0x155   : > { %v1953_v48 = vadd.f32 %v1952_v46, %v1910_v44  ;;  %v2135_v52 = vpack.c.bf16 %v1951_v45, %v1947_v49 }
 0x157   : > { %v2136_v51 = vpack.c.bf16 %v1953_v48, %v1949_v47 }
 0x159   : > { %2208 = vmatprep.subr.bf16.mxu0 %v2136_v51 }
 0x15a   : > { %2209 = vmatpush1.bf16.msra.mxu0 %v2135_v52 }
 0x15d   : > { %2704 = vmatmul.mubr.msk.bf16.vlgmr.msra.gmra.mxu0 %vm2181_vm0, %v3109_v54 }
 0x15e   : > { %2236 = vmatprep.mubr.bf16.mxu0 %v3121_v50 }
 0x165   : > { %2705 = vmatmul.mubr.msk.bf16.gmra.mxu0 %vm2181_vm0, %v3110_v56 }
 0x166   : > { %2246 = vmatprep.mubr.bf16.mxu0 %v3121_v50 }
 0x16d   : > { %2706 = vmatmul.mubr.msk.bf16.gmra.mxu0 %vm2181_vm0, %v3111_v57 }
 0x16e   : > { %2256 = vmatprep.mubr.bf16.mxu0 %v3121_v50 }
 0x175   : > { %2707 = vmatmul.mubr.msk.bf16.gmra.mxu0 %vm2181_vm0, %v3112_v58 }
 0x18c   : > { %v1989_v59 = vpop.f32.mrf.mxu0 }
 0x18d   : > { %v2032_v60 = vpop.f32.mrf.mxu1 }
 0x18e   : > { %v1991_v61 = vpop.f32.mrf.mxu0  ;;  %v2033_v11 = vadd.f32 %v2032_v60, %v1989_v59 }
 0x18f   : > { %v2034_v62 = vpop.f32.mrf.mxu1 }
 0x190   : > { %v1993_v63 = vpop.f32.mrf.mxu0  ;;  %v2035_v7 = vadd.f32 %v2034_v62, %v1991_v61 }
 0x191   : > { %v2036_v0 = vpop.f32.mrf.mxu1 }
 0x192   : > { %v1995_v1 = vpop.f32.mrf.mxu0  ;;  %v2037_v10 = vadd.f32 %v2036_v0, %v1993_v63  ;;  %v2151_v0 = vsub.s32 2, %v2142_v30 }
 0x193   : > { %v2038_v2 = vpop.f32.mrf.mxu1 }
 0x194   : > { %v2039_v14 = vadd.f32 %v2038_v2, %v1995_v1  ;;  %v2155_v1 = vsub.s32 3, %v2142_v30  ;;  %v2152_v2 = vrot.slane %v2139_v32, %v2151_v0 }
 0x1cc   : > { %v2075_v3 = vpop.f32.mrf.mxu0 }
 0x1cd   : > { %v2118_v4 = vpop.f32.mrf.mxu1  ;;  %v2076_v17 = vadd.f32 %v2075_v3, %v2033_v11  ;;  %v2156_v3 = vrot.slane %v2139_v32, %v2155_v1 }
 0x1ce   : > { %v2077_v5 = vpop.f32.mrf.mxu0 }
 0x1cf   : > { %v2120_v6 = vpop.f32.mrf.mxu1  ;;  %v2078_v15 = vadd.f32 %v2077_v5, %v2035_v7  ;;  %v2119_v26 = vadd.f32 %v2118_v4, %v2076_v17 }
 0x1d0   : > { %v2079_v12 = vpop.f32.mrf.mxu0 }
 0x1d1   : > { %v2122_v13 = vpop.f32.mrf.mxu1  ;;  %v2080_v16 = vadd.f32 %v2079_v12, %v2037_v10  ;;  %v2121_v24 = vadd.f32 %v2120_v6, %v2078_v15 }
 0x1d2   : > { %v2081_v18 = vpop.f32.mrf.mxu0 }
 0x1d3   : > { %v2082_v19 = vadd.f32 %v2081_v18, %v2039_v14  ;;  %v2123_v22 = vadd.f32 %v2122_v13, %v2080_v16  ;;  %v2124_v23 = vpop.f32.mrf.mxu1 }
 0x1d5   : > { %v2125_v25 = vadd.f32 %v2124_v23, %v2082_v19  ;;  %v2137_v28 = vpack.c.bf16 %v2123_v22, %v2119_v26 }
 0x1d7   : > { %v2138_v27 = vpack.c.bf16 %v2125_v25, %v2121_v24 }
 0x1d9   : > { %2281 = vmatprep.subr.bf16.mxu1 %v2138_v27 }
 0x1da   : > { %2282 = vmatpush1.bf16.msra.mxu1 %v2137_v28 }
 0x1dd   : > { %2708 = vmatmul.mubr.msk.bf16.vlgmr.msra.gmra.mxu1 %vm2181_vm0, %v3109_v54 }
 0x1de   : > { %2309 = vmatprep.mubr.bf16.mxu1 %v3121_v50 }
 0x1e5   : > { %2709 = vmatmul.mubr.msk.bf16.gmra.mxu1 %vm2181_vm0, %v3110_v56 }
 0x1e6   : > { %2319 = vmatprep.mubr.bf16.mxu1 %v3121_v50 }
 0x1ed   : > { %2710 = vmatmul.mubr.msk.bf16.gmra.mxu1 %vm2181_vm0, %v3111_v57 }
 0x1ee   : > { %2329 = vmatprep.mubr.bf16.mxu1 %v3121_v50 }
 0x1f5   : > { %2711 = vmatmul.mubr.msk.bf16.gmra.mxu1 %vm2181_vm0, %v3112_v58 }
 0x21d   : > { %v2228_v9 = vpop.f32.mrf.mxu0 }
 0x21e   : > { %v2229_v33 = vadd.f32 %v2228_v9, %v2144_v53 }
 0x21f   : > { %v2230_v34 = vpop.f32.mrf.mxu0 }
 0x220   : > { %2340 = vst [vmem:[%s4018_s21] sm:$0xff] %v2229_v33  ;;  %v2231_v41 = vadd.f32 %v2230_v34, %v2148_v8 }
 0x221   : > { %v2232_v43 = vpop.f32.mrf.mxu0 }
 0x222   : > { %2341 = vst [vmem:[%s4018_s21 + $0x8] sm:$0xff] %v2231_v41  ;;  %v2233_v35 = vadd.f32 %v2232_v43, %v2144_v53 }
 0x223   : > { %v2234_v36 = vpop.f32.mrf.mxu0 }
 0x224   : > { %2344 = vst [vmem:[%s4018_s21 + $0x20] sm:$0xff] %v2233_v35  ;;  %v2235_v37 = vadd.f32 %v2234_v36, %v2148_v8 }
 0x225   : > { %v2238_v38 = vpop.f32.mrf.mxu0 }
 0x226   : > { %2345 = vst [vmem:[%s4018_s21 + $0x28] sm:$0xff] %v2235_v37  ;;  %v2239_v20 = vadd.f32 %v2238_v38, %v2144_v53 }
 0x227   : > { %v2240_v39 = vpop.f32.mrf.mxu0 }
 0x228   : > { %2348 = vst [vmem:[%s4018_s21 + $0x40] sm:$0xff] %v2239_v20  ;;  %v2241_v21 = vadd.f32 %v2240_v39, %v2148_v8 }
 0x229   : > { %v2242_v40 = vpop.f32.mrf.mxu0 }
 0x22a   : > { %2349 = vst [vmem:[%s4018_s21 + $0x48] sm:$0xff] %v2241_v21  ;;  %v2243_v42 = vadd.f32 %v2242_v40, %v2144_v53 }
 0x22b   : > { %v2244_v44 = vpop.f32.mrf.mxu0 }
 0x22c   : > { %2352 = vst [vmem:[%s4018_s21 + $0x60] sm:$0xff] %v2243_v42  ;;  %v2245_v45 = vadd.f32 %v2244_v44, %v2148_v8 }
 0x22d   : > { %v2248_v46 = vpop.f32.mrf.mxu0 }
 0x22e   : > { %2353 = vst [vmem:[%s4018_s21 + $0x68] sm:$0xff] %v2245_v45  ;;  %v2249_v47 = vadd.f32 %v2248_v46, %v2144_v53 }
 0x22f   : > { %v2250_v48 = vpop.f32.mrf.mxu0 }
 0x230   : > { %2356 = vst [vmem:[%s4018_s21 + $0x80] sm:$0xff] %v2249_v47  ;;  %v2251_v49 = vadd.f32 %v2250_v48, %v2148_v8 }
 0x231   : > { %v2252_v50 = vpop.f32.mrf.mxu0 }
 0x232   : > { %2357 = vst [vmem:[%s4018_s21 + $0x88] sm:$0xff] %v2251_v49  ;;  %v2253_v51 = vadd.f32 %v2252_v50, %v2144_v53 }
 0x233   : > { %v2254_v52 = vpop.f32.mrf.mxu0 }
 0x234   : > { %2360 = vst [vmem:[%s4018_s21 + $0xa0] sm:$0xff] %v2253_v51  ;;  %v2255_v54 = vadd.f32 %v2254_v52, %v2148_v8 }
 0x235   : > { %v2258_v56 = vpop.f32.mrf.mxu0 }
 0x236   : > { %2361 = vst [vmem:[%s4018_s21 + $0xa8] sm:$0xff] %v2255_v54  ;;  %v2259_v57 = vadd.f32 %v2258_v56, %v2144_v53 }
 0x237   : > { %v2260_v58 = vpop.f32.mrf.mxu0 }
 0x238   : > { %2364 = vst [vmem:[%s4018_s21 + $0xc0] sm:$0xff] %v2259_v57  ;;  %v2261_v59 = vadd.f32 %v2260_v58, %v2148_v8 }
 0x239   : > { %v2262_v60 = vpop.f32.mrf.mxu0 }
 0x23a   : > { %2365 = vst [vmem:[%s4018_s21 + $0xc8] sm:$0xff] %v2261_v59  ;;  %v2263_v61 = vadd.f32 %v2262_v60, %v2144_v53 }
 0x23b   : > { %v2264_v62 = vpop.f32.mrf.mxu0 }
 0x23c   : > { %2368 = vst [vmem:[%s4018_s21 + $0xe0] sm:$0xff] %v2263_v61  ;;  %v2265_v63 = vadd.f32 %v2264_v62, %v2148_v8 }
 0x23e   : > { %2369 = vst [vmem:[%s4018_s21 + $0xe8] sm:$0xff] %v2265_v63 }
 0x29d   : > { %v2301_v4 = vpop.f32.mrf.mxu1 }
 0x29e   : > { %v2302_v5 = vadd.f32 %v2301_v4, %v2152_v2 }
 0x29f   : > { %v2303_v6 = vpop.f32.mrf.mxu1 }
 0x2a0   : > { %2342 = vst [vmem:[%s4018_s21 + $0x10] sm:$0xff] %v2302_v5  ;;  %v2304_v7 = vadd.f32 %v2303_v6, %v2156_v3 }
 0x2a1   : > { %v2305_v10 = vpop.f32.mrf.mxu1 }
 0x2a2   : > { %2343 = vst [vmem:[%s4018_s21 + $0x18] sm:$0xff] %v2304_v7  ;;  %v2306_v11 = vadd.f32 %v2305_v10, %v2152_v2 }
 0x2a3   : > { %v2307_v12 = vpop.f32.mrf.mxu1 }
 0x2a4   : > { %2346 = vst [vmem:[%s4018_s21 + $0x30] sm:$0xff] %v2306_v11  ;;  %v2308_v13 = vadd.f32 %v2307_v12, %v2156_v3 }
 0x2a5   : > { %v2311_v14 = vpop.f32.mrf.mxu1 }
 0x2a6   : > { %2347 = vst [vmem:[%s4018_s21 + $0x38] sm:$0xff] %v2308_v13  ;;  %v2312_v15 = vadd.f32 %v2311_v14, %v2152_v2 }
 0x2a7   : > { %v2313_v16 = vpop.f32.mrf.mxu1 }
 0x2a8   : > { %2350 = vst [vmem:[%s4018_s21 + $0x50] sm:$0xff] %v2312_v15  ;;  %v2314_v17 = vadd.f32 %v2313_v16, %v2156_v3 }
 0x2a9   : > { %v2315_v18 = vpop.f32.mrf.mxu1 }
 0x2aa   : > { %2351 = vst [vmem:[%s4018_s21 + $0x58] sm:$0xff] %v2314_v17  ;;  %v2316_v19 = vadd.f32 %v2315_v18, %v2152_v2 }
 0x2ab   : > { %v2317_v22 = vpop.f32.mrf.mxu1 }
 0x2ac   : > { %2354 = vst [vmem:[%s4018_s21 + $0x70] sm:$0xff] %v2316_v19  ;;  %v2318_v23 = vadd.f32 %v2317_v22, %v2156_v3 }
 0x2ad   : > { %v2321_v24 = vpop.f32.mrf.mxu1 }
 0x2ae   : > { %2355 = vst [vmem:[%s4018_s21 + $0x78] sm:$0xff] %v2318_v23  ;;  %v2322_v25 = vadd.f32 %v2321_v24, %v2152_v2 }
 0x2af   : > { %v2323_v26 = vpop.f32.mrf.mxu1 }
 0x2b0   : > { %2358 = vst [vmem:[%s4018_s21 + $0x90] sm:$0xff] %v2322_v25  ;;  %v2324_v27 = vadd.f32 %v2323_v26, %v2156_v3 }
 0x2b1   : > { %v2325_v28 = vpop.f32.mrf.mxu1 }
 0x2b2   : > { %2359 = vst [vmem:[%s4018_s21 + $0x98] sm:$0xff] %v2324_v27  ;;  %v2326_v29 = vadd.f32 %v2325_v28, %v2152_v2 }
 0x2b3   : > { %v2327_v30 = vpop.f32.mrf.mxu1 }
 0x2b4   : > { %2362 = vst [vmem:[%s4018_s21 + $0xb0] sm:$0xff] %v2326_v29  ;;  %v2328_v31 = vadd.f32 %v2327_v30, %v2156_v3 }
 0x2b5   : > { %v2331_v32 = vpop.f32.mrf.mxu1 }
 0x2b6   : > { %2363 = vst [vmem:[%s4018_s21 + $0xb8] sm:$0xff] %v2328_v31  ;;  %v2332_v53 = vadd.f32 %v2331_v32, %v2152_v2 }
 0x2b7   : > { %v2333_v55 = vpop.f32.mrf.mxu1 }
 0x2b8   : > { %2366 = vst [vmem:[%s4018_s21 + $0xd0] sm:$0xff] %v2332_v53  ;;  %v2334_v8 = vadd.f32 %v2333_v55, %v2156_v3 }
 0x2b9   : > { %v2335_v9 = vpop.f32.mrf.mxu1 }
 0x2ba   : > { %2367 = vst [vmem:[%s4018_s21 + $0xd8] sm:$0xff] %v2334_v8  ;;  %v2336_v33 = vadd.f32 %v2335_v9, %v2152_v2 }
 0x2bb   : > { %v2337_v34 = vpop.f32.mrf.mxu1 }
 0x2bc   : > { %2370 = vst [vmem:[%s4018_s21 + $0xf0] sm:$0xff] %v2336_v33  ;;  %v2338_v41 = vadd.f32 %v2337_v34, %v2156_v3 }
 0x2be   : > { %2371 = vst [vmem:[%s4018_s21 + $0xf8] sm:$0xff] %v2338_v41 }
 0x2bf PF: > { %s14_s15 = sadd.s32 1, %s3119_s15  }
 0x2c0   : > { %p11_p4 = scmp.ge.s32.totalorder %s14_s15, 4  }
 0x2c2   :  { %13 = sbr.rel (!%p11_p4) target bundleno = 1 (0x1), region = 66 }

</bundles_post_ra>
